<compile_context>
chip_gen: v6e
topology: v6e:2x2x1
jax: 0.10.0
libtpu: 0.0.40
codegen_flags: <defaults>
</compile_context>

<pallas_src>
import functools

import jax
import jax.numpy as jnp
from jax.experimental import pallas as pl
from jax.experimental.pallas import tpu as pltpu

BN_EPS = 1e-5            # nn.BatchNorm2d default eps
BLOCK_SLOPE = -0.2       # nn.LeakyReLU(negative_slope=-0.2) inside ConvBlock (as spec'd)
INITIAL_SLOPE = 0.2      # nn.LeakyReLU(0.2) after the first conv

MAX_TILE_R = 512
MAX_TILE_K = 2048
LANE = 128


def _round_up(x, m):
    return (x + m - 1) // m * m


# ---------------------------------------------------------------------------
# Kernels
# ---------------------------------------------------------------------------
def _conv_bias_lrelu_kernel(p_ref, w_ref, b_ref, o_ref, acc_ref, *, slope):
    """Tiled conv matmul + bias + LeakyReLU(slope). Grid = (row_tiles, K_tiles)."""
    k = pl.program_id(1)

    @pl.when(k == 0)
    def _():
        acc_ref[...] = jnp.zeros_like(acc_ref)

    acc_ref[...] += jnp.dot(p_ref[...], w_ref[...],
                            preferred_element_type=jnp.float32)

    @pl.when(k == pl.num_programs(1) - 1)
    def _():
        z = acc_ref[...] + b_ref[...]
        o_ref[...] = jnp.where(z > 0, z, slope * z).astype(o_ref.dtype)


def _conv_stats_kernel(p_ref, w_ref, y_ref, st_ref, acc_ref):
    """Pass A of ConvBlock: conv matmul -> y (f32) + per-row-tile partial stats.

    st block is (8, OCp): sublane 0 = per-channel sum, sublane 1 = sum of squares.
    """
    k = pl.program_id(1)

    @pl.when(k == 0)
    def _():
        acc_ref[...] = jnp.zeros_like(acc_ref)

    acc_ref[...] += jnp.dot(p_ref[...], w_ref[...],
                            preferred_element_type=jnp.float32)

    @pl.when(k == pl.num_programs(1) - 1)
    def _():
        y = acc_ref[...]
        y_ref[...] = y
        s = jnp.sum(y, axis=0, keepdims=True)          # (1, OCp)
        ss = jnp.sum(y * y, axis=0, keepdims=True)     # (1, OCp)
        row = jax.lax.broadcasted_iota(jnp.int32, st_ref.shape, 0)
        st_ref[...] = jnp.where(row == 0, s, jnp.where(row == 1, ss, 0.0))


def _affine_lrelu_kernel(y_ref, sc_ref, sh_ref, o_ref, *, slope):
    """Pass B of ConvBlock: y*scale + shift (folded BN) then LeakyReLU(slope)."""
    z = y_ref[...] * sc_ref[...] + sh_ref[...]
    o_ref[...] = jnp.where(z > 0, z, slope * z).astype(o_ref.dtype)


# ---------------------------------------------------------------------------
# Wrapper glue (im2col, padding, tiling)
# ---------------------------------------------------------------------------
def _im2col_nhwc(x, KH, KW, stride, padding):
    """x: (N,H,W,C) f32 -> patches (R, KH*KW*C) in (kh,kw,c) feature order."""
    if padding > 0:
        x = jnp.pad(x, ((0, 0), (padding, padding), (padding, padding), (0, 0)),
                    mode="reflect")                    # padding_mode='reflect'
    N, Hp, Wp, C = x.shape
    OH = (Hp - KH) // stride + 1
    OW = (Wp - KW) // stride + 1
    taps = []
    for kh in range(KH):
        for kw in range(KW):
            taps.append(x[:, kh:kh + stride * OH:stride,
                          kw:kw + stride * OW:stride, :])
    patches = jnp.concatenate(taps, axis=-1)           # (N, OH, OW, KH*KW*C)
    # TODO(synk): replace the HBM-materialized im2col with in-kernel tap accumulation
    # over the padded NHWC input (removes the 16x patches HBM round trip).
    return patches.reshape(N * OH * OW, KH * KW * C), (N, OH, OW)


def _pad_operands(patches, w2d, OC):
    """Zero-pad to tile multiples; cast MXU inputs to bf16 (f32 accumulation in-kernel)."""
    R, K = patches.shape
    tr = min(MAX_TILE_R, _round_up(R, 8))
    tk = min(MAX_TILE_K, _round_up(K, LANE))
    Rp = _round_up(R, tr)
    Kp = _round_up(K, tk)
    OCp = _round_up(OC, LANE)                          # lane-dense output channels
    p = jnp.pad(patches, ((0, Rp - R), (0, Kp - K))).astype(jnp.bfloat16)
    w = jnp.pad(w2d, ((0, Kp - K), (0, OCp - OC))).astype(jnp.bfloat16)
    return p, w, tr, tk, Rp, Kp, OCp


def _conv_bias_lrelu(x_nhwc, weight, bias, *, stride, padding, slope):
    """Conv2d(k=4, reflect pad, bias=True) + LeakyReLU(slope).  slope=1.0 == identity."""
    OC, C, KH, KW = weight.shape
    patches, (N, OH, OW) = _im2col_nhwc(x_nhwc, KH, KW, stride, padding)
    R = patches.shape[0]
    w2d = weight.transpose(2, 3, 1, 0).reshape(KH * KW * C, OC)
    p, w, tr, tk, Rp, Kp, OCp = _pad_operands(patches, w2d, OC)
    b = jnp.pad(bias.astype(jnp.float32), (0, OCp - OC)).reshape(1, OCp)

    out = pl.pallas_call(
        functools.partial(_conv_bias_lrelu_kernel, slope=slope),
        out_shape=jax.ShapeDtypeStruct((Rp, OCp), jnp.float32),
        grid_spec=pltpu.PrefetchScalarGridSpec(
            num_scalar_prefetch=0,
            grid=(Rp // tr, Kp // tk),
            in_specs=[
                pl.BlockSpec((tr, tk), lambda i, k: (i, k)),
                pl.BlockSpec((tk, OCp), lambda i, k: (k, 0)),
                pl.BlockSpec((1, OCp), lambda i, k: (0, 0)),   # bias: never re-DMA'd
            ],
            out_specs=pl.BlockSpec((tr, OCp), lambda i, k: (i, 0)),
            scratch_shapes=[pltpu.VMEM((tr, OCp), jnp.float32)],
        ),
        compiler_params=pltpu.CompilerParams(
            dimension_semantics=("parallel", "arbitrary")),
    )(p, w, b)
    return out[:R, :OC].reshape(N, OH, OW, OC)


def _conv_block(x_nhwc, weight, gamma, beta, *, stride, padding):
    """ConvBlock: Conv(no bias) -> BatchNorm2d(batch stats) -> LeakyReLU(-0.2)."""
    OC, C, KH, KW = weight.shape
    patches, (N, OH, OW) = _im2col_nhwc(x_nhwc, KH, KW, stride, padding)
    R = patches.shape[0]
    w2d = weight.transpose(2, 3, 1, 0).reshape(KH * KW * C, OC)
    p, w, tr, tk, Rp, Kp, OCp = _pad_operands(patches, w2d, OC)
    nr, nk = Rp // tr, Kp // tk

    # Pass A: conv matmul + per-row-tile partial (sum, sum-of-squares).
    y, stats = pl.pallas_call(
        _conv_stats_kernel,
        out_shape=(jax.ShapeDtypeStruct((Rp, OCp), jnp.float32),
                   jax.ShapeDtypeStruct((nr * 8, OCp), jnp.float32)),
        grid_spec=pltpu.PrefetchScalarGridSpec(
            num_scalar_prefetch=0,
            grid=(nr, nk),
            in_specs=[
                pl.BlockSpec((tr, tk), lambda i, k: (i, k)),
                pl.BlockSpec((tk, OCp), lambda i, k: (k, 0)),
            ],
            out_specs=(
                pl.BlockSpec((tr, OCp), lambda i, k: (i, 0)),
                pl.BlockSpec((8, OCp), lambda i, k: (i, 0)),
            ),
            scratch_shapes=[pltpu.VMEM((tr, OCp), jnp.float32)],
        ),
        compiler_params=pltpu.CompilerParams(
            dimension_semantics=("parallel", "arbitrary")),
    )(p, w)

    # Tiny per-channel reduction between passes (cross-row-tile combine; keeps pass A
    # row-axis 'parallel').  Zero-padded rows/lanes contribute nothing to the sums.
    st = stats.reshape(nr, 8, OCp)
    total = jnp.sum(st[:, 0, :], axis=0)
    total_sq = jnp.sum(st[:, 1, :], axis=0)
    mean = total / R
    var = jnp.maximum(total_sq / R - mean * mean, 0.0)     # biased var (PyTorch BN norm)
    g = jnp.pad(gamma.astype(jnp.float32), (0, OCp - OC))
    bt = jnp.pad(beta.astype(jnp.float32), (0, OCp - OC))
    scale = g * jax.lax.rsqrt(var + BN_EPS)                # hoisted: per-row work is FMA
    shift = bt - mean * scale
    scale = scale.reshape(1, OCp)
    shift = shift.reshape(1, OCp)

    # Pass B: affine + LeakyReLU(-0.2), row-parallel sweep.
    out = pl.pallas_call(
        functools.partial(_affine_lrelu_kernel, slope=BLOCK_SLOPE),
        out_shape=jax.ShapeDtypeStruct((Rp, OCp), jnp.float32),
        grid_spec=pltpu.PrefetchScalarGridSpec(
            num_scalar_prefetch=0,
            grid=(nr,),
            in_specs=[
                pl.BlockSpec((tr, OCp), lambda i: (i, 0)),
                pl.BlockSpec((1, OCp), lambda i: (0, 0)),
                pl.BlockSpec((1, OCp), lambda i: (0, 0)),
            ],
            out_specs=pl.BlockSpec((tr, OCp), lambda i: (i, 0)),
        ),
        compiler_params=pltpu.CompilerParams(dimension_semantics=("parallel",)),
    )(y, scale, shift)
    return out[:R, :OC].reshape(N, OH, OW, OC)


# ---------------------------------------------------------------------------
# Full Discriminator forward
# ---------------------------------------------------------------------------
def discriminator_forward(x, y, params):
    """x, y: NCHW float32. Returns NCHW (N, 1, H', W')."""
    h = jnp.concatenate([x, y], axis=1)                # torch.cat([x, y], dim=1)
    h = jnp.transpose(h, (0, 2, 3, 1))                 # -> NHWC once; stays NHWC below
    # initial: Conv(in, 63, k4, s2, p1 reflect, bias) + LeakyReLU(0.2)
    h = _conv_bias_lrelu(h, params["w0"], params["b0"],
                         stride=2, padding=1, slope=INITIAL_SLOPE)
    # ConvBlocks (Conv no-bias + BN batch-stats + LeakyReLU(-0.2))
    h = _conv_block(h, params["w1"], params["g1"], params["be1"], stride=2, padding=0)
    h = _conv_block(h, params["w2"], params["g2"], params["be2"], stride=2, padding=0)
    h = _conv_block(h, params["w3"], params["g3"], params["be3"], stride=1, padding=0)
    # final conv: Conv(512, 1, k4, s1, p1 reflect, bias), no activation (slope=1.0)
    h = _conv_bias_lrelu(h, params["w4"], params["b4"],
                         stride=1, padding=1, slope=1.0)
    return jnp.transpose(h, (0, 3, 1, 2))              # back to NCHW at the boundary


def init_discriminator_params(key, in_channels, features=(63, 128, 256, 512)):
    ks = jax.random.split(key, 12)
    f0, f1, f2, f3 = features

    def w(k, oc, ic):
        return jax.random.normal(k, (oc, ic, 4, 4), jnp.float32) * 0.05

    return {
        "w0": w(ks[0], f0, in_channels),
        "b0": jax.random.normal(ks[1], (f0,), jnp.float32) * 0.05,
        "w1": w(ks[2], f1, f0),
        "g1": 1.0 + 0.1 * jax.random.normal(ks[3], (f1,), jnp.float32),
        "be1": 0.1 * jax.random.normal(ks[4], (f1,), jnp.float32),
        "w2": w(ks[5], f2, f1),
        "g2": 1.0 + 0.1 * jax.random.normal(ks[6], (f2,), jnp.float32),
        "be2": 0.1 * jax.random.normal(ks[7], (f2,), jnp.float32),
        "w3": w(ks[8], f3, f2),
        "g3": 1.0 + 0.1 * jax.random.normal(ks[9], (f3,), jnp.float32),
        "be3": 0.1 * jax.random.normal(ks[10], (f3,), jnp.float32),
        "w4": w(ks[11], 1, f3),
        "b4": jnp.zeros((1,), jnp.float32),
    }


# ---------------------------------------------------------------------------
# Pure-JAX reference (mirrors the bf16 MXU inputs of the kernel path)
# ---------------------------------------------------------------------------
def _ref_conv(x, w, bias, stride, padding):
    if padding > 0:
        x = jnp.pad(x, ((0, 0), (0, 0), (padding, padding), (padding, padding)),
                    mode="reflect")
    y = jax.lax.conv_general_dilated(
        x.astype(jnp.bfloat16), w.astype(jnp.bfloat16),
        window_strides=(stride, stride), padding="VALID",
        dimension_numbers=("NCHW", "OIHW", "NCHW"),
        preferred_element_type=jnp.float32)
    if bias is not None:
        y = y + bias.reshape(1, -1, 1, 1)
    return y


def _ref_discriminator(x, y, params):
    h = jnp.concatenate([x, y], axis=1)
    h = _ref_conv(h, params["w0"], params["b0"], 2, 1)
    h = jnp.where(h > 0, h, INITIAL_SLOPE * h)
    for i, (s, p) in zip((1, 2, 3), ((2, 0), (2, 0), (1, 0))):
        h = _ref_conv(h, params[f"w{i}"], None, s, p)
        mean = h.mean(axis=(0, 2, 3), keepdims=True)
        var = ((h - mean) ** 2).mean(axis=(0, 2, 3), keepdims=True)
        h = (h - mean) * jax.lax.rsqrt(var + BN_EPS)
        h = h * params[f"g{i}"].reshape(1, -1, 1, 1) + params[f"be{i}"].reshape(1, -1, 1, 1)
        h = jnp.where(h > 0, h, BLOCK_SLOPE * h)
    return _ref_conv(h, params["w4"], params["b4"], 1, 1)


if __name__ == "__main__":
    # Small but valid shapes: 5 conv layers of k=4 need >= 64 spatial to survive.
    N, C_in, H, W = 2, 3, 64, 64
    key = jax.random.PRNGKey(0)
    kx, ky, kp = jax.random.split(key, 3)
    x = jax.random.normal(kx, (N, C_in, H, W), dtype=jnp.float32)
    y = jax.random.normal(ky, (N, C_in, H, W), dtype=jnp.float32)
    params = init_discriminator_params(kp, in_channels=2 * C_in)

    out = jax.block_until_ready(jax.jit(discriminator_forward)(x, y, params))
    ref = jax.block_until_ready(jax.jit(_ref_discriminator)(x, y, params))

    assert out.shape == (N, 1, 2, 2), out.shape
    max_err = float(jnp.max(jnp.abs(out - ref)))
    assert jnp.allclose(out, ref, atol=2e-2, rtol=2e-2), max_err
    print("KERNEL_OK")
</pallas_src>

<mosaic_0001>
module attributes {stable_mosaic.version = 11 : i64} {
  func.func @_conv_bias_lrelu_kernel(%arg0: i32, %arg1: i32, %arg2: memref<512x128xbf16, #tpu.memory_space<vmem>>, %arg3: memref<128x128xbf16, #tpu.memory_space<vmem>>, %arg4: memref<1x128xf32, #tpu.memory_space<vmem>>, %arg5: memref<512x128xf32, #tpu.memory_space<vmem>>, %arg6: memref<512x128xf32, #tpu.memory_space<vmem>>) attributes {dimension_semantics = [#tpu.dimension_semantics<parallel>, #tpu.dimension_semantics<arbitrary>], iteration_bounds = array<i64: 4, 1>, scalar_prefetch = 0 : i64, scratch_operands = 1 : i64, tpu.core_type = #tpu.core_type<tc>, window_params = [{transform_indices = @transform_0, window_bounds = array<i64: 512, 128>}, {transform_indices = @transform_1, window_bounds = array<i64: 128, 128>}, {pipeline_mode = #tpu.pipeline_mode<synchronous>, transform_indices = @transform_2, window_bounds = array<i64: 1, 128>}, {transform_indices = @transform_3, window_bounds = array<i64: 512, 128>}]} {
    %c0_i32 = arith.constant 0 : i32
    %0 = arith.cmpi eq, %arg1, %c0_i32 : i32
    %1 = arith.extui %0 : i1 to i32
    %c0_i32_0 = arith.constant 0 : i32
    %2 = arith.cmpi ne, %1, %c0_i32_0 : i32
    scf.if %2 {
      %cst_10 = arith.constant 0.000000e+00 : f32
      %12 = vector.broadcast %cst_10 : f32 to vector<512x128xf32>
      %c0_11 = arith.constant 0 : index
      %c0_12 = arith.constant 0 : index
      %13 = vector.load %arg6[%c0_11, %c0_12] : memref<512x128xf32, #tpu.memory_space<vmem>>, vector<512x128xf32>
      tpu.vector_store %arg6[%c0_11, %c0_12], %12 {strides = array<i32>} : memref<512x128xf32, #tpu.memory_space<vmem>>, vector<512x128xf32>,
    } else {
    }
    %c0 = arith.constant 0 : index
    %c0_1 = arith.constant 0 : index
    %3 = vector.load %arg6[%c0, %c0_1] : memref<512x128xf32, #tpu.memory_space<vmem>>, vector<512x128xf32>
    %c0_2 = arith.constant 0 : index
    %c0_3 = arith.constant 0 : index
    %4 = vector.load %arg2[%c0_2, %c0_3] : memref<512x128xbf16, #tpu.memory_space<vmem>>, vector<512x128xbf16>
    %c0_4 = arith.constant 0 : index
    %c0_5 = arith.constant 0 : index
    %5 = vector.load %arg3[%c0_4, %c0_5] : memref<128x128xbf16, #tpu.memory_space<vmem>>, vector<128x128xbf16>
    %cst = arith.constant dense<0.000000e+00> : vector<512x128xf32>
    %6 = tpu.matmul %4, %5, %cst {dimension_numbers = #tpu.dot_dimension_numbers<[1], [0], [0], [1], [0, 0, 1, 1], [], []>} : vector<512x128xbf16>, vector<128x128xbf16>, vector<512x128xf32> -> vector<512x128xf32>
    %7 = arith.addf %3, %6 : vector<512x128xf32>
    %c0_6 = arith.constant 0 : index
    %c0_7 = arith.constant 0 : index
    %8 = vector.load %arg6[%c0_6, %c0_7] : memref<512x128xf32, #tpu.memory_space<vmem>>, vector<512x128xf32>
    tpu.vector_store %arg6[%c0_6, %c0_7], %7 {strides = array<i32>} : memref<512x128xf32, #tpu.memory_space<vmem>>, vector<512x128xf32>,
    %c0_i32_8 = arith.constant 0 : i32
    %9 = arith.cmpi eq, %arg1, %c0_i32_8 : i32
    %10 = arith.extui %9 : i1 to i32
    %c0_i32_9 = arith.constant 0 : i32
    %11 = arith.cmpi ne, %10, %c0_i32_9 : i32
    scf.if %11 {
      %c0_10 = arith.constant 0 : index
      %c0_11 = arith.constant 0 : index
      %12 = vector.load %arg6[%c0_10, %c0_11] : memref<512x128xf32, #tpu.memory_space<vmem>>, vector<512x128xf32>
      %c0_12 = arith.constant 0 : index
      %c0_13 = arith.constant 0 : index
      %13 = vector.load %arg4[%c0_12, %c0_13] : memref<1x128xf32, #tpu.memory_space<vmem>>, vector<1x128xf32>
      %14 = vector.broadcast %13 : vector<1x128xf32> to vector<512x128xf32>
      %15 = arith.addf %12, %14 : vector<512x128xf32>
      %cst_14 = arith.constant 0.000000e+00 : f32
      %16 = vector.broadcast %cst_14 : f32 to vector<512x128xf32>
      %17 = arith.cmpf ogt, %15, %16 : vector<512x128xf32>
      %cst_15 = arith.constant 2.000000e-01 : f32
      %18 = vector.broadcast %cst_15 : f32 to vector<512x128xf32>
      %19 = arith.mulf %18, %15 : vector<512x128xf32>
      %20 = arith.select %17, %15, %19 : vector<512x128xi1>, vector<512x128xf32>
      %c0_16 = arith.constant 0 : index
      %c0_17 = arith.constant 0 : index
      %21 = vector.load %arg5[%c0_16, %c0_17] : memref<512x128xf32, #tpu.memory_space<vmem>>, vector<512x128xf32>
      tpu.vector_store %arg5[%c0_16, %c0_17], %20 {strides = array<i32>} : memref<512x128xf32, #tpu.memory_space<vmem>>, vector<512x128xf32>,
    } else {
    }
    return
  }
  func.func @transform_0(%arg0: i32, %arg1: i32) -> (i32, i32) {
    %c0_i32 = arith.constant 0 : i32
    return %arg0, %arg1 : i32, i32
  }
  func.func @transform_1(%arg0: i32, %arg1: i32) -> (i32, i32) {
    %c0_i32 = arith.constant 0 : i32
    %c0_i32_0 = arith.constant 0 : i32
    return %arg1, %c0_i32 : i32, i32
  }
  func.func @transform_2(%arg0: i32, %arg1: i32) -> (i32, i32) {
    %c0_i32 = arith.constant 0 : i32
    %c0_i32_0 = arith.constant 0 : i32
    %c0_i32_1 = arith.constant 0 : i32
    return %c0_i32, %c0_i32_0 : i32, i32
  }
  func.func @transform_3(%arg0: i32, %arg1: i32) -> (i32, i32) {
    %c0_i32 = arith.constant 0 : i32
    %c0_i32_0 = arith.constant 0 : i32
    return %arg0, %c0_i32 : i32, i32
  }
}

module attributes {stable_mosaic.version = 11 : i64} {
  func.func @_conv_stats_kernel(%arg0: i32, %arg1: i32, %arg2: memref<456x1024xbf16, #tpu.memory_space<vmem>>, %arg3: memref<1024x128xbf16, #tpu.memory_space<vmem>>, %arg4: memref<456x128xf32, #tpu.memory_space<vmem>>, %arg5: memref<8x128xf32, #tpu.memory_space<vmem>>, %arg6: memref<456x128xf32, #tpu.memory_space<vmem>>) attributes {dimension_semantics = [#tpu.dimension_semantics<parallel>, #tpu.dimension_semantics<arbitrary>], iteration_bounds = array<i64: 1, 1>, scalar_prefetch = 0 : i64, scratch_operands = 1 : i64, tpu.core_type = #tpu.core_type<tc>, window_params = [{transform_indices = @transform_0, window_bounds = array<i64: 456, 1024>}, {transform_indices = @transform_1, window_bounds = array<i64: 1024, 128>}, {transform_indices = @transform_2, window_bounds = array<i64: 456, 128>}, {transform_indices = @transform_3, window_bounds = array<i64: 8, 128>}]} {
    %c0_i32 = arith.constant 0 : i32
    %0 = arith.cmpi eq, %arg1, %c0_i32 : i32
    %1 = arith.extui %0 : i1 to i32
    %c0_i32_0 = arith.constant 0 : i32
    %2 = arith.cmpi ne, %1, %c0_i32_0 : i32
    scf.if %2 {
      %cst_10 = arith.constant 0.000000e+00 : f32
      %12 = vector.broadcast %cst_10 : f32 to vector<456x128xf32>
      %c0_11 = arith.constant 0 : index
      %c0_12 = arith.constant 0 : index
      %13 = vector.load %arg6[%c0_11, %c0_12] : memref<456x128xf32, #tpu.memory_space<vmem>>, vector<456x128xf32>
      tpu.vector_store %arg6[%c0_11, %c0_12], %12 {strides = array<i32>} : memref<456x128xf32, #tpu.memory_space<vmem>>, vector<456x128xf32>,
    } else {
    }
    %c0 = arith.constant 0 : index
    %c0_1 = arith.constant 0 : index
    %3 = vector.load %arg6[%c0, %c0_1] : memref<456x128xf32, #tpu.memory_space<vmem>>, vector<456x128xf32>
    %c0_2 = arith.constant 0 : index
    %c0_3 = arith.constant 0 : index
    %4 = vector.load %arg2[%c0_2, %c0_3] : memref<456x1024xbf16, #tpu.memory_space<vmem>>, vector<456x1024xbf16>
    %c0_4 = arith.constant 0 : index
    %c0_5 = arith.constant 0 : index
    %5 = vector.load %arg3[%c0_4, %c0_5] : memref<1024x128xbf16, #tpu.memory_space<vmem>>, vector<1024x128xbf16>
    %cst = arith.constant dense<0.000000e+00> : vector<456x128xf32>
    %6 = tpu.matmul %4, %5, %cst {dimension_numbers = #tpu.dot_dimension_numbers<[1], [0], [0], [1], [0, 0, 1, 1], [], []>} : vector<456x1024xbf16>, vector<1024x128xbf16>, vector<456x128xf32> -> vector<456x128xf32>
    %7 = arith.addf %3, %6 : vector<456x128xf32>
    %c0_6 = arith.constant 0 : index
    %c0_7 = arith.constant 0 : index
    %8 = vector.load %arg6[%c0_6, %c0_7] : memref<456x128xf32, #tpu.memory_space<vmem>>, vector<456x128xf32>
    tpu.vector_store %arg6[%c0_6, %c0_7], %7 {strides = array<i32>} : memref<456x128xf32, #tpu.memory_space<vmem>>, vector<456x128xf32>,
    %c0_i32_8 = arith.constant 0 : i32
    %9 = arith.cmpi eq, %arg1, %c0_i32_8 : i32
    %10 = arith.extui %9 : i1 to i32
    %c0_i32_9 = arith.constant 0 : i32
    %11 = arith.cmpi ne, %10, %c0_i32_9 : i32
    scf.if %11 {
      %c0_10 = arith.constant 0 : index
      %c0_11 = arith.constant 0 : index
      %12 = vector.load %arg6[%c0_10, %c0_11] : memref<456x128xf32, #tpu.memory_space<vmem>>, vector<456x128xf32>
      %c0_12 = arith.constant 0 : index
      %c0_13 = arith.constant 0 : index
      %13 = vector.load %arg4[%c0_12, %c0_13] : memref<456x128xf32, #tpu.memory_space<vmem>>, vector<456x128xf32>
      tpu.vector_store %arg4[%c0_12, %c0_13], %12 {strides = array<i32>} : memref<456x128xf32, #tpu.memory_space<vmem>>, vector<456x128xf32>,
      %cst_14 = arith.constant dense<0.000000e+00> : vector<128xf32>
      %14 = vector.multi_reduction <add>, %12, %cst_14 [0] : vector<456x128xf32> to vector<128xf32>
      %15 = vector.shape_cast %14 : vector<128xf32> to vector<1x128xf32>
      %16 = arith.mulf %12, %12 : vector<456x128xf32>
      %cst_15 = arith.constant dense<0.000000e+00> : vector<128xf32>
      %17 = vector.multi_reduction <add>, %16, %cst_15 [0] : vector<456x128xf32> to vector<128xf32>
      %18 = vector.shape_cast %17 : vector<128xf32> to vector<1x128xf32>
      %19 = tpu.iota {dimensions = array<i32: 0>} : vector<8x128xi32>
      %c0_i32_16 = arith.constant 0 : i32
      %20 = vector.broadcast %c0_i32_16 : i32 to vector<8x128xi32>
      %21 = arith.cmpi eq, %19, %20 : vector<8x128xi32>
      %c1_i32 = arith.constant 1 : i32
      %22 = vector.broadcast %c1_i32 : i32 to vector<8x128xi32>
      %23 = arith.cmpi eq, %19, %22 : vector<8x128xi32>
      %cst_17 = arith.constant 0.000000e+00 : f32
      %24 = vector.shape_cast %18 : vector<1x128xf32> to vector<1x128xf32>
      %25 = vector.broadcast %24 : vector<1x128xf32> to vector<8x128xf32>
      %26 = vector.broadcast %cst_17 : f32 to vector<8x128xf32>
      %27 = arith.select %23, %25, %26 : vector<8x128xi1>, vector<8x128xf32>
      %28 = vector.shape_cast %15 : vector<1x128xf32> to vector<1x128xf32>
      %29 = vector.broadcast %28 : vector<1x128xf32> to vector<8x128xf32>
      %30 = arith.select %21, %29, %27 : vector<8x128xi1>, vector<8x128xf32>
      %c0_18 = arith.constant 0 : index
      %c0_19 = arith.constant 0 : index
      %31 = vector.load %arg5[%c0_18, %c0_19] : memref<8x128xf32, #tpu.memory_space<vmem>>, vector<8x128xf32>
      tpu.vector_store %arg5[%c0_18, %c0_19], %30 {strides = array<i32>} : memref<8x128xf32, #tpu.memory_space<vmem>>, vector<8x128xf32>,
    } else {
    }
    return
  }
  func.func @transform_0(%arg0: i32, %arg1: i32) -> (i32, i32) {
    %c0_i32 = arith.constant 0 : i32
    return %arg0, %arg1 : i32, i32
  }
  func.func @transform_1(%arg0: i32, %arg1: i32) -> (i32, i32) {
    %c0_i32 = arith.constant 0 : i32
    %c0_i32_0 = arith.constant 0 : i32
    return %arg1, %c0_i32 : i32, i32
  }
  func.func @transform_2(%arg0: i32, %arg1: i32) -> (i32, i32) {
    %c0_i32 = arith.constant 0 : i32
    %c0_i32_0 = arith.constant 0 : i32
    return %arg0, %c0_i32 : i32, i32
  }
  func.func @transform_3(%arg0: i32, %arg1: i32) -> (i32, i32) {
    %c0_i32 = arith.constant 0 : i32
    %c0_i32_0 = arith.constant 0 : i32
    return %arg0, %c0_i32 : i32, i32
  }
}

module attributes {stable_mosaic.version = 11 : i64} {
  func.func @_affine_lrelu_kernel(%arg0: i32, %arg1: memref<456x128xf32, #tpu.memory_space<vmem>>, %arg2: memref<1x128xf32, #tpu.memory_space<vmem>>, %arg3: memref<1x128xf32, #tpu.memory_space<vmem>>, %arg4: memref<456x128xf32, #tpu.memory_space<vmem>>) attributes {dimension_semantics = [#tpu.dimension_semantics<parallel>], iteration_bounds = array<i64: 1>, scalar_prefetch = 0 : i64, scratch_operands = 0 : i64, tpu.core_type = #tpu.core_type<tc>, window_params = [{transform_indices = @transform_0, window_bounds = array<i64: 456, 128>}, {pipeline_mode = #tpu.pipeline_mode<synchronous>, transform_indices = @transform_1, window_bounds = array<i64: 1, 128>}, {pipeline_mode = #tpu.pipeline_mode<synchronous>, transform_indices = @transform_2, window_bounds = array<i64: 1, 128>}, {transform_indices = @transform_3, window_bounds = array<i64: 456, 128>}]} {
    %c0 = arith.constant 0 : index
    %c0_0 = arith.constant 0 : index
    %0 = vector.load %arg1[%c0, %c0_0] : memref<456x128xf32, #tpu.memory_space<vmem>>, vector<456x128xf32>
    %c0_1 = arith.constant 0 : index
    %c0_2 = arith.constant 0 : index
    %1 = vector.load %arg2[%c0_1, %c0_2] : memref<1x128xf32, #tpu.memory_space<vmem>>, vector<1x128xf32>
    %2 = vector.broadcast %1 : vector<1x128xf32> to vector<456x128xf32>
    %3 = arith.mulf %0, %2 : vector<456x128xf32>
    %c0_3 = arith.constant 0 : index
    %c0_4 = arith.constant 0 : index
    %4 = vector.load %arg3[%c0_3, %c0_4] : memref<1x128xf32, #tpu.memory_space<vmem>>, vector<1x128xf32>
    %5 = vector.broadcast %4 : vector<1x128xf32> to vector<456x128xf32>
    %6 = arith.addf %3, %5 : vector<456x128xf32>
    %cst = arith.constant 0.000000e+00 : f32
    %7 = vector.broadcast %cst : f32 to vector<456x128xf32>
    %8 = arith.cmpf ogt, %6, %7 : vector<456x128xf32>
    %cst_5 = arith.constant -2.000000e-01 : f32
    %9 = vector.broadcast %cst_5 : f32 to vector<456x128xf32>
    %10 = arith.mulf %9, %6 : vector<456x128xf32>
    %11 = arith.select %8, %6, %10 : vector<456x128xi1>, vector<456x128xf32>
    %c0_6 = arith.constant 0 : index
    %c0_7 = arith.constant 0 : index
    %12 = vector.load %arg4[%c0_6, %c0_7] : memref<456x128xf32, #tpu.memory_space<vmem>>, vector<456x128xf32>
    tpu.vector_store %arg4[%c0_6, %c0_7], %11 {strides = array<i32>} : memref<456x128xf32, #tpu.memory_space<vmem>>, vector<456x128xf32>,
    return
  }
  func.func @transform_0(%arg0: i32) -> (i32, i32) {
    %c0_i32 = arith.constant 0 : i32
    %c0_i32_0 = arith.constant 0 : i32
    return %arg0, %c0_i32 : i32, i32
  }
  func.func @transform_1(%arg0: i32) -> (i32, i32) {
    %c0_i32 = arith.constant 0 : i32
    %c0_i32_0 = arith.constant 0 : i32
    %c0_i32_1 = arith.constant 0 : i32
    return %c0_i32, %c0_i32_0 : i32, i32
  }
  func.func @transform_2(%arg0: i32) -> (i32, i32) {
    %c0_i32 = arith.constant 0 : i32
    %c0_i32_0 = arith.constant 0 : i32
    %c0_i32_1 = arith.constant 0 : i32
    return %c0_i32, %c0_i32_0 : i32, i32
  }
  func.func @transform_3(%arg0: i32) -> (i32, i32) {
    %c0_i32 = arith.constant 0 : i32
    %c0_i32_0 = arith.constant 0 : i32
    return %arg0, %c0_i32 : i32, i32
  }
}

module attributes {stable_mosaic.version = 11 : i64} {
  func.func @_affine_lrelu_kernel(%arg0: i32, %arg1: memref<72x256xf32, #tpu.memory_space<vmem>>, %arg2: memref<1x256xf32, #tpu.memory_space<vmem>>, %arg3: memref<1x256xf32, #tpu.memory_space<vmem>>, %arg4: memref<72x256xf32, #tpu.memory_space<vmem>>) attributes {dimension_semantics = [#tpu.dimension_semantics<parallel>], iteration_bounds = array<i64: 1>, scalar_prefetch = 0 : i64, scratch_operands = 0 : i64, tpu.core_type = #tpu.core_type<tc>, window_params = [{transform_indices = @transform_0, window_bounds = array<i64: 72, 256>}, {pipeline_mode = #tpu.pipeline_mode<synchronous>, transform_indices = @transform_1, window_bounds = array<i64: 1, 256>}, {pipeline_mode = #tpu.pipeline_mode<synchronous>, transform_indices = @transform_2, window_bounds = array<i64: 1, 256>}, {transform_indices = @transform_3, window_bounds = array<i64: 72, 256>}]} {
    %c0 = arith.constant 0 : index
    %c0_0 = arith.constant 0 : index
    %0 = vector.load %arg1[%c0, %c0_0] : memref<72x256xf32, #tpu.memory_space<vmem>>, vector<72x256xf32>
    %c0_1 = arith.constant 0 : index
    %c0_2 = arith.constant 0 : index
    %1 = vector.load %arg2[%c0_1, %c0_2] : memref<1x256xf32, #tpu.memory_space<vmem>>, vector<1x256xf32>
    %2 = vector.broadcast %1 : vector<1x256xf32> to vector<72x256xf32>
    %3 = arith.mulf %0, %2 : vector<72x256xf32>
    %c0_3 = arith.constant 0 : index
    %c0_4 = arith.constant 0 : index
    %4 = vector.load %arg3[%c0_3, %c0_4] : memref<1x256xf32, #tpu.memory_space<vmem>>, vector<1x256xf32>
    %5 = vector.broadcast %4 : vector<1x256xf32> to vector<72x256xf32>
    %6 = arith.addf %3, %5 : vector<72x256xf32>
    %cst = arith.constant 0.000000e+00 : f32
    %7 = vector.broadcast %cst : f32 to vector<72x256xf32>
    %8 = arith.cmpf ogt, %6, %7 : vector<72x256xf32>
    %cst_5 = arith.constant -2.000000e-01 : f32
    %9 = vector.broadcast %cst_5 : f32 to vector<72x256xf32>
    %10 = arith.mulf %9, %6 : vector<72x256xf32>
    %11 = arith.select %8, %6, %10 : vector<72x256xi1>, vector<72x256xf32>
    %c0_6 = arith.constant 0 : index
    %c0_7 = arith.constant 0 : index
    %12 = vector.load %arg4[%c0_6, %c0_7] : memref<72x256xf32, #tpu.memory_space<vmem>>, vector<72x256xf32>
    tpu.vector_store %arg4[%c0_6, %c0_7], %11 {strides = array<i32>} : memref<72x256xf32, #tpu.memory_space<vmem>>, vector<72x256xf32>,
    return
  }
  func.func @transform_0(%arg0: i32) -> (i32, i32) {
    %c0_i32 = arith.constant 0 : i32
    %c0_i32_0 = arith.constant 0 : i32
    return %arg0, %c0_i32 : i32, i32
  }
  func.func @transform_1(%arg0: i32) -> (i32, i32) {
    %c0_i32 = arith.constant 0 : i32
    %c0_i32_0 = arith.constant 0 : i32
    %c0_i32_1 = arith.constant 0 : i32
    return %c0_i32, %c0_i32_0 : i32, i32
  }
  func.func @transform_2(%arg0: i32) -> (i32, i32) {
    %c0_i32 = arith.constant 0 : i32
    %c0_i32_0 = arith.constant 0 : i32
    %c0_i32_1 = arith.constant 0 : i32
    return %c0_i32, %c0_i32_0 : i32, i32
  }
  func.func @transform_3(%arg0: i32) -> (i32, i32) {
    %c0_i32 = arith.constant 0 : i32
    %c0_i32_0 = arith.constant 0 : i32
    return %arg0, %c0_i32 : i32, i32
  }
}

module attributes {stable_mosaic.version = 11 : i64} {
  func.func @_conv_stats_kernel(%arg0: i32, %arg1: i32, %arg2: memref<72x2048xbf16, #tpu.memory_space<vmem>>, %arg3: memref<2048x256xbf16, #tpu.memory_space<vmem>>, %arg4: memref<72x256xf32, #tpu.memory_space<vmem>>, %arg5: memref<8x256xf32, #tpu.memory_space<vmem>>, %arg6: memref<72x256xf32, #tpu.memory_space<vmem>>) attributes {dimension_semantics = [#tpu.dimension_semantics<parallel>, #tpu.dimension_semantics<arbitrary>], iteration_bounds = array<i64: 1, 1>, scalar_prefetch = 0 : i64, scratch_operands = 1 : i64, tpu.core_type = #tpu.core_type<tc>, window_params = [{transform_indices = @transform_0, window_bounds = array<i64: 72, 2048>}, {transform_indices = @transform_1, window_bounds = array<i64: 2048, 256>}, {transform_indices = @transform_2, window_bounds = array<i64: 72, 256>}, {transform_indices = @transform_3, window_bounds = array<i64: 8, 256>}]} {
    %c0_i32 = arith.constant 0 : i32
    %0 = arith.cmpi eq, %arg1, %c0_i32 : i32
    %1 = arith.extui %0 : i1 to i32
    %c0_i32_0 = arith.constant 0 : i32
    %2 = arith.cmpi ne, %1, %c0_i32_0 : i32
    scf.if %2 {
      %cst_10 = arith.constant 0.000000e+00 : f32
      %12 = vector.broadcast %cst_10 : f32 to vector<72x256xf32>
      %c0_11 = arith.constant 0 : index
      %c0_12 = arith.constant 0 : index
      %13 = vector.load %arg6[%c0_11, %c0_12] : memref<72x256xf32, #tpu.memory_space<vmem>>, vector<72x256xf32>
      tpu.vector_store %arg6[%c0_11, %c0_12], %12 {strides = array<i32>} : memref<72x256xf32, #tpu.memory_space<vmem>>, vector<72x256xf32>,
    } else {
    }
    %c0 = arith.constant 0 : index
    %c0_1 = arith.constant 0 : index
    %3 = vector.load %arg6[%c0, %c0_1] : memref<72x256xf32, #tpu.memory_space<vmem>>, vector<72x256xf32>
    %c0_2 = arith.constant 0 : index
    %c0_3 = arith.constant 0 : index
    %4 = vector.load %arg2[%c0_2, %c0_3] : memref<72x2048xbf16, #tpu.memory_space<vmem>>, vector<72x2048xbf16>
    %c0_4 = arith.constant 0 : index
    %c0_5 = arith.constant 0 : index
    %5 = vector.load %arg3[%c0_4, %c0_5] : memref<2048x256xbf16, #tpu.memory_space<vmem>>, vector<2048x256xbf16>
    %cst = arith.constant dense<0.000000e+00> : vector<72x256xf32>
    %6 = tpu.matmul %4, %5, %cst {dimension_numbers = #tpu.dot_dimension_numbers<[1], [0], [0], [1], [0, 0, 1, 1], [], []>} : vector<72x2048xbf16>, vector<2048x256xbf16>, vector<72x256xf32> -> vector<72x256xf32>
    %7 = arith.addf %3, %6 : vector<72x256xf32>
    %c0_6 = arith.constant 0 : index
    %c0_7 = arith.constant 0 : index
    %8 = vector.load %arg6[%c0_6, %c0_7] : memref<72x256xf32, #tpu.memory_space<vmem>>, vector<72x256xf32>
    tpu.vector_store %arg6[%c0_6, %c0_7], %7 {strides = array<i32>} : memref<72x256xf32, #tpu.memory_space<vmem>>, vector<72x256xf32>,
    %c0_i32_8 = arith.constant 0 : i32
    %9 = arith.cmpi eq, %arg1, %c0_i32_8 : i32
    %10 = arith.extui %9 : i1 to i32
    %c0_i32_9 = arith.constant 0 : i32
    %11 = arith.cmpi ne, %10, %c0_i32_9 : i32
    scf.if %11 {
      %c0_10 = arith.constant 0 : index
      %c0_11 = arith.constant 0 : index
      %12 = vector.load %arg6[%c0_10, %c0_11] : memref<72x256xf32, #tpu.memory_space<vmem>>, vector<72x256xf32>
      %c0_12 = arith.constant 0 : index
      %c0_13 = arith.constant 0 : index
      %13 = vector.load %arg4[%c0_12, %c0_13] : memref<72x256xf32, #tpu.memory_space<vmem>>, vector<72x256xf32>
      tpu.vector_store %arg4[%c0_12, %c0_13], %12 {strides = array<i32>} : memref<72x256xf32, #tpu.memory_space<vmem>>, vector<72x256xf32>,
      %cst_14 = arith.constant dense<0.000000e+00> : vector<256xf32>
      %14 = vector.multi_reduction <add>, %12, %cst_14 [0] : vector<72x256xf32> to vector<256xf32>
      %15 = vector.shape_cast %14 : vector<256xf32> to vector<1x256xf32>
      %16 = arith.mulf %12, %12 : vector<72x256xf32>
      %cst_15 = arith.constant dense<0.000000e+00> : vector<256xf32>
      %17 = vector.multi_reduction <add>, %16, %cst_15 [0] : vector<72x256xf32> to vector<256xf32>
      %18 = vector.shape_cast %17 : vector<256xf32> to vector<1x256xf32>
      %19 = tpu.iota {dimensions = array<i32: 0>} : vector<8x256xi32>
      %c0_i32_16 = arith.constant 0 : i32
      %20 = vector.broadcast %c0_i32_16 : i32 to vector<8x256xi32>
      %21 = arith.cmpi eq, %19, %20 : vector<8x256xi32>
      %c1_i32 = arith.constant 1 : i32
      %22 = vector.broadcast %c1_i32 : i32 to vector<8x256xi32>
      %23 = arith.cmpi eq, %19, %22 : vector<8x256xi32>
      %cst_17 = arith.constant 0.000000e+00 : f32
      %24 = vector.shape_cast %18 : vector<1x256xf32> to vector<1x256xf32>
      %25 = vector.broadcast %24 : vector<1x256xf32> to vector<8x256xf32>
      %26 = vector.broadcast %cst_17 : f32 to vector<8x256xf32>
      %27 = arith.select %23, %25, %26 : vector<8x256xi1>, vector<8x256xf32>
      %28 = vector.shape_cast %15 : vector<1x256xf32> to vector<1x256xf32>
      %29 = vector.broadcast %28 : vector<1x256xf32> to vector<8x256xf32>
      %30 = arith.select %21, %29, %27 : vector<8x256xi1>, vector<8x256xf32>
      %c0_18 = arith.constant 0 : index
      %c0_19 = arith.constant 0 : index
      %31 = vector.load %arg5[%c0_18, %c0_19] : memref<8x256xf32, #tpu.memory_space<vmem>>, vector<8x256xf32>
      tpu.vector_store %arg5[%c0_18, %c0_19], %30 {strides = array<i32>} : memref<8x256xf32, #tpu.memory_space<vmem>>, vector<8x256xf32>,
    } else {
    }
    return
  }
  func.func @transform_0(%arg0: i32, %arg1: i32) -> (i32, i32) {
    %c0_i32 = arith.constant 0 : i32
    return %arg0, %arg1 : i32, i32
  }
  func.func @transform_1(%arg0: i32, %arg1: i32) -> (i32, i32) {
    %c0_i32 = arith.constant 0 : i32
    %c0_i32_0 = arith.constant 0 : i32
    return %arg1, %c0_i32 : i32, i32
  }
  func.func @transform_2(%arg0: i32, %arg1: i32) -> (i32, i32) {
    %c0_i32 = arith.constant 0 : i32
    %c0_i32_0 = arith.constant 0 : i32
    return %arg0, %c0_i32 : i32, i32
  }
  func.func @transform_3(%arg0: i32, %arg1: i32) -> (i32, i32) {
    %c0_i32 = arith.constant 0 : i32
    %c0_i32_0 = arith.constant 0 : i32
    return %arg0, %c0_i32 : i32, i32
  }
}

module attributes {stable_mosaic.version = 11 : i64} {
  func.func @_conv_stats_kernel(%arg0: i32, %arg1: i32, %arg2: memref<24x2048xbf16, #tpu.memory_space<vmem>>, %arg3: memref<2048x512xbf16, #tpu.memory_space<vmem>>, %arg4: memref<24x512xf32, #tpu.memory_space<vmem>>, %arg5: memref<8x512xf32, #tpu.memory_space<vmem>>, %arg6: memref<24x512xf32, #tpu.memory_space<vmem>>) attributes {dimension_semantics = [#tpu.dimension_semantics<parallel>, #tpu.dimension_semantics<arbitrary>], iteration_bounds = array<i64: 1, 2>, scalar_prefetch = 0 : i64, scratch_operands = 1 : i64, tpu.core_type = #tpu.core_type<tc>, window_params = [{transform_indices = @transform_0, window_bounds = array<i64: 24, 2048>}, {transform_indices = @transform_1, window_bounds = array<i64: 2048, 512>}, {transform_indices = @transform_2, window_bounds = array<i64: 24, 512>}, {transform_indices = @transform_3, window_bounds = array<i64: 8, 512>}]} {
    %c0_i32 = arith.constant 0 : i32
    %0 = arith.cmpi eq, %arg1, %c0_i32 : i32
    %1 = arith.extui %0 : i1 to i32
    %c0_i32_0 = arith.constant 0 : i32
    %2 = arith.cmpi ne, %1, %c0_i32_0 : i32
    scf.if %2 {
      %cst_9 = arith.constant 0.000000e+00 : f32
      %12 = vector.broadcast %cst_9 : f32 to vector<24x512xf32>
      %c0_10 = arith.constant 0 : index
      %c0_11 = arith.constant 0 : index
      %13 = vector.load %arg6[%c0_10, %c0_11] : memref<24x512xf32, #tpu.memory_space<vmem>>, vector<24x512xf32>
      tpu.vector_store %arg6[%c0_10, %c0_11], %12 {strides = array<i32>} : memref<24x512xf32, #tpu.memory_space<vmem>>, vector<24x512xf32>,
    } else {
    }
    %c0 = arith.constant 0 : index
    %c0_1 = arith.constant 0 : index
    %3 = vector.load %arg6[%c0, %c0_1] : memref<24x512xf32, #tpu.memory_space<vmem>>, vector<24x512xf32>
    %c0_2 = arith.constant 0 : index
    %c0_3 = arith.constant 0 : index
    %4 = vector.load %arg2[%c0_2, %c0_3] : memref<24x2048xbf16, #tpu.memory_space<vmem>>, vector<24x2048xbf16>
    %c0_4 = arith.constant 0 : index
    %c0_5 = arith.constant 0 : index
    %5 = vector.load %arg3[%c0_4, %c0_5] : memref<2048x512xbf16, #tpu.memory_space<vmem>>, vector<2048x512xbf16>
    %cst = arith.constant dense<0.000000e+00> : vector<24x512xf32>
    %6 = tpu.matmul %4, %5, %cst {dimension_numbers = #tpu.dot_dimension_numbers<[1], [0], [0], [1], [0, 0, 1, 1], [], []>} : vector<24x2048xbf16>, vector<2048x512xbf16>, vector<24x512xf32> -> vector<24x512xf32>
    %7 = arith.addf %3, %6 : vector<24x512xf32>
    %c0_6 = arith.constant 0 : index
    %c0_7 = arith.constant 0 : index
    %8 = vector.load %arg6[%c0_6, %c0_7] : memref<24x512xf32, #tpu.memory_space<vmem>>, vector<24x512xf32>
    tpu.vector_store %arg6[%c0_6, %c0_7], %7 {strides = array<i32>} : memref<24x512xf32, #tpu.memory_space<vmem>>, vector<24x512xf32>,
    %c1_i32 = arith.constant 1 : i32
    %9 = arith.cmpi eq, %arg1, %c1_i32 : i32
    %10 = arith.extui %9 : i1 to i32
    %c0_i32_8 = arith.constant 0 : i32
    %11 = arith.cmpi ne, %10, %c0_i32_8 : i32
    scf.if %11 {
      %c0_9 = arith.constant 0 : index
      %c0_10 = arith.constant 0 : index
      %12 = vector.load %arg6[%c0_9, %c0_10] : memref<24x512xf32, #tpu.memory_space<vmem>>, vector<24x512xf32>
      %c0_11 = arith.constant 0 : index
      %c0_12 = arith.constant 0 : index
      %13 = vector.load %arg4[%c0_11, %c0_12] : memref<24x512xf32, #tpu.memory_space<vmem>>, vector<24x512xf32>
      tpu.vector_store %arg4[%c0_11, %c0_12], %12 {strides = array<i32>} : memref<24x512xf32, #tpu.memory_space<vmem>>, vector<24x512xf32>,
      %cst_13 = arith.constant dense<0.000000e+00> : vector<512xf32>
      %14 = vector.multi_reduction <add>, %12, %cst_13 [0] : vector<24x512xf32> to vector<512xf32>
      %15 = vector.shape_cast %14 : vector<512xf32> to vector<1x512xf32>
      %16 = arith.mulf %12, %12 : vector<24x512xf32>
      %cst_14 = arith.constant dense<0.000000e+00> : vector<512xf32>
      %17 = vector.multi_reduction <add>, %16, %cst_14 [0] : vector<24x512xf32> to vector<512xf32>
      %18 = vector.shape_cast %17 : vector<512xf32> to vector<1x512xf32>
      %19 = tpu.iota {dimensions = array<i32: 0>} : vector<8x512xi32>
      %c0_i32_15 = arith.constant 0 : i32
      %20 = vector.broadcast %c0_i32_15 : i32 to vector<8x512xi32>
      %21 = arith.cmpi eq, %19, %20 : vector<8x512xi32>
      %c1_i32_16 = arith.constant 1 : i32
      %22 = vector.broadcast %c1_i32_16 : i32 to vector<8x512xi32>
      %23 = arith.cmpi eq, %19, %22 : vector<8x512xi32>
      %cst_17 = arith.constant 0.000000e+00 : f32
      %24 = vector.shape_cast %18 : vector<1x512xf32> to vector<1x512xf32>
      %25 = vector.broadcast %24 : vector<1x512xf32> to vector<8x512xf32>
      %26 = vector.broadcast %cst_17 : f32 to vector<8x512xf32>
      %27 = arith.select %23, %25, %26 : vector<8x512xi1>, vector<8x512xf32>
      %28 = vector.shape_cast %15 : vector<1x512xf32> to vector<1x512xf32>
      %29 = vector.broadcast %28 : vector<1x512xf32> to vector<8x512xf32>
      %30 = arith.select %21, %29, %27 : vector<8x512xi1>, vector<8x512xf32>
      %c0_18 = arith.constant 0 : index
      %c0_19 = arith.constant 0 : index
      %31 = vector.load %arg5[%c0_18, %c0_19] : memref<8x512xf32, #tpu.memory_space<vmem>>, vector<8x512xf32>
      tpu.vector_store %arg5[%c0_18, %c0_19], %30 {strides = array<i32>} : memref<8x512xf32, #tpu.memory_space<vmem>>, vector<8x512xf32>,
    } else {
    }
    return
  }
  func.func @transform_0(%arg0: i32, %arg1: i32) -> (i32, i32) {
    %c0_i32 = arith.constant 0 : i32
    return %arg0, %arg1 : i32, i32
  }
  func.func @transform_1(%arg0: i32, %arg1: i32) -> (i32, i32) {
    %c0_i32 = arith.constant 0 : i32
    %c0_i32_0 = arith.constant 0 : i32
    return %arg1, %c0_i32 : i32, i32
  }
  func.func @transform_2(%arg0: i32, %arg1: i32) -> (i32, i32) {
    %c0_i32 = arith.constant 0 : i32
    %c0_i32_0 = arith.constant 0 : i32
    return %arg0, %c0_i32 : i32, i32
  }
  func.func @transform_3(%arg0: i32, %arg1: i32) -> (i32, i32) {
    %c0_i32 = arith.constant 0 : i32
    %c0_i32_0 = arith.constant 0 : i32
    return %arg0, %c0_i32 : i32, i32
  }
}

module attributes {stable_mosaic.version = 11 : i64} {
  func.func @_affine_lrelu_kernel(%arg0: i32, %arg1: memref<24x512xf32, #tpu.memory_space<vmem>>, %arg2: memref<1x512xf32, #tpu.memory_space<vmem>>, %arg3: memref<1x512xf32, #tpu.memory_space<vmem>>, %arg4: memref<24x512xf32, #tpu.memory_space<vmem>>) attributes {dimension_semantics = [#tpu.dimension_semantics<parallel>], iteration_bounds = array<i64: 1>, scalar_prefetch = 0 : i64, scratch_operands = 0 : i64, tpu.core_type = #tpu.core_type<tc>, window_params = [{transform_indices = @transform_0, window_bounds = array<i64: 24, 512>}, {pipeline_mode = #tpu.pipeline_mode<synchronous>, transform_indices = @transform_1, window_bounds = array<i64: 1, 512>}, {pipeline_mode = #tpu.pipeline_mode<synchronous>, transform_indices = @transform_2, window_bounds = array<i64: 1, 512>}, {transform_indices = @transform_3, window_bounds = array<i64: 24, 512>}]} {
    %c0 = arith.constant 0 : index
    %c0_0 = arith.constant 0 : index
    %0 = vector.load %arg1[%c0, %c0_0] : memref<24x512xf32, #tpu.memory_space<vmem>>, vector<24x512xf32>
    %c0_1 = arith.constant 0 : index
    %c0_2 = arith.constant 0 : index
    %1 = vector.load %arg2[%c0_1, %c0_2] : memref<1x512xf32, #tpu.memory_space<vmem>>, vector<1x512xf32>
    %2 = vector.broadcast %1 : vector<1x512xf32> to vector<24x512xf32>
    %3 = arith.mulf %0, %2 : vector<24x512xf32>
    %c0_3 = arith.constant 0 : index
    %c0_4 = arith.constant 0 : index
    %4 = vector.load %arg3[%c0_3, %c0_4] : memref<1x512xf32, #tpu.memory_space<vmem>>, vector<1x512xf32>
    %5 = vector.broadcast %4 : vector<1x512xf32> to vector<24x512xf32>
    %6 = arith.addf %3, %5 : vector<24x512xf32>
    %cst = arith.constant 0.000000e+00 : f32
    %7 = vector.broadcast %cst : f32 to vector<24x512xf32>
    %8 = arith.cmpf ogt, %6, %7 : vector<24x512xf32>
    %cst_5 = arith.constant -2.000000e-01 : f32
    %9 = vector.broadcast %cst_5 : f32 to vector<24x512xf32>
    %10 = arith.mulf %9, %6 : vector<24x512xf32>
    %11 = arith.select %8, %6, %10 : vector<24x512xi1>, vector<24x512xf32>
    %c0_6 = arith.constant 0 : index
    %c0_7 = arith.constant 0 : index
    %12 = vector.load %arg4[%c0_6, %c0_7] : memref<24x512xf32, #tpu.memory_space<vmem>>, vector<24x512xf32>
    tpu.vector_store %arg4[%c0_6, %c0_7], %11 {strides = array<i32>} : memref<24x512xf32, #tpu.memory_space<vmem>>, vector<24x512xf32>,
    return
  }
  func.func @transform_0(%arg0: i32) -> (i32, i32) {
    %c0_i32 = arith.constant 0 : i32
    %c0_i32_0 = arith.constant 0 : i32
    return %arg0, %c0_i32 : i32, i32
  }
  func.func @transform_1(%arg0: i32) -> (i32, i32) {
    %c0_i32 = arith.constant 0 : i32
    %c0_i32_0 = arith.constant 0 : i32
    %c0_i32_1 = arith.constant 0 : i32
    return %c0_i32, %c0_i32_0 : i32, i32
  }
  func.func @transform_2(%arg0: i32) -> (i32, i32) {
    %c0_i32 = arith.constant 0 : i32
    %c0_i32_0 = arith.constant 0 : i32
    %c0_i32_1 = arith.constant 0 : i32
    return %c0_i32, %c0_i32_0 : i32, i32
  }
  func.func @transform_3(%arg0: i32) -> (i32, i32) {
    %c0_i32 = arith.constant 0 : i32
    %c0_i32_0 = arith.constant 0 : i32
    return %arg0, %c0_i32 : i32, i32
  }
}

module attributes {stable_mosaic.version = 11 : i64} {
  func.func @_conv_bias_lrelu_kernel(%arg0: i32, %arg1: i32, %arg2: memref<8x2048xbf16, #tpu.memory_space<vmem>>, %arg3: memref<2048x128xbf16, #tpu.memory_space<vmem>>, %arg4: memref<1x128xf32, #tpu.memory_space<vmem>>, %arg5: memref<8x128xf32, #tpu.memory_space<vmem>>, %arg6: memref<8x128xf32, #tpu.memory_space<vmem>>) attributes {dimension_semantics = [#tpu.dimension_semantics<parallel>, #tpu.dimension_semantics<arbitrary>], iteration_bounds = array<i64: 1, 4>, scalar_prefetch = 0 : i64, scratch_operands = 1 : i64, tpu.core_type = #tpu.core_type<tc>, window_params = [{transform_indices = @transform_0, window_bounds = array<i64: 8, 2048>}, {transform_indices = @transform_1, window_bounds = array<i64: 2048, 128>}, {pipeline_mode = #tpu.pipeline_mode<synchronous>, transform_indices = @transform_2, window_bounds = array<i64: 1, 128>}, {transform_indices = @transform_3, window_bounds = array<i64: 8, 128>}]} {
    %c0_i32 = arith.constant 0 : i32
    %0 = arith.cmpi eq, %arg1, %c0_i32 : i32
    %1 = arith.extui %0 : i1 to i32
    %c0_i32_0 = arith.constant 0 : i32
    %2 = arith.cmpi ne, %1, %c0_i32_0 : i32
    scf.if %2 {
      %cst_9 = arith.constant 0.000000e+00 : f32
      %12 = vector.broadcast %cst_9 : f32 to vector<8x128xf32>
      %c0_10 = arith.constant 0 : index
      %c0_11 = arith.constant 0 : index
      %13 = vector.load %arg6[%c0_10, %c0_11] : memref<8x128xf32, #tpu.memory_space<vmem>>, vector<8x128xf32>
      tpu.vector_store %arg6[%c0_10, %c0_11], %12 {strides = array<i32>} : memref<8x128xf32, #tpu.memory_space<vmem>>, vector<8x128xf32>,
    } else {
    }
    %c0 = arith.constant 0 : index
    %c0_1 = arith.constant 0 : index
    %3 = vector.load %arg6[%c0, %c0_1] : memref<8x128xf32, #tpu.memory_space<vmem>>, vector<8x128xf32>
    %c0_2 = arith.constant 0 : index
    %c0_3 = arith.constant 0 : index
    %4 = vector.load %arg2[%c0_2, %c0_3] : memref<8x2048xbf16, #tpu.memory_space<vmem>>, vector<8x2048xbf16>
    %c0_4 = arith.constant 0 : index
    %c0_5 = arith.constant 0 : index
    %5 = vector.load %arg3[%c0_4, %c0_5] : memref<2048x128xbf16, #tpu.memory_space<vmem>>, vector<2048x128xbf16>
    %cst = arith.constant dense<0.000000e+00> : vector<8x128xf32>
    %6 = tpu.matmul %4, %5, %cst {dimension_numbers = #tpu.dot_dimension_numbers<[1], [0], [0], [1], [0, 0, 1, 1], [], []>} : vector<8x2048xbf16>, vector<2048x128xbf16>, vector<8x128xf32> -> vector<8x128xf32>
    %7 = arith.addf %3, %6 : vector<8x128xf32>
    %c0_6 = arith.constant 0 : index
    %c0_7 = arith.constant 0 : index
    %8 = vector.load %arg6[%c0_6, %c0_7] : memref<8x128xf32, #tpu.memory_space<vmem>>, vector<8x128xf32>
    tpu.vector_store %arg6[%c0_6, %c0_7], %7 {strides = array<i32>} : memref<8x128xf32, #tpu.memory_space<vmem>>, vector<8x128xf32>,
    %c3_i32 = arith.constant 3 : i32
    %9 = arith.cmpi eq, %arg1, %c3_i32 : i32
    %10 = arith.extui %9 : i1 to i32
    %c0_i32_8 = arith.constant 0 : i32
    %11 = arith.cmpi ne, %10, %c0_i32_8 : i32
    scf.if %11 {
      %c0_9 = arith.constant 0 : index
      %c0_10 = arith.constant 0 : index
      %12 = vector.load %arg6[%c0_9, %c0_10] : memref<8x128xf32, #tpu.memory_space<vmem>>, vector<8x128xf32>
      %c0_11 = arith.constant 0 : index
      %c0_12 = arith.constant 0 : index
      %13 = vector.load %arg4[%c0_11, %c0_12] : memref<1x128xf32, #tpu.memory_space<vmem>>, vector<1x128xf32>
      %14 = vector.broadcast %13 : vector<1x128xf32> to vector<8x128xf32>
      %15 = arith.addf %12, %14 : vector<8x128xf32>
      %cst_13 = arith.constant 0.000000e+00 : f32
      %16 = vector.broadcast %cst_13 : f32 to vector<8x128xf32>
      %17 = arith.cmpf ogt, %15, %16 : vector<8x128xf32>
      %cst_14 = arith.constant 1.000000e+00 : f32
      %18 = vector.broadcast %cst_14 : f32 to vector<8x128xf32>
      %19 = arith.mulf %18, %15 : vector<8x128xf32>
      %20 = arith.select %17, %15, %19 : vector<8x128xi1>, vector<8x128xf32>
      %c0_15 = arith.constant 0 : index
      %c0_16 = arith.constant 0 : index
      %21 = vector.load %arg5[%c0_15, %c0_16] : memref<8x128xf32, #tpu.memory_space<vmem>>, vector<8x128xf32>
      tpu.vector_store %arg5[%c0_15, %c0_16], %20 {strides = array<i32>} : memref<8x128xf32, #tpu.memory_space<vmem>>, vector<8x128xf32>,
    } else {
    }
    return
  }
  func.func @transform_0(%arg0: i32, %arg1: i32) -> (i32, i32) {
    %c0_i32 = arith.constant 0 : i32
    return %arg0, %arg1 : i32, i32
  }
  func.func @transform_1(%arg0: i32, %arg1: i32) -> (i32, i32) {
    %c0_i32 = arith.constant 0 : i32
    %c0_i32_0 = arith.constant 0 : i32
    return %arg1, %c0_i32 : i32, i32
  }
  func.func @transform_2(%arg0: i32, %arg1: i32) -> (i32, i32) {
    %c0_i32 = arith.constant 0 : i32
    %c0_i32_0 = arith.constant 0 : i32
    %c0_i32_1 = arith.constant 0 : i32
    return %c0_i32, %c0_i32_0 : i32, i32
  }
  func.func @transform_3(%arg0: i32, %arg1: i32) -> (i32, i32) {
    %c0_i32 = arith.constant 0 : i32
    %c0_i32_0 = arith.constant 0 : i32
    return %arg0, %c0_i32 : i32, i32
  }
}

</mosaic_0001>

<bundles_post_ra>
// kernel: discriminator_forward.8
= control target key start
LH: loop header
LB: loop body
LE: loop exit
PB: predicated region body
PF: predicated region fallthrough
CT: control target
= control target key end

     0   :  { %s1863_s12 = smov 0   ;;  %s1865_s13 = smov 0   ;;  %s2093_s0 = inlined_call_operand.vmem [shape: bf16[2048,128], index: 0, kind: input, shape index: {}]   ;;  %s2094_s1 = inlined_call_operand.vmem [shape: bf16[128,128], index: 1, kind: input, shape index: {}]   ;;  %s2095_s2 = inlined_call_operand.vmem [shape: f32[1,128], index: 2, kind: input, shape index: {}]   ;;  %s2096_s3 = inlined_call_operand.vmem [shape: f32[2048,128], index: 3, kind: output, shape index: {}]  }
   0x1   :  { %s1867_s14 = smov 0  }
   0x2 LB: > { %s25_s15 = sadd.s32 1, %s1837_s13  ;;  %p1571_p0 = scmp.ge.s32.totalorder %s1841_s14, 1  ;;  %s1841_s14 = sphi %s1867_s14, %s13_s14   ;;  %s1837_s13 = sphi %s1865_s13, %s2098_s13   ;;  %s1833_s12 = sphi %s1863_s12, %s2097_s12  }
   0x3   : > { %p27_p1 = scmp.ge.s32.totalorder %s25_s15, 4  ;;  %p166_p2 = scmp.lt.s32.totalorder %s1841_s14, 5 }
   0x5   : > { %s2100_s15 = smov (%p27_p1, %s25_s15), 0  ;;  %p167_p3 = pnand %p1571_p0, %p166_p2 }
   0x6   : > { %s1572_s18 = sshll.u32 (!%p167_p3), %s1833_s12, 6 }
   0x7   : > { %170 = sbr.rel (%p167_p3) target bundleno = 307 (0x133), region = 32  ;;  %p199_p4 = scmp.lt.s32.totalorder (!%p167_p3), %s1572_s18, 255 }
   0xc   : > { %v1779_v0 = vld [vmem:[%s2094_s1 + $0x38] sm:$0xff]   ;;  %v1780_v1 = vld [vmem:[%s2094_s1 + $0x30] sm:$0xff]   ;;  %s2102_s18 = smov (!%p199_p4, %s1572_s18), 255  ;;  %v1781_v2 = vld [vmem:[%s2094_s1 + $0x28] sm:$0xff]  }
   0xd   : > { %1659 = vmatprep.subr.bf16.mxu0 %v1779_v0  ;;  %1739 = vmatprep.subr.bf16.mxu1 %v1779_v0  ;;  %s1573_s23 = sshll.u32 %s2102_s18, 2  ;;  %v1782_v3 = vld [vmem:[%s2094_s1 + $0x20] sm:$0xff]   ;;  %v1783_v6 = vld [vmem:[%s2094_s1 + $0x18] sm:$0xff]   ;;  %v1784_v7 = vld [vmem:[%s2094_s1 + $0x10] sm:$0xff]   ;;  %s1575_s12 = sshll.u32 %s2102_s18, 3 }
   0xe   : > { %1660 = vmatpush3.bf16.msra.mxu0 %v1779_v0  ;;  %1747 = vmatpush3.bf16.msra.mxu1 %v1779_v0  ;;  %s1896_s26 = scalar_lea.vmem %s2093_s0, %s1573_s23  ;;  %v1785_v8 = vld [vmem:[%s2094_s1 + $0x8] sm:$0xff]   ;;  %v1786_v9 = vld [vmem:[%s2094_s1] sm:$0xff]   ;;  %s1956_s19 = scalar_lea.vmem %s2096_s3, %s1575_s12 }
   0xf   : > { %1661 = vmatprep.subr.bf16.mxu0 %v1780_v1  ;;  %1740 = vmatprep.subr.bf16.mxu1 %v1780_v1  ;;  %v1787_v4 = vld [vmem:[%s1896_s26] sm:$0xff]   ;;  %v1789_v10 = vld [vmem:[%s1896_s26 + $0x8] sm:$0xff]   ;;  %v1791_v12 = vld [vmem:[%s1896_s26 + $0x10] sm:$0xff]  }
  0x10   : > { %v1788_v5 = vld [vmem:[%s1896_s26 + $0x80] sm:$0xff]   ;;  %1675 = vmatprep.mubr.bf16.mxu0 %v1787_v4  ;;  %v1790_v11 = vld [vmem:[%s1896_s26 + $0x88] sm:$0xff]   ;;  %v1792_v13 = vld [vmem:[%s1896_s26 + $0x90] sm:$0xff]  }
  0x11   : > { %1707 = vmatprep.mubr.bf16.mxu1 %v1788_v5  ;;  %v1793_v14 = vld [vmem:[%s1896_s26 + $0x18] sm:$0xff]   ;;  %v1795_v16 = vld [vmem:[%s1896_s26 + $0x20] sm:$0xff]   ;;  %v1797_v18 = vld [vmem:[%s1896_s26 + $0x28] sm:$0xff]  }
  0x12   : > { %1662 = vmatpush3.bf16.msra.mxu0 %v1780_v1  ;;  %1748 = vmatpush3.bf16.msra.mxu1 %v1780_v1  ;;  %v1794_v15 = vld [vmem:[%s1896_s26 + $0x98] sm:$0xff]   ;;  %v1796_v17 = vld [vmem:[%s1896_s26 + $0xa0] sm:$0xff]   ;;  %v1798_v19 = vld [vmem:[%s1896_s26 + $0xa8] sm:$0xff]  }
  0x13   : > { %1663 = vmatprep.subr.bf16.mxu0 %v1781_v2  ;;  %1741 = vmatprep.subr.bf16.mxu1 %v1781_v2  ;;  %v1799_v20 = vld [vmem:[%s1896_s26 + $0x30] sm:$0xff]   ;;  %v1801_v22 = vld [vmem:[%s1896_s26 + $0x38] sm:$0xff]   ;;  %v1803_v24 = vld [vmem:[%s1896_s26 + $0x40] sm:$0xff]  }
  0x14   : > { %v1800_v21 = vld [vmem:[%s1896_s26 + $0xb0] sm:$0xff]   ;;  %v1802_v23 = vld [vmem:[%s1896_s26 + $0xb8] sm:$0xff]   ;;  %v1804_v25 = vld [vmem:[%s1896_s26 + $0xc0] sm:$0xff]  }
  0x15   : > { %v1805_v26 = vld [vmem:[%s1896_s26 + $0x48] sm:$0xff]   ;;  %v1807_v28 = vld [vmem:[%s1896_s26 + $0x50] sm:$0xff]   ;;  %v1809_v30 = vld [vmem:[%s1896_s26 + $0x58] sm:$0xff]  }
  0x16   : > { %1664 = vmatpush3.bf16.msra.mxu0 %v1781_v2  ;;  %1749 = vmatpush3.bf16.msra.mxu1 %v1781_v2  ;;  %v1806_v27 = vld [vmem:[%s1896_s26 + $0xc8] sm:$0xff]   ;;  %v1808_v29 = vld [vmem:[%s1896_s26 + $0xd0] sm:$0xff]   ;;  %v1810_v31 = vld [vmem:[%s1896_s26 + $0xd8] sm:$0xff]  }
  0x17   : > { %1665 = vmatprep.subr.bf16.mxu0 %v1782_v3  ;;  %1742 = vmatprep.subr.bf16.mxu1 %v1782_v3  ;;  %v1811_v32 = vld [vmem:[%s1896_s26 + $0x60] sm:$0xff]   ;;  %v1813_v34 = vld [vmem:[%s1896_s26 + $0x68] sm:$0xff]   ;;  %v1815_v36 = vld [vmem:[%s1896_s26 + $0x70] sm:$0xff]  }
  0x18   : > { %v1812_v33 = vld [vmem:[%s1896_s26 + $0xe0] sm:$0xff]   ;;  %v1814_v35 = vld [vmem:[%s1896_s26 + $0xe8] sm:$0xff]   ;;  %v1816_v37 = vld [vmem:[%s1896_s26 + $0xf0] sm:$0xff]  }
  0x19   : > { %v1817_v38 = vld [vmem:[%s1896_s26 + $0x78] sm:$0xff]   ;;  %v1948_v40 = vld [vmem:[%s2095_s2] ss:$0 sm:$0xff] }
  0x1a   : > { %1666 = vmatpush3.bf16.msra.mxu0 %v1782_v3  ;;  %1750 = vmatpush3.bf16.msra.mxu1 %v1782_v3  ;;  %v1818_v39 = vld [vmem:[%s1896_s26 + $0xf8] sm:$0xff]  }
  0x1b   : > { %1667 = vmatprep.subr.bf16.mxu0 %v1783_v6  ;;  %1743 = vmatprep.subr.bf16.mxu1 %v1783_v6 }
  0x1e   : > { %1668 = vmatpush3.bf16.msra.mxu0 %v1783_v6  ;;  %1751 = vmatpush3.bf16.msra.mxu1 %v1783_v6 }
  0x1f   : > { %1669 = vmatprep.subr.bf16.mxu0 %v1784_v7  ;;  %1744 = vmatprep.subr.bf16.mxu1 %v1784_v7 }
  0x22   : > { %1670 = vmatpush3.bf16.msra.mxu0 %v1784_v7  ;;  %1752 = vmatpush3.bf16.msra.mxu1 %v1784_v7 }
  0x23   : > { %1671 = vmatprep.subr.bf16.mxu0 %v1785_v8  ;;  %1745 = vmatprep.subr.bf16.mxu1 %v1785_v8 }
  0x26   : > { %1672 = vmatpush3.bf16.msra.mxu0 %v1785_v8  ;;  %1753 = vmatpush3.bf16.msra.mxu1 %v1785_v8 }
  0x27   : > { %1673 = vmatprep.subr.bf16.mxu0 %v1786_v9  ;;  %1746 = vmatprep.subr.bf16.mxu1 %v1786_v9 }
  0x2a   : > { %1674 = vmatpush3.bf16.msra.mxu0 %v1786_v9  ;;  %1754 = vmatpush3.bf16.msra.mxu1 %v1786_v9 }
  0x2d   : > { %1676 = vmatmul.mubr.bf16.vlgmr.msra.gmra.mxu0 %v1789_v10  ;;  %1708 = vmatmul.mubr.bf16.vlgmr.msra.gmra.mxu1 %v1790_v11 }
  0x2e   : > { %1679 = vmatprep.mubr.bf16.mxu0 %v1791_v12  ;;  %1711 = vmatprep.mubr.bf16.mxu1 %v1792_v13 }
  0x35   : > { %1680 = vmatmul.mubr.bf16.gmra.mxu0 %v1793_v14  ;;  %1712 = vmatmul.mubr.bf16.gmra.mxu1 %v1794_v15 }
  0x36   : > { %1683 = vmatprep.mubr.bf16.mxu0 %v1795_v16  ;;  %1715 = vmatprep.mubr.bf16.mxu1 %v1796_v17 }
  0x3d   : > { %1684 = vmatmul.mubr.bf16.gmra.mxu0 %v1797_v18  ;;  %1716 = vmatmul.mubr.bf16.gmra.mxu1 %v1798_v19 }
  0x3e   : > { %1687 = vmatprep.mubr.bf16.mxu0 %v1799_v20  ;;  %1719 = vmatprep.mubr.bf16.mxu1 %v1800_v21 }
  0x45   : > { %1688 = vmatmul.mubr.bf16.gmra.mxu0 %v1801_v22  ;;  %1720 = vmatmul.mubr.bf16.gmra.mxu1 %v1802_v23 }
  0x46   : > { %1691 = vmatprep.mubr.bf16.mxu0 %v1803_v24  ;;  %1723 = vmatprep.mubr.bf16.mxu1 %v1804_v25 }
  0x4d   : > { %1692 = vmatmul.mubr.bf16.gmra.mxu0 %v1805_v26  ;;  %1724 = vmatmul.mubr.bf16.gmra.mxu1 %v1806_v27 }
  0x4e   : > { %1695 = vmatprep.mubr.bf16.mxu0 %v1807_v28  ;;  %1727 = vmatprep.mubr.bf16.mxu1 %v1808_v29 }
  0x55   : > { %1696 = vmatmul.mubr.bf16.gmra.mxu0 %v1809_v30  ;;  %1728 = vmatmul.mubr.bf16.gmra.mxu1 %v1810_v31 }
  0x56   : > { %1699 = vmatprep.mubr.bf16.mxu0 %v1811_v32  ;;  %1731 = vmatprep.mubr.bf16.mxu1 %v1812_v33 }
  0x5d   : > { %1700 = vmatmul.mubr.bf16.gmra.mxu0 %v1813_v34  ;;  %1732 = vmatmul.mubr.bf16.gmra.mxu1 %v1814_v35 }
  0x5e   : > { %1703 = vmatprep.mubr.bf16.mxu0 %v1815_v36  ;;  %1735 = vmatprep.mubr.bf16.mxu1 %v1816_v37 }
  0x65   : > { %1704 = vmatmul.mubr.bf16.gmra.mxu0 %v1817_v38  ;;  %1736 = vmatmul.mubr.bf16.gmra.mxu1 %v1818_v39 }
  0xed   : > { %v1677_v41 = vpop.f32.mrf.mxu0  ;;  %v1709_v42 = vpop.f32.mrf.mxu1 }
  0xee   : > { %v1165_v43 = vadd.f32 %v1677_v41, %v1948_v40  ;;  %v1197_v44 = vadd.f32 %v1709_v42, %v1948_v40 }
  0xef   : > { %v706_v45 = vpop.f32.mrf.mxu0  ;;  %v834_v46 = vpop.f32.mrf.mxu1 }
  0xf0   : > { %vm1229_vm0 = vcmp.gt.f32.partialorder %v1165_v43, 0.0  ;;  %v1293_v47 = vmul.f32 0.2, %v1165_v43  ;;  %vm1261_vm1 = vcmp.gt.f32.partialorder %v1197_v44, 0.0  ;;  %v1325_v48 = vmul.f32 0.2, %v1197_v44 }
  0xf1   : > { %v1163_v49 = vadd.f32 %v1948_v40, %v706_v45  ;;  %v1195_v50 = vadd.f32 %v1948_v40, %v834_v46  ;;  %v1678_v51 = vpop.f32.mrf.mxu0  ;;  %v1710_v52 = vpop.f32.mrf.mxu1 }
  0xf2   : > { %v1357_v53 = vsel %vm1229_vm0, %v1165_v43, %v1293_v47  ;;  %v1389_v54 = vsel %vm1261_vm1, %v1197_v44, %v1325_v48  ;;  %v1166_v55 = vadd.f32 %v1678_v51, %v1948_v40  ;;  %v1198_v56 = vadd.f32 %v1710_v52, %v1948_v40 }
  0xf3   : > { %1421 = vst [vmem:[%s1956_s19 + $0x10] sm:$0xff] %v1357_v53  ;;  %1453 = vst [vmem:[%s1956_s19 + $0x110] sm:$0xff] %v1389_v54  ;;  %vm1227_vm2 = vcmp.gt.f32.partialorder %v1163_v49, 0.0  ;;  %v1291_v57 = vmul.f32 0.2, %v1163_v49  ;;  %vm1259_vm3 = vcmp.gt.f32.partialorder %v1195_v50, 0.0  ;;  %v709_v59 = vpop.f32.mrf.mxu0  ;;  %v837_v60 = vpop.f32.mrf.mxu1 }
  0xf4   : > { %v1323_v58 = vmul.f32 0.2, %v1195_v50  ;;  %vm1230_vm4 = vcmp.gt.f32.partialorder %v1166_v55, 0.0  ;;  %v1294_v61 = vmul.f32 0.2, %v1166_v55  ;;  %vm1262_vm5 = vcmp.gt.f32.partialorder %v1198_v56, 0.0 }
  0xf5   : > { %v1326_v62 = vmul.f32 0.2, %v1198_v56  ;;  %v1355_v63 = vsel %vm1227_vm2, %v1163_v49, %v1291_v57  ;;  %v1164_v1 = vadd.f32 %v1948_v40, %v709_v59  ;;  %v1196_v2 = vadd.f32 %v1948_v40, %v837_v60  ;;  %v1681_v3 = vpop.f32.mrf.mxu0  ;;  %v1713_v4 = vpop.f32.mrf.mxu1 }
  0xf6   : > { %v1387_v0 = vsel %vm1259_vm3, %v1195_v50, %v1323_v58  ;;  %1419 = vst [vmem:[%s1956_s19] sm:$0xff] %v1355_v63  ;;  %v1358_v5 = vsel %vm1230_vm4, %v1166_v55, %v1294_v61  ;;  %v1169_v7 = vadd.f32 %v1681_v3, %v1948_v40  ;;  %v1201_v8 = vadd.f32 %v1713_v4, %v1948_v40 }
  0xf7   : > { %1451 = vst [vmem:[%s1956_s19 + $0x100] sm:$0xff] %v1387_v0  ;;  %v1390_v6 = vsel %vm1262_vm5, %v1198_v56, %v1326_v62  ;;  %1422 = vst [vmem:[%s1956_s19 + $0x18] sm:$0xff] %v1358_v5  ;;  %vm1228_vm6 = vcmp.gt.f32.partialorder %v1164_v1, 0.0  ;;  %v1292_v9 = vmul.f32 0.2, %v1164_v1  ;;  %vm1260_vm7 = vcmp.gt.f32.partialorder %v1196_v2, 0.0  ;;  %v722_v11 = vpop.f32.mrf.mxu0  ;;  %v850_v12 = vpop.f32.mrf.mxu1 }
  0xf8   : > { %1454 = vst [vmem:[%s1956_s19 + $0x118] sm:$0xff] %v1390_v6  ;;  %v1324_v10 = vmul.f32 0.2, %v1196_v2  ;;  %vm1233_vm8 = vcmp.gt.f32.partialorder %v1169_v7, 0.0  ;;  %v1297_v13 = vmul.f32 0.2, %v1169_v7  ;;  %v1167_v17 = vadd.f32 %v1948_v40, %v722_v11 }
  0xf9   : > { %vm1265_vm9 = vcmp.gt.f32.partialorder %v1201_v8, 0.0  ;;  %v1329_v14 = vmul.f32 0.2, %v1201_v8  ;;  %v1356_v15 = vsel %vm1228_vm6, %v1164_v1, %v1292_v9  ;;  %v1199_v18 = vadd.f32 %v1948_v40, %v850_v12  ;;  %v1682_v19 = vpop.f32.mrf.mxu0  ;;  %v1714_v20 = vpop.f32.mrf.mxu1 }
  0xfa   : > { %v1388_v16 = vsel %vm1260_vm7, %v1196_v2, %v1324_v10  ;;  %1420 = vst [vmem:[%s1956_s19 + $0x8] sm:$0xff] %v1356_v15  ;;  %v1361_v21 = vsel %vm1233_vm8, %v1169_v7, %v1297_v13  ;;  %v1170_v23 = vadd.f32 %v1682_v19, %v1948_v40  ;;  %v1202_v24 = vadd.f32 %v1714_v20, %v1948_v40 }
  0xfb   : > { %1452 = vst [vmem:[%s1956_s19 + $0x108] sm:$0xff] %v1388_v16  ;;  %v1393_v22 = vsel %vm1265_vm9, %v1201_v8, %v1329_v14  ;;  %1425 = vst [vmem:[%s1956_s19 + $0x30] sm:$0xff] %v1361_v21  ;;  %vm1231_vm10 = vcmp.gt.f32.partialorder %v1167_v17, 0.0  ;;  %v1295_v25 = vmul.f32 0.2, %v1167_v17  ;;  %vm1263_vm11 = vcmp.gt.f32.partialorder %v1199_v18, 0.0  ;;  %v725_v27 = vpop.f32.mrf.mxu0  ;;  %v853_v28 = vpop.f32.mrf.mxu1 }
  0xfc   : > { %1457 = vst [vmem:[%s1956_s19 + $0x130] sm:$0xff] %v1393_v22  ;;  %v1327_v26 = vmul.f32 0.2, %v1199_v18  ;;  %vm1234_vm12 = vcmp.gt.f32.partialorder %v1170_v23, 0.0  ;;  %v1298_v29 = vmul.f32 0.2, %v1170_v23  ;;  %v1168_v33 = vadd.f32 %v1948_v40, %v725_v27 }
  0xfd   : > { %vm1266_vm13 = vcmp.gt.f32.partialorder %v1202_v24, 0.0  ;;  %v1330_v30 = vmul.f32 0.2, %v1202_v24  ;;  %v1359_v31 = vsel %vm1231_vm10, %v1167_v17, %v1295_v25  ;;  %v1200_v34 = vadd.f32 %v1948_v40, %v853_v28  ;;  %v1685_v35 = vpop.f32.mrf.mxu0  ;;  %v1717_v36 = vpop.f32.mrf.mxu1 }
  0xfe   : > { %v1391_v32 = vsel %vm1263_vm11, %v1199_v18, %v1327_v26  ;;  %1423 = vst [vmem:[%s1956_s19 + $0x20] sm:$0xff] %v1359_v31  ;;  %v1362_v37 = vsel %vm1234_vm12, %v1170_v23, %v1298_v29  ;;  %v1173_v39 = vadd.f32 %v1685_v35, %v1948_v40  ;;  %v1205_v41 = vadd.f32 %v1717_v36, %v1948_v40 }
  0xff   : > { %1455 = vst [vmem:[%s1956_s19 + $0x120] sm:$0xff] %v1391_v32  ;;  %v1394_v38 = vsel %vm1266_vm13, %v1202_v24, %v1330_v30  ;;  %1426 = vst [vmem:[%s1956_s19 + $0x38] sm:$0xff] %v1362_v37  ;;  %vm1232_vm14 = vcmp.gt.f32.partialorder %v1168_v33, 0.0  ;;  %v1296_v42 = vmul.f32 0.2, %v1168_v33  ;;  %vm1264_vm15 = vcmp.gt.f32.partialorder %v1200_v34, 0.0  ;;  %v738_v44 = vpop.f32.mrf.mxu0  ;;  %v866_v45 = vpop.f32.mrf.mxu1 }
 0x100   : > { %1458 = vst [vmem:[%s1956_s19 + $0x138] sm:$0xff] %v1394_v38  ;;  %v1328_v43 = vmul.f32 0.2, %v1200_v34  ;;  %vm1237_vm0 = vcmp.gt.f32.partialorder %v1173_v39, 0.0  ;;  %v1301_v46 = vmul.f32 0.2, %v1173_v39  ;;  %v1171_v50 = vadd.f32 %v1948_v40, %v738_v44 }
 0x101   : > { %vm1269_vm1 = vcmp.gt.f32.partialorder %v1205_v41, 0.0  ;;  %v1333_v47 = vmul.f32 0.2, %v1205_v41  ;;  %v1360_v48 = vsel %vm1232_vm14, %v1168_v33, %v1296_v42  ;;  %v1203_v51 = vadd.f32 %v1948_v40, %v866_v45  ;;  %v1686_v52 = vpop.f32.mrf.mxu0  ;;  %v1718_v53 = vpop.f32.mrf.mxu1 }
 0x102   : > { %v1392_v49 = vsel %vm1264_vm15, %v1200_v34, %v1328_v43  ;;  %1424 = vst [vmem:[%s1956_s19 + $0x28] sm:$0xff] %v1360_v48  ;;  %v1365_v54 = vsel %vm1237_vm0, %v1173_v39, %v1301_v46  ;;  %v1174_v56 = vadd.f32 %v1686_v52, %v1948_v40  ;;  %v1206_v57 = vadd.f32 %v1718_v53, %v1948_v40 }
 0x103   : > { %1456 = vst [vmem:[%s1956_s19 + $0x128] sm:$0xff] %v1392_v49  ;;  %v1397_v55 = vsel %vm1269_vm1, %v1205_v41, %v1333_v47  ;;  %1429 = vst [vmem:[%s1956_s19 + $0x50] sm:$0xff] %v1365_v54  ;;  %vm1235_vm2 = vcmp.gt.f32.partialorder %v1171_v50, 0.0  ;;  %v1299_v58 = vmul.f32 0.2, %v1171_v50  ;;  %vm1267_vm3 = vcmp.gt.f32.partialorder %v1203_v51, 0.0  ;;  %v741_v60 = vpop.f32.mrf.mxu0  ;;  %v869_v61 = vpop.f32.mrf.mxu1 }
 0x104   : > { %1461 = vst [vmem:[%s1956_s19 + $0x150] sm:$0xff] %v1397_v55  ;;  %v1331_v59 = vmul.f32 0.2, %v1203_v51  ;;  %vm1238_vm4 = vcmp.gt.f32.partialorder %v1174_v56, 0.0  ;;  %v1302_v62 = vmul.f32 0.2, %v1174_v56  ;;  %v1172_v2 = vadd.f32 %v1948_v40, %v741_v60 }
 0x105   : > { %vm1270_vm5 = vcmp.gt.f32.partialorder %v1206_v57, 0.0  ;;  %v1334_v63 = vmul.f32 0.2, %v1206_v57  ;;  %v1363_v0 = vsel %vm1235_vm2, %v1171_v50, %v1299_v58  ;;  %v1204_v3 = vadd.f32 %v1948_v40, %v869_v61  ;;  %v1689_v4 = vpop.f32.mrf.mxu0  ;;  %v1721_v5 = vpop.f32.mrf.mxu1 }
 0x106   : > { %v1395_v1 = vsel %vm1267_vm3, %v1203_v51, %v1331_v59  ;;  %1427 = vst [vmem:[%s1956_s19 + $0x40] sm:$0xff] %v1363_v0  ;;  %v1366_v6 = vsel %vm1238_vm4, %v1174_v56, %v1302_v62  ;;  %v1177_v8 = vadd.f32 %v1689_v4, %v1948_v40  ;;  %v1209_v9 = vadd.f32 %v1721_v5, %v1948_v40 }
 0x107   : > { %1459 = vst [vmem:[%s1956_s19 + $0x140] sm:$0xff] %v1395_v1  ;;  %v1398_v7 = vsel %vm1270_vm5, %v1206_v57, %v1334_v63  ;;  %1430 = vst [vmem:[%s1956_s19 + $0x58] sm:$0xff] %v1366_v6  ;;  %vm1236_vm6 = vcmp.gt.f32.partialorder %v1172_v2, 0.0  ;;  %v1300_v10 = vmul.f32 0.2, %v1172_v2  ;;  %vm1268_vm7 = vcmp.gt.f32.partialorder %v1204_v3, 0.0  ;;  %v754_v12 = vpop.f32.mrf.mxu0  ;;  %v882_v13 = vpop.f32.mrf.mxu1 }
 0x108   : > { %1462 = vst [vmem:[%s1956_s19 + $0x158] sm:$0xff] %v1398_v7  ;;  %v1332_v11 = vmul.f32 0.2, %v1204_v3  ;;  %vm1241_vm8 = vcmp.gt.f32.partialorder %v1177_v8, 0.0  ;;  %v1305_v14 = vmul.f32 0.2, %v1177_v8  ;;  %v1175_v18 = vadd.f32 %v1948_v40, %v754_v12 }
 0x109   : > { %vm1273_vm9 = vcmp.gt.f32.partialorder %v1209_v9, 0.0  ;;  %v1337_v15 = vmul.f32 0.2, %v1209_v9  ;;  %v1364_v16 = vsel %vm1236_vm6, %v1172_v2, %v1300_v10  ;;  %v1207_v19 = vadd.f32 %v1948_v40, %v882_v13  ;;  %v1690_v20 = vpop.f32.mrf.mxu0  ;;  %v1722_v21 = vpop.f32.mrf.mxu1 }
 0x10a   : > { %v1396_v17 = vsel %vm1268_vm7, %v1204_v3, %v1332_v11  ;;  %1428 = vst [vmem:[%s1956_s19 + $0x48] sm:$0xff] %v1364_v16  ;;  %v1369_v22 = vsel %vm1241_vm8, %v1177_v8, %v1305_v14  ;;  %v1178_v24 = vadd.f32 %v1690_v20, %v1948_v40  ;;  %v1210_v25 = vadd.f32 %v1722_v21, %v1948_v40 }
 0x10b   : > { %1460 = vst [vmem:[%s1956_s19 + $0x148] sm:$0xff] %v1396_v17  ;;  %v1401_v23 = vsel %vm1273_vm9, %v1209_v9, %v1337_v15  ;;  %1433 = vst [vmem:[%s1956_s19 + $0x70] sm:$0xff] %v1369_v22  ;;  %vm1239_vm10 = vcmp.gt.f32.partialorder %v1175_v18, 0.0  ;;  %v1303_v26 = vmul.f32 0.2, %v1175_v18  ;;  %vm1271_vm11 = vcmp.gt.f32.partialorder %v1207_v19, 0.0  ;;  %v757_v28 = vpop.f32.mrf.mxu0  ;;  %v885_v29 = vpop.f32.mrf.mxu1 }
 0x10c   : > { %1465 = vst [vmem:[%s1956_s19 + $0x170] sm:$0xff] %v1401_v23  ;;  %v1335_v27 = vmul.f32 0.2, %v1207_v19  ;;  %vm1242_vm12 = vcmp.gt.f32.partialorder %v1178_v24, 0.0  ;;  %v1306_v30 = vmul.f32 0.2, %v1178_v24  ;;  %v1176_v34 = vadd.f32 %v1948_v40, %v757_v28 }
 0x10d   : > { %vm1274_vm13 = vcmp.gt.f32.partialorder %v1210_v25, 0.0  ;;  %v1338_v31 = vmul.f32 0.2, %v1210_v25  ;;  %v1367_v32 = vsel %vm1239_vm10, %v1175_v18, %v1303_v26  ;;  %v1208_v35 = vadd.f32 %v1948_v40, %v885_v29  ;;  %v1693_v36 = vpop.f32.mrf.mxu0  ;;  %v1725_v37 = vpop.f32.mrf.mxu1 }
 0x10e   : > { %v1399_v33 = vsel %vm1271_vm11, %v1207_v19, %v1335_v27  ;;  %1431 = vst [vmem:[%s1956_s19 + $0x60] sm:$0xff] %v1367_v32  ;;  %v1370_v38 = vsel %vm1242_vm12, %v1178_v24, %v1306_v30  ;;  %v1181_v41 = vadd.f32 %v1693_v36, %v1948_v40  ;;  %v1213_v42 = vadd.f32 %v1725_v37, %v1948_v40 }
 0x10f   : > { %1463 = vst [vmem:[%s1956_s19 + $0x160] sm:$0xff] %v1399_v33  ;;  %v1402_v39 = vsel %vm1274_vm13, %v1210_v25, %v1338_v31  ;;  %1434 = vst [vmem:[%s1956_s19 + $0x78] sm:$0xff] %v1370_v38  ;;  %vm1240_vm14 = vcmp.gt.f32.partialorder %v1176_v34, 0.0  ;;  %v1304_v43 = vmul.f32 0.2, %v1176_v34  ;;  %vm1272_vm15 = vcmp.gt.f32.partialorder %v1208_v35, 0.0  ;;  %v770_v45 = vpop.f32.mrf.mxu0  ;;  %v898_v46 = vpop.f32.mrf.mxu1 }
 0x110   : > { %1466 = vst [vmem:[%s1956_s19 + $0x178] sm:$0xff] %v1402_v39  ;;  %v1336_v44 = vmul.f32 0.2, %v1208_v35  ;;  %vm1245_vm0 = vcmp.gt.f32.partialorder %v1181_v41, 0.0  ;;  %v1309_v47 = vmul.f32 0.2, %v1181_v41  ;;  %v1179_v51 = vadd.f32 %v1948_v40, %v770_v45 }
 0x111   : > { %vm1277_vm1 = vcmp.gt.f32.partialorder %v1213_v42, 0.0  ;;  %v1341_v48 = vmul.f32 0.2, %v1213_v42  ;;  %v1368_v49 = vsel %vm1240_vm14, %v1176_v34, %v1304_v43  ;;  %v1211_v52 = vadd.f32 %v1948_v40, %v898_v46  ;;  %v1694_v53 = vpop.f32.mrf.mxu0  ;;  %v1726_v54 = vpop.f32.mrf.mxu1 }
 0x112   : > { %v1400_v50 = vsel %vm1272_vm15, %v1208_v35, %v1336_v44  ;;  %1432 = vst [vmem:[%s1956_s19 + $0x68] sm:$0xff] %v1368_v49  ;;  %v1373_v55 = vsel %vm1245_vm0, %v1181_v41, %v1309_v47  ;;  %v1182_v57 = vadd.f32 %v1694_v53, %v1948_v40  ;;  %v1214_v58 = vadd.f32 %v1726_v54, %v1948_v40 }
 0x113   : > { %1464 = vst [vmem:[%s1956_s19 + $0x168] sm:$0xff] %v1400_v50  ;;  %v1405_v56 = vsel %vm1277_vm1, %v1213_v42, %v1341_v48  ;;  %1437 = vst [vmem:[%s1956_s19 + $0x90] sm:$0xff] %v1373_v55  ;;  %vm1243_vm2 = vcmp.gt.f32.partialorder %v1179_v51, 0.0  ;;  %v1307_v59 = vmul.f32 0.2, %v1179_v51  ;;  %vm1275_vm3 = vcmp.gt.f32.partialorder %v1211_v52, 0.0  ;;  %v773_v61 = vpop.f32.mrf.mxu0  ;;  %v901_v62 = vpop.f32.mrf.mxu1 }
 0x114   : > { %1469 = vst [vmem:[%s1956_s19 + $0x190] sm:$0xff] %v1405_v56  ;;  %v1339_v60 = vmul.f32 0.2, %v1211_v52  ;;  %vm1246_vm4 = vcmp.gt.f32.partialorder %v1182_v57, 0.0  ;;  %v1310_v63 = vmul.f32 0.2, %v1182_v57  ;;  %v1180_v3 = vadd.f32 %v1948_v40, %v773_v61 }
 0x115   : > { %vm1278_vm5 = vcmp.gt.f32.partialorder %v1214_v58, 0.0  ;;  %v1342_v0 = vmul.f32 0.2, %v1214_v58  ;;  %v1371_v1 = vsel %vm1243_vm2, %v1179_v51, %v1307_v59  ;;  %v1212_v4 = vadd.f32 %v1948_v40, %v901_v62  ;;  %v1697_v5 = vpop.f32.mrf.mxu0  ;;  %v1729_v6 = vpop.f32.mrf.mxu1 }
 0x116   : > { %v1403_v2 = vsel %vm1275_vm3, %v1211_v52, %v1339_v60  ;;  %1435 = vst [vmem:[%s1956_s19 + $0x80] sm:$0xff] %v1371_v1  ;;  %v1374_v7 = vsel %vm1246_vm4, %v1182_v57, %v1310_v63  ;;  %v1185_v9 = vadd.f32 %v1697_v5, %v1948_v40  ;;  %v1217_v10 = vadd.f32 %v1729_v6, %v1948_v40 }
 0x117   : > { %1467 = vst [vmem:[%s1956_s19 + $0x180] sm:$0xff] %v1403_v2  ;;  %v1406_v8 = vsel %vm1278_vm5, %v1214_v58, %v1342_v0  ;;  %1438 = vst [vmem:[%s1956_s19 + $0x98] sm:$0xff] %v1374_v7  ;;  %vm1244_vm6 = vcmp.gt.f32.partialorder %v1180_v3, 0.0  ;;  %v1308_v11 = vmul.f32 0.2, %v1180_v3  ;;  %vm1276_vm7 = vcmp.gt.f32.partialorder %v1212_v4, 0.0  ;;  %v786_v13 = vpop.f32.mrf.mxu0  ;;  %v914_v14 = vpop.f32.mrf.mxu1 }
 0x118   : > { %1470 = vst [vmem:[%s1956_s19 + $0x198] sm:$0xff] %v1406_v8  ;;  %v1340_v12 = vmul.f32 0.2, %v1212_v4  ;;  %vm1249_vm8 = vcmp.gt.f32.partialorder %v1185_v9, 0.0  ;;  %v1313_v15 = vmul.f32 0.2, %v1185_v9  ;;  %v1183_v19 = vadd.f32 %v1948_v40, %v786_v13 }
 0x119   : > { %vm1281_vm9 = vcmp.gt.f32.partialorder %v1217_v10, 0.0  ;;  %v1345_v16 = vmul.f32 0.2, %v1217_v10  ;;  %v1372_v17 = vsel %vm1244_vm6, %v1180_v3, %v1308_v11  ;;  %v1215_v20 = vadd.f32 %v1948_v40, %v914_v14  ;;  %v1698_v21 = vpop.f32.mrf.mxu0  ;;  %v1730_v22 = vpop.f32.mrf.mxu1 }
 0x11a   : > { %v1404_v18 = vsel %vm1276_vm7, %v1212_v4, %v1340_v12  ;;  %1436 = vst [vmem:[%s1956_s19 + $0x88] sm:$0xff] %v1372_v17  ;;  %v1377_v23 = vsel %vm1249_vm8, %v1185_v9, %v1313_v15  ;;  %v1186_v25 = vadd.f32 %v1698_v21, %v1948_v40  ;;  %v1218_v26 = vadd.f32 %v1730_v22, %v1948_v40 }
 0x11b   : > { %1468 = vst [vmem:[%s1956_s19 + $0x188] sm:$0xff] %v1404_v18  ;;  %v1409_v24 = vsel %vm1281_vm9, %v1217_v10, %v1345_v16  ;;  %1441 = vst [vmem:[%s1956_s19 + $0xb0] sm:$0xff] %v1377_v23  ;;  %vm1247_vm10 = vcmp.gt.f32.partialorder %v1183_v19, 0.0  ;;  %v1311_v27 = vmul.f32 0.2, %v1183_v19  ;;  %vm1279_vm11 = vcmp.gt.f32.partialorder %v1215_v20, 0.0  ;;  %v789_v29 = vpop.f32.mrf.mxu0  ;;  %v917_v30 = vpop.f32.mrf.mxu1 }
 0x11c   : > { %1473 = vst [vmem:[%s1956_s19 + $0x1b0] sm:$0xff] %v1409_v24  ;;  %v1343_v28 = vmul.f32 0.2, %v1215_v20  ;;  %vm1250_vm12 = vcmp.gt.f32.partialorder %v1186_v25, 0.0  ;;  %v1314_v31 = vmul.f32 0.2, %v1186_v25  ;;  %v1184_v35 = vadd.f32 %v1948_v40, %v789_v29 }
 0x11d   : > { %vm1282_vm13 = vcmp.gt.f32.partialorder %v1218_v26, 0.0  ;;  %v1346_v32 = vmul.f32 0.2, %v1218_v26  ;;  %v1375_v33 = vsel %vm1247_vm10, %v1183_v19, %v1311_v27  ;;  %v1216_v36 = vadd.f32 %v1948_v40, %v917_v30  ;;  %v1701_v37 = vpop.f32.mrf.mxu0  ;;  %v1733_v38 = vpop.f32.mrf.mxu1 }
 0x11e   : > { %v1407_v34 = vsel %vm1279_vm11, %v1215_v20, %v1343_v28  ;;  %1439 = vst [vmem:[%s1956_s19 + $0xa0] sm:$0xff] %v1375_v33  ;;  %v1378_v39 = vsel %vm1250_vm12, %v1186_v25, %v1314_v31  ;;  %v1189_v42 = vadd.f32 %v1701_v37, %v1948_v40  ;;  %v1221_v43 = vadd.f32 %v1733_v38, %v1948_v40 }
 0x11f   : > { %1471 = vst [vmem:[%s1956_s19 + $0x1a0] sm:$0xff] %v1407_v34  ;;  %v1410_v41 = vsel %vm1282_vm13, %v1218_v26, %v1346_v32  ;;  %1442 = vst [vmem:[%s1956_s19 + $0xb8] sm:$0xff] %v1378_v39  ;;  %vm1248_vm14 = vcmp.gt.f32.partialorder %v1184_v35, 0.0  ;;  %v1312_v44 = vmul.f32 0.2, %v1184_v35  ;;  %vm1280_vm15 = vcmp.gt.f32.partialorder %v1216_v36, 0.0  ;;  %v802_v46 = vpop.f32.mrf.mxu0  ;;  %v930_v47 = vpop.f32.mrf.mxu1 }
 0x120   : > { %1474 = vst [vmem:[%s1956_s19 + $0x1b8] sm:$0xff] %v1410_v41  ;;  %v1344_v45 = vmul.f32 0.2, %v1216_v36  ;;  %vm1253_vm0 = vcmp.gt.f32.partialorder %v1189_v42, 0.0  ;;  %v1317_v48 = vmul.f32 0.2, %v1189_v42  ;;  %v1187_v52 = vadd.f32 %v1948_v40, %v802_v46 }
 0x121   : > { %vm1285_vm1 = vcmp.gt.f32.partialorder %v1221_v43, 0.0  ;;  %v1349_v49 = vmul.f32 0.2, %v1221_v43  ;;  %v1376_v50 = vsel %vm1248_vm14, %v1184_v35, %v1312_v44  ;;  %v1219_v53 = vadd.f32 %v1948_v40, %v930_v47  ;;  %v1702_v54 = vpop.f32.mrf.mxu0  ;;  %v1734_v55 = vpop.f32.mrf.mxu1 }
 0x122   : > { %v1408_v51 = vsel %vm1280_vm15, %v1216_v36, %v1344_v45  ;;  %1440 = vst [vmem:[%s1956_s19 + $0xa8] sm:$0xff] %v1376_v50  ;;  %v1381_v56 = vsel %vm1253_vm0, %v1189_v42, %v1317_v48  ;;  %v1190_v58 = vadd.f32 %v1702_v54, %v1948_v40  ;;  %v1222_v59 = vadd.f32 %v1734_v55, %v1948_v40 }
 0x123   : > { %1472 = vst [vmem:[%s1956_s19 + $0x1a8] sm:$0xff] %v1408_v51  ;;  %v1413_v57 = vsel %vm1285_vm1, %v1221_v43, %v1349_v49  ;;  %1445 = vst [vmem:[%s1956_s19 + $0xd0] sm:$0xff] %v1381_v56  ;;  %vm1251_vm2 = vcmp.gt.f32.partialorder %v1187_v52, 0.0  ;;  %v1315_v60 = vmul.f32 0.2, %v1187_v52  ;;  %vm1283_vm3 = vcmp.gt.f32.partialorder %v1219_v53, 0.0  ;;  %v805_v62 = vpop.f32.mrf.mxu0  ;;  %v933_v63 = vpop.f32.mrf.mxu1 }
 0x124   : > { %1477 = vst [vmem:[%s1956_s19 + $0x1d0] sm:$0xff] %v1413_v57  ;;  %v1347_v61 = vmul.f32 0.2, %v1219_v53  ;;  %vm1254_vm4 = vcmp.gt.f32.partialorder %v1190_v58, 0.0  ;;  %v1318_v0 = vmul.f32 0.2, %v1190_v58  ;;  %v1188_v4 = vadd.f32 %v1948_v40, %v805_v62 }
 0x125   : > { %vm1286_vm5 = vcmp.gt.f32.partialorder %v1222_v59, 0.0  ;;  %v1350_v1 = vmul.f32 0.2, %v1222_v59  ;;  %v1379_v2 = vsel %vm1251_vm2, %v1187_v52, %v1315_v60  ;;  %v1220_v5 = vadd.f32 %v1948_v40, %v933_v63  ;;  %v1705_v6 = vpop.f32.mrf.mxu0  ;;  %v1737_v7 = vpop.f32.mrf.mxu1 }
 0x126   : > { %v1411_v3 = vsel %vm1283_vm3, %v1219_v53, %v1347_v61  ;;  %1443 = vst [vmem:[%s1956_s19 + $0xc0] sm:$0xff] %v1379_v2  ;;  %v1382_v8 = vsel %vm1254_vm4, %v1190_v58, %v1318_v0  ;;  %v1193_v10 = vadd.f32 %v1705_v6, %v1948_v40  ;;  %v1225_v11 = vadd.f32 %v1737_v7, %v1948_v40 }
 0x127   : > { %1475 = vst [vmem:[%s1956_s19 + $0x1c0] sm:$0xff] %v1411_v3  ;;  %v1414_v9 = vsel %vm1286_vm5, %v1222_v59, %v1350_v1  ;;  %1446 = vst [vmem:[%s1956_s19 + $0xd8] sm:$0xff] %v1382_v8  ;;  %vm1252_vm6 = vcmp.gt.f32.partialorder %v1188_v4, 0.0  ;;  %v1316_v12 = vmul.f32 0.2, %v1188_v4  ;;  %vm1284_vm7 = vcmp.gt.f32.partialorder %v1220_v5, 0.0  ;;  %v818_v14 = vpop.f32.mrf.mxu0  ;;  %v946_v15 = vpop.f32.mrf.mxu1 }
 0x128   : > { %1478 = vst [vmem:[%s1956_s19 + $0x1d8] sm:$0xff] %v1414_v9  ;;  %v1348_v13 = vmul.f32 0.2, %v1220_v5  ;;  %vm1257_vm8 = vcmp.gt.f32.partialorder %v1193_v10, 0.0  ;;  %v1321_v16 = vmul.f32 0.2, %v1193_v10  ;;  %v1191_v20 = vadd.f32 %v1948_v40, %v818_v14 }
 0x129   : > { %vm1289_vm9 = vcmp.gt.f32.partialorder %v1225_v11, 0.0  ;;  %v1353_v17 = vmul.f32 0.2, %v1225_v11  ;;  %v1380_v18 = vsel %vm1252_vm6, %v1188_v4, %v1316_v12  ;;  %v1223_v21 = vadd.f32 %v1948_v40, %v946_v15  ;;  %v1706_v22 = vpop.f32.mrf.mxu0  ;;  %v1738_v23 = vpop.f32.mrf.mxu1 }
 0x12a   : > { %v1412_v19 = vsel %vm1284_vm7, %v1220_v5, %v1348_v13  ;;  %1444 = vst [vmem:[%s1956_s19 + $0xc8] sm:$0xff] %v1380_v18  ;;  %v1385_v24 = vsel %vm1257_vm8, %v1193_v10, %v1321_v16  ;;  %v1194_v26 = vadd.f32 %v1706_v22, %v1948_v40  ;;  %v1226_v27 = vadd.f32 %v1738_v23, %v1948_v40 }
 0x12b   : > { %1476 = vst [vmem:[%s1956_s19 + $0x1c8] sm:$0xff] %v1412_v19  ;;  %v1417_v25 = vsel %vm1289_vm9, %v1225_v11, %v1353_v17  ;;  %1449 = vst [vmem:[%s1956_s19 + $0xf0] sm:$0xff] %v1385_v24  ;;  %vm1255_vm10 = vcmp.gt.f32.partialorder %v1191_v20, 0.0  ;;  %v1319_v28 = vmul.f32 0.2, %v1191_v20  ;;  %vm1287_vm11 = vcmp.gt.f32.partialorder %v1223_v21, 0.0  ;;  %v821_v30 = vpop.f32.mrf.mxu0  ;;  %v949_v31 = vpop.f32.mrf.mxu1 }
 0x12c   : > { %1481 = vst [vmem:[%s1956_s19 + $0x1f0] sm:$0xff] %v1417_v25  ;;  %v1351_v29 = vmul.f32 0.2, %v1223_v21  ;;  %vm1258_vm12 = vcmp.gt.f32.partialorder %v1194_v26, 0.0  ;;  %v1322_v32 = vmul.f32 0.2, %v1194_v26  ;;  %v1192_v36 = vadd.f32 %v1948_v40, %v821_v30 }
 0x12d   : > { %vm1290_vm13 = vcmp.gt.f32.partialorder %v1226_v27, 0.0  ;;  %v1354_v33 = vmul.f32 0.2, %v1226_v27  ;;  %v1383_v34 = vsel %vm1255_vm10, %v1191_v20, %v1319_v28  ;;  %v1224_v37 = vadd.f32 %v1948_v40, %v949_v31 }
 0x12e   : > { %v1415_v35 = vsel %vm1287_vm11, %v1223_v21, %v1351_v29  ;;  %1447 = vst [vmem:[%s1956_s19 + $0xe0] sm:$0xff] %v1383_v34  ;;  %v1386_v38 = vsel %vm1258_vm12, %v1194_v26, %v1322_v32  ;;  %vm1256_vm14 = vcmp.gt.f32.partialorder %v1192_v36, 0.0  ;;  %v1320_v41 = vmul.f32 0.2, %v1192_v36 }
 0x12f   : > { %1479 = vst [vmem:[%s1956_s19 + $0x1e0] sm:$0xff] %v1415_v35  ;;  %v1418_v39 = vsel %vm1290_vm13, %v1226_v27, %v1354_v33  ;;  %1450 = vst [vmem:[%s1956_s19 + $0xf8] sm:$0xff] %v1386_v38  ;;  %vm1288_vm15 = vcmp.gt.f32.partialorder %v1224_v37, 0.0  ;;  %v1352_v42 = vmul.f32 0.2, %v1224_v37 }
 0x130   : > { %1482 = vst [vmem:[%s1956_s19 + $0x1f8] sm:$0xff] %v1418_v39  ;;  %v1384_v43 = vsel %vm1256_vm14, %v1192_v36, %v1320_v41 }
 0x131   : > { %v1416_v44 = vsel %vm1288_vm15, %v1224_v37, %v1352_v42  ;;  %1448 = vst [vmem:[%s1956_s19 + $0xe8] sm:$0xff] %v1384_v43 }
 0x132   : > { %1480 = vst [vmem:[%s1956_s19 + $0x1e8] sm:$0xff] %v1416_v44 }
 0x133 PF: > { %s13_s14 = sadd.s32 1, %s1841_s14   ;;  %s2097_s12 = smov %s1837_s13 }
 0x134   : > { %p10_p5 = scmp.ge.s32.totalorder %s13_s14, 6   ;;  %s2098_s13 = smov %s2100_s15 }
 0x136   :  { %12 = sbr.rel (!%p10_p5) target bundleno = 2 (0x2), region = 73 }

// kernel: discriminator_forward.10
= control target key start
LH: loop header
LB: loop body
LE: loop exit
PB: predicated region body
PF: predicated region fallthrough
CT: control target
= control target key end

     0   :  { %s924_s0 = inlined_call_operand.vmem [shape: f32[456,128], index: 0, kind: input, shape index: {}]   ;;  %s925_s1 = inlined_call_operand.vmem [shape: f32[1,128], index: 1, kind: input, shape index: {}]   ;;  %s926_s2 = inlined_call_operand.vmem [shape: f32[1,128], index: 2, kind: input, shape index: {}]   ;;  %s927_s3 = inlined_call_operand.vmem [shape: f32[456,128], index: 3, kind: output, shape index: {}]  }
   0x1   :  { %v14_v0 = vld [vmem:[%s924_s0] sm:$0xff]  ;;  %v15_v4 = vld [vmem:[%s924_s0 + $0x8] sm:$0xff]  ;;  %v16_v5 = vld [vmem:[%s924_s0 + $0x10] sm:$0xff] }
   0x2   :  { %v459_v1 = vld [vmem:[%s925_s1] ss:$0 sm:$0xff]  ;;  %v17_v6 = vld [vmem:[%s924_s0 + $0x18] sm:$0xff]  ;;  %v19_v11 = vld [vmem:[%s924_s0 + $0x28] sm:$0xff] }
   0x3   :  { %v464_v2 = vld [vmem:[%s926_s2] ss:$0 sm:$0xff]  ;;  %v78_v3 = vmul.f32 %v459_v1, %v14_v0  ;;  %v79_v7 = vmul.f32 %v459_v1, %v15_v4  ;;  %v80_v8 = vmul.f32 %v459_v1, %v16_v5  ;;  %v81_v9 = vmul.f32 %v459_v1, %v17_v6  ;;  %v20_v12 = vld [vmem:[%s924_s0 + $0x30] sm:$0xff]  ;;  %v21_v17 = vld [vmem:[%s924_s0 + $0x38] sm:$0xff] }
   0x4   :  { %v18_v10 = vld [vmem:[%s924_s0 + $0x20] sm:$0xff]  ;;  %v83_v15 = vmul.f32 %v459_v1, %v19_v11  ;;  %v84_v16 = vmul.f32 %v459_v1, %v20_v12  ;;  %v85_v21 = vmul.f32 %v459_v1, %v21_v17  ;;  %v23_v30 = vld [vmem:[%s924_s0 + $0x48] sm:$0xff]  ;;  %v24_v31 = vld [vmem:[%s924_s0 + $0x50] sm:$0xff] }
   0x5   :  { %v142_v13 = vadd.f32 %v464_v2, %v78_v3  ;;  %v82_v14 = vmul.f32 %v459_v1, %v18_v10  ;;  %v143_v18 = vadd.f32 %v464_v2, %v79_v7  ;;  %v144_v19 = vadd.f32 %v464_v2, %v80_v8  ;;  %v22_v25 = vld [vmem:[%s924_s0 + $0x40] sm:$0xff]  ;;  %v25_v43 = vld [vmem:[%s924_s0 + $0x58] sm:$0xff]  ;;  %v27_v45 = vld [vmem:[%s924_s0 + $0x68] sm:$0xff] }
   0x6   :  { %v145_v20 = vadd.f32 %v464_v2, %v81_v9  ;;  %v147_v24 = vadd.f32 %v464_v2, %v83_v15  ;;  %v148_v37 = vadd.f32 %v464_v2, %v84_v16  ;;  %v149_v38 = vadd.f32 %v464_v2, %v85_v21  ;;  %v26_v44 = vld [vmem:[%s924_s0 + $0x60] sm:$0xff]  ;;  %v28_v56 = vld [vmem:[%s924_s0 + $0x70] sm:$0xff]  ;;  %v29_v4 = vld [vmem:[%s924_s0 + $0x78] sm:$0xff] }
   0x7   :  { %vm199_vm0 = vcmp.gt.f32.partialorder %v142_v13, 0.0  ;;  %v256_v22 = vmul.f32 -0.2, %v142_v13  ;;  %v146_v23 = vadd.f32 %v464_v2, %v82_v14  ;;  %vm200_vm1 = vcmp.gt.f32.partialorder %v143_v18, 0.0  ;;  %v30_v5 = vld [vmem:[%s924_s0 + $0x80] sm:$0xff]  ;;  %v31_v9 = vld [vmem:[%s924_s0 + $0x88] sm:$0xff] }
   0x8   :  { %v257_v26 = vmul.f32 -0.2, %v143_v18  ;;  %vm201_vm2 = vcmp.gt.f32.partialorder %v144_v19, 0.0  ;;  %v258_v27 = vmul.f32 -0.2, %v144_v19  ;;  %vm202_vm3 = vcmp.gt.f32.partialorder %v145_v20, 0.0 }
   0x9   :  { %v313_v28 = vsel %vm199_vm0, %v142_v13, %v256_v22  ;;  %v259_v29 = vmul.f32 -0.2, %v145_v20  ;;  %vm203_vm4 = vcmp.gt.f32.partialorder %v146_v23, 0.0  ;;  %v260_v34 = vmul.f32 -0.2, %v146_v23  ;;  %v32_v10 = vld [vmem:[%s924_s0 + $0x90] sm:$0xff] }
   0xa   :  { %370 = vst [vmem:[%s927_s3] sm:$0xff] %v313_v28  ;;  %v314_v32 = vsel %vm200_vm1, %v143_v18, %v257_v26  ;;  %v315_v33 = vsel %vm201_vm2, %v144_v19, %v258_v27  ;;  %vm204_vm5 = vcmp.gt.f32.partialorder %v147_v24, 0.0  ;;  %v261_v36 = vmul.f32 -0.2, %v147_v24  ;;  %v33_v17 = vld [vmem:[%s924_s0 + $0x98] sm:$0xff]  ;;  %v34_v18 = vld [vmem:[%s924_s0 + $0xa0] sm:$0xff] }
   0xb   :  { %371 = vst [vmem:[%s927_s3 + $0x8] sm:$0xff] %v314_v32  ;;  %372 = vst [vmem:[%s927_s3 + $0x10] sm:$0xff] %v315_v33  ;;  %v316_v35 = vsel %vm202_vm3, %v145_v20, %v259_v29  ;;  %v317_v39 = vsel %vm203_vm4, %v146_v23, %v260_v34  ;;  %v86_v40 = vmul.f32 %v459_v1, %v22_v25  ;;  %vm205_vm6 = vcmp.gt.f32.partialorder %v148_v37, 0.0  ;;  %v35_v32 = vld [vmem:[%s924_s0 + $0xa8] sm:$0xff]  ;;  %v36_v33 = vld [vmem:[%s924_s0 + $0xb0] sm:$0xff] }
   0xc   :  { %373 = vst [vmem:[%s927_s3 + $0x18] sm:$0xff] %v316_v35  ;;  %v87_v41 = vmul.f32 %v459_v1, %v23_v30  ;;  %v88_v42 = vmul.f32 %v459_v1, %v24_v31  ;;  %374 = vst [vmem:[%s927_s3 + $0x20] sm:$0xff] %v317_v39  ;;  %v318_v46 = vsel %vm204_vm5, %v147_v24, %v261_v36  ;;  %v262_v47 = vmul.f32 -0.2, %v148_v37 }
   0xd   :  { %vm206_vm7 = vcmp.gt.f32.partialorder %v149_v38, 0.0  ;;  %375 = vst [vmem:[%s927_s3 + $0x28] sm:$0xff] %v318_v46  ;;  %v263_v48 = vmul.f32 -0.2, %v149_v38  ;;  %v150_v49 = vadd.f32 %v464_v2, %v86_v40  ;;  %v89_v53 = vmul.f32 %v459_v1, %v25_v43  ;;  %v37_v40 = vld [vmem:[%s924_s0 + $0xb8] sm:$0xff]  ;;  %v39_v46 = vld [vmem:[%s924_s0 + $0xc8] sm:$0xff] }
   0xe   :  { %v151_v50 = vadd.f32 %v464_v2, %v87_v41  ;;  %v152_v51 = vadd.f32 %v464_v2, %v88_v42  ;;  %v319_v52 = vsel %vm205_vm6, %v148_v37, %v262_v47  ;;  %v90_v54 = vmul.f32 %v459_v1, %v26_v44  ;;  %v40_v47 = vld [vmem:[%s924_s0 + $0xd0] sm:$0xff] }
   0xf   :  { %v91_v55 = vmul.f32 %v459_v1, %v27_v45  ;;  %376 = vst [vmem:[%s927_s3 + $0x30] sm:$0xff] %v319_v52  ;;  %v320_v57 = vsel %vm206_vm7, %v149_v38, %v263_v48  ;;  %vm207_vm8 = vcmp.gt.f32.partialorder %v150_v49, 0.0  ;;  %v264_v58 = vmul.f32 -0.2, %v150_v49  ;;  %v38_v45 = vld [vmem:[%s924_s0 + $0xc0] sm:$0xff] }
  0x10   :  { %vm208_vm9 = vcmp.gt.f32.partialorder %v151_v50, 0.0  ;;  %377 = vst [vmem:[%s927_s3 + $0x38] sm:$0xff] %v320_v57  ;;  %v265_v59 = vmul.f32 -0.2, %v151_v50  ;;  %vm209_vm10 = vcmp.gt.f32.partialorder %v152_v51, 0.0  ;;  %v153_v61 = vadd.f32 %v464_v2, %v89_v53 }
  0x11   :  { %v266_v60 = vmul.f32 -0.2, %v152_v51  ;;  %v321_v62 = vsel %vm207_vm8, %v150_v49, %v264_v58  ;;  %v154_v63 = vadd.f32 %v464_v2, %v90_v54  ;;  %v155_v0 = vadd.f32 %v464_v2, %v91_v55  ;;  %v41_v58 = vld [vmem:[%s924_s0 + $0xd8] sm:$0xff] }
  0x12   :  { %v92_v3 = vmul.f32 %v459_v1, %v28_v56  ;;  %378 = vst [vmem:[%s927_s3 + $0x40] sm:$0xff] %v321_v62  ;;  %v322_v6 = vsel %vm208_vm9, %v151_v50, %v265_v59  ;;  %vm210_vm11 = vcmp.gt.f32.partialorder %v153_v61, 0.0  ;;  %v267_v8 = vmul.f32 -0.2, %v153_v61  ;;  %v42_v59 = vld [vmem:[%s924_s0 + $0xe0] sm:$0xff] }
  0x13   :  { %v323_v7 = vsel %vm209_vm10, %v152_v51, %v266_v60  ;;  %379 = vst [vmem:[%s927_s3 + $0x48] sm:$0xff] %v322_v6  ;;  %vm211_vm12 = vcmp.gt.f32.partialorder %v154_v63, 0.0  ;;  %v268_v11 = vmul.f32 -0.2, %v154_v63  ;;  %vm212_vm13 = vcmp.gt.f32.partialorder %v155_v0, 0.0 }
  0x14   :  { %380 = vst [vmem:[%s927_s3 + $0x50] sm:$0xff] %v323_v7  ;;  %v269_v12 = vmul.f32 -0.2, %v155_v0  ;;  %v324_v13 = vsel %vm210_vm11, %v153_v61, %v267_v8  ;;  %v156_v14 = vadd.f32 %v464_v2, %v92_v3  ;;  %v93_v15 = vmul.f32 %v459_v1, %v29_v4 }
  0x15   :  { %v94_v16 = vmul.f32 %v459_v1, %v30_v5  ;;  %381 = vst [vmem:[%s927_s3 + $0x58] sm:$0xff] %v324_v13  ;;  %v325_v19 = vsel %vm211_vm12, %v154_v63, %v268_v11  ;;  %v95_v21 = vmul.f32 %v459_v1, %v31_v9  ;;  %v96_v22 = vmul.f32 %v459_v1, %v32_v10  ;;  %v43_v10 = vld [vmem:[%s924_s0 + $0xe8] sm:$0xff]  ;;  %v44_v11 = vld [vmem:[%s924_s0 + $0xf0] sm:$0xff] }
  0x16   :  { %v326_v20 = vsel %vm212_vm13, %v155_v0, %v269_v12  ;;  %382 = vst [vmem:[%s927_s3 + $0x60] sm:$0xff] %v325_v19  ;;  %vm213_vm14 = vcmp.gt.f32.partialorder %v156_v14, 0.0  ;;  %v270_v23 = vmul.f32 -0.2, %v156_v14  ;;  %v157_v24 = vadd.f32 %v464_v2, %v93_v15 }
  0x17   :  { %383 = vst [vmem:[%s927_s3 + $0x68] sm:$0xff] %v326_v20  ;;  %v158_v25 = vadd.f32 %v464_v2, %v94_v16  ;;  %v159_v26 = vadd.f32 %v464_v2, %v95_v21  ;;  %v160_v27 = vadd.f32 %v464_v2, %v96_v22  ;;  %v97_v28 = vmul.f32 %v459_v1, %v33_v17 }
  0x18   :  { %v98_v29 = vmul.f32 %v459_v1, %v34_v18  ;;  %v327_v30 = vsel %vm213_vm14, %v156_v14, %v270_v23  ;;  %vm214_vm15 = vcmp.gt.f32.partialorder %v157_v24, 0.0  ;;  %v271_v31 = vmul.f32 -0.2, %v157_v24  ;;  %v45_v18 = vld [vmem:[%s924_s0 + $0xf8] sm:$0xff]  ;;  %v46_v23 = vld [vmem:[%s924_s0 + $0x100] sm:$0xff] }
  0x19   :  { %vm215_vm0 = vcmp.gt.f32.partialorder %v158_v25, 0.0  ;;  %384 = vst [vmem:[%s927_s3 + $0x70] sm:$0xff] %v327_v30  ;;  %v272_v34 = vmul.f32 -0.2, %v158_v25  ;;  %vm216_vm1 = vcmp.gt.f32.partialorder %v159_v26, 0.0  ;;  %vm217_vm2 = vcmp.gt.f32.partialorder %v160_v27, 0.0 }
  0x1a   :  { %v273_v35 = vmul.f32 -0.2, %v159_v26  ;;  %v328_v36 = vsel %vm214_vm15, %v157_v24, %v271_v31  ;;  %v274_v37 = vmul.f32 -0.2, %v160_v27  ;;  %v161_v38 = vadd.f32 %v464_v2, %v97_v28  ;;  %v47_v24 = vld [vmem:[%s924_s0 + $0x108] sm:$0xff] }
  0x1b   :  { %v162_v39 = vadd.f32 %v464_v2, %v98_v29  ;;  %385 = vst [vmem:[%s927_s3 + $0x78] sm:$0xff] %v328_v36  ;;  %v329_v41 = vsel %vm215_vm0, %v158_v25, %v272_v34  ;;  %v99_v43 = vmul.f32 %v459_v1, %v35_v32  ;;  %v100_v44 = vmul.f32 %v459_v1, %v36_v33  ;;  %v48_v25 = vld [vmem:[%s924_s0 + $0x110] sm:$0xff]  ;;  %v49_v36 = vld [vmem:[%s924_s0 + $0x118] sm:$0xff] }
  0x1c   :  { %v330_v42 = vsel %vm216_vm1, %v159_v26, %v273_v35  ;;  %386 = vst [vmem:[%s927_s3 + $0x80] sm:$0xff] %v329_v41  ;;  %v331_v48 = vsel %vm217_vm2, %v160_v27, %v274_v37  ;;  %vm218_vm3 = vcmp.gt.f32.partialorder %v161_v38, 0.0  ;;  %v275_v49 = vmul.f32 -0.2, %v161_v38  ;;  %v50_v37 = vld [vmem:[%s924_s0 + $0x120] sm:$0xff] }
  0x1d   :  { %387 = vst [vmem:[%s927_s3 + $0x88] sm:$0xff] %v330_v42  ;;  %vm219_vm4 = vcmp.gt.f32.partialorder %v162_v39, 0.0  ;;  %388 = vst [vmem:[%s927_s3 + $0x90] sm:$0xff] %v331_v48  ;;  %v276_v50 = vmul.f32 -0.2, %v162_v39  ;;  %v163_v51 = vadd.f32 %v464_v2, %v99_v43  ;;  %v164_v52 = vadd.f32 %v464_v2, %v100_v44 }
  0x1e   :  { %v101_v53 = vmul.f32 %v459_v1, %v37_v40  ;;  %v332_v54 = vsel %vm218_vm3, %v161_v38, %v275_v49  ;;  %v102_v55 = vmul.f32 %v459_v1, %v38_v45  ;;  %v103_v56 = vmul.f32 %v459_v1, %v39_v46 }
  0x1f   :  { %v104_v57 = vmul.f32 %v459_v1, %v40_v47  ;;  %389 = vst [vmem:[%s927_s3 + $0x98] sm:$0xff] %v332_v54  ;;  %v333_v60 = vsel %vm219_vm4, %v162_v39, %v276_v50  ;;  %vm220_vm5 = vcmp.gt.f32.partialorder %v163_v51, 0.0  ;;  %v277_v61 = vmul.f32 -0.2, %v163_v51  ;;  %v51_v50 = vld [vmem:[%s924_s0 + $0x128] sm:$0xff] }
  0x20   :  { %vm221_vm6 = vcmp.gt.f32.partialorder %v164_v52, 0.0  ;;  %390 = vst [vmem:[%s927_s3 + $0xa0] sm:$0xff] %v333_v60  ;;  %v278_v62 = vmul.f32 -0.2, %v164_v52  ;;  %v165_v63 = vadd.f32 %v464_v2, %v101_v53  ;;  %v166_v0 = vadd.f32 %v464_v2, %v102_v55 }
  0x21   :  { %v167_v3 = vadd.f32 %v464_v2, %v103_v56  ;;  %v334_v4 = vsel %vm220_vm5, %v163_v51, %v277_v61  ;;  %v168_v5 = vadd.f32 %v464_v2, %v104_v57  ;;  %v105_v6 = vmul.f32 %v459_v1, %v41_v58  ;;  %v52_v51 = vld [vmem:[%s924_s0 + $0x130] sm:$0xff]  ;;  %v53_v58 = vld [vmem:[%s924_s0 + $0x138] sm:$0xff] }
  0x22   :  { %v106_v7 = vmul.f32 %v459_v1, %v42_v59  ;;  %391 = vst [vmem:[%s927_s3 + $0xa8] sm:$0xff] %v334_v4  ;;  %v335_v8 = vsel %vm221_vm6, %v164_v52, %v278_v62  ;;  %vm222_vm7 = vcmp.gt.f32.partialorder %v165_v63, 0.0  ;;  %v279_v9 = vmul.f32 -0.2, %v165_v63 }
  0x23   :  { %vm223_vm8 = vcmp.gt.f32.partialorder %v166_v0, 0.0  ;;  %392 = vst [vmem:[%s927_s3 + $0xb0] sm:$0xff] %v335_v8  ;;  %v280_v12 = vmul.f32 -0.2, %v166_v0  ;;  %vm224_vm9 = vcmp.gt.f32.partialorder %v167_v3, 0.0  ;;  %vm225_vm10 = vcmp.gt.f32.partialorder %v168_v5, 0.0 }
  0x24   :  { %v281_v13 = vmul.f32 -0.2, %v167_v3  ;;  %v336_v14 = vsel %vm222_vm7, %v165_v63, %v279_v9  ;;  %v282_v15 = vmul.f32 -0.2, %v168_v5  ;;  %v169_v16 = vadd.f32 %v464_v2, %v105_v6  ;;  %v54_v63 = vld [vmem:[%s924_s0 + $0x140] sm:$0xff] }
  0x25   :  { %v170_v17 = vadd.f32 %v464_v2, %v106_v7  ;;  %393 = vst [vmem:[%s927_s3 + $0xb8] sm:$0xff] %v336_v14  ;;  %v337_v19 = vsel %vm223_vm8, %v166_v0, %v280_v12  ;;  %v107_v21 = vmul.f32 %v459_v1, %v43_v10  ;;  %v108_v22 = vmul.f32 %v459_v1, %v44_v11  ;;  %v55_v0 = vld [vmem:[%s924_s0 + $0x148] sm:$0xff]  ;;  %v57_v14 = vld [vmem:[%s924_s0 + $0x158] sm:$0xff] }
  0x26   :  { %v338_v20 = vsel %vm224_vm9, %v167_v3, %v281_v13  ;;  %394 = vst [vmem:[%s927_s3 + $0xc0] sm:$0xff] %v337_v19  ;;  %v339_v26 = vsel %vm225_vm10, %v168_v5, %v282_v15  ;;  %vm226_vm11 = vcmp.gt.f32.partialorder %v169_v16, 0.0  ;;  %v283_v27 = vmul.f32 -0.2, %v169_v16  ;;  %v56_v3 = vld [vmem:[%s924_s0 + $0x150] sm:$0xff]  ;;  %v58_v15 = vld [vmem:[%s924_s0 + $0x160] sm:$0xff] }
  0x27   :  { %395 = vst [vmem:[%s927_s3 + $0xc8] sm:$0xff] %v338_v20  ;;  %vm227_vm12 = vcmp.gt.f32.partialorder %v170_v17, 0.0  ;;  %396 = vst [vmem:[%s927_s3 + $0xd0] sm:$0xff] %v339_v26  ;;  %v284_v28 = vmul.f32 -0.2, %v170_v17  ;;  %v171_v29 = vadd.f32 %v464_v2, %v107_v21  ;;  %v172_v30 = vadd.f32 %v464_v2, %v108_v22 }
  0x28   :  { %v109_v31 = vmul.f32 %v459_v1, %v45_v18  ;;  %v340_v32 = vsel %vm226_vm11, %v169_v16, %v283_v27  ;;  %v110_v33 = vmul.f32 %v459_v1, %v46_v23  ;;  %v111_v34 = vmul.f32 %v459_v1, %v47_v24 }
  0x29   :  { %v112_v35 = vmul.f32 %v459_v1, %v48_v25  ;;  %397 = vst [vmem:[%s927_s3 + $0xd8] sm:$0xff] %v340_v32  ;;  %v341_v38 = vsel %vm227_vm12, %v170_v17, %v284_v28  ;;  %vm228_vm13 = vcmp.gt.f32.partialorder %v171_v29, 0.0  ;;  %v285_v39 = vmul.f32 -0.2, %v171_v29  ;;  %v59_v28 = vld [vmem:[%s924_s0 + $0x168] sm:$0xff] }
  0x2a   :  { %vm229_vm14 = vcmp.gt.f32.partialorder %v172_v30, 0.0  ;;  %398 = vst [vmem:[%s927_s3 + $0xe0] sm:$0xff] %v341_v38  ;;  %v286_v40 = vmul.f32 -0.2, %v172_v30  ;;  %v173_v41 = vadd.f32 %v464_v2, %v109_v31  ;;  %v174_v42 = vadd.f32 %v464_v2, %v110_v33 }
  0x2b   :  { %v175_v43 = vadd.f32 %v464_v2, %v111_v34  ;;  %v342_v44 = vsel %vm228_vm13, %v171_v29, %v285_v39  ;;  %v176_v45 = vadd.f32 %v464_v2, %v112_v35  ;;  %v113_v46 = vmul.f32 %v459_v1, %v49_v36  ;;  %v60_v29 = vld [vmem:[%s924_s0 + $0x170] sm:$0xff]  ;;  %v61_v36 = vld [vmem:[%s924_s0 + $0x178] sm:$0xff] }
  0x2c   :  { %v114_v47 = vmul.f32 %v459_v1, %v50_v37  ;;  %399 = vst [vmem:[%s927_s3 + $0xe8] sm:$0xff] %v342_v44  ;;  %v343_v48 = vsel %vm229_vm14, %v172_v30, %v286_v40  ;;  %vm230_vm15 = vcmp.gt.f32.partialorder %v173_v41, 0.0  ;;  %v287_v49 = vmul.f32 -0.2, %v173_v41 }
  0x2d   :  { %vm231_vm0 = vcmp.gt.f32.partialorder %v174_v42, 0.0  ;;  %400 = vst [vmem:[%s927_s3 + $0xf0] sm:$0xff] %v343_v48  ;;  %v288_v52 = vmul.f32 -0.2, %v174_v42  ;;  %vm232_vm1 = vcmp.gt.f32.partialorder %v175_v43, 0.0  ;;  %vm233_vm2 = vcmp.gt.f32.partialorder %v176_v45, 0.0 }
  0x2e   :  { %v289_v53 = vmul.f32 -0.2, %v175_v43  ;;  %v344_v54 = vsel %vm230_vm15, %v173_v41, %v287_v49  ;;  %v290_v55 = vmul.f32 -0.2, %v176_v45  ;;  %v177_v56 = vadd.f32 %v464_v2, %v113_v46  ;;  %v62_v41 = vld [vmem:[%s924_s0 + $0x180] sm:$0xff] }
  0x2f   :  { %v178_v57 = vadd.f32 %v464_v2, %v114_v47  ;;  %401 = vst [vmem:[%s927_s3 + $0xf8] sm:$0xff] %v344_v54  ;;  %v345_v59 = vsel %vm231_vm0, %v174_v42, %v288_v52  ;;  %v115_v61 = vmul.f32 %v459_v1, %v51_v50  ;;  %v116_v62 = vmul.f32 %v459_v1, %v52_v51  ;;  %v63_v42 = vld [vmem:[%s924_s0 + $0x188] sm:$0xff]  ;;  %v65_v54 = vld [vmem:[%s924_s0 + $0x198] sm:$0xff] }
  0x30   :  { %v346_v60 = vsel %vm232_vm1, %v175_v43, %v289_v53  ;;  %402 = vst [vmem:[%s927_s3 + $0x100] sm:$0xff] %v345_v59  ;;  %v347_v4 = vsel %vm233_vm2, %v176_v45, %v290_v55  ;;  %vm234_vm3 = vcmp.gt.f32.partialorder %v177_v56, 0.0  ;;  %v291_v5 = vmul.f32 -0.2, %v177_v56  ;;  %v64_v43 = vld [vmem:[%s924_s0 + $0x190] sm:$0xff]  ;;  %v66_v55 = vld [vmem:[%s924_s0 + $0x1a0] sm:$0xff] }
  0x31   :  { %403 = vst [vmem:[%s927_s3 + $0x108] sm:$0xff] %v346_v60  ;;  %vm235_vm4 = vcmp.gt.f32.partialorder %v178_v57, 0.0  ;;  %404 = vst [vmem:[%s927_s3 + $0x110] sm:$0xff] %v347_v4  ;;  %v292_v6 = vmul.f32 -0.2, %v178_v57  ;;  %v179_v7 = vadd.f32 %v464_v2, %v115_v61  ;;  %v180_v8 = vadd.f32 %v464_v2, %v116_v62 }
  0x32   :  { %v117_v9 = vmul.f32 %v459_v1, %v53_v58  ;;  %v348_v10 = vsel %vm234_vm3, %v177_v56, %v291_v5  ;;  %v118_v11 = vmul.f32 %v459_v1, %v54_v63  ;;  %v119_v12 = vmul.f32 %v459_v1, %v55_v0 }
  0x33   :  { %v120_v13 = vmul.f32 %v459_v1, %v56_v3  ;;  %405 = vst [vmem:[%s927_s3 + $0x118] sm:$0xff] %v348_v10  ;;  %v349_v16 = vsel %vm235_vm4, %v178_v57, %v292_v6  ;;  %vm236_vm5 = vcmp.gt.f32.partialorder %v179_v7, 0.0  ;;  %v293_v17 = vmul.f32 -0.2, %v179_v7  ;;  %v67_v6 = vld [vmem:[%s924_s0 + $0x1a8] sm:$0xff] }
  0x34   :  { %vm237_vm6 = vcmp.gt.f32.partialorder %v180_v8, 0.0  ;;  %406 = vst [vmem:[%s927_s3 + $0x120] sm:$0xff] %v349_v16  ;;  %v294_v18 = vmul.f32 -0.2, %v180_v8  ;;  %v181_v19 = vadd.f32 %v464_v2, %v117_v9  ;;  %v182_v20 = vadd.f32 %v464_v2, %v118_v11 }
  0x35   :  { %v183_v21 = vadd.f32 %v464_v2, %v119_v12  ;;  %v350_v22 = vsel %vm236_vm5, %v179_v7, %v293_v17  ;;  %v184_v23 = vadd.f32 %v464_v2, %v120_v13  ;;  %v121_v24 = vmul.f32 %v459_v1, %v57_v14  ;;  %v68_v7 = vld [vmem:[%s924_s0 + $0x1b0] sm:$0xff]  ;;  %v69_v14 = vld [vmem:[%s924_s0 + $0x1b8] sm:$0xff] }
  0x36   :  { %v122_v25 = vmul.f32 %v459_v1, %v58_v15  ;;  %407 = vst [vmem:[%s927_s3 + $0x128] sm:$0xff] %v350_v22  ;;  %v351_v26 = vsel %vm237_vm6, %v180_v8, %v294_v18  ;;  %vm238_vm7 = vcmp.gt.f32.partialorder %v181_v19, 0.0  ;;  %v295_v27 = vmul.f32 -0.2, %v181_v19 }
  0x37   :  { %vm239_vm8 = vcmp.gt.f32.partialorder %v182_v20, 0.0  ;;  %408 = vst [vmem:[%s927_s3 + $0x130] sm:$0xff] %v351_v26  ;;  %v296_v30 = vmul.f32 -0.2, %v182_v20  ;;  %vm240_vm9 = vcmp.gt.f32.partialorder %v183_v21, 0.0  ;;  %vm241_vm10 = vcmp.gt.f32.partialorder %v184_v23, 0.0 }
  0x38   :  { %v297_v31 = vmul.f32 -0.2, %v183_v21  ;;  %v352_v32 = vsel %vm238_vm7, %v181_v19, %v295_v27  ;;  %v298_v33 = vmul.f32 -0.2, %v184_v23  ;;  %v185_v34 = vadd.f32 %v464_v2, %v121_v24  ;;  %v70_v19 = vld [vmem:[%s924_s0 + $0x1c0] sm:$0xff] }
  0x39   :  { %v186_v35 = vadd.f32 %v464_v2, %v122_v25  ;;  %409 = vst [vmem:[%s927_s3 + $0x138] sm:$0xff] %v352_v32  ;;  %v353_v37 = vsel %vm239_vm8, %v182_v20, %v296_v30  ;;  %v123_v39 = vmul.f32 %v459_v1, %v59_v28  ;;  %v124_v40 = vmul.f32 %v459_v1, %v60_v29 }
  0x3a   :  { %v354_v38 = vsel %vm240_vm9, %v183_v21, %v297_v31  ;;  %410 = vst [vmem:[%s927_s3 + $0x140] sm:$0xff] %v353_v37  ;;  %v355_v44 = vsel %vm241_vm10, %v184_v23, %v298_v33  ;;  %vm242_vm11 = vcmp.gt.f32.partialorder %v185_v34, 0.0  ;;  %v299_v45 = vmul.f32 -0.2, %v185_v34 }
  0x3b   :  { %411 = vst [vmem:[%s927_s3 + $0x148] sm:$0xff] %v354_v38  ;;  %vm243_vm12 = vcmp.gt.f32.partialorder %v186_v35, 0.0  ;;  %412 = vst [vmem:[%s927_s3 + $0x150] sm:$0xff] %v355_v44  ;;  %v300_v46 = vmul.f32 -0.2, %v186_v35  ;;  %v187_v47 = vadd.f32 %v464_v2, %v123_v39  ;;  %v188_v48 = vadd.f32 %v464_v2, %v124_v40 }
  0x3c   :  { %v125_v49 = vmul.f32 %v459_v1, %v61_v36  ;;  %v356_v50 = vsel %vm242_vm11, %v185_v34, %v299_v45  ;;  %v126_v51 = vmul.f32 %v459_v1, %v62_v41  ;;  %v127_v52 = vmul.f32 %v459_v1, %v63_v42 }
  0x3d   :  { %v128_v53 = vmul.f32 %v459_v1, %v64_v43  ;;  %413 = vst [vmem:[%s927_s3 + $0x158] sm:$0xff] %v356_v50  ;;  %v357_v56 = vsel %vm243_vm12, %v186_v35, %v300_v46  ;;  %vm244_vm13 = vcmp.gt.f32.partialorder %v187_v47, 0.0  ;;  %v301_v57 = vmul.f32 -0.2, %v187_v47 }
  0x3e   :  { %vm245_vm14 = vcmp.gt.f32.partialorder %v188_v48, 0.0  ;;  %414 = vst [vmem:[%s927_s3 + $0x160] sm:$0xff] %v357_v56  ;;  %v302_v58 = vmul.f32 -0.2, %v188_v48  ;;  %v189_v59 = vadd.f32 %v464_v2, %v125_v49  ;;  %v190_v60 = vadd.f32 %v464_v2, %v126_v51 }
  0x3f   :  { %v191_v61 = vadd.f32 %v464_v2, %v127_v52  ;;  %v358_v62 = vsel %vm244_vm13, %v187_v47, %v301_v57  ;;  %v192_v63 = vadd.f32 %v464_v2, %v128_v53  ;;  %v129_v0 = vmul.f32 %v459_v1, %v65_v54 }
  0x40   :  { %v130_v3 = vmul.f32 %v459_v1, %v66_v55  ;;  %415 = vst [vmem:[%s927_s3 + $0x168] sm:$0xff] %v358_v62  ;;  %v359_v4 = vsel %vm245_vm14, %v188_v48, %v302_v58  ;;  %vm246_vm15 = vcmp.gt.f32.partialorder %v189_v59, 0.0  ;;  %v303_v5 = vmul.f32 -0.2, %v189_v59 }
  0x41   :  { %vm247_vm0 = vcmp.gt.f32.partialorder %v190_v60, 0.0  ;;  %416 = vst [vmem:[%s927_s3 + $0x170] sm:$0xff] %v359_v4  ;;  %v304_v8 = vmul.f32 -0.2, %v190_v60  ;;  %vm248_vm1 = vcmp.gt.f32.partialorder %v191_v61, 0.0  ;;  %vm249_vm2 = vcmp.gt.f32.partialorder %v192_v63, 0.0 }
  0x42   :  { %v305_v9 = vmul.f32 -0.2, %v191_v61  ;;  %v360_v10 = vsel %vm246_vm15, %v189_v59, %v303_v5  ;;  %v306_v11 = vmul.f32 -0.2, %v192_v63  ;;  %v193_v12 = vadd.f32 %v464_v2, %v129_v0 }
  0x43   :  { %v194_v13 = vadd.f32 %v464_v2, %v130_v3  ;;  %417 = vst [vmem:[%s927_s3 + $0x178] sm:$0xff] %v360_v10  ;;  %v361_v15 = vsel %vm247_vm0, %v190_v60, %v304_v8  ;;  %v131_v17 = vmul.f32 %v459_v1, %v67_v6  ;;  %v132_v18 = vmul.f32 %v459_v1, %v68_v7 }
  0x44   :  { %v362_v16 = vsel %vm248_vm1, %v191_v61, %v305_v9  ;;  %418 = vst [vmem:[%s927_s3 + $0x180] sm:$0xff] %v361_v15  ;;  %v363_v20 = vsel %vm249_vm2, %v192_v63, %v306_v11  ;;  %vm250_vm3 = vcmp.gt.f32.partialorder %v193_v12, 0.0  ;;  %v307_v21 = vmul.f32 -0.2, %v193_v12 }
  0x45   :  { %419 = vst [vmem:[%s927_s3 + $0x188] sm:$0xff] %v362_v16  ;;  %vm251_vm4 = vcmp.gt.f32.partialorder %v194_v13, 0.0  ;;  %420 = vst [vmem:[%s927_s3 + $0x190] sm:$0xff] %v363_v20  ;;  %v308_v22 = vmul.f32 -0.2, %v194_v13  ;;  %v195_v23 = vadd.f32 %v464_v2, %v131_v17  ;;  %v196_v24 = vadd.f32 %v464_v2, %v132_v18 }
  0x46   :  { %v133_v25 = vmul.f32 %v459_v1, %v69_v14  ;;  %v364_v26 = vsel %vm250_vm3, %v193_v12, %v307_v21  ;;  %v134_v27 = vmul.f32 %v459_v1, %v70_v19 }
  0x47   :  { %421 = vst [vmem:[%s927_s3 + $0x198] sm:$0xff] %v364_v26  ;;  %v365_v28 = vsel %vm251_vm4, %v194_v13, %v308_v22  ;;  %vm252_vm5 = vcmp.gt.f32.partialorder %v195_v23, 0.0  ;;  %v309_v29 = vmul.f32 -0.2, %v195_v23  ;;  %vm253_vm6 = vcmp.gt.f32.partialorder %v196_v24, 0.0 }
  0x48   :  { %422 = vst [vmem:[%s927_s3 + $0x1a0] sm:$0xff] %v365_v28  ;;  %v310_v30 = vmul.f32 -0.2, %v196_v24  ;;  %v197_v31 = vadd.f32 %v464_v2, %v133_v25  ;;  %v198_v32 = vadd.f32 %v464_v2, %v134_v27 }
  0x49   :  { %v366_v33 = vsel %vm252_vm5, %v195_v23, %v309_v29 }
  0x4a   :  { %423 = vst [vmem:[%s927_s3 + $0x1a8] sm:$0xff] %v366_v33  ;;  %v367_v1 = vsel %vm253_vm6, %v196_v24, %v310_v30  ;;  %vm254_vm7 = vcmp.gt.f32.partialorder %v197_v31, 0.0  ;;  %v311_v34 = vmul.f32 -0.2, %v197_v31  ;;  %vm255_vm8 = vcmp.gt.f32.partialorder %v198_v32, 0.0 }
  0x4b   :  { %424 = vst [vmem:[%s927_s3 + $0x1b0] sm:$0xff] %v367_v1  ;;  %v312_v35 = vmul.f32 -0.2, %v198_v32 }
  0x4c   :  { %v368_v36 = vsel %vm254_vm7, %v197_v31, %v311_v34 }
  0x4d   :  { %425 = vst [vmem:[%s927_s3 + $0x1b8] sm:$0xff] %v368_v36  ;;  %v369_v2 = vsel %vm255_vm8, %v198_v32, %v312_v35 }
  0x4e   :  { %426 = vst [vmem:[%s927_s3 + $0x1c0] sm:$0xff] %v369_v2 }

// kernel: discriminator_forward.9
= control target key start
LH: loop header
LB: loop body
LE: loop exit
PB: predicated region body
PF: predicated region fallthrough
CT: control target
= control target key end

     0   :  { %v3872_v0 = vmov 0   ;;  %s5190_s1 = inlined_call_operand.vmem [shape: bf16[1024,128], index: 1, kind: input, shape index: {}]   ;;  %s5191_s0 = inlined_call_operand.vmem [shape: bf16[456,1024], index: 0, kind: input, shape index: {}]   ;;  %s5192_s2 = inlined_call_operand.vmem [shape: f32[456,128], index: 2, kind: output, shape index: {0}]   ;;  %s5193_s3 = inlined_call_operand.vmem [shape: f32[8,128], index: 3, kind: output, shape index: {1}]  }
   0x1   :  { %2020 = vmatprep.subr.bf16.mxu0 %v3872_v0  ;;  %2284 = vmatprep.subr.bf16.mxu1 %v3872_v0  ;;  %v3800_v1 = vld [vmem:[%s5190_s1 + $0x38] sm:$0xff]   ;;  %v3802_v3 = vld [vmem:[%s5190_s1 + $0x30] sm:$0xff]   ;;  %v3804_v5 = vld [vmem:[%s5190_s1 + $0x28] sm:$0xff]  }
   0x2   :  { %v3801_v2 = vld [vmem:[%s5190_s1 + $0xb8] sm:$0xff]   ;;  %2021 = vmatpush1.bf16.msra.mxu0 %v3800_v1  ;;  %v3803_v4 = vld [vmem:[%s5190_s1 + $0xb0] sm:$0xff]   ;;  %v3805_v6 = vld [vmem:[%s5190_s1 + $0xa8] sm:$0xff]  }
   0x3   :  { %2285 = vmatpush1.bf16.msra.mxu1 %v3801_v2  ;;  %2022 = vmatprep.subr.bf16.mxu0 %v3872_v0  ;;  %v3806_v7 = vld [vmem:[%s5190_s1 + $0x20] sm:$0xff]   ;;  %v3808_v9 = vld [vmem:[%s5190_s1 + $0x18] sm:$0xff]   ;;  %v3810_v11 = vld [vmem:[%s5190_s1 + $0x10] sm:$0xff]  }
   0x4   :  { %2286 = vmatprep.subr.bf16.mxu1 %v3872_v0  ;;  %v3807_v8 = vld [vmem:[%s5190_s1 + $0xa0] sm:$0xff]   ;;  %v3809_v10 = vld [vmem:[%s5190_s1 + $0x98] sm:$0xff]   ;;  %v3811_v12 = vld [vmem:[%s5190_s1 + $0x90] sm:$0xff]  }
   0x5   :  { %v3812_v13 = vld [vmem:[%s5190_s1 + $0x8] sm:$0xff]   ;;  %v3814_v15 = vld [vmem:[%s5190_s1] sm:$0xff]   ;;  %v3816_v17 = vld [vmem:[%s5190_s1 + $0x78] sm:$0xff]  }
   0x6   :  { %2023 = vmatpush1.bf16.msra.mxu0 %v3802_v3  ;;  %v3813_v14 = vld [vmem:[%s5190_s1 + $0x88] sm:$0xff]   ;;  %v3815_v16 = vld [vmem:[%s5190_s1 + $0x80] sm:$0xff]   ;;  %v3817_v18 = vld [vmem:[%s5190_s1 + $0xf8] sm:$0xff]  }
   0x7   :  { %2287 = vmatpush1.bf16.msra.mxu1 %v3803_v4  ;;  %2024 = vmatprep.subr.bf16.mxu0 %v3872_v0  ;;  %v3968_v19 = vld [vmem:[%s5191_s0] sm:$0xff]  ;;  %v3978_v21 = vld [vmem:[%s5191_s0 + $0x8] sm:$0xff]  ;;  %v3818_v24 = vld [vmem:[%s5190_s1 + $0x70] sm:$0xff]  }
   0x8   :  { %2288 = vmatprep.subr.bf16.mxu1 %v3872_v0  ;;  %v3973_v20 = vld [vmem:[%s5191_s0 + $0x20] sm:$0xff]  ;;  %v137_v23 = vld [vmem:[%s5191_s0 + $0x28] sm:$0xff]  ;;  %v3819_v26 = vld [vmem:[%s5190_s1 + $0xf0] sm:$0xff]  }
   0x9   :  { %v3504_v22 = vcombine.high %v3968_v19, %v3973_v20  ;;  %v3506_v25 = vcombine.high %v3978_v21, %v137_v23  ;;  %v3820_v27 = vld [vmem:[%s5190_s1 + $0x68] sm:$0xff]   ;;  %v3822_v29 = vld [vmem:[%s5190_s1 + $0x60] sm:$0xff]   ;;  %v3824_v31 = vld [vmem:[%s5190_s1 + $0x58] sm:$0xff]   ;;  %v3503_v42 = vcombine.low %v3968_v19, %v3973_v20  ;;  %v3505_v44 = vcombine.low %v3978_v21, %v137_v23 }
   0xa   :  { %2025 = vmatpush1.bf16.msra.mxu0 %v3804_v5  ;;  %v3821_v28 = vld [vmem:[%s5190_s1 + $0xe8] sm:$0xff]   ;;  %v3823_v30 = vld [vmem:[%s5190_s1 + $0xe0] sm:$0xff]   ;;  %v3825_v32 = vld [vmem:[%s5190_s1 + $0xd8] sm:$0xff]  }
   0xb   :  { %2289 = vmatpush1.bf16.msra.mxu1 %v3805_v6  ;;  %2026 = vmatprep.subr.bf16.mxu0 %v3872_v0  ;;  %v3826_v33 = vld [vmem:[%s5190_s1 + $0x50] sm:$0xff]   ;;  %v3828_v35 = vld [vmem:[%s5190_s1 + $0x48] sm:$0xff]   ;;  %v3830_v37 = vld [vmem:[%s5190_s1 + $0x40] sm:$0xff]  }
   0xc   :  { %2290 = vmatprep.subr.bf16.mxu1 %v3872_v0  ;;  %2052 = vmatprep.mubr.bf16.mxu0 %v3504_v22  ;;  %v3827_v34 = vld [vmem:[%s5190_s1 + $0xd0] sm:$0xff]   ;;  %v3829_v36 = vld [vmem:[%s5190_s1 + $0xc8] sm:$0xff]   ;;  %v3831_v38 = vld [vmem:[%s5190_s1 + $0xc0] sm:$0xff]  }
   0xd   :  { %2316 = vmatprep.mubr.bf16.mxu1 %v3506_v25  ;;  %v140_v39 = vld [vmem:[%s5191_s0 + $0x40] sm:$0xff]  ;;  %v141_v41 = vld [vmem:[%s5191_s0 + $0x48] sm:$0xff]  ;;  %v3832_v45 = vld [vmem:[%s5190_s1 + $0x138] sm:$0xff]  }
   0xe   :  { %2027 = vmatpush1.bf16.msra.mxu0 %v3806_v7  ;;  %v144_v40 = vld [vmem:[%s5191_s0 + $0x60] sm:$0xff]  ;;  %v145_v43 = vld [vmem:[%s5191_s0 + $0x68] sm:$0xff]  ;;  %v3833_v46 = vld [vmem:[%s5190_s1 + $0x1b8] sm:$0xff]  }
   0xf   :  { %2291 = vmatpush1.bf16.msra.mxu1 %v3807_v8  ;;  %2028 = vmatprep.subr.bf16.mxu0 %v3872_v0  ;;  %v3512_v47 = vcombine.high %v140_v39, %v144_v40  ;;  %v3514_v48 = vcombine.high %v141_v41, %v145_v43  ;;  %v148_v49 = vld [vmem:[%s5191_s0 + $0x80] sm:$0xff]  ;;  %v3834_v50 = vld [vmem:[%s5190_s1 + $0x130] sm:$0xff]   ;;  %v149_v52 = vld [vmem:[%s5191_s0 + $0x88] sm:$0xff]  ;;  %v3511_v55 = vcombine.low %v140_v39, %v144_v40 }
  0x10   :  { %2292 = vmatprep.subr.bf16.mxu1 %v3872_v0  ;;  %v152_v51 = vld [vmem:[%s5191_s0 + $0xa0] sm:$0xff]  ;;  %v3835_v53 = vld [vmem:[%s5190_s1 + $0x1b0] sm:$0xff]   ;;  %v153_v54 = vld [vmem:[%s5191_s0 + $0xa8] sm:$0xff]  ;;  %v3513_v56 = vcombine.low %v141_v41, %v145_v43 }
  0x11   :  { %v3520_v57 = vcombine.high %v148_v49, %v152_v51  ;;  %v3522_v58 = vcombine.high %v149_v52, %v153_v54  ;;  %v3836_v59 = vld [vmem:[%s5190_s1 + $0x128] sm:$0xff]   ;;  %v156_v61 = vld [vmem:[%s5191_s0 + $0xc0] sm:$0xff]  ;;  %v3519_v4 = vcombine.low %v148_v49, %v152_v51  ;;  %v3840_v5 = vld [vmem:[%s5190_s1 + $0x118] sm:$0xff]   ;;  %v3521_v6 = vcombine.low %v149_v52, %v153_v54 }
  0x12   :  { %2029 = vmatpush1.bf16.msra.mxu0 %v3808_v9  ;;  %v3837_v60 = vld [vmem:[%s5190_s1 + $0x1a8] sm:$0xff]   ;;  %v160_v62 = vld [vmem:[%s5191_s0 + $0xe0] sm:$0xff]  ;;  %v3841_v8 = vld [vmem:[%s5190_s1 + $0x198] sm:$0xff]  }
  0x13   :  { %2293 = vmatpush1.bf16.msra.mxu1 %v3809_v10  ;;  %2030 = vmatprep.subr.bf16.mxu0 %v3872_v0  ;;  %v3838_v63 = vld [vmem:[%s5190_s1 + $0x120] sm:$0xff]   ;;  %v157_v1 = vld [vmem:[%s5191_s0 + $0xc8] sm:$0xff]  ;;  %v3528_v7 = vcombine.high %v156_v61, %v160_v62  ;;  %v3851_v39 = vld [vmem:[%s5190_s1 + $0x1f0] sm:$0xff]  }
  0x14   :  { %2294 = vmatprep.subr.bf16.mxu1 %v3872_v0  ;;  %v161_v2 = vld [vmem:[%s5191_s0 + $0xe8] sm:$0xff]  ;;  %v3839_v3 = vld [vmem:[%s5190_s1 + $0x1a0] sm:$0xff]  }
  0x15   :  { %v3530_v9 = vcombine.high %v157_v1, %v161_v2  ;;  %v164_v10 = vld [vmem:[%s5191_s0 + $0x100] sm:$0xff]  ;;  %v3844_v20 = vld [vmem:[%s5190_s1 + $0x108] sm:$0xff]  }
  0x16   :  { %2031 = vmatpush1.bf16.msra.mxu0 %v3810_v11  ;;  %v168_v11 = vld [vmem:[%s5191_s0 + $0x120] sm:$0xff]  ;;  %v3845_v21 = vld [vmem:[%s5190_s1 + $0x188] sm:$0xff]  }
  0x17   :  { %2295 = vmatpush1.bf16.msra.mxu1 %v3811_v12  ;;  %2032 = vmatprep.subr.bf16.mxu0 %v3872_v0  ;;  %v165_v12 = vld [vmem:[%s5191_s0 + $0x108] sm:$0xff]  ;;  %v172_v22 = vld [vmem:[%s5191_s0 + $0x140] sm:$0xff] }
  0x18   :  { %2296 = vmatprep.subr.bf16.mxu1 %v3872_v0  ;;  %v176_v23 = vld [vmem:[%s5191_s0 + $0x160] sm:$0xff]  ;;  %v173_v25 = vld [vmem:[%s5191_s0 + $0x148] sm:$0xff] }
  0x19   :  { %v3543_v40 = vcombine.low %v172_v22, %v176_v23  ;;  %v189_v49 = vld [vmem:[%s5191_s0 + $0x1c8] sm:$0xff]  ;;  %v3855_v51 = vld [vmem:[%s5190_s1 + $0x1e0] sm:$0xff]  }
  0x1a   :  { %2033 = vmatpush1.bf16.msra.mxu0 %v3812_v13  ;;  %v169_v13 = vld [vmem:[%s5191_s0 + $0x128] sm:$0xff] }
  0x1b   :  { %2297 = vmatpush1.bf16.msra.mxu1 %v3813_v14  ;;  %2034 = vmatprep.subr.bf16.mxu0 %v3872_v0  ;;  %v3842_v14 = vld [vmem:[%s5190_s1 + $0x110] sm:$0xff]   ;;  %v3538_v19 = vcombine.high %v165_v12, %v169_v13 }
  0x1c   :  { %2298 = vmatprep.subr.bf16.mxu1 %v3872_v0 }
  0x1e   :  { %2035 = vmatpush1.bf16.msra.mxu0 %v3814_v15  ;;  %v3843_v15 = vld [vmem:[%s5190_s1 + $0x190] sm:$0xff]  }
  0x1f   :  { %2299 = vmatpush1.bf16.msra.mxu1 %v3815_v16  ;;  %2036 = vmatprep.subr.bf16.mxu0 %v3872_v0  ;;  %v3527_v16 = vcombine.low %v156_v61, %v160_v62  ;;  %v201_v61 = vld [vmem:[%s5191_s0 + $0x228] sm:$0xff] }
  0x20   :  { %2300 = vmatprep.subr.bf16.mxu1 %v3872_v0 }
  0x22   :  { %2037 = vmatpush2.bf16.msra.mxu0 %v3816_v17  ;;  %v3529_v17 = vcombine.low %v157_v1, %v161_v2 }
  0x23   :  { %2301 = vmatpush2.bf16.msra.mxu1 %v3817_v18  ;;  %2038 = vmatprep.subr.bf16.mxu0 %v3872_v0  ;;  %v3536_v18 = vcombine.high %v164_v10, %v168_v11 }
  0x24   :  { %2302 = vmatprep.subr.bf16.mxu1 %v3872_v0 }
  0x26   :  { %2039 = vmatpush2.bf16.msra.mxu0 %v3818_v24  ;;  %v3846_v24 = vld [vmem:[%s5190_s1 + $0x100] sm:$0xff]  }
  0x27   :  { %2303 = vmatpush2.bf16.msra.mxu1 %v3819_v26  ;;  %2040 = vmatprep.subr.bf16.mxu0 %v3872_v0  ;;  %v177_v26 = vld [vmem:[%s5191_s0 + $0x168] sm:$0xff] }
  0x28   :  { %2304 = vmatprep.subr.bf16.mxu1 %v3872_v0  ;;  %v3545_v41 = vcombine.low %v173_v25, %v177_v26 }
  0x2a   :  { %2041 = vmatpush2.bf16.msra.mxu0 %v3820_v27  ;;  %v3847_v27 = vld [vmem:[%s5190_s1 + $0x180] sm:$0xff]  }
  0x2b   :  { %2305 = vmatpush2.bf16.msra.mxu1 %v3821_v28  ;;  %2042 = vmatprep.subr.bf16.mxu0 %v3872_v0  ;;  %v3535_v28 = vcombine.low %v164_v10, %v168_v11 }
  0x2c   :  { %2306 = vmatprep.subr.bf16.mxu1 %v3872_v0 }
  0x2e   :  { %2043 = vmatpush2.bf16.msra.mxu0 %v3822_v29  ;;  %v3537_v29 = vcombine.low %v165_v12, %v169_v13  ;;  %v212_v12 = vld [vmem:[%s5191_s0 + $0x280] sm:$0xff] }
  0x2f   :  { %2307 = vmatpush2.bf16.msra.mxu1 %v3823_v30  ;;  %2044 = vmatprep.subr.bf16.mxu0 %v3872_v0  ;;  %v3544_v30 = vcombine.high %v172_v22, %v176_v23  ;;  %v216_v13 = vld [vmem:[%s5191_s0 + $0x2a0] sm:$0xff]  ;;  %v221_v23 = vld [vmem:[%s5191_s0 + $0x2c8] sm:$0xff] }
  0x30   :  { %2308 = vmatprep.subr.bf16.mxu1 %v3872_v0  ;;  %v224_v22 = vld [vmem:[%s5191_s0 + $0x2e0] sm:$0xff] }
  0x32   :  { %2045 = vmatpush2.bf16.msra.mxu0 %v3824_v31  ;;  %v3546_v31 = vcombine.high %v173_v25, %v177_v26  ;;  %v3583_v25 = vcombine.low %v212_v12, %v216_v13 }
  0x33   :  { %2309 = vmatpush2.bf16.msra.mxu1 %v3825_v32  ;;  %2046 = vmatprep.subr.bf16.mxu0 %v3872_v0  ;;  %v3848_v32 = vld [vmem:[%s5190_s1 + $0x178] sm:$0xff]  }
  0x34   :  { %2310 = vmatprep.subr.bf16.mxu1 %v3872_v0 }
  0x36   :  { %2047 = vmatpush2.bf16.msra.mxu0 %v3826_v33  ;;  %v3849_v33 = vld [vmem:[%s5190_s1 + $0x1f8] sm:$0xff]  }
  0x37   :  { %2311 = vmatpush2.bf16.msra.mxu1 %v3827_v34  ;;  %2048 = vmatprep.subr.bf16.mxu0 %v3872_v0  ;;  %v180_v34 = vld [vmem:[%s5191_s0 + $0x180] sm:$0xff] }
  0x38   :  { %2312 = vmatprep.subr.bf16.mxu1 %v3872_v0 }
  0x3a   :  { %2049 = vmatpush2.bf16.msra.mxu0 %v3828_v35  ;;  %v184_v35 = vld [vmem:[%s5191_s0 + $0x1a0] sm:$0xff] }
  0x3b   :  { %2313 = vmatpush2.bf16.msra.mxu1 %v3829_v36  ;;  %2050 = vmatprep.subr.bf16.mxu0 %v3872_v0  ;;  %v3850_v36 = vld [vmem:[%s5190_s1 + $0x170] sm:$0xff]   ;;  %v3551_v52 = vcombine.low %v180_v34, %v184_v35 }
  0x3c   :  { %2314 = vmatprep.subr.bf16.mxu1 %v3872_v0 }
  0x3e   :  { %2051 = vmatpush2.bf16.msra.mxu0 %v3830_v37  ;;  %v181_v37 = vld [vmem:[%s5191_s0 + $0x188] sm:$0xff] }
  0x3f   :  { %2315 = vmatpush2.bf16.msra.mxu1 %v3831_v38  ;;  %2548 = vmatprep.subr.bf16.mxu0 %v3872_v0  ;;  %v185_v38 = vld [vmem:[%s5191_s0 + $0x1a8] sm:$0xff] }
  0x40   :  { %2812 = vmatprep.subr.bf16.mxu1 %v3872_v0  ;;  %v3554_v43 = vcombine.high %v181_v37, %v185_v38 }
  0x41   :  { %2053 = vmatmul.mubr.bf16.vlgmr.msra.gmra.mxu0 %v3503_v42  ;;  %v3552_v42 = vcombine.high %v180_v34, %v184_v35  ;;  %v233_v34 = vld [vmem:[%s5191_s0 + $0x328] sm:$0xff] }
  0x42   :  { %2317 = vmatmul.mubr.bf16.vlgmr.msra.gmra.mxu1 %v3505_v44  ;;  %2549 = vmatpush1.bf16.msra.mxu0 %v3832_v45  ;;  %v3852_v44 = vld [vmem:[%s5190_s1 + $0x168] sm:$0xff]  }
  0x43   :  { %2813 = vmatpush1.bf16.msra.mxu1 %v3833_v46  ;;  %2060 = vmatprep.mubr.bf16.mxu0 %v3512_v47  ;;  %v3853_v45 = vld [vmem:[%s5190_s1 + $0x1e8] sm:$0xff]   ;;  %v188_v46 = vld [vmem:[%s5191_s0 + $0x1c0] sm:$0xff] }
  0x44   :  { %2324 = vmatprep.mubr.bf16.mxu1 %v3514_v48  ;;  %2550 = vmatprep.subr.bf16.mxu0 %v3872_v0  ;;  %v192_v47 = vld [vmem:[%s5191_s0 + $0x1e0] sm:$0xff] }
  0x45   :  { %2814 = vmatprep.subr.bf16.mxu1 %v3872_v0  ;;  %v3854_v48 = vld [vmem:[%s5190_s1 + $0x160] sm:$0xff]   ;;  %v3560_v54 = vcombine.high %v188_v46, %v192_v47  ;;  %v3559_v62 = vcombine.low %v188_v46, %v192_v47 }
  0x46   :  { %2551 = vmatpush1.bf16.msra.mxu0 %v3834_v50  ;;  %v193_v50 = vld [vmem:[%s5191_s0 + $0x1e8] sm:$0xff]  ;;  %v3863_v47 = vld [vmem:[%s5190_s1 + $0x1c0] sm:$0xff]  }
  0x47   :  { %2815 = vmatpush1.bf16.msra.mxu1 %v3835_v53  ;;  %2552 = vmatprep.subr.bf16.mxu0 %v3872_v0  ;;  %v3553_v53 = vcombine.low %v181_v37, %v185_v38 }
  0x48   :  { %2816 = vmatprep.subr.bf16.mxu1 %v3872_v0 }
  0x49   :  { %2061 = vmatmul.mubr.bf16.gmra.mxu0 %v3511_v55  ;;  %v3562_v55 = vcombine.high %v189_v49, %v193_v50 }
  0x4a   :  { %2325 = vmatmul.mubr.bf16.gmra.mxu1 %v3513_v56  ;;  %2068 = vmatprep.mubr.bf16.mxu0 %v3520_v57  ;;  %v3856_v56 = vld [vmem:[%s5190_s1 + $0x158] sm:$0xff]  }
  0x4b   :  { %2332 = vmatprep.mubr.bf16.mxu1 %v3522_v58  ;;  %2553 = vmatpush1.bf16.msra.mxu0 %v3836_v59  ;;  %v3857_v57 = vld [vmem:[%s5190_s1 + $0x1d8] sm:$0xff]   ;;  %v196_v58 = vld [vmem:[%s5191_s0 + $0x200] sm:$0xff] }
  0x4c   :  { %2817 = vmatpush1.bf16.msra.mxu1 %v3837_v60  ;;  %2554 = vmatprep.subr.bf16.mxu0 %v3872_v0  ;;  %v200_v59 = vld [vmem:[%s5191_s0 + $0x220] sm:$0xff]  ;;  %v197_v60 = vld [vmem:[%s5191_s0 + $0x208] sm:$0xff] }
  0x4d   :  { %2818 = vmatprep.subr.bf16.mxu1 %v3872_v0  ;;  %v3568_v1 = vcombine.high %v196_v58, %v200_v59  ;;  %v3570_v2 = vcombine.high %v197_v60, %v201_v61 }
  0x4f   :  { %2555 = vmatpush1.bf16.msra.mxu0 %v3838_v63  ;;  %v3561_v63 = vcombine.low %v189_v49, %v193_v50  ;;  %v248_v49 = vld [vmem:[%s5191_s0 + $0x3a0] sm:$0xff]  ;;  %v245_v50 = vld [vmem:[%s5191_s0 + $0x388] sm:$0xff] }
  0x50   :  { %2819 = vmatpush1.bf16.msra.mxu1 %v3839_v3  ;;  %2556 = vmatprep.subr.bf16.mxu0 %v3872_v0  ;;  %v3858_v3 = vld [vmem:[%s5190_s1 + $0x150] sm:$0xff]  }
  0x51   :  { %2069 = vmatmul.mubr.bf16.gmra.mxu0 %v3519_v4  ;;  %2820 = vmatprep.subr.bf16.mxu1 %v3872_v0  ;;  %v204_v4 = vld [vmem:[%s5191_s0 + $0x240] sm:$0xff] }
  0x52   :  { %2333 = vmatmul.mubr.bf16.gmra.mxu1 %v3521_v6  ;;  %2076 = vmatprep.mubr.bf16.mxu0 %v3528_v7  ;;  %v205_v6 = vld [vmem:[%s5191_s0 + $0x248] sm:$0xff] }
  0x53   :  { %2340 = vmatprep.mubr.bf16.mxu1 %v3530_v9  ;;  %2557 = vmatpush1.bf16.msra.mxu0 %v3840_v5  ;;  %v208_v5 = vld [vmem:[%s5191_s0 + $0x260] sm:$0xff]  ;;  %v209_v7 = vld [vmem:[%s5191_s0 + $0x268] sm:$0xff]  ;;  %v3569_v9 = vcombine.low %v197_v60, %v201_v61 }
  0x54   :  { %2821 = vmatpush1.bf16.msra.mxu1 %v3841_v8  ;;  %2558 = vmatprep.subr.bf16.mxu0 %v3872_v0  ;;  %v3567_v8 = vcombine.low %v196_v58, %v200_v59  ;;  %v3576_v10 = vcombine.high %v204_v4, %v208_v5  ;;  %v3578_v11 = vcombine.high %v205_v6, %v209_v7  ;;  %v253_v58 = vld [vmem:[%s5191_s0 + $0x3c8] sm:$0xff] }
  0x55   :  { %2822 = vmatprep.subr.bf16.mxu1 %v3872_v0  ;;  %v257_v59 = vld [vmem:[%s5191_s0 + $0x3e8] sm:$0xff] }
  0x57   :  { %2559 = vmatpush1.bf16.msra.mxu0 %v3842_v14  ;;  %v3859_v14 = vld [vmem:[%s5190_s1 + $0x1d0] sm:$0xff]  }
  0x58   :  { %2823 = vmatpush1.bf16.msra.mxu1 %v3843_v15  ;;  %2560 = vmatprep.subr.bf16.mxu0 %v3872_v0  ;;  %v213_v15 = vld [vmem:[%s5191_s0 + $0x288] sm:$0xff] }
  0x59   :  { %2077 = vmatmul.mubr.bf16.gmra.mxu0 %v3527_v16  ;;  %2824 = vmatprep.subr.bf16.mxu1 %v3872_v0  ;;  %v217_v16 = vld [vmem:[%s5191_s0 + $0x2a8] sm:$0xff] }
  0x5a   :  { %2341 = vmatmul.mubr.bf16.gmra.mxu1 %v3529_v17  ;;  %2084 = vmatprep.mubr.bf16.mxu0 %v3536_v18  ;;  %v3575_v17 = vcombine.low %v204_v4, %v208_v5  ;;  %v3577_v18 = vcombine.low %v205_v6, %v209_v7  ;;  %v3585_v26 = vcombine.low %v213_v15, %v217_v16  ;;  %v265_v4 = vld [vmem:[%s5191_s0 + $0x428] sm:$0xff] }
  0x5b   :  { %2348 = vmatprep.mubr.bf16.mxu1 %v3538_v19  ;;  %2561 = vmatpush1.bf16.msra.mxu0 %v3844_v20  ;;  %v3584_v19 = vcombine.high %v212_v12, %v216_v13  ;;  %v3586_v20 = vcombine.high %v213_v15, %v217_v16  ;;  %v3625_v6 = vcombine.low %v253_v58, %v257_v59  ;;  %v273_v12 = vld [vmem:[%s5191_s0 + $0x468] sm:$0xff] }
  0x5c   :  { %2825 = vmatpush1.bf16.msra.mxu1 %v3845_v21  ;;  %2562 = vmatprep.subr.bf16.mxu0 %v3872_v0  ;;  %v220_v21 = vld [vmem:[%s5191_s0 + $0x2c0] sm:$0xff] }
  0x5d   :  { %2826 = vmatprep.subr.bf16.mxu1 %v3872_v0  ;;  %v3591_v35 = vcombine.low %v220_v21, %v224_v22 }
  0x5f   :  { %2563 = vmatpush1.bf16.msra.mxu0 %v3846_v24  ;;  %v225_v24 = vld [vmem:[%s5191_s0 + $0x2e8] sm:$0xff] }
  0x60   :  { %2827 = vmatpush1.bf16.msra.mxu1 %v3847_v27  ;;  %2564 = vmatprep.subr.bf16.mxu0 %v3872_v0  ;;  %v3592_v27 = vcombine.high %v220_v21, %v224_v22 }
  0x61   :  { %2085 = vmatmul.mubr.bf16.gmra.mxu0 %v3535_v28  ;;  %2828 = vmatprep.subr.bf16.mxu1 %v3872_v0  ;;  %v3594_v28 = vcombine.high %v221_v23, %v225_v24 }
  0x62   :  { %2349 = vmatmul.mubr.bf16.gmra.mxu1 %v3537_v29  ;;  %2092 = vmatprep.mubr.bf16.mxu0 %v3544_v30  ;;  %v3860_v29 = vld [vmem:[%s5190_s1 + $0x148] sm:$0xff]  }
  0x63   :  { %2356 = vmatprep.mubr.bf16.mxu1 %v3546_v31  ;;  %2565 = vmatpush2.bf16.msra.mxu0 %v3848_v32  ;;  %v3861_v30 = vld [vmem:[%s5190_s1 + $0x1c8] sm:$0xff]   ;;  %v228_v31 = vld [vmem:[%s5191_s0 + $0x300] sm:$0xff] }
  0x64   :  { %2829 = vmatpush2.bf16.msra.mxu1 %v3849_v33  ;;  %2566 = vmatprep.subr.bf16.mxu0 %v3872_v0  ;;  %v232_v32 = vld [vmem:[%s5191_s0 + $0x320] sm:$0xff]  ;;  %v229_v33 = vld [vmem:[%s5191_s0 + $0x308] sm:$0xff] }
  0x65   :  { %2830 = vmatprep.subr.bf16.mxu1 %v3872_v0  ;;  %v3600_v37 = vcombine.high %v228_v31, %v232_v32  ;;  %v3602_v38 = vcombine.high %v229_v33, %v233_v34 }
  0x67   :  { %2567 = vmatpush2.bf16.msra.mxu0 %v3850_v36  ;;  %v3593_v36 = vcombine.low %v221_v23, %v225_v24 }
  0x68   :  { %2831 = vmatpush2.bf16.msra.mxu1 %v3851_v39  ;;  %2568 = vmatprep.subr.bf16.mxu0 %v3872_v0  ;;  %v236_v39 = vld [vmem:[%s5191_s0 + $0x340] sm:$0xff] }
  0x69   :  { %2093 = vmatmul.mubr.bf16.gmra.mxu0 %v3543_v40  ;;  %2832 = vmatprep.subr.bf16.mxu1 %v3872_v0  ;;  %v240_v40 = vld [vmem:[%s5191_s0 + $0x360] sm:$0xff] }
  0x6a   :  { %2357 = vmatmul.mubr.bf16.gmra.mxu1 %v3545_v41  ;;  %2100 = vmatprep.mubr.bf16.mxu0 %v3552_v42  ;;  %v237_v41 = vld [vmem:[%s5191_s0 + $0x348] sm:$0xff]  ;;  %v3862_v42 = vld [vmem:[%s5190_s1 + $0x140] sm:$0xff]  }
  0x6b   :  { %2364 = vmatprep.mubr.bf16.mxu1 %v3554_v43  ;;  %2569 = vmatpush2.bf16.msra.mxu0 %v3852_v44  ;;  %v3599_v43 = vcombine.low %v228_v31, %v232_v32  ;;  %v3601_v44 = vcombine.low %v229_v33, %v233_v34  ;;  %v292_v33 = vld [vmem:[%s5191_s0 + $0x500] sm:$0xff] }
  0x6c   :  { %2833 = vmatpush2.bf16.msra.mxu1 %v3853_v45  ;;  %2570 = vmatprep.subr.bf16.mxu0 %v3872_v0  ;;  %v3608_v45 = vcombine.high %v236_v39, %v240_v40  ;;  %v296_v34 = vld [vmem:[%s5191_s0 + $0x520] sm:$0xff] }
  0x6d   :  { %2834 = vmatprep.subr.bf16.mxu1 %v3872_v0 }
  0x6f   :  { %2571 = vmatpush2.bf16.msra.mxu0 %v3854_v48  ;;  %v244_v48 = vld [vmem:[%s5191_s0 + $0x380] sm:$0xff] }
  0x70   :  { %2835 = vmatpush2.bf16.msra.mxu1 %v3855_v51  ;;  %2572 = vmatprep.subr.bf16.mxu0 %v3872_v0  ;;  %v249_v51 = vld [vmem:[%s5191_s0 + $0x3a8] sm:$0xff]  ;;  %v3615_v60 = vcombine.low %v244_v48, %v248_v49 }
  0x71   :  { %2101 = vmatmul.mubr.bf16.gmra.mxu0 %v3551_v52  ;;  %2836 = vmatprep.subr.bf16.mxu1 %v3872_v0  ;;  %v3607_v52 = vcombine.low %v236_v39, %v240_v40  ;;  %v3617_v61 = vcombine.low %v245_v50, %v249_v51  ;;  %v3664_v39 = vcombine.high %v292_v33, %v296_v34 }
  0x72   :  { %2365 = vmatmul.mubr.bf16.gmra.mxu1 %v3553_v53  ;;  %2108 = vmatprep.mubr.bf16.mxu0 %v3560_v54  ;;  %v3616_v54 = vcombine.high %v244_v48, %v248_v49  ;;  %v308_v48 = vld [vmem:[%s5191_s0 + $0x580] sm:$0xff] }
  0x73   :  { %2372 = vmatprep.mubr.bf16.mxu1 %v3562_v55  ;;  %2573 = vmatpush2.bf16.msra.mxu0 %v3856_v56  ;;  %v3618_v55 = vcombine.high %v245_v50, %v249_v51  ;;  %v252_v56 = vld [vmem:[%s5191_s0 + $0x3c0] sm:$0xff]  ;;  %v309_v50 = vld [vmem:[%s5191_s0 + $0x588] sm:$0xff] }
  0x74   :  { %2837 = vmatpush2.bf16.msra.mxu1 %v3857_v57  ;;  %2574 = vmatprep.subr.bf16.mxu0 %v3872_v0  ;;  %v256_v57 = vld [vmem:[%s5191_s0 + $0x3e0] sm:$0xff]  ;;  %v313_v51 = vld [vmem:[%s5191_s0 + $0x5a8] sm:$0xff] }
  0x75   :  { %2838 = vmatprep.subr.bf16.mxu1 %v3872_v0  ;;  %v3623_v5 = vcombine.low %v252_v56, %v256_v57  ;;  %v312_v49 = vld [vmem:[%s5191_s0 + $0x5a0] sm:$0xff] }
  0x77   :  { %2575 = vmatpush2.bf16.msra.mxu0 %v3858_v3  ;;  %v261_v3 = vld [vmem:[%s5191_s0 + $0x408] sm:$0xff] }
  0x78   :  { %2576 = vmatprep.subr.bf16.mxu0 %v3872_v0  ;;  %2839 = vmatpush2.bf16.msra.mxu1 %v3859_v14  ;;  %v3633_v14 = vcombine.low %v261_v3, %v265_v4 }
  0x79   :  { %2109 = vmatmul.mubr.bf16.gmra.mxu0 %v3559_v62  ;;  %2840 = vmatprep.subr.bf16.mxu1 %v3872_v0  ;;  %v3624_v62 = vcombine.high %v252_v56, %v256_v57  ;;  %v316_v56 = vld [vmem:[%s5191_s0 + $0x5c0] sm:$0xff] }
  0x7a   :  { %2373 = vmatmul.mubr.bf16.gmra.mxu1 %v3561_v63  ;;  %2116 = vmatprep.mubr.bf16.mxu0 %v3568_v1  ;;  %v3626_v63 = vcombine.high %v253_v58, %v257_v59  ;;  %v260_v1 = vld [vmem:[%s5191_s0 + $0x400] sm:$0xff]  ;;  %v317_v58 = vld [vmem:[%s5191_s0 + $0x5c8] sm:$0xff] }
  0x7b   :  { %2380 = vmatprep.mubr.bf16.mxu1 %v3570_v2  ;;  %2577 = vmatpush2.bf16.msra.mxu0 %v3860_v29  ;;  %v264_v2 = vld [vmem:[%s5191_s0 + $0x420] sm:$0xff]  ;;  %v321_v59 = vld [vmem:[%s5191_s0 + $0x5e8] sm:$0xff] }
  0x7c   :  { %2841 = vmatpush2.bf16.msra.mxu1 %v3861_v30  ;;  %2578 = vmatprep.subr.bf16.mxu0 %v3872_v0  ;;  %v3632_v7 = vcombine.high %v260_v1, %v264_v2  ;;  %v3631_v13 = vcombine.low %v260_v1, %v264_v2  ;;  %v320_v57 = vld [vmem:[%s5191_s0 + $0x5e0] sm:$0xff] }
  0x7d   :  { %2842 = vmatprep.subr.bf16.mxu1 %v3872_v0  ;;  %v241_v0 = vld [vmem:[%s5191_s0 + $0x368] sm:$0xff]  ;;  %v324_v1 = vld [vmem:[%s5191_s0 + $0x600] sm:$0xff] }
  0x7e   :  { %v3610_v46 = vcombine.high %v237_v41, %v241_v0  ;;  %v3609_v53 = vcombine.low %v237_v41, %v241_v0  ;;  %v300_v41 = vld [vmem:[%s5191_s0 + $0x540] sm:$0xff] }
  0x7f   :  { %2579 = vmatpush2.bf16.msra.mxu0 %v3862_v42  ;;  %v304_v0 = vld [vmem:[%s5191_s0 + $0x560] sm:$0xff]  ;;  %v301_v42 = vld [vmem:[%s5191_s0 + $0x548] sm:$0xff] }
  0x80   :  { %2843 = vmatpush2.bf16.msra.mxu1 %v3863_v47  ;;  %v328_v2 = vld [vmem:[%s5191_s0 + $0x620] sm:$0xff] }
  0x81   :  { %2117 = vmatmul.mubr.bf16.gmra.mxu0 %v3567_v8  ;;  %v3634_v8 = vcombine.high %v261_v3, %v265_v4  ;;  %v325_v3 = vld [vmem:[%s5191_s0 + $0x608] sm:$0xff] }
  0x82   :  { %2381 = vmatmul.mubr.bf16.gmra.mxu1 %v3569_v9  ;;  %2124 = vmatprep.mubr.bf16.mxu0 %v3576_v10  ;;  %v268_v9 = vld [vmem:[%s5191_s0 + $0x440] sm:$0xff]  ;;  %v329_v4 = vld [vmem:[%s5191_s0 + $0x628] sm:$0xff] }
  0x83   :  { %2388 = vmatprep.mubr.bf16.mxu1 %v3578_v11  ;;  %v272_v10 = vld [vmem:[%s5191_s0 + $0x460] sm:$0xff]  ;;  %v269_v11 = vld [vmem:[%s5191_s0 + $0x448] sm:$0xff] }
  0x84   :  { %v3640_v15 = vcombine.high %v268_v9, %v272_v10  ;;  %v3642_v16 = vcombine.high %v269_v11, %v273_v12  ;;  %v3639_v21 = vcombine.low %v268_v9, %v272_v10  ;;  %v3641_v22 = vcombine.low %v269_v11, %v273_v12  ;;  %v332_v9 = vld [vmem:[%s5191_s0 + $0x640] sm:$0xff]  ;;  %v333_v11 = vld [vmem:[%s5191_s0 + $0x648] sm:$0xff] }
  0x85   :  { %v336_v10 = vld [vmem:[%s5191_s0 + $0x660] sm:$0xff]  ;;  %v337_v12 = vld [vmem:[%s5191_s0 + $0x668] sm:$0xff] }
  0x89   :  { %2125 = vmatmul.mubr.bf16.gmra.mxu0 %v3575_v17  ;;  %v276_v17 = vld [vmem:[%s5191_s0 + $0x480] sm:$0xff] }
  0x8a   :  { %2389 = vmatmul.mubr.bf16.gmra.mxu1 %v3577_v18  ;;  %2132 = vmatprep.mubr.bf16.mxu0 %v3584_v19  ;;  %v280_v18 = vld [vmem:[%s5191_s0 + $0x4a0] sm:$0xff]  ;;  %v277_v19 = vld [vmem:[%s5191_s0 + $0x488] sm:$0xff] }
  0x8b   :  { %2396 = vmatprep.mubr.bf16.mxu1 %v3586_v20  ;;  %v281_v20 = vld [vmem:[%s5191_s0 + $0x4a8] sm:$0xff]  ;;  %v3648_v23 = vcombine.high %v276_v17, %v280_v18  ;;  %v3647_v29 = vcombine.low %v276_v17, %v280_v18 }
  0x8c   :  { %v3650_v24 = vcombine.high %v277_v19, %v281_v20  ;;  %v3649_v30 = vcombine.low %v277_v19, %v281_v20 }
  0x91   :  { %2133 = vmatmul.mubr.bf16.gmra.mxu0 %v3583_v25  ;;  %v284_v25 = vld [vmem:[%s5191_s0 + $0x4c0] sm:$0xff] }
  0x92   :  { %2397 = vmatmul.mubr.bf16.gmra.mxu1 %v3585_v26  ;;  %2140 = vmatprep.mubr.bf16.mxu0 %v3592_v27  ;;  %v288_v26 = vld [vmem:[%s5191_s0 + $0x4e0] sm:$0xff]  ;;  %v285_v27 = vld [vmem:[%s5191_s0 + $0x4c8] sm:$0xff] }
  0x93   :  { %2404 = vmatprep.mubr.bf16.mxu1 %v3594_v28  ;;  %v289_v28 = vld [vmem:[%s5191_s0 + $0x4e8] sm:$0xff]  ;;  %v3656_v31 = vcombine.high %v284_v25, %v288_v26 }
  0x94   :  { %v3658_v32 = vcombine.high %v285_v27, %v289_v28 }
  0x99   :  { %2141 = vmatmul.mubr.bf16.gmra.mxu0 %v3591_v35  ;;  %v293_v35 = vld [vmem:[%s5191_s0 + $0x508] sm:$0xff] }
  0x9a   :  { %2405 = vmatmul.mubr.bf16.gmra.mxu1 %v3593_v36  ;;  %2148 = vmatprep.mubr.bf16.mxu0 %v3600_v37  ;;  %v297_v36 = vld [vmem:[%s5191_s0 + $0x528] sm:$0xff]  ;;  %v3655_v37 = vcombine.low %v284_v25, %v288_v26 }
  0x9b   :  { %2412 = vmatprep.mubr.bf16.mxu1 %v3602_v38  ;;  %v3657_v38 = vcombine.low %v285_v27, %v289_v28  ;;  %v3666_v40 = vcombine.high %v293_v35, %v297_v36  ;;  %v345_v25 = vld [vmem:[%s5191_s0 + $0x6a8] sm:$0xff]  ;;  %v3703_v27 = vcombine.low %v332_v9, %v336_v10 }
  0xa1   :  { %2149 = vmatmul.mubr.bf16.gmra.mxu0 %v3599_v43  ;;  %v305_v43 = vld [vmem:[%s5191_s0 + $0x568] sm:$0xff] }
  0xa2   :  { %2413 = vmatmul.mubr.bf16.gmra.mxu1 %v3601_v44  ;;  %2156 = vmatprep.mubr.bf16.mxu0 %v3608_v45  ;;  %v3663_v44 = vcombine.low %v292_v33, %v296_v34  ;;  %v3665_v45 = vcombine.low %v293_v35, %v297_v36  ;;  %v3674_v47 = vcombine.high %v301_v42, %v305_v43 }
  0xa3   :  { %2420 = vmatprep.mubr.bf16.mxu1 %v3610_v46  ;;  %v3672_v46 = vcombine.high %v300_v41, %v304_v0 }
  0xa9   :  { %2157 = vmatmul.mubr.bf16.gmra.mxu0 %v3607_v52  ;;  %v3671_v52 = vcombine.low %v300_v41, %v304_v0  ;;  %v349_v0 = vld [vmem:[%s5191_s0 + $0x6c8] sm:$0xff] }
  0xaa   :  { %2421 = vmatmul.mubr.bf16.gmra.mxu1 %v3609_v53  ;;  %2164 = vmatprep.mubr.bf16.mxu0 %v3616_v54  ;;  %v3673_v53 = vcombine.low %v301_v42, %v305_v43  ;;  %v3680_v54 = vcombine.high %v308_v48, %v312_v49  ;;  %v353_v42 = vld [vmem:[%s5191_s0 + $0x6e8] sm:$0xff] }
  0xab   :  { %2428 = vmatprep.mubr.bf16.mxu1 %v3618_v55  ;;  %v3682_v55 = vcombine.high %v309_v50, %v313_v51 }
  0xb1   :  { %2165 = vmatmul.mubr.bf16.gmra.mxu0 %v3615_v60  ;;  %v3679_v60 = vcombine.low %v308_v48, %v312_v49 }
  0xb2   :  { %2429 = vmatmul.mubr.bf16.gmra.mxu1 %v3617_v61  ;;  %2172 = vmatprep.mubr.bf16.mxu0 %v3624_v62  ;;  %v3681_v61 = vcombine.low %v309_v50, %v313_v51  ;;  %v3688_v62 = vcombine.high %v316_v56, %v320_v57  ;;  %v3722_v50 = vcombine.high %v349_v0, %v353_v42 }
  0xb3   :  { %2436 = vmatprep.mubr.bf16.mxu1 %v3626_v63  ;;  %v3690_v63 = vcombine.high %v317_v58, %v321_v59 }
  0xb9   :  { %2173 = vmatmul.mubr.bf16.gmra.mxu0 %v3623_v5  ;;  %v3687_v5 = vcombine.low %v316_v56, %v320_v57  ;;  %v356_v56 = vld [vmem:[%s5191_s0 + $0x700] sm:$0xff] }
  0xba   :  { %2437 = vmatmul.mubr.bf16.gmra.mxu1 %v3625_v6  ;;  %2180 = vmatprep.mubr.bf16.mxu0 %v3632_v7  ;;  %v3689_v6 = vcombine.low %v317_v58, %v321_v59  ;;  %v3696_v7 = vcombine.high %v324_v1, %v328_v2  ;;  %v357_v58 = vld [vmem:[%s5191_s0 + $0x708] sm:$0xff] }
  0xbb   :  { %2444 = vmatprep.mubr.bf16.mxu1 %v3634_v8  ;;  %v3698_v8 = vcombine.high %v325_v3, %v329_v4 }
  0xc1   :  { %2181 = vmatmul.mubr.bf16.gmra.mxu0 %v3631_v13  ;;  %v3695_v13 = vcombine.low %v324_v1, %v328_v2 }
  0xc2   :  { %2445 = vmatmul.mubr.bf16.gmra.mxu1 %v3633_v14  ;;  %2188 = vmatprep.mubr.bf16.mxu0 %v3640_v15  ;;  %v3697_v14 = vcombine.low %v325_v3, %v329_v4  ;;  %v3704_v15 = vcombine.high %v332_v9, %v336_v10  ;;  %v3730_v3 = vcombine.high %v357_v58, %v357_v58  ;;  %v134_v9 = vld [vmem:[%s5191_s0 + $0x10] sm:$0xff] }
  0xc3   :  { %2452 = vmatprep.mubr.bf16.mxu1 %v3642_v16  ;;  %v3706_v16 = vcombine.high %v333_v11, %v337_v12  ;;  %v138_v10 = vld [vmem:[%s5191_s0 + $0x30] sm:$0xff] }
  0xc9   :  { %2189 = vmatmul.mubr.bf16.gmra.mxu0 %v3639_v21  ;;  %v340_v21 = vld [vmem:[%s5191_s0 + $0x680] sm:$0xff] }
  0xca   :  { %2453 = vmatmul.mubr.bf16.gmra.mxu1 %v3641_v22  ;;  %2196 = vmatprep.mubr.bf16.mxu0 %v3648_v23  ;;  %v344_v22 = vld [vmem:[%s5191_s0 + $0x6a0] sm:$0xff] }
  0xcb   :  { %2460 = vmatprep.mubr.bf16.mxu1 %v3650_v24  ;;  %v341_v24 = vld [vmem:[%s5191_s0 + $0x688] sm:$0xff] }
  0xcc   :  { %v3714_v33 = vcombine.high %v341_v24, %v345_v25 }
  0xd1   :  { %2197 = vmatmul.mubr.bf16.gmra.mxu0 %v3647_v29  ;;  %v3705_v29 = vcombine.low %v333_v11, %v337_v12  ;;  %v135_v12 = vld [vmem:[%s5191_s0 + $0x18] sm:$0xff] }
  0xd2   :  { %2461 = vmatmul.mubr.bf16.gmra.mxu1 %v3649_v30  ;;  %2204 = vmatprep.mubr.bf16.mxu0 %v3656_v31  ;;  %v3712_v30 = vcombine.high %v340_v21, %v344_v22 }
  0xd3   :  { %2468 = vmatprep.mubr.bf16.mxu1 %v3658_v32 }
  0xd9   :  { %2205 = vmatmul.mubr.bf16.gmra.mxu0 %v3655_v37 }
  0xda   :  { %2469 = vmatmul.mubr.bf16.gmra.mxu1 %v3657_v38  ;;  %2212 = vmatprep.mubr.bf16.mxu0 %v3664_v39  ;;  %v348_v39 = vld [vmem:[%s5191_s0 + $0x6c0] sm:$0xff] }
  0xdb   :  { %2476 = vmatprep.mubr.bf16.mxu1 %v3666_v40  ;;  %v352_v40 = vld [vmem:[%s5191_s0 + $0x6e0] sm:$0xff] }
  0xe1   :  { %2213 = vmatmul.mubr.bf16.gmra.mxu0 %v3663_v44  ;;  %v3711_v44 = vcombine.low %v340_v21, %v344_v22 }
  0xe2   :  { %2477 = vmatmul.mubr.bf16.gmra.mxu1 %v3665_v45  ;;  %2220 = vmatprep.mubr.bf16.mxu0 %v3672_v46  ;;  %v3713_v46 = vcombine.low %v341_v24, %v345_v25 }
  0xe3   :  { %2484 = vmatprep.mubr.bf16.mxu1 %v3674_v47  ;;  %v3720_v47 = vcombine.high %v348_v39, %v352_v40 }
  0xe9   :  { %2221 = vmatmul.mubr.bf16.gmra.mxu0 %v3671_v52 }
  0xea   :  { %2485 = vmatmul.mubr.bf16.gmra.mxu1 %v3673_v53  ;;  %2228 = vmatprep.mubr.bf16.mxu0 %v3680_v54 }
  0xeb   :  { %2492 = vmatprep.mubr.bf16.mxu1 %v3682_v55 }
  0xf1   :  { %2229 = vmatmul.mubr.bf16.gmra.mxu0 %v3679_v60  ;;  %v3719_v60 = vcombine.low %v348_v39, %v352_v40 }
  0xf2   :  { %2493 = vmatmul.mubr.bf16.gmra.mxu1 %v3681_v61  ;;  %2236 = vmatprep.mubr.bf16.mxu0 %v3688_v62  ;;  %v3721_v62 = vcombine.low %v349_v0, %v353_v42 }
  0xf3   :  { %2500 = vmatprep.mubr.bf16.mxu1 %v3690_v63  ;;  %v3728_v63 = vcombine.high %v356_v56, %v356_v56 }
  0xf9   :  { %2237 = vmatmul.mubr.bf16.gmra.mxu0 %v3687_v5 }
  0xfa   :  { %2501 = vmatmul.mubr.bf16.gmra.mxu1 %v3689_v6  ;;  %2244 = vmatprep.mubr.bf16.mxu0 %v3696_v7 }
  0xfb   :  { %2508 = vmatprep.mubr.bf16.mxu1 %v3698_v8 }
 0x101   :  { %v2054_v17 = vpop.f32.mrf.mxu0  ;;  %2245 = vmatmul.mubr.bf16.gmra.mxu0 %v3695_v13  ;;  %v139_v13 = vld [vmem:[%s5191_s0 + $0x38] sm:$0xff] }
 0x102   :  { %v2318_v18 = vpop.f32.mrf.mxu1  ;;  %2509 = vmatmul.mubr.bf16.gmra.mxu1 %v3697_v14  ;;  %2252 = vmatprep.mubr.bf16.mxu0 %v3704_v15  ;;  %v3727_v15 = vcombine.low %v356_v56, %v356_v56  ;;  %v3510_v22 = vcombine.high %v135_v12, %v139_v13 }
 0x103   :  { %v4473_v19 = vadd.f32 %v2318_v18, %v2054_v17  ;;  %v2056_v20 = vpop.f32.mrf.mxu0  ;;  %2516 = vmatprep.mubr.bf16.mxu1 %v3706_v16  ;;  %v3729_v17 = vcombine.low %v357_v58, %v357_v58  ;;  %v3508_v18 = vcombine.high %v134_v9, %v138_v10 }
 0x104   :  { %v2320_v23 = vpop.f32.mrf.mxu1 }
 0x105   :  { %v2057_v26 = vpop.f32.mrf.mxu0 }
 0x106   :  { %v2321_v28 = vpop.f32.mrf.mxu1 }
 0x107   :  { %v4487_v31 = vadd.f32 %v2321_v28, %v2057_v26  ;;  %v2059_v32 = vpop.f32.mrf.mxu0  ;;  %v142_v28 = vld [vmem:[%s5191_s0 + $0x50] sm:$0xff] }
 0x108   :  { %v2323_v34 = vpop.f32.mrf.mxu1  ;;  %v143_v32 = vld [vmem:[%s5191_s0 + $0x58] sm:$0xff] }
 0x109   :  { %v2062_v35 = vpop.f32.mrf.mxu0  ;;  %2253 = vmatmul.mubr.bf16.gmra.mxu0 %v3703_v27 }
 0x10a   :  { %v2326_v36 = vpop.f32.mrf.mxu1  ;;  %2517 = vmatmul.mubr.bf16.gmra.mxu1 %v3705_v29  ;;  %2260 = vmatprep.mubr.bf16.mxu0 %v3712_v30  ;;  %v146_v29 = vld [vmem:[%s5191_s0 + $0x70] sm:$0xff] }
 0x10b   :  { %v4489_v37 = vadd.f32 %v2326_v36, %v2062_v35  ;;  %v2064_v38 = vpop.f32.mrf.mxu0  ;;  %2524 = vmatprep.mubr.bf16.mxu1 %v3714_v33  ;;  %v147_v33 = vld [vmem:[%s5191_s0 + $0x78] sm:$0xff]  ;;  %v3507_v35 = vcombine.low %v134_v9, %v138_v10  ;;  %v3516_v39 = vcombine.high %v142_v28, %v146_v29 }
 0x10c   :  { %v2328_v41 = vpop.f32.mrf.mxu1  ;;  %v3509_v38 = vcombine.low %v135_v12, %v139_v13  ;;  %v3518_v0 = vcombine.high %v143_v32, %v147_v33  ;;  %v159_v9 = vld [vmem:[%s5191_s0 + $0xd8] sm:$0xff] }
 0x10d   :  { %v2065_v43 = vpop.f32.mrf.mxu0  ;;  %v163_v10 = vld [vmem:[%s5191_s0 + $0xf8] sm:$0xff] }
 0x10e   :  { %v2329_v45 = vpop.f32.mrf.mxu1 }
 0x10f   :  { %v4503_v48 = vadd.f32 %v2329_v45, %v2065_v43  ;;  %v2067_v49 = vpop.f32.mrf.mxu0 }
 0x110   :  { %v2331_v51 = vpop.f32.mrf.mxu1  ;;  %v154_v49 = vld [vmem:[%s5191_s0 + $0xb0] sm:$0xff] }
 0x111   :  { %v2070_v52 = vpop.f32.mrf.mxu0  ;;  %2261 = vmatmul.mubr.bf16.gmra.mxu0 %v3711_v44  ;;  %v151_v51 = vld [vmem:[%s5191_s0 + $0x98] sm:$0xff] }
 0x112   :  { %v2334_v53 = vpop.f32.mrf.mxu1  ;;  %2525 = vmatmul.mubr.bf16.gmra.mxu1 %v3713_v46  ;;  %2268 = vmatprep.mubr.bf16.mxu0 %v3720_v47  ;;  %v150_v47 = vld [vmem:[%s5191_s0 + $0x90] sm:$0xff] }
 0x113   :  { %v4505_v54 = vadd.f32 %v2334_v53, %v2070_v52  ;;  %v2072_v55 = vpop.f32.mrf.mxu0  ;;  %2532 = vmatprep.mubr.bf16.mxu1 %v3722_v50  ;;  %v155_v52 = vld [vmem:[%s5191_s0 + $0xb8] sm:$0xff]  ;;  %v3524_v58 = vcombine.high %v150_v47, %v154_v49  ;;  %v3523_v12 = vcombine.low %v150_v47, %v154_v49  ;;  %v174_v49 = vld [vmem:[%s5191_s0 + $0x150] sm:$0xff] }
 0x114   :  { %v2336_v57 = vpop.f32.mrf.mxu1  ;;  %v3515_v55 = vcombine.low %v142_v28, %v146_v29  ;;  %v170_v28 = vld [vmem:[%s5191_s0 + $0x130] sm:$0xff] }
 0x115   :  { %v2073_v59 = vpop.f32.mrf.mxu0  ;;  %v3517_v57 = vcombine.low %v143_v32, %v147_v33  ;;  %v171_v32 = vld [vmem:[%s5191_s0 + $0x138] sm:$0xff] }
 0x116   :  { %v2337_v61 = vpop.f32.mrf.mxu1 }
 0x117   :  { %v4513_v1 = vadd.f32 %v2337_v61, %v2073_v59  ;;  %v2075_v2 = vpop.f32.mrf.mxu0  ;;  %v3526_v61 = vcombine.high %v151_v51, %v155_v52 }
 0x118   :  { %v2339_v4 = vpop.f32.mrf.mxu1 }
 0x119   :  { %v2078_v5 = vpop.f32.mrf.mxu0  ;;  %2269 = vmatmul.mubr.bf16.gmra.mxu0 %v3719_v60 }
 0x11a   :  { %v2342_v6 = vpop.f32.mrf.mxu1  ;;  %2533 = vmatmul.mubr.bf16.gmra.mxu1 %v3721_v62  ;;  %2276 = vmatprep.mubr.bf16.mxu0 %v3728_v63 }
 0x11b   :  { %v4515_v7 = vadd.f32 %v2342_v6, %v2078_v5  ;;  %v2080_v8 = vpop.f32.mrf.mxu0  ;;  %2540 = vmatprep.mubr.bf16.mxu1 %v3730_v3  ;;  %v158_v5 = vld [vmem:[%s5191_s0 + $0xd0] sm:$0xff] }
 0x11c   :  { %v2344_v11 = vpop.f32.mrf.mxu1  ;;  %v162_v6 = vld [vmem:[%s5191_s0 + $0xf0] sm:$0xff] }
 0x11d   :  { %v2081_v14 = vpop.f32.mrf.mxu0 }
 0x11e   :  { %v2345_v16 = vpop.f32.mrf.mxu1 }
 0x11f   :  { %v4529_v20 = vadd.f32 %v2345_v16, %v2081_v14  ;;  %v2083_v21 = vpop.f32.mrf.mxu0  ;;  %v3525_v14 = vcombine.low %v151_v51, %v155_v52  ;;  %v175_v52 = vld [vmem:[%s5191_s0 + $0x158] sm:$0xff] }
 0x120   :  { %v2347_v23 = vpop.f32.mrf.mxu1 }
 0x121   :  { %v2086_v24 = vpop.f32.mrf.mxu0  ;;  %2277 = vmatmul.mubr.bf16.gmra.mxu0 %v3727_v15  ;;  %v3532_v15 = vcombine.high %v158_v5, %v162_v6 }
 0x122   :  { %v2350_v25 = vpop.f32.mrf.mxu1  ;;  %2541 = vmatmul.mubr.bf16.gmra.mxu1 %v3729_v17  ;;  %2580 = vmatprep.mubr.bf16.mxu0 %v3508_v18  ;;  %v3534_v18 = vcombine.high %v159_v9, %v163_v10 }
 0x123   :  { %v4531_v26 = vadd.f32 %v2350_v25, %v2086_v24  ;;  %v2088_v27 = vpop.f32.mrf.mxu0  ;;  %2844 = vmatprep.mubr.bf16.mxu1 %v3510_v22 }
 0x124   :  { %v2352_v30 = vpop.f32.mrf.mxu1  ;;  %v166_v27 = vld [vmem:[%s5191_s0 + $0x110] sm:$0xff] }
 0x125   :  { %v2089_v34 = vpop.f32.mrf.mxu0  ;;  %v167_v30 = vld [vmem:[%s5191_s0 + $0x118] sm:$0xff] }
 0x126   :  { %v2353_v36 = vpop.f32.mrf.mxu1 }
 0x127   :  { %v4545_v40 = vadd.f32 %v2353_v36, %v2089_v34  ;;  %v2091_v41 = vpop.f32.mrf.mxu0  ;;  %v3531_v34 = vcombine.low %v158_v5, %v162_v6  ;;  %v3533_v36 = vcombine.low %v159_v9, %v163_v10  ;;  %v182_v9 = vld [vmem:[%s5191_s0 + $0x190] sm:$0xff] }
 0x128   :  { %v2355_v42 = vpop.f32.mrf.mxu1  ;;  %v186_v10 = vld [vmem:[%s5191_s0 + $0x1b0] sm:$0xff] }
 0x129   :  { %v2094_v43 = vpop.f32.mrf.mxu0  ;;  %2581 = vmatmul.mubr.bf16.vlgmr.msra.gmra.mxu0 %v3507_v35 }
 0x12a   :  { %v2358_v44 = vpop.f32.mrf.mxu1  ;;  %2845 = vmatmul.mubr.bf16.vlgmr.msra.gmra.mxu1 %v3509_v38  ;;  %2588 = vmatprep.mubr.bf16.mxu0 %v3516_v39  ;;  %v3540_v38 = vcombine.high %v166_v27, %v170_v28 }
 0x12b   :  { %v4547_v45 = vadd.f32 %v2358_v44, %v2094_v43  ;;  %v2096_v46 = vpop.f32.mrf.mxu0  ;;  %2852 = vmatprep.mubr.bf16.mxu1 %v3518_v0  ;;  %v3542_v0 = vcombine.high %v167_v30, %v171_v32 }
 0x12c   :  { %v2360_v50 = vpop.f32.mrf.mxu1 }
 0x12d   :  { %v2097_v53 = vpop.f32.mrf.mxu0  ;;  %v178_v50 = vld [vmem:[%s5191_s0 + $0x170] sm:$0xff] }
 0x12e   :  { %v2361_v56 = vpop.f32.mrf.mxu1 }
 0x12f   :  { %v4561_v59 = vadd.f32 %v2361_v56, %v2097_v53  ;;  %v2099_v60 = vpop.f32.mrf.mxu0  ;;  %v179_v53 = vld [vmem:[%s5191_s0 + $0x178] sm:$0xff]  ;;  %v3539_v56 = vcombine.low %v166_v27, %v170_v28 }
 0x130   :  { %v2363_v62 = vpop.f32.mrf.mxu1  ;;  %v3548_v60 = vcombine.high %v174_v49, %v178_v50 }
 0x131   :  { %v2102_v63 = vpop.f32.mrf.mxu0  ;;  %2589 = vmatmul.mubr.bf16.gmra.mxu0 %v3515_v55 }
 0x132   :  { %v2366_v2 = vpop.f32.mrf.mxu1  ;;  %2853 = vmatmul.mubr.bf16.gmra.mxu1 %v3517_v57  ;;  %2596 = vmatprep.mubr.bf16.mxu0 %v3524_v58  ;;  %v3541_v58 = vcombine.low %v167_v30, %v171_v32 }
 0x133   :  { %v4563_v3 = vadd.f32 %v2366_v2, %v2102_v63  ;;  %v2104_v4 = vpop.f32.mrf.mxu0  ;;  %2860 = vmatprep.mubr.bf16.mxu1 %v3526_v61  ;;  %v3550_v63 = vcombine.high %v175_v52, %v179_v53 }
 0x134   :  { %v2368_v8 = vpop.f32.mrf.mxu1 }
 0x135   :  { %v2105_v11 = vpop.f32.mrf.mxu0 }
 0x136   :  { %v2369_v13 = vpop.f32.mrf.mxu1 }
 0x137   :  { %v4577_v16 = vadd.f32 %v2369_v13, %v2105_v11  ;;  %v2107_v17 = vpop.f32.mrf.mxu0  ;;  %v187_v13 = vld [vmem:[%s5191_s0 + $0x1b8] sm:$0xff] }
 0x138   :  { %v2371_v21 = vpop.f32.mrf.mxu1 }
 0x139   :  { %v2110_v22 = vpop.f32.mrf.mxu0  ;;  %2597 = vmatmul.mubr.bf16.gmra.mxu0 %v3523_v12  ;;  %v183_v12 = vld [vmem:[%s5191_s0 + $0x198] sm:$0xff]  ;;  %v3556_v21 = vcombine.high %v182_v9, %v186_v10 }
 0x13a   :  { %v2374_v23 = vpop.f32.mrf.mxu1  ;;  %2861 = vmatmul.mubr.bf16.gmra.mxu1 %v3525_v14  ;;  %2604 = vmatprep.mubr.bf16.mxu0 %v3532_v15  ;;  %v3547_v15 = vcombine.low %v174_v49, %v178_v50 }
 0x13b   :  { %v4579_v24 = vadd.f32 %v2374_v23, %v2110_v22  ;;  %v2112_v25 = vpop.f32.mrf.mxu0  ;;  %2868 = vmatprep.mubr.bf16.mxu1 %v3534_v18  ;;  %v3549_v18 = vcombine.low %v175_v52, %v179_v53 }
 0x13c   :  { %v2376_v29 = vpop.f32.mrf.mxu1  ;;  %v3558_v25 = vcombine.high %v183_v12, %v187_v13 }
 0x13d   :  { %v2113_v33 = vpop.f32.mrf.mxu0 }
 0x13e   :  { %v2377_v35 = vpop.f32.mrf.mxu1 }
 0x13f   :  { %v4593_v39 = vadd.f32 %v2377_v35, %v2113_v33  ;;  %v2115_v41 = vpop.f32.mrf.mxu0  ;;  %v190_v33 = vld [vmem:[%s5191_s0 + $0x1d0] sm:$0xff] }
 0x140   :  { %v2379_v42 = vpop.f32.mrf.mxu1 }
 0x141   :  { %v2118_v43 = vpop.f32.mrf.mxu0  ;;  %2605 = vmatmul.mubr.bf16.gmra.mxu0 %v3531_v34  ;;  %v194_v34 = vld [vmem:[%s5191_s0 + $0x1f0] sm:$0xff] }
 0x142   :  { %v2382_v44 = vpop.f32.mrf.mxu1  ;;  %2869 = vmatmul.mubr.bf16.gmra.mxu1 %v3533_v36  ;;  %2612 = vmatprep.mubr.bf16.mxu0 %v3540_v38  ;;  %v191_v36 = vld [vmem:[%s5191_s0 + $0x1d8] sm:$0xff] }
 0x143   :  { %v4595_v46 = vadd.f32 %v2382_v44, %v2118_v43  ;;  %v2120_v47 = vpop.f32.mrf.mxu0  ;;  %2876 = vmatprep.mubr.bf16.mxu1 %v3542_v0  ;;  %v195_v38 = vld [vmem:[%s5191_s0 + $0x1f8] sm:$0xff]  ;;  %v3555_v0 = vcombine.low %v182_v9, %v186_v10  ;;  %v3557_v43 = vcombine.low %v183_v12, %v187_v13  ;;  %v3564_v44 = vcombine.high %v190_v33, %v194_v34 }
 0x144   :  { %v2384_v51 = vpop.f32.mrf.mxu1  ;;  %v3566_v50 = vcombine.high %v191_v36, %v195_v38 }
 0x145   :  { %v2121_v55 = vpop.f32.mrf.mxu0 }
 0x146   :  { %v2385_v57 = vpop.f32.mrf.mxu1 }
 0x147   :  { %v4609_v61 = vadd.f32 %v2385_v57, %v2121_v55  ;;  %v2123_v62 = vpop.f32.mrf.mxu0  ;;  %v198_v57 = vld [vmem:[%s5191_s0 + $0x210] sm:$0xff] }
 0x148   :  { %v2387_v2 = vpop.f32.mrf.mxu1  ;;  %v199_v62 = vld [vmem:[%s5191_s0 + $0x218] sm:$0xff] }
 0x149   :  { %v2126_v4 = vpop.f32.mrf.mxu0  ;;  %2613 = vmatmul.mubr.bf16.gmra.mxu0 %v3539_v56 }
 0x14a   :  { %v2390_v5 = vpop.f32.mrf.mxu1  ;;  %2877 = vmatmul.mubr.bf16.gmra.mxu1 %v3541_v58  ;;  %2620 = vmatprep.mubr.bf16.mxu0 %v3548_v60  ;;  %v202_v58 = vld [vmem:[%s5191_s0 + $0x230] sm:$0xff] }
 0x14b   :  { %v4611_v6 = vadd.f32 %v2390_v5, %v2126_v4  ;;  %v2128_v8 = vpop.f32.mrf.mxu0  ;;  %2884 = vmatprep.mubr.bf16.mxu1 %v3550_v63  ;;  %v203_v63 = vld [vmem:[%s5191_s0 + $0x238] sm:$0xff]  ;;  %v3563_v4 = vcombine.low %v190_v33, %v194_v34  ;;  %v3572_v9 = vcombine.high %v198_v57, %v202_v58 }
 0x14c   :  { %v2392_v11 = vpop.f32.mrf.mxu1  ;;  %v3565_v8 = vcombine.low %v191_v36, %v195_v38  ;;  %v3574_v12 = vcombine.high %v199_v62, %v203_v63  ;;  %v3573_v34 = vcombine.low %v199_v62, %v203_v63 }
 0x14d   :  { %v2129_v14 = vpop.f32.mrf.mxu0 }
 0x14e   :  { %v2393_v17 = vpop.f32.mrf.mxu1 }
 0x14f   :  { %v4625_v22 = vadd.f32 %v2393_v17, %v2129_v14  ;;  %v2131_v23 = vpop.f32.mrf.mxu0 }
 0x150   :  { %v2395_v27 = vpop.f32.mrf.mxu1  ;;  %v210_v23 = vld [vmem:[%s5191_s0 + $0x270] sm:$0xff] }
 0x151   :  { %v2134_v28 = vpop.f32.mrf.mxu0  ;;  %2621 = vmatmul.mubr.bf16.gmra.mxu0 %v3547_v15  ;;  %v207_v27 = vld [vmem:[%s5191_s0 + $0x258] sm:$0xff] }
 0x152   :  { %v2398_v29 = vpop.f32.mrf.mxu1  ;;  %2885 = vmatmul.mubr.bf16.gmra.mxu1 %v3549_v18  ;;  %2628 = vmatprep.mubr.bf16.mxu0 %v3556_v21  ;;  %v206_v21 = vld [vmem:[%s5191_s0 + $0x250] sm:$0xff] }
 0x153   :  { %v4627_v30 = vadd.f32 %v2398_v29, %v2134_v28  ;;  %v2136_v32 = vpop.f32.mrf.mxu0  ;;  %2892 = vmatprep.mubr.bf16.mxu1 %v3558_v25  ;;  %v211_v28 = vld [vmem:[%s5191_s0 + $0x278] sm:$0xff] }
 0x154   :  { %v2400_v35 = vpop.f32.mrf.mxu1  ;;  %v3571_v32 = vcombine.low %v198_v57, %v202_v58  ;;  %v3579_v58 = vcombine.low %v206_v21, %v210_v23  ;;  %v3581_v62 = vcombine.low %v207_v27, %v211_v28 }
 0x155   :  { %v2137_v41 = vpop.f32.mrf.mxu0  ;;  %v3580_v35 = vcombine.high %v206_v21, %v210_v23  ;;  %v223_v21 = vld [vmem:[%s5191_s0 + $0x2d8] sm:$0xff] }
 0x156   :  { %v2401_v42 = vpop.f32.mrf.mxu1  ;;  %v227_v23 = vld [vmem:[%s5191_s0 + $0x2f8] sm:$0xff] }
 0x157   :  { %v4641_v47 = vadd.f32 %v2401_v42, %v2137_v41  ;;  %v2139_v49 = vpop.f32.mrf.mxu0  ;;  %v3582_v41 = vcombine.high %v207_v27, %v211_v28 }
 0x158   :  { %v2403_v51 = vpop.f32.mrf.mxu1 }
 0x159   :  { %v2142_v52 = vpop.f32.mrf.mxu0  ;;  %2629 = vmatmul.mubr.bf16.gmra.mxu0 %v3555_v0  ;;  %v218_v51 = vld [vmem:[%s5191_s0 + $0x2b0] sm:$0xff] }
 0x15a   :  { %v2406_v53 = vpop.f32.mrf.mxu1  ;;  %2893 = vmatmul.mubr.bf16.gmra.mxu1 %v3557_v43  ;;  %2636 = vmatprep.mubr.bf16.mxu0 %v3564_v44 }
 0x15b   :  { %v4643_v55 = vadd.f32 %v2406_v53, %v2142_v52  ;;  %v2144_v56 = vpop.f32.mrf.mxu0  ;;  %2900 = vmatprep.mubr.bf16.mxu1 %v3566_v50  ;;  %v214_v50 = vld [vmem:[%s5191_s0 + $0x290] sm:$0xff]  ;;  %v215_v53 = vld [vmem:[%s5191_s0 + $0x298] sm:$0xff] }
 0x15c   :  { %v2408_v60 = vpop.f32.mrf.mxu1  ;;  %v219_v56 = vld [vmem:[%s5191_s0 + $0x2b8] sm:$0xff]  ;;  %v3588_v63 = vcombine.high %v214_v50, %v218_v51  ;;  %v3587_v27 = vcombine.low %v214_v50, %v218_v51  ;;  %v234_v50 = vld [vmem:[%s5191_s0 + $0x330] sm:$0xff] }
 0x15d   :  { %v2145_v2 = vpop.f32.mrf.mxu0 }
 0x15e   :  { %v2409_v5 = vpop.f32.mrf.mxu1 }
 0x15f   :  { %v4657_v10 = vadd.f32 %v2409_v5, %v2145_v2  ;;  %v2147_v11 = vpop.f32.mrf.mxu0  ;;  %v3590_v5 = vcombine.high %v215_v53, %v219_v56 }
 0x160   :  { %v2411_v13 = vpop.f32.mrf.mxu1 }
 0x161   :  { %v2150_v14 = vpop.f32.mrf.mxu0  ;;  %2637 = vmatmul.mubr.bf16.gmra.mxu0 %v3563_v4 }
 0x162   :  { %v2414_v15 = vpop.f32.mrf.mxu1  ;;  %2901 = vmatmul.mubr.bf16.gmra.mxu1 %v3565_v8  ;;  %2644 = vmatprep.mubr.bf16.mxu0 %v3572_v9 }
 0x163   :  { %v4659_v17 = vadd.f32 %v2414_v15, %v2150_v14  ;;  %v2152_v18 = vpop.f32.mrf.mxu0  ;;  %2908 = vmatprep.mubr.bf16.mxu1 %v3574_v12  ;;  %v222_v14 = vld [vmem:[%s5191_s0 + $0x2d0] sm:$0xff] }
 0x164   :  { %v2416_v25 = vpop.f32.mrf.mxu1  ;;  %v226_v15 = vld [vmem:[%s5191_s0 + $0x2f0] sm:$0xff] }
 0x165   :  { %v2153_v29 = vpop.f32.mrf.mxu0 }
 0x166   :  { %v2417_v33 = vpop.f32.mrf.mxu1 }
 0x167   :  { %v4673_v36 = vadd.f32 %v2417_v33, %v2153_v29  ;;  %v2155_v38 = vpop.f32.mrf.mxu0  ;;  %v3589_v29 = vcombine.low %v215_v53, %v219_v56  ;;  %v235_v53 = vld [vmem:[%s5191_s0 + $0x338] sm:$0xff] }
 0x168   :  { %v2419_v0 = vpop.f32.mrf.mxu1 }
 0x169   :  { %v2158_v42 = vpop.f32.mrf.mxu0  ;;  %2645 = vmatmul.mubr.bf16.gmra.mxu0 %v3571_v32  ;;  %v3596_v32 = vcombine.high %v222_v14, %v226_v15 }
 0x16a   :  { %v2422_v43 = vpop.f32.mrf.mxu1  ;;  %2909 = vmatmul.mubr.bf16.gmra.mxu1 %v3573_v34  ;;  %2652 = vmatprep.mubr.bf16.mxu0 %v3580_v35  ;;  %v3598_v35 = vcombine.high %v223_v21, %v227_v23 }
 0x16b   :  { %v4675_v44 = vadd.f32 %v2422_v43, %v2158_v42  ;;  %v2160_v49 = vpop.f32.mrf.mxu0  ;;  %2916 = vmatprep.mubr.bf16.mxu1 %v3582_v41 }
 0x16c   :  { %v2424_v52 = vpop.f32.mrf.mxu1  ;;  %v230_v49 = vld [vmem:[%s5191_s0 + $0x310] sm:$0xff] }
 0x16d   :  { %v2161_v57 = vpop.f32.mrf.mxu0  ;;  %v231_v52 = vld [vmem:[%s5191_s0 + $0x318] sm:$0xff] }
 0x16e   :  { %v2425_v60 = vpop.f32.mrf.mxu1 }
 0x16f   :  { %v4689_v2 = vadd.f32 %v2425_v60, %v2161_v57  ;;  %v2163_v4 = vpop.f32.mrf.mxu0  ;;  %v3595_v57 = vcombine.low %v222_v14, %v226_v15  ;;  %v3597_v60 = vcombine.low %v223_v21, %v227_v23  ;;  %v238_v14 = vld [vmem:[%s5191_s0 + $0x350] sm:$0xff]  ;;  %v239_v23 = vld [vmem:[%s5191_s0 + $0x358] sm:$0xff] }
 0x170   :  { %v2427_v8 = vpop.f32.mrf.mxu1  ;;  %v242_v15 = vld [vmem:[%s5191_s0 + $0x370] sm:$0xff] }
 0x171   :  { %v2166_v9 = vpop.f32.mrf.mxu0  ;;  %2653 = vmatmul.mubr.bf16.gmra.mxu0 %v3579_v58 }
 0x172   :  { %v2430_v11 = vpop.f32.mrf.mxu1  ;;  %2917 = vmatmul.mubr.bf16.gmra.mxu1 %v3581_v62  ;;  %2660 = vmatprep.mubr.bf16.mxu0 %v3588_v63  ;;  %v3604_v62 = vcombine.high %v230_v49, %v234_v50 }
 0x173   :  { %v4691_v12 = vadd.f32 %v2430_v11, %v2166_v9  ;;  %v2168_v13 = vpop.f32.mrf.mxu0  ;;  %2924 = vmatprep.mubr.bf16.mxu1 %v3590_v5  ;;  %v3606_v5 = vcombine.high %v231_v52, %v235_v53 }
 0x174   :  { %v2432_v18 = vpop.f32.mrf.mxu1 }
 0x175   :  { %v2169_v25 = vpop.f32.mrf.mxu0 }
 0x176   :  { %v2433_v28 = vpop.f32.mrf.mxu1 }
 0x177   :  { %v4705_v33 = vadd.f32 %v2433_v28, %v2169_v25  ;;  %v2171_v34 = vpop.f32.mrf.mxu0  ;;  %v243_v25 = vld [vmem:[%s5191_s0 + $0x378] sm:$0xff]  ;;  %v3603_v28 = vcombine.low %v230_v49, %v234_v50  ;;  %v246_v49 = vld [vmem:[%s5191_s0 + $0x390] sm:$0xff] }
 0x178   :  { %v2435_v38 = vpop.f32.mrf.mxu1  ;;  %v3612_v34 = vcombine.high %v238_v14, %v242_v15  ;;  %v250_v50 = vld [vmem:[%s5191_s0 + $0x3b0] sm:$0xff] }
 0x179   :  { %v2174_v41 = vpop.f32.mrf.mxu0  ;;  %2661 = vmatmul.mubr.bf16.gmra.mxu0 %v3587_v27 }
 0x17a   :  { %v2438_v0 = vpop.f32.mrf.mxu1  ;;  %2925 = vmatmul.mubr.bf16.gmra.mxu1 %v3589_v29  ;;  %2668 = vmatprep.mubr.bf16.mxu0 %v3596_v32  ;;  %v3605_v32 = vcombine.low %v231_v52, %v235_v53  ;;  %v247_v53 = vld [vmem:[%s5191_s0 + $0x398] sm:$0xff] }
 0x17b   :  { %v4707_v42 = vadd.f32 %v2438_v0, %v2174_v41  ;;  %v2176_v43 = vpop.f32.mrf.mxu0  ;;  %2932 = vmatprep.mubr.bf16.mxu1 %v3598_v35  ;;  %v3614_v41 = vcombine.high %v239_v23, %v243_v25 }
 0x17c   :  { %v2440_v51 = vpop.f32.mrf.mxu1 }
 0x17d   :  { %v2177_v56 = vpop.f32.mrf.mxu0 }
 0x17e   :  { %v2441_v58 = vpop.f32.mrf.mxu1 }
 0x17f   :  { %v4721_v63 = vadd.f32 %v2441_v58, %v2177_v56  ;;  %v2179_v4 = vpop.f32.mrf.mxu0  ;;  %v251_v58 = vld [vmem:[%s5191_s0 + $0x3b8] sm:$0xff] }
 0x180   :  { %v2443_v8 = vpop.f32.mrf.mxu1 }
 0x181   :  { %v2182_v9 = vpop.f32.mrf.mxu0  ;;  %2669 = vmatmul.mubr.bf16.gmra.mxu0 %v3595_v57  ;;  %v3620_v8 = vcombine.high %v246_v49, %v250_v50 }
 0x182   :  { %v2446_v11 = vpop.f32.mrf.mxu1  ;;  %2933 = vmatmul.mubr.bf16.gmra.mxu1 %v3597_v60  ;;  %2676 = vmatprep.mubr.bf16.mxu0 %v3604_v62  ;;  %v3611_v62 = vcombine.low %v238_v14, %v242_v15  ;;  %v254_v14 = vld [vmem:[%s5191_s0 + $0x3d0] sm:$0xff] }
 0x183   :  { %v4723_v13 = vadd.f32 %v2446_v11, %v2182_v9  ;;  %v2184_v18 = vpop.f32.mrf.mxu0  ;;  %2940 = vmatprep.mubr.bf16.mxu1 %v3606_v5  ;;  %v3613_v5 = vcombine.low %v239_v23, %v243_v25  ;;  %v258_v15 = vld [vmem:[%s5191_s0 + $0x3f0] sm:$0xff]  ;;  %v255_v25 = vld [vmem:[%s5191_s0 + $0x3d8] sm:$0xff] }
 0x184   :  { %v2448_v21 = vpop.f32.mrf.mxu1  ;;  %v3622_v18 = vcombine.high %v247_v53, %v251_v58 }
 0x185   :  { %v2185_v27 = vpop.f32.mrf.mxu0 }
 0x186   :  { %v2449_v29 = vpop.f32.mrf.mxu1 }
 0x187   :  { %v4737_v35 = vadd.f32 %v2449_v29, %v2185_v27  ;;  %v2187_v38 = vpop.f32.mrf.mxu0 }
 0x188   :  { %v2451_v0 = vpop.f32.mrf.mxu1 }
 0x189   :  { %v2190_v43 = vpop.f32.mrf.mxu0  ;;  %2677 = vmatmul.mubr.bf16.gmra.mxu0 %v3603_v28 }
 0x18a   :  { %v2454_v51 = vpop.f32.mrf.mxu1  ;;  %2941 = vmatmul.mubr.bf16.gmra.mxu1 %v3605_v32  ;;  %2684 = vmatprep.mubr.bf16.mxu0 %v3612_v34  ;;  %v259_v34 = vld [vmem:[%s5191_s0 + $0x3f8] sm:$0xff] }
 0x18b   :  { %v4739_v56 = vadd.f32 %v2454_v51, %v2190_v43  ;;  %v2192_v57 = vpop.f32.mrf.mxu0  ;;  %2948 = vmatprep.mubr.bf16.mxu1 %v3614_v41  ;;  %v3619_v41 = vcombine.low %v246_v49, %v250_v50  ;;  %v3621_v43 = vcombine.low %v247_v53, %v251_v58  ;;  %v3628_v51 = vcombine.high %v254_v14, %v258_v15  ;;  %v262_v49 = vld [vmem:[%s5191_s0 + $0x410] sm:$0xff]  ;;  %v263_v58 = vld [vmem:[%s5191_s0 + $0x418] sm:$0xff] }
 0x18c   :  { %v2456_v52 = vpop.f32.mrf.mxu1  ;;  %v266_v50 = vld [vmem:[%s5191_s0 + $0x430] sm:$0xff] }
 0x18d   :  { %v2193_v60 = vpop.f32.mrf.mxu0 }
 0x18e   :  { %v2457_v4 = vpop.f32.mrf.mxu1 }
 0x18f   :  { %v4753_v9 = vadd.f32 %v2457_v4, %v2193_v60  ;;  %v2195_v11 = vpop.f32.mrf.mxu0  ;;  %v3630_v60 = vcombine.high %v255_v25, %v259_v34 }
 0x190   :  { %v2459_v21 = vpop.f32.mrf.mxu1 }
 0x191   :  { %v2198_v27 = vpop.f32.mrf.mxu0  ;;  %2685 = vmatmul.mubr.bf16.gmra.mxu0 %v3611_v62 }
 0x192   :  { %v2462_v28 = vpop.f32.mrf.mxu1  ;;  %2949 = vmatmul.mubr.bf16.gmra.mxu1 %v3613_v5  ;;  %2692 = vmatprep.mubr.bf16.mxu0 %v3620_v8 }
 0x193   :  { %v4755_v29 = vadd.f32 %v2462_v28, %v2198_v27  ;;  %v2200_v32 = vpop.f32.mrf.mxu0  ;;  %2956 = vmatprep.mubr.bf16.mxu1 %v3622_v18  ;;  %v267_v18 = vld [vmem:[%s5191_s0 + $0x438] sm:$0xff]  ;;  %v3627_v27 = vcombine.low %v254_v14, %v258_v15  ;;  %v270_v14 = vld [vmem:[%s5191_s0 + $0x450] sm:$0xff] }
 0x194   :  { %v2464_v23 = vpop.f32.mrf.mxu1  ;;  %v3629_v32 = vcombine.low %v255_v25, %v259_v34  ;;  %v274_v15 = vld [vmem:[%s5191_s0 + $0x470] sm:$0xff]  ;;  %v271_v34 = vld [vmem:[%s5191_s0 + $0x458] sm:$0xff] }
 0x195   :  { %v2201_v38 = vpop.f32.mrf.mxu0  ;;  %v3636_v23 = vcombine.high %v262_v49, %v266_v50 }
 0x196   :  { %v2465_v0 = vpop.f32.mrf.mxu1 }
 0x197   :  { %v4769_v57 = vadd.f32 %v2465_v0, %v2201_v38  ;;  %v2203_v52 = vpop.f32.mrf.mxu0  ;;  %v3638_v0 = vcombine.high %v263_v58, %v267_v18 }
 0x198   :  { %v2467_v62 = vpop.f32.mrf.mxu1 }
 0x199   :  { %v2206_v4 = vpop.f32.mrf.mxu0  ;;  %2693 = vmatmul.mubr.bf16.gmra.mxu0 %v3619_v41 }
 0x19a   :  { %v2470_v5 = vpop.f32.mrf.mxu1  ;;  %2957 = vmatmul.mubr.bf16.gmra.mxu1 %v3621_v43  ;;  %2700 = vmatprep.mubr.bf16.mxu0 %v3628_v51 }
 0x19b   :  { %v4771_v8 = vadd.f32 %v2470_v5, %v2206_v4  ;;  %v2208_v11 = vpop.f32.mrf.mxu0  ;;  %2964 = vmatprep.mubr.bf16.mxu1 %v3630_v60  ;;  %v275_v4 = vld [vmem:[%s5191_s0 + $0x478] sm:$0xff] }
 0x19c   :  { %v2472_v53 = vpop.f32.mrf.mxu1  ;;  %v3635_v11 = vcombine.low %v262_v49, %v266_v50  ;;  %v278_v49 = vld [vmem:[%s5191_s0 + $0x490] sm:$0xff] }
 0x19d   :  { %v2209_v21 = vpop.f32.mrf.mxu0  ;;  %v282_v50 = vld [vmem:[%s5191_s0 + $0x4b0] sm:$0xff] }
 0x19e   :  { %v2473_v28 = vpop.f32.mrf.mxu1 }
 0x19f   :  { %v4785_v38 = vadd.f32 %v2473_v28, %v2209_v21  ;;  %v2211_v41 = vpop.f32.mrf.mxu0  ;;  %v3637_v21 = vcombine.low %v263_v58, %v267_v18  ;;  %v279_v18 = vld [vmem:[%s5191_s0 + $0x498] sm:$0xff] }
 0x1a0   :  { %v2475_v43 = vpop.f32.mrf.mxu1 }
 0x1a1   :  { %v2214_v51 = vpop.f32.mrf.mxu0  ;;  %2701 = vmatmul.mubr.bf16.gmra.mxu0 %v3627_v27  ;;  %v3644_v27 = vcombine.high %v270_v14, %v274_v15 }
 0x1a2   :  { %v2478_v52 = vpop.f32.mrf.mxu1  ;;  %2965 = vmatmul.mubr.bf16.gmra.mxu1 %v3629_v32  ;;  %2708 = vmatprep.mubr.bf16.mxu0 %v3636_v23  ;;  %v3646_v23 = vcombine.high %v271_v34, %v275_v4 }
 0x1a3   :  { %v4787_v60 = vadd.f32 %v2478_v52, %v2214_v51  ;;  %v2216_v62 = vpop.f32.mrf.mxu0  ;;  %2972 = vmatprep.mubr.bf16.mxu1 %v3638_v0 }
 0x1a4   :  { %v2480_v25 = vpop.f32.mrf.mxu1  ;;  %v283_v62 = vld [vmem:[%s5191_s0 + $0x4b8] sm:$0xff] }
 0x1a5   :  { %v2217_v5 = vpop.f32.mrf.mxu0 }
 0x1a6   :  { %v2481_v53 = vpop.f32.mrf.mxu1 }
 0x1a7   :  { %v4801_v28 = vadd.f32 %v2481_v53, %v2217_v5  ;;  %v2219_v32 = vpop.f32.mrf.mxu0  ;;  %v3643_v5 = vcombine.low %v270_v14, %v274_v15  ;;  %v3645_v53 = vcombine.low %v271_v34, %v275_v4  ;;  %v286_v14 = vld [vmem:[%s5191_s0 + $0x4d0] sm:$0xff]  ;;  %v287_v4 = vld [vmem:[%s5191_s0 + $0x4d8] sm:$0xff] }
 0x1a8   :  { %v2483_v41 = vpop.f32.mrf.mxu1  ;;  %v290_v15 = vld [vmem:[%s5191_s0 + $0x4f0] sm:$0xff] }
 0x1a9   :  { %v2222_v0 = vpop.f32.mrf.mxu0  ;;  %2709 = vmatmul.mubr.bf16.gmra.mxu0 %v3635_v11 }
 0x1aa   :  { %v2486_v43 = vpop.f32.mrf.mxu1  ;;  %2973 = vmatmul.mubr.bf16.gmra.mxu1 %v3637_v21  ;;  %2716 = vmatprep.mubr.bf16.mxu0 %v3644_v27  ;;  %v3652_v21 = vcombine.high %v278_v49, %v282_v50 }
 0x1ab   :  { %v4803_v51 = vadd.f32 %v2486_v43, %v2222_v0  ;;  %v2224_v52 = vpop.f32.mrf.mxu0  ;;  %2980 = vmatprep.mubr.bf16.mxu1 %v3646_v23  ;;  %v3654_v23 = vcombine.high %v279_v18, %v283_v62 }
 0x1ac   :  { %v2488_v58 = vpop.f32.mrf.mxu1 }
 0x1ad   :  { %5194 = vst [vmem:[#allocation3_spill] sm:$0xff] %v4803_v51  ;;  %v2225_v25 = vpop.f32.mrf.mxu0 }
 0x1ae   :  { %v2489_v11 = vpop.f32.mrf.mxu1 }
 0x1af   :  { %v4817_v27 = vadd.f32 %v2489_v11, %v2225_v25  ;;  %v2227_v32 = vpop.f32.mrf.mxu0  ;;  %v291_v25 = vld [vmem:[%s5191_s0 + $0x4f8] sm:$0xff]  ;;  %v3651_v11 = vcombine.low %v278_v49, %v282_v50  ;;  %v294_v49 = vld [vmem:[%s5191_s0 + $0x510] sm:$0xff] }
 0x1b0   :  { %v2491_v41 = vpop.f32.mrf.mxu1  ;;  %v3660_v32 = vcombine.high %v286_v14, %v290_v15  ;;  %v298_v50 = vld [vmem:[%s5191_s0 + $0x530] sm:$0xff] }
 0x1b1   :  { %5195 = vst [vmem:[#allocation4_spill] sm:$0xff] %v4817_v27  ;;  %v2230_v0 = vpop.f32.mrf.mxu0  ;;  %2717 = vmatmul.mubr.bf16.gmra.mxu0 %v3643_v5 }
 0x1b2   :  { %v2494_v43 = vpop.f32.mrf.mxu1  ;;  %2981 = vmatmul.mubr.bf16.gmra.mxu1 %v3645_v53  ;;  %2724 = vmatprep.mubr.bf16.mxu0 %v3652_v21  ;;  %v3653_v21 = vcombine.low %v279_v18, %v283_v62  ;;  %v295_v62 = vld [vmem:[%s5191_s0 + $0x518] sm:$0xff] }
 0x1b3   :  { %v4819_v52 = vadd.f32 %v2494_v43, %v2230_v0  ;;  %v2232_v58 = vpop.f32.mrf.mxu0  ;;  %2988 = vmatprep.mubr.bf16.mxu1 %v3654_v23  ;;  %v3662_v0 = vcombine.high %v287_v4, %v291_v25 }
 0x1b4   :  { %v2496_v34 = vpop.f32.mrf.mxu1 }
 0x1b5   :  { %5196 = vst [vmem:[#allocation5_spill] sm:$0xff] %v4819_v52  ;;  %v2233_v5 = vpop.f32.mrf.mxu0 }
 0x1b6   :  { %v2497_v53 = vpop.f32.mrf.mxu1 }
 0x1b7   :  { %v4833_v23 = vadd.f32 %v2497_v53, %v2233_v5  ;;  %v2235_v41 = vpop.f32.mrf.mxu0  ;;  %v299_v5 = vld [vmem:[%s5191_s0 + $0x538] sm:$0xff] }
 0x1b8   :  { %v2499_v43 = vpop.f32.mrf.mxu1 }
 0x1b9   :  { %5197 = vst [vmem:[#allocation6_spill] sm:$0xff] %v4833_v23  ;;  %v2238_v58 = vpop.f32.mrf.mxu0  ;;  %2725 = vmatmul.mubr.bf16.gmra.mxu0 %v3651_v11  ;;  %v3670_v43 = vcombine.high %v295_v62, %v299_v5 }
 0x1ba   :  { %v2502_v34 = vpop.f32.mrf.mxu1  ;;  %2989 = vmatmul.mubr.bf16.gmra.mxu1 %v3653_v21  ;;  %2732 = vmatprep.mubr.bf16.mxu0 %v3660_v32  ;;  %v3661_v21 = vcombine.low %v287_v4, %v291_v25  ;;  %v3668_v32 = vcombine.high %v294_v49, %v298_v50  ;;  %v303_v25 = vld [vmem:[%s5191_s0 + $0x558] sm:$0xff] }
 0x1bb   :  { %v4835_v52 = vadd.f32 %v2502_v34, %v2238_v58  ;;  %v2240_v27 = vpop.f32.mrf.mxu0  ;;  %2996 = vmatprep.mubr.bf16.mxu1 %v3662_v0 }
 0x1bc   :  { %v2504_v18 = vpop.f32.mrf.mxu1  ;;  %v3659_v27 = vcombine.low %v286_v14, %v290_v15  ;;  %v302_v14 = vld [vmem:[%s5191_s0 + $0x550] sm:$0xff] }
 0x1bd   :  { %5198 = vst [vmem:[#allocation7_spill] sm:$0xff] %v4835_v52  ;;  %v2241_v11 = vpop.f32.mrf.mxu0  ;;  %v306_v15 = vld [vmem:[%s5191_s0 + $0x570] sm:$0xff] }
 0x1be   :  { %v2505_v53 = vpop.f32.mrf.mxu1 }
 0x1bf   :  { %v4849_v41 = vadd.f32 %v2505_v53, %v2241_v11  ;;  %v2243_v0 = vpop.f32.mrf.mxu0  ;;  %v307_v11 = vld [vmem:[%s5191_s0 + $0x578] sm:$0xff] }
 0x1c0   :  { %v2507_v58 = vpop.f32.mrf.mxu1 }
 0x1c1   :  { %5199 = vst [vmem:[#allocation8_spill] sm:$0xff] %v4849_v41  ;;  %v2246_v34 = vpop.f32.mrf.mxu0  ;;  %2733 = vmatmul.mubr.bf16.gmra.mxu0 %v3659_v27  ;;  %v3678_v58 = vcombine.high %v303_v25, %v307_v11 }
 0x1c2   :  { %v2510_v18 = vpop.f32.mrf.mxu1  ;;  %2997 = vmatmul.mubr.bf16.gmra.mxu1 %v3661_v21  ;;  %2740 = vmatprep.mubr.bf16.mxu0 %v3668_v32  ;;  %v3669_v21 = vcombine.low %v295_v62, %v299_v5  ;;  %v3676_v32 = vcombine.high %v302_v14, %v306_v15  ;;  %v311_v5 = vld [vmem:[%s5191_s0 + $0x598] sm:$0xff] }
 0x1c3   :  { %v4851_v52 = vadd.f32 %v2510_v18, %v2246_v34  ;;  %v2248_v23 = vpop.f32.mrf.mxu0  ;;  %3004 = vmatprep.mubr.bf16.mxu1 %v3670_v43 }
 0x1c4   :  { %v2512_v4 = vpop.f32.mrf.mxu1  ;;  %v3667_v23 = vcombine.low %v294_v49, %v298_v50  ;;  %v310_v49 = vld [vmem:[%s5191_s0 + $0x590] sm:$0xff] }
 0x1c5   :  { %5200 = vst [vmem:[#allocation9_spill] sm:$0xff] %v4851_v52  ;;  %v2249_v27 = vpop.f32.mrf.mxu0  ;;  %v314_v50 = vld [vmem:[%s5191_s0 + $0x5b0] sm:$0xff] }
 0x1c6   :  { %v2513_v53 = vpop.f32.mrf.mxu1 }
 0x1c7   :  { %v4865_v0 = vadd.f32 %v2513_v53, %v2249_v27  ;;  %v2251_v43 = vpop.f32.mrf.mxu0  ;;  %v315_v27 = vld [vmem:[%s5191_s0 + $0x5b8] sm:$0xff] }
 0x1c8   :  { %v2515_v34 = vpop.f32.mrf.mxu1 }
 0x1c9   :  { %5201 = vst [vmem:[#allocation10_spill] sm:$0xff] %v4865_v0  ;;  %v2254_v18 = vpop.f32.mrf.mxu0  ;;  %2741 = vmatmul.mubr.bf16.gmra.mxu0 %v3667_v23  ;;  %v3686_v34 = vcombine.high %v311_v5, %v315_v27 }
 0x1ca   :  { %v2518_v4 = vpop.f32.mrf.mxu1  ;;  %3005 = vmatmul.mubr.bf16.gmra.mxu1 %v3669_v21  ;;  %2748 = vmatprep.mubr.bf16.mxu0 %v3676_v32  ;;  %v3677_v21 = vcombine.low %v303_v25, %v307_v11  ;;  %v3684_v32 = vcombine.high %v310_v49, %v314_v50  ;;  %v319_v11 = vld [vmem:[%s5191_s0 + $0x5d8] sm:$0xff] }
 0x1cb   :  { %v4867_v52 = vadd.f32 %v2518_v4, %v2254_v18  ;;  %v2256_v41 = vpop.f32.mrf.mxu0  ;;  %3012 = vmatprep.mubr.bf16.mxu1 %v3678_v58 }
 0x1cc   :  { %v2520_v62 = vpop.f32.mrf.mxu1  ;;  %v3675_v41 = vcombine.low %v302_v14, %v306_v15  ;;  %v318_v14 = vld [vmem:[%s5191_s0 + $0x5d0] sm:$0xff] }
 0x1cd   :  { %5202 = vst [vmem:[#allocation11_spill] sm:$0xff] %v4867_v52  ;;  %v2257_v23 = vpop.f32.mrf.mxu0  ;;  %v322_v15 = vld [vmem:[%s5191_s0 + $0x5f0] sm:$0xff] }
 0x1ce   :  { %v2521_v53 = vpop.f32.mrf.mxu1 }
 0x1cf   :  { %v4881_v43 = vadd.f32 %v2521_v53, %v2257_v23  ;;  %v2259_v58 = vpop.f32.mrf.mxu0  ;;  %v323_v23 = vld [vmem:[%s5191_s0 + $0x5f8] sm:$0xff] }
 0x1d0   :  { %v2523_v18 = vpop.f32.mrf.mxu1 }
 0x1d1   :  { %5203 = vst [vmem:[#allocation12_spill] sm:$0xff] %v4881_v43  ;;  %v2262_v4 = vpop.f32.mrf.mxu0  ;;  %2749 = vmatmul.mubr.bf16.gmra.mxu0 %v3675_v41  ;;  %v3694_v18 = vcombine.high %v319_v11, %v323_v23 }
 0x1d2   :  { %v2526_v62 = vpop.f32.mrf.mxu1  ;;  %3013 = vmatmul.mubr.bf16.gmra.mxu1 %v3677_v21  ;;  %2756 = vmatprep.mubr.bf16.mxu0 %v3684_v32  ;;  %v3685_v21 = vcombine.low %v311_v5, %v315_v27  ;;  %v3692_v32 = vcombine.high %v318_v14, %v322_v15  ;;  %v327_v27 = vld [vmem:[%s5191_s0 + $0x618] sm:$0xff] }
 0x1d3   :  { %v4883_v52 = vadd.f32 %v2526_v62, %v2262_v4  ;;  %v2264_v0 = vpop.f32.mrf.mxu0  ;;  %3020 = vmatprep.mubr.bf16.mxu1 %v3686_v34 }
 0x1d4   :  { %v2528_v25 = vpop.f32.mrf.mxu1  ;;  %v3683_v0 = vcombine.low %v310_v49, %v314_v50  ;;  %v326_v49 = vld [vmem:[%s5191_s0 + $0x610] sm:$0xff] }
 0x1d5   :  { %5204 = vst [vmem:[#allocation13_spill] sm:$0xff] %v4883_v52  ;;  %v2265_v41 = vpop.f32.mrf.mxu0  ;;  %v330_v50 = vld [vmem:[%s5191_s0 + $0x630] sm:$0xff] }
 0x1d6   :  { %v2529_v53 = vpop.f32.mrf.mxu1 }
 0x1d7   :  { %v4897_v58 = vadd.f32 %v2529_v53, %v2265_v41  ;;  %v2267_v34 = vpop.f32.mrf.mxu0  ;;  %v331_v41 = vld [vmem:[%s5191_s0 + $0x638] sm:$0xff] }
 0x1d8   :  { %v2531_v4 = vpop.f32.mrf.mxu1 }
 0x1d9   :  { %5205 = vst [vmem:[#allocation14_spill] sm:$0xff] %v4897_v58  ;;  %v2270_v62 = vpop.f32.mrf.mxu0  ;;  %2757 = vmatmul.mubr.bf16.gmra.mxu0 %v3683_v0  ;;  %v3702_v4 = vcombine.high %v327_v27, %v331_v41 }
 0x1da   :  { %v2534_v25 = vpop.f32.mrf.mxu1  ;;  %3021 = vmatmul.mubr.bf16.gmra.mxu1 %v3685_v21  ;;  %2764 = vmatprep.mubr.bf16.mxu0 %v3692_v32  ;;  %v3693_v21 = vcombine.low %v319_v11, %v323_v23  ;;  %v3700_v32 = vcombine.high %v326_v49, %v330_v50  ;;  %v335_v23 = vld [vmem:[%s5191_s0 + $0x658] sm:$0xff] }
 0x1db   :  { %v4899_v52 = vadd.f32 %v2534_v25, %v2270_v62  ;;  %v2272_v43 = vpop.f32.mrf.mxu0  ;;  %3028 = vmatprep.mubr.bf16.mxu1 %v3694_v18 }
 0x1dc   :  { %v2536_v5 = vpop.f32.mrf.mxu1  ;;  %v3691_v43 = vcombine.low %v318_v14, %v322_v15  ;;  %v334_v14 = vld [vmem:[%s5191_s0 + $0x650] sm:$0xff] }
 0x1dd   :  { %5206 = vst [vmem:[#allocation15_spill] sm:$0xff] %v4899_v52  ;;  %v2273_v0 = vpop.f32.mrf.mxu0  ;;  %v338_v15 = vld [vmem:[%s5191_s0 + $0x670] sm:$0xff] }
 0x1de   :  { %v2537_v53 = vpop.f32.mrf.mxu1 }
 0x1df   :  { %v4913_v34 = vadd.f32 %v2537_v53, %v2273_v0  ;;  %v2275_v18 = vpop.f32.mrf.mxu0  ;;  %v339_v0 = vld [vmem:[%s5191_s0 + $0x678] sm:$0xff] }
 0x1e0   :  { %v2539_v62 = vpop.f32.mrf.mxu1 }
 0x1e1   :  { %5207 = vst [vmem:[#allocation16_spill] sm:$0xff] %v4913_v34  ;;  %v2278_v25 = vpop.f32.mrf.mxu0  ;;  %2765 = vmatmul.mubr.bf16.gmra.mxu0 %v3691_v43 }
 0x1e2   :  { %v2542_v5 = vpop.f32.mrf.mxu1  ;;  %3029 = vmatmul.mubr.bf16.gmra.mxu1 %v3693_v21  ;;  %2772 = vmatprep.mubr.bf16.mxu0 %v3700_v32  ;;  %v3701_v21 = vcombine.low %v327_v27, %v331_v41  ;;  %v3708_v32 = vcombine.high %v334_v14, %v338_v15  ;;  %v343_v41 = vld [vmem:[%s5191_s0 + $0x698] sm:$0xff] }
 0x1e3   :  { %v4915_v52 = vadd.f32 %v2542_v5, %v2278_v25  ;;  %v2280_v58 = vpop.f32.mrf.mxu0  ;;  %3036 = vmatprep.mubr.bf16.mxu1 %v3702_v4  ;;  %v3710_v4 = vcombine.high %v335_v23, %v339_v0 }
 0x1e4   :  { %v2544_v11 = vpop.f32.mrf.mxu1  ;;  %v3699_v58 = vcombine.low %v326_v49, %v330_v50  ;;  %v346_v49 = vld [vmem:[%s5191_s0 + $0x6b0] sm:$0xff] }
 0x1e5   :  { %5208 = vst [vmem:[#allocation17_spill] sm:$0xff] %v4915_v52  ;;  %v2281_v43 = vpop.f32.mrf.mxu0 }
 0x1e6   :  { %v2545_v53 = vpop.f32.mrf.mxu1  ;;  %v342_v43 = vld [vmem:[%s5191_s0 + $0x690] sm:$0xff] }
 0x1e7   :  { %v2282_v18 = vpop.f32.mrf.mxu0 }
 0x1e8   :  { %v2546_v62 = vpop.f32.mrf.mxu1  ;;  %v3716_v18 = vcombine.high %v342_v43, %v346_v49 }
 0x1e9   :  { %v2582_v25 = vpop.f32.mrf.mxu0  ;;  %2773 = vmatmul.mubr.bf16.gmra.mxu0 %v3699_v58  ;;  %v3707_v58 = vcombine.low %v334_v14, %v338_v15 }
 0x1ea   :  { %v2583_v5 = vadd.f32 %v2582_v25, %v4473_v19  ;;  %v2846_v11 = vpop.f32.mrf.mxu1  ;;  %3037 = vmatmul.mubr.bf16.gmra.mxu1 %v3701_v21  ;;  %2780 = vmatprep.mubr.bf16.mxu0 %v3708_v32  ;;  %v347_v19 = vld [vmem:[%s5191_s0 + $0x6b8] sm:$0xff]  ;;  %v3709_v32 = vcombine.low %v335_v23, %v339_v0  ;;  %v350_v23 = vld [vmem:[%s5191_s0 + $0x6d0] sm:$0xff] }
 0x1eb   :  { %v2584_v52 = vpop.f32.mrf.mxu0  ;;  %3044 = vmatprep.mubr.bf16.mxu1 %v3710_v4  ;;  %v3718_v62 = vcombine.high %v343_v41, %v347_v19  ;;  %v354_v0 = vld [vmem:[%s5191_s0 + $0x6f0] sm:$0xff] }
 0x1ec   :  { %v2847_v50 = vadd.f32 %v2846_v11, %v2583_v5  ;;  %v2848_v27 = vpop.f32.mrf.mxu1 }
 0x1ed   :  { %v2585_v52 = vpop.f32.mrf.mxu0 }
 0x1ee   :  { %3250 = vst [vmem:[%s5192_s2] sm:$0xff] %v2847_v50  ;;  %v2586_v53 = vadd.f32 %v2585_v52, %v4487_v31  ;;  %v2849_v21 = vpop.f32.mrf.mxu1  ;;  %v3369_v11 = vmul.f32 %v2847_v50, %v2847_v50 }
 0x1ef   :  { %v2587_v4 = vpop.f32.mrf.mxu0 }
 0x1f0   :  { %v2850_v25 = vadd.f32 %v2849_v21, %v2586_v53  ;;  %v2851_v5 = vpop.f32.mrf.mxu1 }
 0x1f1   :  { %v2590_v27 = vpop.f32.mrf.mxu0  ;;  %2781 = vmatmul.mubr.bf16.gmra.mxu0 %v3707_v58 }
 0x1f2   :  { %3251 = vst [vmem:[%s5192_s2 + $0x8] sm:$0xff] %v2850_v25  ;;  %v3307_v14 = vadd.f32 %v2850_v25, %v2847_v50  ;;  %v3370_v15 = vmul.f32 %v2850_v25, %v2850_v25  ;;  %v2591_v34 = vadd.f32 %v2590_v27, %v4489_v37  ;;  %v2854_v51 = vpop.f32.mrf.mxu1  ;;  %3045 = vmatmul.mubr.bf16.gmra.mxu1 %v3709_v32  ;;  %v351_v37 = vld [vmem:[%s5191_s0 + $0x6d8] sm:$0xff] }
 0x1f3   :  { %2788 = vmatprep.mubr.bf16.mxu0 %v3716_v18  ;;  %v2592_v31 = vpop.f32.mrf.mxu0  ;;  %3052 = vmatprep.mubr.bf16.mxu1 %v3718_v62  ;;  %v355_v50 = vld [vmem:[%s5191_s0 + $0x6f8] sm:$0xff]  ;;  %v3715_v32 = vcombine.low %v342_v43, %v346_v49  ;;  %v3717_v18 = vcombine.low %v343_v41, %v347_v19  ;;  %v3724_v25 = vcombine.high %v350_v23, %v354_v0 }
 0x1f4   :  { %v3426_v52 = vadd.f32 %v3370_v15, %v3369_v11  ;;  %v2855_v58 = vadd.f32 %v2854_v51, %v2591_v34  ;;  %v2856_v53 = vpop.f32.mrf.mxu1  ;;  %v3726_v11 = vcombine.high %v351_v37, %v355_v50 }
 0x1f5   :  { %v2593_v21 = vpop.f32.mrf.mxu0 }
 0x1f6   :  { %3252 = vst [vmem:[%s5192_s2 + $0x10] sm:$0xff] %v2855_v58  ;;  %v3308_v4 = vadd.f32 %v3307_v14, %v2855_v58  ;;  %v3371_v62 = vmul.f32 %v2855_v58, %v2855_v58  ;;  %v2594_v51 = vadd.f32 %v2593_v21, %v4503_v48  ;;  %v2857_v34 = vpop.f32.mrf.mxu1  ;;  %v358_v14 = vld [vmem:[%s5191_s0 + $0x710] sm:$0xff] }
 0x1f7   :  { %v2595_v5 = vpop.f32.mrf.mxu0 }
 0x1f8   :  { %v3427_v27 = vadd.f32 %v3426_v52, %v3371_v62  ;;  %v2858_v15 = vadd.f32 %v2857_v34, %v2594_v51  ;;  %v2859_v31 = vpop.f32.mrf.mxu1  ;;  %v3723_v62 = vcombine.low %v350_v23, %v354_v0  ;;  %v3725_v51 = vcombine.low %v351_v37, %v355_v50 }
 0x1f9   :  { %v2598_v53 = vpop.f32.mrf.mxu0  ;;  %2789 = vmatmul.mubr.bf16.gmra.mxu0 %v3715_v32  ;;  %v359_v32 = vld [vmem:[%s5191_s0 + $0x718] sm:$0xff]  ;;  %v3732_v5 = vcombine.high %v358_v14, %v358_v14 }
 0x1fa   :  { %3253 = vst [vmem:[%s5192_s2 + $0x18] sm:$0xff] %v2858_v15  ;;  %v3309_v43 = vadd.f32 %v3308_v4, %v2858_v15  ;;  %v3372_v49 = vmul.f32 %v2858_v15, %v2858_v15  ;;  %v2599_v41 = vadd.f32 %v2598_v53, %v4505_v54  ;;  %v2862_v19 = vpop.f32.mrf.mxu1  ;;  %3053 = vmatmul.mubr.bf16.gmra.mxu1 %v3717_v18 }
 0x1fb   :  { %2796 = vmatprep.mubr.bf16.mxu0 %v3724_v25  ;;  %v2600_v48 = vpop.f32.mrf.mxu0  ;;  %3060 = vmatprep.mubr.bf16.mxu1 %v3726_v11 }
 0x1fc   :  { %v3428_v52 = vadd.f32 %v3427_v27, %v3372_v49  ;;  %v2863_v58 = vadd.f32 %v2862_v19, %v2599_v41  ;;  %v2864_v21 = vpop.f32.mrf.mxu1  ;;  %v3734_v27 = vcombine.high %v359_v32, %v359_v32 }
 0x1fd   :  { %v2601_v4 = vpop.f32.mrf.mxu0 }
 0x1fe   :  { %3254 = vst [vmem:[%s5192_s2 + $0x20] sm:$0xff] %v2863_v58  ;;  %v3310_v54 = vadd.f32 %v3309_v43, %v2863_v58  ;;  %v3373_v18 = vmul.f32 %v2863_v58, %v2863_v58  ;;  %v2602_v34 = vadd.f32 %v2601_v4, %v4513_v1  ;;  %v2865_v25 = vpop.f32.mrf.mxu1 }
 0x1ff   :  { %v2603_v11 = vpop.f32.mrf.mxu0 }
 0x200   :  { %v3429_v15 = vadd.f32 %v3428_v52, %v3373_v18  ;;  %v2866_v31 = vadd.f32 %v2865_v25, %v2602_v34  ;;  %v2867_v53 = vpop.f32.mrf.mxu1  ;;  %v3731_v52 = vcombine.low %v358_v14, %v358_v14 }
 0x201   :  { %v2606_v49 = vpop.f32.mrf.mxu0  ;;  %2797 = vmatmul.mubr.bf16.gmra.mxu0 %v3723_v62 }
 0x202   :  { %3255 = vst [vmem:[%s5192_s2 + $0x28] sm:$0xff] %v2866_v31  ;;  %v3311_v23 = vadd.f32 %v3310_v54, %v2866_v31  ;;  %v3374_v0 = vmul.f32 %v2866_v31, %v2866_v31  ;;  %v2607_v37 = vadd.f32 %v2606_v49, %v4515_v7  ;;  %v2870_v50 = vpop.f32.mrf.mxu1  ;;  %3061 = vmatmul.mubr.bf16.gmra.mxu1 %v3725_v51 }
 0x203   :  { %2804 = vmatprep.mubr.bf16.mxu0 %v3732_v5  ;;  %v2608_v1 = vpop.f32.mrf.mxu0  ;;  %3068 = vmatprep.mubr.bf16.mxu1 %v3734_v27  ;;  %v3733_v7 = vcombine.low %v359_v32, %v359_v32 }
 0x204   :  { %v3430_v43 = vadd.f32 %v3429_v15, %v3374_v0  ;;  %v2871_v41 = vadd.f32 %v2870_v50, %v2607_v37  ;;  %v2872_v19 = vpop.f32.mrf.mxu1 }
 0x205   :  { %v2609_v48 = vpop.f32.mrf.mxu0 }
 0x206   :  { %3256 = vst [vmem:[%s5192_s2 + $0x30] sm:$0xff] %v2871_v41  ;;  %v3312_v58 = vadd.f32 %v3311_v23, %v2871_v41  ;;  %v3375_v21 = vmul.f32 %v2871_v41, %v2871_v41  ;;  %v2610_v4 = vadd.f32 %v2609_v48, %v4529_v20  ;;  %v2873_v62 = vpop.f32.mrf.mxu1 }
 0x207   :  { %v2611_v54 = vpop.f32.mrf.mxu0 }
 0x208   :  { %v3431_v51 = vadd.f32 %v3430_v43, %v3375_v21  ;;  %v2874_v18 = vadd.f32 %v2873_v62, %v2610_v4  ;;  %v2875_v34 = vpop.f32.mrf.mxu1 }
 0x209   :  { %v2614_v25 = vpop.f32.mrf.mxu0  ;;  %2805 = vmatmul.mubr.bf16.gmra.mxu0 %v3731_v52 }
 0x20a   :  { %3257 = vst [vmem:[%s5192_s2 + $0x38] sm:$0xff] %v2874_v18  ;;  %v3313_v14 = vadd.f32 %v3312_v58, %v2874_v18  ;;  %v3376_v5 = vmul.f32 %v2874_v18, %v2874_v18  ;;  %v2615_v11 = vadd.f32 %v2614_v25, %v4531_v26  ;;  %v2878_v27 = vpop.f32.mrf.mxu1  ;;  %3069 = vmatmul.mubr.bf16.gmra.mxu1 %v3733_v7 }
 0x20b   :  { %v2616_v15 = vpop.f32.mrf.mxu0 }
 0x20c   :  { %v3432_v20 = vadd.f32 %v3431_v51, %v3376_v5  ;;  %v2879_v31 = vadd.f32 %v2878_v27, %v2615_v11  ;;  %v2880_v32 = vpop.f32.mrf.mxu1 }
 0x20d   :  { %v2617_v53 = vpop.f32.mrf.mxu0 }
 0x20e   :  { %3258 = vst [vmem:[%s5192_s2 + $0x40] sm:$0xff] %v2879_v31  ;;  %v3314_v49 = vadd.f32 %v3313_v14, %v2879_v31  ;;  %v3377_v23 = vmul.f32 %v2879_v31, %v2879_v31  ;;  %v2618_v0 = vadd.f32 %v2617_v53, %v4545_v40  ;;  %v2881_v37 = vpop.f32.mrf.mxu1 }
 0x20f   :  { %v2619_v50 = vpop.f32.mrf.mxu0 }
 0x210   :  { %v3433_v1 = vadd.f32 %v3432_v20, %v3377_v23  ;;  %v2882_v43 = vadd.f32 %v2881_v37, %v2618_v0  ;;  %v2883_v26 = vpop.f32.mrf.mxu1 }
 0x211   :  { %v2622_v41 = vpop.f32.mrf.mxu0 }
 0x212   :  { %3259 = vst [vmem:[%s5192_s2 + $0x48] sm:$0xff] %v2882_v43  ;;  %v3315_v19 = vadd.f32 %v3314_v49, %v2882_v43  ;;  %v3378_v48 = vmul.f32 %v2882_v43, %v2882_v43  ;;  %v2623_v52 = vadd.f32 %v2622_v41, %v4547_v45  ;;  %v2886_v58 = vpop.f32.mrf.mxu1 }
 0x213   :  { %v2624_v21 = vpop.f32.mrf.mxu0 }
 0x214   :  { %v3434_v4 = vadd.f32 %v3433_v1, %v3378_v48  ;;  %v2887_v62 = vadd.f32 %v2886_v58, %v2623_v52  ;;  %v2888_v7 = vpop.f32.mrf.mxu1 }
 0x215   :  { %v2625_v40 = vpop.f32.mrf.mxu0 }
 0x216   :  { %3260 = vst [vmem:[%s5192_s2 + $0x50] sm:$0xff] %v2887_v62  ;;  %v3316_v54 = vadd.f32 %v3315_v19, %v2887_v62  ;;  %v3379_v51 = vmul.f32 %v2887_v62, %v2887_v62  ;;  %v2626_v18 = vadd.f32 %v2625_v40, %v4561_v59  ;;  %v2889_v34 = vpop.f32.mrf.mxu1 }
 0x217   :  { %v2627_v25 = vpop.f32.mrf.mxu0 }
 0x218   :  { %v3435_v14 = vadd.f32 %v3434_v4, %v3379_v51  ;;  %v2890_v5 = vadd.f32 %v2889_v34, %v2626_v18  ;;  %v2891_v11 = vpop.f32.mrf.mxu1 }
 0x219   :  { %v2630_v45 = vpop.f32.mrf.mxu0 }
 0x21a   :  { %3261 = vst [vmem:[%s5192_s2 + $0x58] sm:$0xff] %v2890_v5  ;;  %v3317_v27 = vadd.f32 %v3316_v54, %v2890_v5  ;;  %v3380_v15 = vmul.f32 %v2890_v5, %v2890_v5  ;;  %v2631_v20 = vadd.f32 %v2630_v45, %v4563_v3  ;;  %v2894_v31 = vpop.f32.mrf.mxu1 }
 0x21b   :  { %v2632_v32 = vpop.f32.mrf.mxu0 }
 0x21c   :  { %v3436_v53 = vadd.f32 %v3435_v14, %v3380_v15  ;;  %v2895_v49 = vadd.f32 %v2894_v31, %v2631_v20  ;;  %v2896_v23 = vpop.f32.mrf.mxu1 }
 0x21d   :  { %v2633_v59 = vpop.f32.mrf.mxu0 }
 0x21e   :  { %3262 = vst [vmem:[%s5192_s2 + $0x60] sm:$0xff] %v2895_v49  ;;  %v3318_v0 = vadd.f32 %v3317_v27, %v2895_v49  ;;  %v3381_v37 = vmul.f32 %v2895_v49, %v2895_v49  ;;  %v2634_v50 = vadd.f32 %v2633_v59, %v4577_v16  ;;  %v2897_v1 = vpop.f32.mrf.mxu1 }
 0x21f   :  { %v2635_v43 = vpop.f32.mrf.mxu0 }
 0x220   :  { %v3437_v26 = vadd.f32 %v3436_v53, %v3381_v37  ;;  %v2898_v41 = vadd.f32 %v2897_v1, %v2634_v50  ;;  %v2899_v19 = vpop.f32.mrf.mxu1 }
 0x221   :  { %v2638_v3 = vpop.f32.mrf.mxu0 }
 0x222   :  { %3263 = vst [vmem:[%s5192_s2 + $0x68] sm:$0xff] %v2898_v41  ;;  %v3319_v48 = vadd.f32 %v3318_v0, %v2898_v41  ;;  %v3382_v52 = vmul.f32 %v2898_v41, %v2898_v41  ;;  %v2639_v58 = vadd.f32 %v2638_v3, %v4579_v24  ;;  %v2902_v21 = vpop.f32.mrf.mxu1 }
 0x223   :  { %v2640_v4 = vpop.f32.mrf.mxu0 }
 0x224   :  { %v3438_v62 = vadd.f32 %v3437_v26, %v3382_v52  ;;  %v2903_v7 = vadd.f32 %v2902_v21, %v2639_v58  ;;  %v2904_v40 = vpop.f32.mrf.mxu1 }
 0x225   :  { %v2641_v16 = vpop.f32.mrf.mxu0 }
 0x226   :  { %3264 = vst [vmem:[%s5192_s2 + $0x70] sm:$0xff] %v2903_v7  ;;  %v3320_v54 = vadd.f32 %v3319_v48, %v2903_v7  ;;  %v3383_v51 = vmul.f32 %v2903_v7, %v2903_v7  ;;  %v2642_v18 = vadd.f32 %v2641_v16, %v4593_v39  ;;  %v2905_v34 = vpop.f32.mrf.mxu1 }
 0x227   :  { %v2643_v25 = vpop.f32.mrf.mxu0 }
 0x228   :  { %v3439_v14 = vadd.f32 %v3438_v62, %v3383_v51  ;;  %v2906_v5 = vadd.f32 %v2905_v34, %v2642_v18  ;;  %v2907_v11 = vpop.f32.mrf.mxu1 }
 0x229   :  { %v2646_v24 = vpop.f32.mrf.mxu0 }
 0x22a   :  { %3265 = vst [vmem:[%s5192_s2 + $0x78] sm:$0xff] %v2906_v5  ;;  %v3321_v45 = vadd.f32 %v3320_v54, %v2906_v5  ;;  %v3384_v27 = vmul.f32 %v2906_v5, %v2906_v5  ;;  %v2647_v15 = vadd.f32 %v2646_v24, %v4595_v46  ;;  %v2910_v20 = vpop.f32.mrf.mxu1 }
 0x22b   :  { %v2648_v31 = vpop.f32.mrf.mxu0 }
 0x22c   :  { %v3440_v32 = vadd.f32 %v3439_v14, %v3384_v27  ;;  %v2911_v53 = vadd.f32 %v2910_v20, %v2647_v15  ;;  %v2912_v49 = vpop.f32.mrf.mxu1 }
 0x22d   :  { %v2649_v39 = vpop.f32.mrf.mxu0 }
 0x22e   :  { %3266 = vst [vmem:[%s5192_s2 + $0x80] sm:$0xff] %v2911_v53  ;;  %v3322_v23 = vadd.f32 %v3321_v45, %v2911_v53  ;;  %v3385_v59 = vmul.f32 %v2911_v53, %v2911_v53  ;;  %v2650_v0 = vadd.f32 %v2649_v39, %v4609_v61  ;;  %v2913_v37 = vpop.f32.mrf.mxu1 }
 0x22f   :  { %v2651_v50 = vpop.f32.mrf.mxu0 }
 0x230   :  { %v3441_v1 = vadd.f32 %v3440_v32, %v3385_v59  ;;  %v2914_v43 = vadd.f32 %v2913_v37, %v2650_v0  ;;  %v2915_v26 = vpop.f32.mrf.mxu1 }
 0x231   :  { %v2654_v46 = vpop.f32.mrf.mxu0 }
 0x232   :  { %3267 = vst [vmem:[%s5192_s2 + $0x88] sm:$0xff] %v2914_v43  ;;  %v3323_v41 = vadd.f32 %v3322_v23, %v2914_v43  ;;  %v3386_v19 = vmul.f32 %v2914_v43, %v2914_v43  ;;  %v2655_v3 = vadd.f32 %v2654_v46, %v4611_v6  ;;  %v2918_v48 = vpop.f32.mrf.mxu1 }
 0x233   :  { %v2656_v52 = vpop.f32.mrf.mxu0 }
 0x234   :  { %v3442_v58 = vadd.f32 %v3441_v1, %v3386_v19  ;;  %v2919_v21 = vadd.f32 %v2918_v48, %v2655_v3  ;;  %v2920_v4 = vpop.f32.mrf.mxu1 }
 0x235   :  { %v2657_v61 = vpop.f32.mrf.mxu0 }
 0x236   :  { %3268 = vst [vmem:[%s5192_s2 + $0x90] sm:$0xff] %v2919_v21  ;;  %v3324_v62 = vadd.f32 %v3323_v41, %v2919_v21  ;;  %v3387_v7 = vmul.f32 %v2919_v21, %v2919_v21  ;;  %v2658_v40 = vadd.f32 %v2657_v61, %v4625_v22  ;;  %v2921_v16 = vpop.f32.mrf.mxu1 }
 0x237   :  { %v2659_v54 = vpop.f32.mrf.mxu0 }
 0x238   :  { %v3443_v51 = vadd.f32 %v3442_v58, %v3387_v7  ;;  %v2922_v18 = vadd.f32 %v2921_v16, %v2658_v40  ;;  %v2923_v34 = vpop.f32.mrf.mxu1 }
 0x239   :  { %v2662_v6 = vpop.f32.mrf.mxu0 }
 0x23a   :  { %3269 = vst [vmem:[%s5192_s2 + $0x98] sm:$0xff] %v2922_v18  ;;  %v3325_v25 = vadd.f32 %v3324_v62, %v2922_v18  ;;  %v3388_v14 = vmul.f32 %v2922_v18, %v2922_v18  ;;  %v2663_v5 = vadd.f32 %v2662_v6, %v4627_v30  ;;  %v2926_v11 = vpop.f32.mrf.mxu1 }
 0x23b   :  { %v2664_v24 = vpop.f32.mrf.mxu0 }
 0x23c   :  { %v3444_v45 = vadd.f32 %v3443_v51, %v3388_v14  ;;  %v2927_v27 = vadd.f32 %v2926_v11, %v2663_v5  ;;  %v2928_v15 = vpop.f32.mrf.mxu1 }
 0x23d   :  { %v2665_v22 = vpop.f32.mrf.mxu0 }
 0x23e   :  { %3270 = vst [vmem:[%s5192_s2 + $0xa0] sm:$0xff] %v2927_v27  ;;  %v3326_v20 = vadd.f32 %v3325_v25, %v2927_v27  ;;  %v3389_v31 = vmul.f32 %v2927_v27, %v2927_v27  ;;  %v2666_v32 = vadd.f32 %v2665_v22, %v4641_v47  ;;  %v2929_v53 = vpop.f32.mrf.mxu1 }
 0x23f   :  { %v2667_v49 = vpop.f32.mrf.mxu0 }
 0x240   :  { %v3445_v39 = vadd.f32 %v3444_v45, %v3389_v31  ;;  %v2930_v23 = vadd.f32 %v2929_v53, %v2666_v32  ;;  %v2931_v59 = vpop.f32.mrf.mxu1 }
 0x241   :  { %v2670_v30 = vpop.f32.mrf.mxu0 }
 0x242   :  { %3271 = vst [vmem:[%s5192_s2 + $0xa8] sm:$0xff] %v2930_v23  ;;  %v3327_v0 = vadd.f32 %v3326_v20, %v2930_v23  ;;  %v3390_v37 = vmul.f32 %v2930_v23, %v2930_v23  ;;  %v2671_v50 = vadd.f32 %v2670_v30, %v4643_v55  ;;  %v2934_v1 = vpop.f32.mrf.mxu1 }
 0x243   :  { %v2672_v43 = vpop.f32.mrf.mxu0 }
 0x244   :  { %v3446_v26 = vadd.f32 %v3445_v39, %v3390_v37  ;;  %v2935_v46 = vadd.f32 %v2934_v1, %v2671_v50  ;;  %v2936_v41 = vpop.f32.mrf.mxu1 }
 0x245   :  { %v2673_v47 = vpop.f32.mrf.mxu0 }
 0x246   :  { %3272 = vst [vmem:[%s5192_s2 + $0xb0] sm:$0xff] %v2935_v46  ;;  %v3328_v19 = vadd.f32 %v3327_v0, %v2935_v46  ;;  %v3391_v3 = vmul.f32 %v2935_v46, %v2935_v46  ;;  %v2674_v48 = vadd.f32 %v2673_v47, %v4657_v10  ;;  %v2937_v52 = vpop.f32.mrf.mxu1 }
 0x247   :  { %v2675_v58 = vpop.f32.mrf.mxu0 }
 0x248   :  { %v3447_v21 = vadd.f32 %v3446_v26, %v3391_v3  ;;  %v2938_v4 = vadd.f32 %v2937_v52, %v2674_v48  ;;  %v2939_v61 = vpop.f32.mrf.mxu1 }
 0x249   :  { %v2678_v55 = vpop.f32.mrf.mxu0 }
 0x24a   :  { %3273 = vst [vmem:[%s5192_s2 + $0xb8] sm:$0xff] %v2938_v4  ;;  %v3329_v62 = vadd.f32 %v3328_v19, %v2938_v4  ;;  %v3392_v7 = vmul.f32 %v2938_v4, %v2938_v4  ;;  %v2679_v40 = vadd.f32 %v2678_v55, %v4659_v17  ;;  %v2942_v16 = vpop.f32.mrf.mxu1 }
 0x24b   :  { %v2680_v54 = vpop.f32.mrf.mxu0 }
 0x24c   :  { %v3448_v51 = vadd.f32 %v3447_v21, %v3392_v7  ;;  %v2943_v18 = vadd.f32 %v2942_v16, %v2679_v40  ;;  %v2944_v34 = vpop.f32.mrf.mxu1 }
 0x24d   :  { %v2681_v10 = vpop.f32.mrf.mxu0 }
 0x24e   :  { %3274 = vst [vmem:[%s5192_s2 + $0xc0] sm:$0xff] %v2943_v18  ;;  %v3330_v6 = vadd.f32 %v3329_v62, %v2943_v18  ;;  %v3393_v25 = vmul.f32 %v2943_v18, %v2943_v18  ;;  %v2682_v14 = vadd.f32 %v2681_v10, %v4673_v36  ;;  %v2945_v5 = vpop.f32.mrf.mxu1 }
 0x24f   :  { %v2683_v11 = vpop.f32.mrf.mxu0 }
 0x250   :  { %v3449_v24 = vadd.f32 %v3448_v51, %v3393_v25  ;;  %v2946_v45 = vadd.f32 %v2945_v5, %v2682_v14  ;;  %v2947_v27 = vpop.f32.mrf.mxu1 }
 0x251   :  { %v2686_v17 = vpop.f32.mrf.mxu0 }
 0x252   :  { %3275 = vst [vmem:[%s5192_s2 + $0xc8] sm:$0xff] %v2946_v45  ;;  %v3331_v15 = vadd.f32 %v3330_v6, %v2946_v45  ;;  %v3394_v22 = vmul.f32 %v2946_v45, %v2946_v45  ;;  %v2687_v20 = vadd.f32 %v2686_v17, %v4675_v44  ;;  %v2950_v31 = vpop.f32.mrf.mxu1 }
 0x253   :  { %v2688_v32 = vpop.f32.mrf.mxu0 }
 0x254   :  { %v3450_v53 = vadd.f32 %v3449_v24, %v3394_v22  ;;  %v2951_v49 = vadd.f32 %v2950_v31, %v2687_v20  ;;  %v2952_v39 = vpop.f32.mrf.mxu1 }
 0x255   :  { %v2689_v36 = vpop.f32.mrf.mxu0 }
 0x256   :  { %3276 = vst [vmem:[%s5192_s2 + $0xd0] sm:$0xff] %v2951_v49  ;;  %v3332_v23 = vadd.f32 %v3331_v15, %v2951_v49  ;;  %v3395_v59 = vmul.f32 %v2951_v49, %v2951_v49  ;;  %v2690_v30 = vadd.f32 %v2689_v36, %v4689_v2  ;;  %v2953_v0 = vpop.f32.mrf.mxu1 }
 0x257   :  { %v2691_v37 = vpop.f32.mrf.mxu0 }
 0x258   :  { %v3451_v50 = vadd.f32 %v3450_v53, %v3395_v59  ;;  %v2954_v1 = vadd.f32 %v2953_v0, %v2690_v30  ;;  %v2955_v43 = vpop.f32.mrf.mxu1 }
 0x259   :  { %v2694_v44 = vpop.f32.mrf.mxu0 }
 0x25a   :  { %3277 = vst [vmem:[%s5192_s2 + $0xd8] sm:$0xff] %v2954_v1  ;;  %v3333_v26 = vadd.f32 %v3332_v23, %v2954_v1  ;;  %v3396_v46 = vmul.f32 %v2954_v1, %v2954_v1  ;;  %v2695_v41 = vadd.f32 %v2694_v44, %v4691_v12  ;;  %v2958_v47 = vpop.f32.mrf.mxu1 }
 0x25b   :  { %v2696_v19 = vpop.f32.mrf.mxu0 }
 0x25c   :  { %v3452_v3 = vadd.f32 %v3451_v50, %v3396_v46  ;;  %v2959_v48 = vadd.f32 %v2958_v47, %v2695_v41  ;;  %v2960_v52 = vpop.f32.mrf.mxu1 }
 0x25d   :  { %v2697_v2 = vpop.f32.mrf.mxu0 }
 0x25e   :  { %3278 = vst [vmem:[%s5192_s2 + $0xe0] sm:$0xff] %v2959_v48  ;;  %v3334_v58 = vadd.f32 %v3333_v26, %v2959_v48  ;;  %v3397_v21 = vmul.f32 %v2959_v48, %v2959_v48  ;;  %v2698_v4 = vadd.f32 %v2697_v2, %v4705_v33  ;;  %v2961_v61 = vpop.f32.mrf.mxu1 }
 0x25f   :  { %v2699_v55 = vpop.f32.mrf.mxu0 }
 0x260   :  { %v3453_v62 = vadd.f32 %v3452_v3, %v3397_v21  ;;  %v2962_v7 = vadd.f32 %v2961_v61, %v2698_v4  ;;  %v2963_v40 = vpop.f32.mrf.mxu1 }
 0x261   :  { %v2702_v12 = vpop.f32.mrf.mxu0 }
 0x262   :  { %3279 = vst [vmem:[%s5192_s2 + $0xe8] sm:$0xff] %v2962_v7  ;;  %v3335_v16 = vadd.f32 %v3334_v58, %v2962_v7  ;;  %v3398_v54 = vmul.f32 %v2962_v7, %v2962_v7  ;;  %v2703_v51 = vadd.f32 %v2702_v12, %v4707_v42  ;;  %v2966_v18 = vpop.f32.mrf.mxu1 }
 0x263   :  { %v2704_v34 = vpop.f32.mrf.mxu0 }
 0x264   :  { %v3454_v10 = vadd.f32 %v3453_v62, %v3398_v54  ;;  %v2967_v6 = vadd.f32 %v2966_v18, %v2703_v51  ;;  %v2968_v25 = vpop.f32.mrf.mxu1 }
 0x265   :  { %v2705_v33 = vpop.f32.mrf.mxu0 }
 0x266   :  { %3280 = vst [vmem:[%s5192_s2 + $0xf0] sm:$0xff] %v2967_v6  ;;  %v3336_v14 = vadd.f32 %v3335_v16, %v2967_v6  ;;  %v3399_v5 = vmul.f32 %v2967_v6, %v2967_v6  ;;  %v2706_v11 = vadd.f32 %v2705_v33, %v4721_v63  ;;  %v2969_v24 = vpop.f32.mrf.mxu1 }
 0x267   :  { %v2707_v45 = vpop.f32.mrf.mxu0 }
 0x268   :  { %v3455_v27 = vadd.f32 %v3454_v10, %v3399_v5  ;;  %v2970_v17 = vadd.f32 %v2969_v24, %v2706_v11  ;;  %v2971_v15 = vpop.f32.mrf.mxu1 }
 0x269   :  { %v2710_v42 = vpop.f32.mrf.mxu0 }
 0x26a   :  { %3281 = vst [vmem:[%s5192_s2 + $0xf8] sm:$0xff] %v2970_v17  ;;  %v3337_v22 = vadd.f32 %v3336_v14, %v2970_v17  ;;  %v3400_v20 = vmul.f32 %v2970_v17, %v2970_v17  ;;  %v2711_v31 = vadd.f32 %v2710_v42, %v4723_v13  ;;  %v2974_v32 = vpop.f32.mrf.mxu1 }
 0x26b   :  { %v2712_v53 = vpop.f32.mrf.mxu0 }
 0x26c   :  { %v3456_v49 = vadd.f32 %v3455_v27, %v3400_v20  ;;  %v2975_v39 = vadd.f32 %v2974_v32, %v2711_v31  ;;  %v2976_v36 = vpop.f32.mrf.mxu1 }
 0x26d   :  { %v2713_v63 = vpop.f32.mrf.mxu0 }
 0x26e   :  { %3282 = vst [vmem:[%s5192_s2 + $0x100] sm:$0xff] %v2975_v39  ;;  %v3338_v23 = vadd.f32 %v3337_v22, %v2975_v39  ;;  %v3401_v59 = vmul.f32 %v2975_v39, %v2975_v39  ;;  %v2714_v30 = vadd.f32 %v2713_v63, %v4737_v35  ;;  %v2977_v0 = vpop.f32.mrf.mxu1 }
 0x26f   :  { %v2715_v37 = vpop.f32.mrf.mxu0 }
 0x270   :  { %v3457_v50 = vadd.f32 %v3456_v49, %v3401_v59  ;;  %v2978_v1 = vadd.f32 %v2977_v0, %v2714_v30  ;;  %v2979_v43 = vpop.f32.mrf.mxu1 }
 0x271   :  { %v2718_v13 = vpop.f32.mrf.mxu0 }
 0x272   :  { %3283 = vst [vmem:[%s5192_s2 + $0x108] sm:$0xff] %v2978_v1  ;;  %v3339_v44 = vadd.f32 %v3338_v23, %v2978_v1  ;;  %v3402_v26 = vmul.f32 %v2978_v1, %v2978_v1  ;;  %v2719_v46 = vadd.f32 %v2718_v13, %v4739_v56  ;;  %v2982_v41 = vpop.f32.mrf.mxu1 }
 0x273   :  { %v2720_v47 = vpop.f32.mrf.mxu0 }
 0x274   :  { %v3458_v19 = vadd.f32 %v3457_v50, %v3402_v26  ;;  %v2983_v3 = vadd.f32 %v2982_v41, %v2719_v46  ;;  %v2984_v48 = vpop.f32.mrf.mxu1 }
 0x275   :  { %v2721_v35 = vpop.f32.mrf.mxu0 }
 0x276   :  { %3284 = vst [vmem:[%s5192_s2 + $0x110] sm:$0xff] %v2983_v3  ;;  %v3340_v52 = vadd.f32 %v3339_v44, %v2983_v3  ;;  %v3403_v2 = vmul.f32 %v2983_v3, %v2983_v3  ;;  %v2722_v58 = vadd.f32 %v2721_v35, %v4753_v9  ;;  %v2985_v21 = vpop.f32.mrf.mxu1 }
 0x277   :  { %v2723_v4 = vpop.f32.mrf.mxu0 }
 0x278   :  { %v3459_v61 = vadd.f32 %v3458_v19, %v3403_v2  ;;  %v2986_v55 = vadd.f32 %v2985_v21, %v2722_v58  ;;  %v2987_v62 = vpop.f32.mrf.mxu1  ;;  %v5209_v58 = vld [vmem:[#allocation3_spill] sm:$0xff] }
 0x279   :  { %v2726_v56 = vpop.f32.mrf.mxu0 }
 0x27a   :  { %3285 = vst [vmem:[%s5192_s2 + $0x118] sm:$0xff] %v2986_v55  ;;  %v3341_v7 = vadd.f32 %v3340_v52, %v2986_v55  ;;  %v3404_v40 = vmul.f32 %v2986_v55, %v2986_v55  ;;  %v2727_v12 = vadd.f32 %v2726_v56, %v4755_v29  ;;  %v2990_v16 = vpop.f32.mrf.mxu1 }
 0x27b   :  { %v2728_v54 = vpop.f32.mrf.mxu0 }
 0x27c   :  { %v3460_v51 = vadd.f32 %v3459_v61, %v3404_v40  ;;  %v2991_v18 = vadd.f32 %v2990_v16, %v2727_v12  ;;  %v2992_v34 = vpop.f32.mrf.mxu1  ;;  %v5210_v12 = vld [vmem:[#allocation4_spill] sm:$0xff] }
 0x27d   :  { %v2729_v9 = vpop.f32.mrf.mxu0 }
 0x27e   :  { %3286 = vst [vmem:[%s5192_s2 + $0x120] sm:$0xff] %v2991_v18  ;;  %v3342_v10 = vadd.f32 %v3341_v7, %v2991_v18  ;;  %v3405_v6 = vmul.f32 %v2991_v18, %v2991_v18  ;;  %v2730_v25 = vadd.f32 %v2729_v9, %v4769_v57  ;;  %v2993_v33 = vpop.f32.mrf.mxu1 }
 0x27f   :  { %v2731_v14 = vpop.f32.mrf.mxu0 }
 0x280   :  { %v3461_v5 = vadd.f32 %v3460_v51, %v3405_v6  ;;  %v2994_v11 = vadd.f32 %v2993_v33, %v2730_v25  ;;  %v2995_v24 = vpop.f32.mrf.mxu1  ;;  %v5211_v33 = vld [vmem:[#allocation5_spill] sm:$0xff] }
 0x281   :  { %v2734_v29 = vpop.f32.mrf.mxu0 }
 0x282   :  { %3287 = vst [vmem:[%s5192_s2 + $0x128] sm:$0xff] %v2994_v11  ;;  %v3343_v45 = vadd.f32 %v3342_v10, %v2994_v11  ;;  %v3406_v27 = vmul.f32 %v2994_v11, %v2994_v11  ;;  %v2735_v17 = vadd.f32 %v2734_v29, %v4771_v8  ;;  %v2998_v15 = vpop.f32.mrf.mxu1 }
 0x283   :  { %v2736_v42 = vpop.f32.mrf.mxu0 }
 0x284   :  { %v3462_v22 = vadd.f32 %v3461_v5, %v3406_v27  ;;  %v2999_v20 = vadd.f32 %v2998_v15, %v2735_v17  ;;  %v3000_v31 = vpop.f32.mrf.mxu1  ;;  %v5212_v42 = vld [vmem:[#allocation6_spill] sm:$0xff] }
 0x285   :  { %v2737_v57 = vpop.f32.mrf.mxu0 }
 0x286   :  { %3288 = vst [vmem:[%s5192_s2 + $0x130] sm:$0xff] %v2999_v20  ;;  %v3344_v32 = vadd.f32 %v3343_v45, %v2999_v20  ;;  %v3407_v53 = vmul.f32 %v2999_v20, %v2999_v20  ;;  %v2738_v49 = vadd.f32 %v2737_v57, %v4785_v38  ;;  %v3001_v39 = vpop.f32.mrf.mxu1 }
 0x287   :  { %v2739_v36 = vpop.f32.mrf.mxu0 }
 0x288   :  { %v3463_v63 = vadd.f32 %v3462_v22, %v3407_v53  ;;  %v3002_v23 = vadd.f32 %v3001_v39, %v2738_v49  ;;  %v3003_v59 = vpop.f32.mrf.mxu1 }
 0x289   :  { %v2742_v8 = vpop.f32.mrf.mxu0 }
 0x28a   :  { %3289 = vst [vmem:[%s5192_s2 + $0x138] sm:$0xff] %v3002_v23  ;;  %v3345_v30 = vadd.f32 %v3344_v32, %v3002_v23  ;;  %v3408_v0 = vmul.f32 %v3002_v23, %v3002_v23  ;;  %v2743_v37 = vadd.f32 %v2742_v8, %v4787_v60  ;;  %v3006_v50 = vpop.f32.mrf.mxu1 }
 0x28b   :  { %v2744_v1 = vpop.f32.mrf.mxu0 }
 0x28c   :  { %v3464_v43 = vadd.f32 %v3463_v63, %v3408_v0  ;;  %v3007_v13 = vadd.f32 %v3006_v50, %v2743_v37  ;;  %v3008_v44 = vpop.f32.mrf.mxu1  ;;  %v5213_v63 = vld [vmem:[#allocation7_spill] sm:$0xff] }
 0x28d   :  { %v2745_v38 = vpop.f32.mrf.mxu0 }
 0x28e   :  { %3290 = vst [vmem:[%s5192_s2 + $0x140] sm:$0xff] %v3007_v13  ;;  %v3346_v26 = vadd.f32 %v3345_v30, %v3007_v13  ;;  %v3409_v46 = vmul.f32 %v3007_v13, %v3007_v13  ;;  %v2746_v41 = vadd.f32 %v2745_v38, %v4801_v28  ;;  %v3009_v47 = vpop.f32.mrf.mxu1  ;;  %v5214_v13 = vld [vmem:[#allocation8_spill] sm:$0xff] }
 0x28f   :  { %v2747_v19 = vpop.f32.mrf.mxu0 }
 0x290   :  { %v3465_v3 = vadd.f32 %v3464_v43, %v3409_v46  ;;  %v3010_v48 = vadd.f32 %v3009_v47, %v2746_v41  ;;  %v3011_v35 = vpop.f32.mrf.mxu1 }
 0x291   :  { %v2750_v60 = vpop.f32.mrf.mxu0  ;;  %v5215_v35 = vld [vmem:[#allocation9_spill] sm:$0xff] }
 0x292   :  { %3291 = vst [vmem:[%s5192_s2 + $0x148] sm:$0xff] %v3010_v48  ;;  %v3347_v52 = vadd.f32 %v3346_v26, %v3010_v48  ;;  %v3410_v2 = vmul.f32 %v3010_v48, %v3010_v48  ;;  %v2751_v21 = vadd.f32 %v2750_v60, %v5209_v58  ;;  %v3014_v4 = vpop.f32.mrf.mxu1 }
 0x293   :  { %v2752_v61 = vpop.f32.mrf.mxu0 }
 0x294   :  { %v3466_v55 = vadd.f32 %v3465_v3, %v3410_v2  ;;  %v3015_v62 = vadd.f32 %v3014_v4, %v2751_v21  ;;  %v3016_v56 = vpop.f32.mrf.mxu1 }
 0x295   :  { %v2753_v28 = vpop.f32.mrf.mxu0  ;;  %v5216_v56 = vld [vmem:[#allocation10_spill] sm:$0xff] }
 0x296   :  { %3292 = vst [vmem:[%s5192_s2 + $0x150] sm:$0xff] %v3015_v62  ;;  %v3348_v7 = vadd.f32 %v3347_v52, %v3015_v62  ;;  %v3411_v40 = vmul.f32 %v3015_v62, %v3015_v62  ;;  %v2754_v16 = vadd.f32 %v2753_v28, %v5210_v12  ;;  %v3017_v54 = vpop.f32.mrf.mxu1 }
 0x297   :  { %v2755_v51 = vpop.f32.mrf.mxu0 }
 0x298   :  { %v3467_v18 = vadd.f32 %v3466_v55, %v3411_v40  ;;  %v3018_v34 = vadd.f32 %v3017_v54, %v2754_v16  ;;  %v3019_v9 = vpop.f32.mrf.mxu1 }
 0x299   :  { %v2758_v10 = vpop.f32.mrf.mxu0  ;;  %v5217_v9 = vld [vmem:[#allocation11_spill] sm:$0xff] }
 0x29a   :  { %3293 = vst [vmem:[%s5192_s2 + $0x158] sm:$0xff] %v3018_v34  ;;  %v3349_v6 = vadd.f32 %v3348_v7, %v3018_v34  ;;  %v3412_v25 = vmul.f32 %v3018_v34, %v3018_v34  ;;  %v2759_v14 = vadd.f32 %v2758_v10, %v5211_v33  ;;  %v3022_v5 = vpop.f32.mrf.mxu1 }
 0x29b   :  { %v2760_v11 = vpop.f32.mrf.mxu0 }
 0x29c   :  { %v3468_v24 = vadd.f32 %v3467_v18, %v3412_v25  ;;  %v3023_v29 = vadd.f32 %v3022_v5, %v2759_v14  ;;  %v3024_v45 = vpop.f32.mrf.mxu1 }
 0x29d   :  { %v2761_v27 = vpop.f32.mrf.mxu0  ;;  %v5218_v45 = vld [vmem:[#allocation12_spill] sm:$0xff] }
 0x29e   :  { %3294 = vst [vmem:[%s5192_s2 + $0x160] sm:$0xff] %v3023_v29  ;;  %v3350_v17 = vadd.f32 %v3349_v6, %v3023_v29  ;;  %v3413_v15 = vmul.f32 %v3023_v29, %v3023_v29  ;;  %v2762_v22 = vadd.f32 %v2761_v27, %v5212_v42  ;;  %v3025_v20 = vpop.f32.mrf.mxu1 }
 0x29f   :  { %v2763_v31 = vpop.f32.mrf.mxu0 }
 0x2a0   :  { %v3469_v57 = vadd.f32 %v3468_v24, %v3413_v15  ;;  %v3026_v32 = vadd.f32 %v3025_v20, %v2762_v22  ;;  %v3027_v53 = vpop.f32.mrf.mxu1 }
 0x2a1   :  { %v2766_v49 = vpop.f32.mrf.mxu0  ;;  %v5219_v53 = vld [vmem:[#allocation13_spill] sm:$0xff] }
 0x2a2   :  { %3295 = vst [vmem:[%s5192_s2 + $0x168] sm:$0xff] %v3026_v32  ;;  %v3351_v39 = vadd.f32 %v3350_v17, %v3026_v32  ;;  %v3414_v36 = vmul.f32 %v3026_v32, %v3026_v32  ;;  %v2767_v23 = vadd.f32 %v2766_v49, %v5213_v63  ;;  %v3030_v59 = vpop.f32.mrf.mxu1 }
 0x2a3   :  { %v2768_v8 = vpop.f32.mrf.mxu0 }
 0x2a4   :  { %v3470_v30 = vadd.f32 %v3469_v57, %v3414_v36  ;;  %v3031_v0 = vadd.f32 %v3030_v59, %v2767_v23  ;;  %v3032_v37 = vpop.f32.mrf.mxu1 }
 0x2a5   :  { %v2769_v50 = vpop.f32.mrf.mxu0  ;;  %v5220_v37 = vld [vmem:[#allocation14_spill] sm:$0xff] }
 0x2a6   :  { %3296 = vst [vmem:[%s5192_s2 + $0x170] sm:$0xff] %v3031_v0  ;;  %v3352_v1 = vadd.f32 %v3351_v39, %v3031_v0  ;;  %v3415_v43 = vmul.f32 %v3031_v0, %v3031_v0  ;;  %v2770_v44 = vadd.f32 %v2769_v50, %v5214_v13  ;;  %v3033_v38 = vpop.f32.mrf.mxu1 }
 0x2a7   :  { %v2771_v26 = vpop.f32.mrf.mxu0 }
 0x2a8   :  { %v3471_v46 = vadd.f32 %v3470_v30, %v3415_v43  ;;  %v3034_v41 = vadd.f32 %v3033_v38, %v2770_v44  ;;  %v3035_v47 = vpop.f32.mrf.mxu1 }
 0x2a9   :  { %v2774_v19 = vpop.f32.mrf.mxu0  ;;  %v5221_v47 = vld [vmem:[#allocation15_spill] sm:$0xff] }
 0x2aa   :  { %3297 = vst [vmem:[%s5192_s2 + $0x178] sm:$0xff] %v3034_v41  ;;  %v3353_v3 = vadd.f32 %v3352_v1, %v3034_v41  ;;  %v3416_v48 = vmul.f32 %v3034_v41, %v3034_v41  ;;  %v2775_v60 = vadd.f32 %v2774_v19, %v5215_v35  ;;  %v3038_v52 = vpop.f32.mrf.mxu1 }
 0x2ab   :  { %v2776_v2 = vpop.f32.mrf.mxu0 }
 0x2ac   :  { %v3472_v58 = vadd.f32 %v3471_v46, %v3416_v48  ;;  %v3039_v21 = vadd.f32 %v3038_v52, %v2775_v60  ;;  %v3040_v4 = vpop.f32.mrf.mxu1 }
 0x2ad   :  { %v2777_v61 = vpop.f32.mrf.mxu0  ;;  %v5222_v4 = vld [vmem:[#allocation16_spill] sm:$0xff] }
 0x2ae   :  { %3298 = vst [vmem:[%s5192_s2 + $0x180] sm:$0xff] %v3039_v21  ;;  %v3354_v55 = vadd.f32 %v3353_v3, %v3039_v21  ;;  %v3417_v62 = vmul.f32 %v3039_v21, %v3039_v21  ;;  %v2778_v28 = vadd.f32 %v2777_v61, %v5216_v56  ;;  %v3041_v7 = vpop.f32.mrf.mxu1 }
 0x2af   :  { %v2779_v40 = vpop.f32.mrf.mxu0 }
 0x2b0   :  { %v3473_v12 = vadd.f32 %v3472_v58, %v3417_v62  ;;  %v3042_v16 = vadd.f32 %v3041_v7, %v2778_v28  ;;  %v3043_v54 = vpop.f32.mrf.mxu1 }
 0x2b1   :  { %v2782_v51 = vpop.f32.mrf.mxu0  ;;  %v5223_v54 = vld [vmem:[#allocation17_spill] sm:$0xff] }
 0x2b2   :  { %3299 = vst [vmem:[%s5192_s2 + $0x188] sm:$0xff] %v3042_v16  ;;  %v3355_v18 = vadd.f32 %v3354_v55, %v3042_v16  ;;  %v3418_v34 = vmul.f32 %v3042_v16, %v3042_v16  ;;  %v2783_v10 = vadd.f32 %v2782_v51, %v5217_v9  ;;  %v3046_v6 = vpop.f32.mrf.mxu1 }
 0x2b3   :  { %v2784_v25 = vpop.f32.mrf.mxu0 }
 0x2b4   :  { %v3474_v33 = vadd.f32 %v3473_v12, %v3418_v34  ;;  %v3047_v14 = vadd.f32 %v3046_v6, %v2783_v10  ;;  %v3048_v5 = vpop.f32.mrf.mxu1 }
 0x2b5   :  { %v2785_v11 = vpop.f32.mrf.mxu0 }
 0x2b6   :  { %3300 = vst [vmem:[%s5192_s2 + $0x190] sm:$0xff] %v3047_v14  ;;  %v3356_v24 = vadd.f32 %v3355_v18, %v3047_v14  ;;  %v3419_v29 = vmul.f32 %v3047_v14, %v3047_v14  ;;  %v2786_v27 = vadd.f32 %v2785_v11, %v5218_v45  ;;  %v3049_v17 = vpop.f32.mrf.mxu1 }
 0x2b7   :  { %v2787_v15 = vpop.f32.mrf.mxu0 }
 0x2b8   :  { %v3475_v42 = vadd.f32 %v3474_v33, %v3419_v29  ;;  %v3050_v22 = vadd.f32 %v3049_v17, %v2786_v27  ;;  %v3051_v20 = vpop.f32.mrf.mxu1  ;;  %v3488_v15 = vlaneseq }
 0x2b9   :  { %v2790_v31 = vpop.f32.mrf.mxu0 }
 0x2ba   :  { %3301 = vst [vmem:[%s5192_s2 + $0x198] sm:$0xff] %v3050_v22  ;;  %v3357_v57 = vadd.f32 %v3356_v24, %v3050_v22  ;;  %v3420_v32 = vmul.f32 %v3050_v22, %v3050_v22  ;;  %v2791_v49 = vadd.f32 %v2790_v31, %v5219_v53  ;;  %v3054_v39 = vpop.f32.mrf.mxu1 }
 0x2bb   :  { %v2792_v36 = vpop.f32.mrf.mxu0 }
 0x2bc   :  { %v3476_v63 = vadd.f32 %v3475_v42, %v3420_v32  ;;  %v3055_v23 = vadd.f32 %v3054_v39, %v2791_v49  ;;  %v3056_v59 = vpop.f32.mrf.mxu1 }
 0x2bd   :  { %v2793_v8 = vpop.f32.mrf.mxu0 }
 0x2be   :  { %3302 = vst [vmem:[%s5192_s2 + $0x1a0] sm:$0xff] %v3055_v23  ;;  %v3358_v30 = vadd.f32 %v3357_v57, %v3055_v23  ;;  %v3421_v0 = vmul.f32 %v3055_v23, %v3055_v23  ;;  %v2794_v50 = vadd.f32 %v2793_v8, %v5220_v37  ;;  %v3057_v1 = vpop.f32.mrf.mxu1  ;;  %v3489_v57 = vshrl.u32 %v3488_v15, 7 }
 0x2bf   :  { %v2795_v43 = vpop.f32.mrf.mxu0 }
 0x2c0   :  { %v3477_v13 = vadd.f32 %v3476_v63, %v3421_v0  ;;  %v3058_v44 = vadd.f32 %v3057_v1, %v2794_v50  ;;  %v3059_v38 = vpop.f32.mrf.mxu1  ;;  %vm3491_vm0 = vcmp.eq.s32.totalorder %v3489_v57, 1  ;;  %vm3490_vm1 = vcmp.eq.s32.totalorder %v3489_v57, 0 }
 0x2c1   :  { %v2798_v26 = vpop.f32.mrf.mxu0 }
 0x2c2   :  { %3303 = vst [vmem:[%s5192_s2 + $0x1a8] sm:$0xff] %v3058_v44  ;;  %v3359_v46 = vadd.f32 %v3358_v30, %v3058_v44  ;;  %v3422_v41 = vmul.f32 %v3058_v44, %v3058_v44  ;;  %v2799_v19 = vadd.f32 %v2798_v26, %v5221_v47  ;;  %v3062_v3 = vpop.f32.mrf.mxu1 }
 0x2c3   :  { %v2800_v48 = vpop.f32.mrf.mxu0 }
 0x2c4   :  { %v3478_v35 = vadd.f32 %v3477_v13, %v3422_v41  ;;  %v3063_v60 = vadd.f32 %v3062_v3, %v2799_v19  ;;  %v3064_v52 = vpop.f32.mrf.mxu1 }
 0x2c5   :  { %v2801_v2 = vpop.f32.mrf.mxu0 }
 0x2c6   :  { %3304 = vst [vmem:[%s5192_s2 + $0x1b0] sm:$0xff] %v3063_v60  ;;  %v3360_v58 = vadd.f32 %v3359_v46, %v3063_v60  ;;  %v3423_v21 = vmul.f32 %v3063_v60, %v3063_v60  ;;  %v2802_v61 = vadd.f32 %v2801_v2, %v5222_v4  ;;  %v3065_v55 = vpop.f32.mrf.mxu1 }
 0x2c7   :  { %v2803_v62 = vpop.f32.mrf.mxu0 }
 0x2c8   :  { %v3479_v56 = vadd.f32 %v3478_v35, %v3423_v21  ;;  %v3066_v28 = vadd.f32 %v3065_v55, %v2802_v61  ;;  %v3067_v7 = vpop.f32.mrf.mxu1 }
 0x2c9   :  { %v2806_v40 = vpop.f32.mrf.mxu0 }
 0x2ca   :  { %3305 = vst [vmem:[%s5192_s2 + $0x1b8] sm:$0xff] %v3066_v28  ;;  %v3361_v12 = vadd.f32 %v3360_v58, %v3066_v28  ;;  %v3424_v16 = vmul.f32 %v3066_v28, %v3066_v28  ;;  %v2807_v51 = vadd.f32 %v2806_v40, %v5223_v54  ;;  %v3070_v18 = vpop.f32.mrf.mxu1 }
 0x2cb   :  { %v2808_v34 = vpop.f32.mrf.mxu0 }
 0x2cc   :  { %v3480_v9 = vadd.f32 %v3479_v56, %v3424_v16  ;;  %v3071_v10 = vadd.f32 %v3070_v18, %v2807_v51  ;;  %v3072_v6 = vpop.f32.mrf.mxu1 }
 0x2cd   :  { %v2809_v25 = vpop.f32.mrf.mxu0 }
 0x2ce   :  { %3306 = vst [vmem:[%s5192_s2 + $0x1c0] sm:$0xff] %v3071_v10  ;;  %v3362_v33 = vadd.f32 %v3361_v12, %v3071_v10  ;;  %v3425_v14 = vmul.f32 %v3071_v10, %v3071_v10  ;;  %v3073_v5 = vpop.f32.mrf.mxu1 }
 0x2cf   :  { %v2810_v11 = vpop.f32.mrf.mxu0 }
 0x2d0   :  { %v3363_v24 = vrot.slane %v3362_v33, 4  ;;  %v3481_v29 = vadd.f32 %v3480_v9, %v3425_v14  ;;  %v3074_v45 = vpop.f32.mrf.mxu1 }
 0x2d2   :  { %v3364_v27 = vadd.f32 %v3363_v24, %v3362_v33  ;;  %v3482_v17 = vrot.slane %v3481_v29, 4 }
 0x2d4   :  { %v3365_v42 = vrot.slane %v3364_v27, 2  ;;  %v3483_v22 = vadd.f32 %v3482_v17, %v3481_v29 }
 0x2d6   :  { %v3366_v20 = vadd.f32 %v3365_v42, %v3364_v27  ;;  %v3484_v31 = vrot.slane %v3483_v22, 2 }
 0x2d8   :  { %v3485_v32 = vadd.f32 %v3484_v31, %v3483_v22  ;;  %v3367_v53 = vrot.slane %v3366_v20, 1 }
 0x2da   :  { %v3486_v49 = vrot.slane %v3485_v32, 1  ;;  %v3368_v36 = vadd.f32 %v3367_v53, %v3366_v20 }
 0x2dc   :  { %v3487_v39 = vadd.f32 %v3486_v49, %v3485_v32 }
 0x2de   :  { %v3492_v63 = vsel %vm3491_vm0, %v3487_v39, 0.0 }
 0x2df   :  { %v3493_v23 = vsel %vm3490_vm1, %v3368_v36, %v3492_v63 }
 0x2e0   :  { %3494 = vst [vmem:[%s5193_s3] sm:$0xff] %v3493_v23 }

// kernel: discriminator_forward.12
= control target key start
LH: loop header
LB: loop body
LE: loop exit
PB: predicated region body
PF: predicated region fallthrough
CT: control target
= control target key end

     0   :  { %v34_v0 = vlaneseq  ;;  %s346_s1 = inlined_call_operand.vmem [shape: f32[1,256], index: 1, kind: input, shape index: {}]   ;;  %s347_s2 = inlined_call_operand.vmem [shape: f32[1,256], index: 2, kind: input, shape index: {}]   ;;  %s348_s0 = inlined_call_operand.vmem [shape: f32[72,256], index: 0, kind: input, shape index: {}]   ;;  %s349_s3 = inlined_call_operand.vmem [shape: f32[72,256], index: 3, kind: output, shape index: {}]  }
   0x1   :  { %v32_v2 = vld [vmem:[%s346_s1] sm:$0x3]  ;;  %v15_v6 = vld [vmem:[%s348_s0 + $0x8] sm:$0xff]  ;;  %v16_v8 = vld [vmem:[%s348_s0 + $0x10] sm:$0xff] }
   0x2   :  { %v35_v1 = vshrl.u32 %v34_v0, 7  ;;  %v62_v3 = vld [vmem:[%s347_s2] sm:$0x3]  ;;  %v17_v9 = vld [vmem:[%s348_s0 + $0x18] sm:$0xff]  ;;  %v19_v15 = vld [vmem:[%s348_s0 + $0x28] sm:$0xff] }
   0x3   :  { %v14_v4 = vld [vmem:[%s348_s0] sm:$0xff]  ;;  %v20_v16 = vld [vmem:[%s348_s0 + $0x30] sm:$0xff]  ;;  %v21_v17 = vld [vmem:[%s348_s0 + $0x38] sm:$0xff] }
   0x4   :  { %v36_v5 = vsub.s32 0, %v35_v1  ;;  %v40_v7 = vsub.s32 1, %v35_v1  ;;  %v18_v10 = vld [vmem:[%s348_s0 + $0x20] sm:$0xff]  ;;  %v23_v42 = vld [vmem:[%s348_s0 + $0x48] sm:$0xff]  ;;  %v24_v46 = vld [vmem:[%s348_s0 + $0x50] sm:$0xff] }
   0x5   :  { %v22_v41 = vld [vmem:[%s348_s0 + $0x40] sm:$0xff]  ;;  %v25_v47 = vld [vmem:[%s348_s0 + $0x58] sm:$0xff]  ;;  %v27_v51 = vld [vmem:[%s348_s0 + $0x68] sm:$0xff] }
   0x6   :  { %v209_v11 = vrot.slane %v32_v2, %v36_v5  ;;  %v211_v12 = vrot.slane %v62_v3, %v36_v5  ;;  %v213_v13 = vrot.slane %v32_v2, %v40_v7  ;;  %v215_v14 = vrot.slane %v62_v3, %v40_v7  ;;  %v26_v48 = vld [vmem:[%s348_s0 + $0x60] sm:$0xff]  ;;  %v28_v56 = vld [vmem:[%s348_s0 + $0x70] sm:$0xff]  ;;  %v29_v5 = vld [vmem:[%s348_s0 + $0x78] sm:$0xff] }
   0x7   :  { %v31_v7 = vld [vmem:[%s348_s0 + $0x88] sm:$0xff] }
   0x8   :  { %v44_v18 = vmul.f32 %v209_v11, %v14_v4  ;;  %v45_v19 = vmul.f32 %v213_v13, %v15_v6  ;;  %v46_v20 = vmul.f32 %v209_v11, %v16_v8  ;;  %v47_v21 = vmul.f32 %v213_v13, %v17_v9  ;;  %v30_v6 = vld [vmem:[%s348_s0 + $0x80] sm:$0xff] }
   0x9   :  { %v48_v22 = vmul.f32 %v209_v11, %v18_v10  ;;  %v49_v23 = vmul.f32 %v213_v13, %v19_v15  ;;  %v50_v24 = vmul.f32 %v209_v11, %v20_v16  ;;  %v51_v25 = vmul.f32 %v213_v13, %v21_v17 }
   0xa   :  { %v74_v26 = vadd.f32 %v211_v12, %v44_v18  ;;  %v75_v27 = vadd.f32 %v215_v14, %v45_v19  ;;  %v76_v28 = vadd.f32 %v211_v12, %v46_v20  ;;  %v77_v29 = vadd.f32 %v215_v14, %v47_v21 }
   0xb   :  { %v78_v30 = vadd.f32 %v211_v12, %v48_v22  ;;  %v79_v31 = vadd.f32 %v215_v14, %v49_v23  ;;  %v80_v32 = vadd.f32 %v211_v12, %v50_v24  ;;  %v81_v33 = vadd.f32 %v215_v14, %v51_v25 }
   0xc   :  { %vm92_vm0 = vcmp.gt.f32.partialorder %v74_v26, 0.0  ;;  %v110_v34 = vmul.f32 -0.2, %v74_v26  ;;  %vm93_vm1 = vcmp.gt.f32.partialorder %v75_v27, 0.0  ;;  %v111_v35 = vmul.f32 -0.2, %v75_v27 }
   0xd   :  { %vm94_vm2 = vcmp.gt.f32.partialorder %v76_v28, 0.0  ;;  %v112_v36 = vmul.f32 -0.2, %v76_v28  ;;  %vm95_vm3 = vcmp.gt.f32.partialorder %v77_v29, 0.0  ;;  %v113_v37 = vmul.f32 -0.2, %v77_v29 }
   0xe   :  { %v128_v38 = vsel %vm92_vm0, %v74_v26, %v110_v34  ;;  %v129_v39 = vsel %vm93_vm1, %v75_v27, %v111_v35  ;;  %vm96_vm4 = vcmp.gt.f32.partialorder %v78_v30, 0.0  ;;  %v114_v40 = vmul.f32 -0.2, %v78_v30 }
   0xf   :  { %146 = vst [vmem:[%s349_s3] sm:$0xff] %v128_v38  ;;  %147 = vst [vmem:[%s349_s3 + $0x8] sm:$0xff] %v129_v39  ;;  %v130_v43 = vsel %vm94_vm2, %v76_v28, %v112_v36  ;;  %v131_v44 = vsel %vm95_vm3, %v77_v29, %v113_v37  ;;  %vm97_vm5 = vcmp.gt.f32.partialorder %v79_v31, 0.0  ;;  %v115_v45 = vmul.f32 -0.2, %v79_v31 }
  0x10   :  { %148 = vst [vmem:[%s349_s3 + $0x10] sm:$0xff] %v130_v43  ;;  %149 = vst [vmem:[%s349_s3 + $0x18] sm:$0xff] %v131_v44  ;;  %v132_v49 = vsel %vm96_vm4, %v78_v30, %v114_v40  ;;  %vm98_vm6 = vcmp.gt.f32.partialorder %v80_v32, 0.0  ;;  %v116_v50 = vmul.f32 -0.2, %v80_v32  ;;  %vm99_vm7 = vcmp.gt.f32.partialorder %v81_v33, 0.0 }
  0x11   :  { %150 = vst [vmem:[%s349_s3 + $0x20] sm:$0xff] %v132_v49  ;;  %v133_v52 = vsel %vm97_vm5, %v79_v31, %v115_v45  ;;  %v117_v53 = vmul.f32 -0.2, %v81_v33  ;;  %v52_v54 = vmul.f32 %v209_v11, %v22_v41  ;;  %v53_v55 = vmul.f32 %v213_v13, %v23_v42 }
  0x12   :  { %151 = vst [vmem:[%s349_s3 + $0x28] sm:$0xff] %v133_v52  ;;  %v134_v57 = vsel %vm98_vm6, %v80_v32, %v116_v50  ;;  %v54_v58 = vmul.f32 %v209_v11, %v24_v46  ;;  %v55_v59 = vmul.f32 %v213_v13, %v25_v47  ;;  %v56_v60 = vmul.f32 %v209_v11, %v26_v48 }
  0x13   :  { %152 = vst [vmem:[%s349_s3 + $0x30] sm:$0xff] %v134_v57  ;;  %v135_v61 = vsel %vm99_vm7, %v81_v33, %v117_v53  ;;  %v82_v62 = vadd.f32 %v211_v12, %v52_v54  ;;  %v83_v63 = vadd.f32 %v215_v14, %v53_v55  ;;  %v57_v0 = vmul.f32 %v213_v13, %v27_v51 }
  0x14   :  { %153 = vst [vmem:[%s349_s3 + $0x38] sm:$0xff] %v135_v61  ;;  %v84_v1 = vadd.f32 %v211_v12, %v54_v58  ;;  %v85_v2 = vadd.f32 %v215_v14, %v55_v59  ;;  %v86_v3 = vadd.f32 %v211_v12, %v56_v60  ;;  %v58_v4 = vmul.f32 %v209_v11, %v28_v56 }
  0x15   :  { %vm100_vm8 = vcmp.gt.f32.partialorder %v82_v62, 0.0  ;;  %v118_v8 = vmul.f32 -0.2, %v82_v62  ;;  %vm101_vm9 = vcmp.gt.f32.partialorder %v83_v63, 0.0  ;;  %v119_v9 = vmul.f32 -0.2, %v83_v63 }
  0x16   :  { %vm102_vm10 = vcmp.gt.f32.partialorder %v84_v1, 0.0  ;;  %v120_v10 = vmul.f32 -0.2, %v84_v1  ;;  %vm103_vm11 = vcmp.gt.f32.partialorder %v85_v2, 0.0  ;;  %v121_v15 = vmul.f32 -0.2, %v85_v2 }
  0x17   :  { %v136_v16 = vsel %vm100_vm8, %v82_v62, %v118_v8  ;;  %v137_v17 = vsel %vm101_vm9, %v83_v63, %v119_v9  ;;  %vm104_vm12 = vcmp.gt.f32.partialorder %v86_v3, 0.0  ;;  %v122_v18 = vmul.f32 -0.2, %v86_v3 }
  0x18   :  { %154 = vst [vmem:[%s349_s3 + $0x40] sm:$0xff] %v136_v16  ;;  %155 = vst [vmem:[%s349_s3 + $0x48] sm:$0xff] %v137_v17  ;;  %v138_v19 = vsel %vm102_vm10, %v84_v1, %v120_v10  ;;  %v139_v20 = vsel %vm103_vm11, %v85_v2, %v121_v15  ;;  %v87_v21 = vadd.f32 %v215_v14, %v57_v0 }
  0x19   :  { %v88_v22 = vadd.f32 %v211_v12, %v58_v4  ;;  %156 = vst [vmem:[%s349_s3 + $0x50] sm:$0xff] %v138_v19  ;;  %157 = vst [vmem:[%s349_s3 + $0x58] sm:$0xff] %v139_v20  ;;  %v140_v23 = vsel %vm104_vm12, %v86_v3, %v122_v18  ;;  %v59_v24 = vmul.f32 %v213_v13, %v29_v5 }
  0x1a   :  { %v60_v25 = vmul.f32 %v209_v11, %v30_v6  ;;  %v61_v26 = vmul.f32 %v213_v13, %v31_v7  ;;  %158 = vst [vmem:[%s349_s3 + $0x60] sm:$0xff] %v140_v23  ;;  %vm105_vm13 = vcmp.gt.f32.partialorder %v87_v21, 0.0  ;;  %v123_v27 = vmul.f32 -0.2, %v87_v21 }
  0x1b   :  { %vm106_vm14 = vcmp.gt.f32.partialorder %v88_v22, 0.0  ;;  %v124_v28 = vmul.f32 -0.2, %v88_v22  ;;  %v89_v29 = vadd.f32 %v215_v14, %v59_v24 }
  0x1c   :  { %v90_v30 = vadd.f32 %v211_v12, %v60_v25  ;;  %v91_v31 = vadd.f32 %v215_v14, %v61_v26  ;;  %v141_v32 = vsel %vm105_vm13, %v87_v21, %v123_v27 }
  0x1d   :  { %v142_v33 = vsel %vm106_vm14, %v88_v22, %v124_v28  ;;  %159 = vst [vmem:[%s349_s3 + $0x68] sm:$0xff] %v141_v32  ;;  %vm107_vm15 = vcmp.gt.f32.partialorder %v89_v29, 0.0  ;;  %v125_v11 = vmul.f32 -0.2, %v89_v29 }
  0x1e   :  { %160 = vst [vmem:[%s349_s3 + $0x70] sm:$0xff] %v142_v33  ;;  %vm108_vm0 = vcmp.gt.f32.partialorder %v90_v30, 0.0  ;;  %v126_v13 = vmul.f32 -0.2, %v90_v30  ;;  %vm109_vm1 = vcmp.gt.f32.partialorder %v91_v31, 0.0 }
  0x1f   :  { %v127_v34 = vmul.f32 -0.2, %v91_v31  ;;  %v143_v35 = vsel %vm107_vm15, %v89_v29, %v125_v11 }
  0x20   :  { %v144_v12 = vsel %vm108_vm0, %v90_v30, %v126_v13  ;;  %161 = vst [vmem:[%s349_s3 + $0x78] sm:$0xff] %v143_v35 }
  0x21   :  { %162 = vst [vmem:[%s349_s3 + $0x80] sm:$0xff] %v144_v12  ;;  %v145_v14 = vsel %vm109_vm1, %v91_v31, %v127_v34 }
  0x22   :  { %163 = vst [vmem:[%s349_s3 + $0x88] sm:$0xff] %v145_v14 }

// kernel: discriminator_forward.11
= control target key start
LH: loop header
LB: loop body
LE: loop exit
PB: predicated region body
PF: predicated region fallthrough
CT: control target
= control target key end

     0   :  { %s4877_s1 = inlined_call_operand.vmem [shape: bf16[2048,256], index: 1, kind: input, shape index: {}]   ;;  %s4878_s0 = inlined_call_operand.vmem [shape: bf16[72,2048], index: 0, kind: input, shape index: {}]   ;;  %s4879_s2 = inlined_call_operand.vmem [shape: f32[72,256], index: 2, kind: output, shape index: {0}]   ;;  %s4880_s3 = inlined_call_operand.vmem [shape: f32[8,256], index: 3, kind: output, shape index: {1}]  }
   0x1   :  { %v3188_v0 = vld [vmem:[%s4877_s1 + $0x74] ss:$8 sps:$4 sm:$0xff]   ;;  %v3192_v2 = vld [vmem:[%s4877_s1 + $0x70] ss:$8 sps:$4 sm:$0xff]   ;;  %v3194_v4 = vld [vmem:[%s4877_s1 + $0x64] ss:$8 sps:$4 sm:$0xff]  }
   0x2   :  { %v3190_v1 = vld [vmem:[%s4877_s1 + $0x174] ss:$8 sps:$4 sm:$0xff]   ;;  %2037 = vmatprep.subr.bf16.mxu0 %v3188_v0  ;;  %v3193_v3 = vld [vmem:[%s4877_s1 + $0x170] ss:$8 sps:$4 sm:$0xff]   ;;  %v3196_v5 = vld [vmem:[%s4877_s1 + $0x164] ss:$8 sps:$4 sm:$0xff]  }
   0x3   :  { %2118 = vmatprep.subr.bf16.mxu1 %v3190_v1  ;;  %2038 = vmatpush1.bf16.msra.mxu0 %v3192_v2  ;;  %v3198_v6 = vld [vmem:[%s4877_s1 + $0x60] ss:$8 sps:$4 sm:$0xff]   ;;  %v3200_v8 = vld [vmem:[%s4877_s1 + $0x54] ss:$8 sps:$4 sm:$0xff]   ;;  %v3204_v10 = vld [vmem:[%s4877_s1 + $0x50] ss:$8 sps:$4 sm:$0xff]  }
   0x4   :  { %2119 = vmatpush1.bf16.msra.mxu1 %v3193_v3  ;;  %2039 = vmatprep.subr.bf16.mxu0 %v3194_v4  ;;  %v3199_v7 = vld [vmem:[%s4877_s1 + $0x160] ss:$8 sps:$4 sm:$0xff]   ;;  %v3202_v9 = vld [vmem:[%s4877_s1 + $0x154] ss:$8 sps:$4 sm:$0xff]   ;;  %v3205_v11 = vld [vmem:[%s4877_s1 + $0x150] ss:$8 sps:$4 sm:$0xff]  }
   0x5   :  { %2120 = vmatprep.subr.bf16.mxu1 %v3196_v5  ;;  %v3206_v12 = vld [vmem:[%s4877_s1 + $0x44] ss:$8 sps:$4 sm:$0xff]   ;;  %v3210_v14 = vld [vmem:[%s4877_s1 + $0x40] ss:$8 sps:$4 sm:$0xff]   ;;  %v3212_v16 = vld [vmem:[%s4877_s1 + $0x34] ss:$8 sps:$4 sm:$0xff]  }
   0x6   :  { %v3208_v13 = vld [vmem:[%s4877_s1 + $0x144] ss:$8 sps:$4 sm:$0xff]   ;;  %v3211_v15 = vld [vmem:[%s4877_s1 + $0x140] ss:$8 sps:$4 sm:$0xff]   ;;  %v3214_v17 = vld [vmem:[%s4877_s1 + $0x134] ss:$8 sps:$4 sm:$0xff]  }
   0x7   :  { %2040 = vmatpush1.bf16.msra.mxu0 %v3198_v6  ;;  %v3216_v18 = vld [vmem:[%s4877_s1 + $0x30] ss:$8 sps:$4 sm:$0xff]   ;;  %v3218_v20 = vld [vmem:[%s4877_s1 + $0x24] ss:$8 sps:$4 sm:$0xff]   ;;  %v3222_v22 = vld [vmem:[%s4877_s1 + $0x20] ss:$8 sps:$4 sm:$0xff]  }
   0x8   :  { %2121 = vmatpush1.bf16.msra.mxu1 %v3199_v7  ;;  %2041 = vmatprep.subr.bf16.mxu0 %v3200_v8  ;;  %v3217_v19 = vld [vmem:[%s4877_s1 + $0x130] ss:$8 sps:$4 sm:$0xff]   ;;  %v3220_v21 = vld [vmem:[%s4877_s1 + $0x124] ss:$8 sps:$4 sm:$0xff]   ;;  %v3223_v23 = vld [vmem:[%s4877_s1 + $0x120] ss:$8 sps:$4 sm:$0xff]  }
   0x9   :  { %2122 = vmatprep.subr.bf16.mxu1 %v3202_v9  ;;  %v3224_v24 = vld [vmem:[%s4877_s1 + $0x14] ss:$8 sps:$4 sm:$0xff]   ;;  %v3228_v26 = vld [vmem:[%s4877_s1 + $0x10] ss:$8 sps:$4 sm:$0xff]   ;;  %v3230_v28 = vld [vmem:[%s4877_s1 + $0x4] ss:$8 sps:$4 sm:$0xff]  }
   0xa   :  { %v3226_v25 = vld [vmem:[%s4877_s1 + $0x114] ss:$8 sps:$4 sm:$0xff]   ;;  %v3229_v27 = vld [vmem:[%s4877_s1 + $0x110] ss:$8 sps:$4 sm:$0xff]   ;;  %v3232_v29 = vld [vmem:[%s4877_s1 + $0x104] ss:$8 sps:$4 sm:$0xff]  }
   0xb   :  { %2042 = vmatpush1.bf16.msra.mxu0 %v3204_v10  ;;  %v3234_v30 = vld [vmem:[%s4877_s1] ss:$8 sps:$4 sm:$0xff]   ;;  %v3236_v32 = vld [vmem:[%s4877_s1 + $0xf4] ss:$8 sps:$4 sm:$0xff]   ;;  %v3240_v34 = vld [vmem:[%s4877_s1 + $0xf0] ss:$8 sps:$4 sm:$0xff]  }
   0xc   :  { %2123 = vmatpush1.bf16.msra.mxu1 %v3205_v11  ;;  %2043 = vmatprep.subr.bf16.mxu0 %v3206_v12  ;;  %v3235_v31 = vld [vmem:[%s4877_s1 + $0x100] ss:$8 sps:$4 sm:$0xff]   ;;  %v3238_v33 = vld [vmem:[%s4877_s1 + $0x1f4] ss:$8 sps:$4 sm:$0xff]   ;;  %v3241_v35 = vld [vmem:[%s4877_s1 + $0x1f0] ss:$8 sps:$4 sm:$0xff]  }
   0xd   :  { %2124 = vmatprep.subr.bf16.mxu1 %v3208_v13  ;;  %v3242_v36 = vld [vmem:[%s4877_s1 + $0xe4] ss:$8 sps:$4 sm:$0xff]   ;;  %v3246_v38 = vld [vmem:[%s4877_s1 + $0xe0] ss:$8 sps:$4 sm:$0xff]   ;;  %v3248_v40 = vld [vmem:[%s4877_s1 + $0xd4] ss:$8 sps:$4 sm:$0xff]  }
   0xe   :  { %v3244_v37 = vld [vmem:[%s4877_s1 + $0x1e4] ss:$8 sps:$4 sm:$0xff]   ;;  %v3247_v39 = vld [vmem:[%s4877_s1 + $0x1e0] ss:$8 sps:$4 sm:$0xff]   ;;  %v3250_v41 = vld [vmem:[%s4877_s1 + $0x1d4] ss:$8 sps:$4 sm:$0xff]  }
   0xf   :  { %2044 = vmatpush1.bf16.msra.mxu0 %v3210_v14  ;;  %v3252_v42 = vld [vmem:[%s4877_s1 + $0xd0] ss:$8 sps:$4 sm:$0xff]   ;;  %v3254_v44 = vld [vmem:[%s4877_s1 + $0xc4] ss:$8 sps:$4 sm:$0xff]   ;;  %v3258_v46 = vld [vmem:[%s4877_s1 + $0xc0] ss:$8 sps:$4 sm:$0xff]  }
  0x10   :  { %2125 = vmatpush1.bf16.msra.mxu1 %v3211_v15  ;;  %2045 = vmatprep.subr.bf16.mxu0 %v3212_v16  ;;  %v3253_v43 = vld [vmem:[%s4877_s1 + $0x1d0] ss:$8 sps:$4 sm:$0xff]   ;;  %v3256_v45 = vld [vmem:[%s4877_s1 + $0x1c4] ss:$8 sps:$4 sm:$0xff]   ;;  %v3259_v47 = vld [vmem:[%s4877_s1 + $0x1c0] ss:$8 sps:$4 sm:$0xff]  }
  0x11   :  { %2126 = vmatprep.subr.bf16.mxu1 %v3214_v17  ;;  %v53_v48 = vld [vmem:[%s4878_s0] sm:$0xff]  ;;  %v54_v50 = vld [vmem:[%s4878_s0 + $0x8] sm:$0xff]  ;;  %v3260_v52 = vld [vmem:[%s4877_s1 + $0xb4] ss:$8 sps:$4 sm:$0xff]  }
  0x12   :  { %v61_v49 = vld [vmem:[%s4878_s0 + $0x40] sm:$0xff]  ;;  %v62_v51 = vld [vmem:[%s4878_s0 + $0x48] sm:$0xff]  ;;  %v3262_v54 = vld [vmem:[%s4877_s1 + $0x1b4] ss:$8 sps:$4 sm:$0xff]  }
  0x13   :  { %2046 = vmatpush1.bf16.msra.mxu0 %v3216_v18  ;;  %v2853_v53 = vcombine.high %v53_v48, %v61_v49  ;;  %v2855_v55 = vcombine.high %v54_v50, %v62_v51  ;;  %v3264_v56 = vld [vmem:[%s4877_s1 + $0xb0] ss:$8 sps:$4 sm:$0xff]   ;;  %v3266_v58 = vld [vmem:[%s4877_s1 + $0xa4] ss:$8 sps:$4 sm:$0xff]   ;;  %v3270_v60 = vld [vmem:[%s4877_s1 + $0xa0] ss:$8 sps:$4 sm:$0xff]   ;;  %v2852_v11 = vcombine.low %v53_v48, %v61_v49  ;;  %v2854_v12 = vcombine.low %v54_v50, %v62_v51 }
  0x14   :  { %2127 = vmatpush1.bf16.msra.mxu1 %v3217_v19  ;;  %2047 = vmatprep.subr.bf16.mxu0 %v3218_v20  ;;  %v3265_v57 = vld [vmem:[%s4877_s1 + $0x1b0] ss:$8 sps:$4 sm:$0xff]   ;;  %v3268_v59 = vld [vmem:[%s4877_s1 + $0x1a4] ss:$8 sps:$4 sm:$0xff]   ;;  %v3271_v61 = vld [vmem:[%s4877_s1 + $0x1a0] ss:$8 sps:$4 sm:$0xff]  }
  0x15   :  { %2128 = vmatprep.subr.bf16.mxu1 %v3220_v21  ;;  %2069 = vmatprep.mubr.bf16.mxu0 %v2853_v53  ;;  %v3272_v62 = vld [vmem:[%s4877_s1 + $0x94] ss:$8 sps:$4 sm:$0xff]   ;;  %v3276_v0 = vld [vmem:[%s4877_s1 + $0x90] ss:$8 sps:$4 sm:$0xff]   ;;  %v3278_v2 = vld [vmem:[%s4877_s1 + $0x84] ss:$8 sps:$4 sm:$0xff]  }
  0x16   :  { %2150 = vmatprep.mubr.bf16.mxu1 %v2855_v55  ;;  %v3274_v63 = vld [vmem:[%s4877_s1 + $0x194] ss:$8 sps:$4 sm:$0xff]   ;;  %v3277_v1 = vld [vmem:[%s4877_s1 + $0x190] ss:$8 sps:$4 sm:$0xff]   ;;  %v3280_v3 = vld [vmem:[%s4877_s1 + $0x184] ss:$8 sps:$4 sm:$0xff]  }
  0x17   :  { %2048 = vmatpush1.bf16.msra.mxu0 %v3222_v22  ;;  %v3282_v4 = vld [vmem:[%s4877_s1 + $0x80] ss:$8 sps:$4 sm:$0xff]   ;;  %v3286_v6 = vld [vmem:[%s4877_s1 + $0x274] ss:$8 sps:$4 sm:$0xff]   ;;  %v3284_v8 = vld [vmem:[%s4877_s1 + $0x270] ss:$8 sps:$4 sm:$0xff]  }
  0x18   :  { %2129 = vmatpush1.bf16.msra.mxu1 %v3223_v23  ;;  %2049 = vmatprep.subr.bf16.mxu0 %v3224_v24  ;;  %v3283_v5 = vld [vmem:[%s4877_s1 + $0x180] ss:$8 sps:$4 sm:$0xff]   ;;  %v3289_v7 = vld [vmem:[%s4877_s1 + $0x374] ss:$8 sps:$4 sm:$0xff]   ;;  %v3287_v9 = vld [vmem:[%s4877_s1 + $0x370] ss:$8 sps:$4 sm:$0xff]  }
  0x19   :  { %2130 = vmatprep.subr.bf16.mxu1 %v3226_v25  ;;  %v69_v10 = vld [vmem:[%s4878_s0 + $0x80] sm:$0xff]  ;;  %v70_v14 = vld [vmem:[%s4878_s0 + $0x88] sm:$0xff]  ;;  %v3298_v22 = vld [vmem:[%s4877_s1 + $0x254] ss:$8 sps:$4 sm:$0xff]  }
  0x1a   :  { %v77_v13 = vld [vmem:[%s4878_s0 + $0xc0] sm:$0xff]  ;;  %v78_v15 = vld [vmem:[%s4878_s0 + $0xc8] sm:$0xff]  ;;  %v3301_v23 = vld [vmem:[%s4877_s1 + $0x354] ss:$8 sps:$4 sm:$0xff]  }
  0x1b   :  { %2050 = vmatpush1.bf16.msra.mxu0 %v3228_v26  ;;  %v3292_v16 = vld [vmem:[%s4877_s1 + $0x264] ss:$8 sps:$4 sm:$0xff]   ;;  %v2869_v18 = vcombine.high %v69_v10, %v77_v13  ;;  %v2871_v19 = vcombine.high %v70_v14, %v78_v15  ;;  %v3290_v20 = vld [vmem:[%s4877_s1 + $0x260] ss:$8 sps:$4 sm:$0xff]   ;;  %v3296_v24 = vld [vmem:[%s4877_s1 + $0x250] ss:$8 sps:$4 sm:$0xff]  }
  0x1c   :  { %2131 = vmatpush1.bf16.msra.mxu1 %v3229_v27  ;;  %2051 = vmatprep.subr.bf16.mxu0 %v3230_v28  ;;  %v3295_v17 = vld [vmem:[%s4877_s1 + $0x364] ss:$8 sps:$4 sm:$0xff]   ;;  %v3293_v21 = vld [vmem:[%s4877_s1 + $0x360] ss:$8 sps:$4 sm:$0xff]   ;;  %v3299_v25 = vld [vmem:[%s4877_s1 + $0x350] ss:$8 sps:$4 sm:$0xff]   ;;  %v2868_v28 = vcombine.low %v69_v10, %v77_v13 }
  0x1d   :  { %2132 = vmatprep.subr.bf16.mxu1 %v3232_v29  ;;  %v85_v26 = vld [vmem:[%s4878_s0 + $0x100] sm:$0xff]  ;;  %v2870_v29 = vcombine.low %v70_v14, %v78_v15  ;;  %v3325_v55 = vld [vmem:[%s4877_s1 + $0x314] ss:$8 sps:$4 sm:$0xff]   ;;  %v3335_v13 = vld [vmem:[%s4877_s1 + $0x3f0] ss:$8 sps:$4 sm:$0xff]  }
  0x1e   :  { %v93_v27 = vld [vmem:[%s4878_s0 + $0x140] sm:$0xff] }
  0x1f   :  { %2052 = vmatpush1.bf16.msra.mxu0 %v3234_v30  ;;  %v86_v30 = vld [vmem:[%s4878_s0 + $0x108] sm:$0xff] }
  0x20   :  { %2133 = vmatpush1.bf16.msra.mxu1 %v3235_v31  ;;  %2053 = vmatprep.subr.bf16.mxu0 %v3236_v32  ;;  %v94_v31 = vld [vmem:[%s4878_s0 + $0x148] sm:$0xff] }
  0x21   :  { %2134 = vmatprep.subr.bf16.mxu1 %v3238_v33  ;;  %v3304_v32 = vld [vmem:[%s4877_s1 + $0x244] ss:$8 sps:$4 sm:$0xff]   ;;  %v3317_v53 = vld [vmem:[%s4877_s1 + $0x320] ss:$8 sps:$4 sm:$0xff]  }
  0x22   :  { %v3307_v33 = vld [vmem:[%s4877_s1 + $0x344] ss:$8 sps:$4 sm:$0xff]  }
  0x23   :  { %2054 = vmatpush2.bf16.msra.mxu0 %v3240_v34  ;;  %v2885_v34 = vcombine.high %v85_v26, %v93_v27  ;;  %v3316_v48 = vld [vmem:[%s4877_s1 + $0x224] ss:$8 sps:$4 sm:$0xff]  }
  0x24   :  { %2135 = vmatpush2.bf16.msra.mxu1 %v3241_v35  ;;  %2055 = vmatprep.subr.bf16.mxu0 %v3242_v36  ;;  %v2887_v35 = vcombine.high %v86_v30, %v94_v31  ;;  %v3302_v36 = vld [vmem:[%s4877_s1 + $0x240] ss:$8 sps:$4 sm:$0xff]   ;;  %v3319_v49 = vld [vmem:[%s4877_s1 + $0x324] ss:$8 sps:$4 sm:$0xff]  }
  0x25   :  { %2136 = vmatprep.subr.bf16.mxu1 %v3244_v37  ;;  %v3305_v37 = vld [vmem:[%s4877_s1 + $0x340] ss:$8 sps:$4 sm:$0xff]   ;;  %v3340_v14 = vld [vmem:[%s4877_s1 + $0x2e4] ss:$8 sps:$4 sm:$0xff]  }
  0x26   :  { %v3343_v15 = vld [vmem:[%s4877_s1 + $0x3e4] ss:$8 sps:$4 sm:$0xff]  }
  0x27   :  { %2056 = vmatpush2.bf16.msra.mxu0 %v3246_v38  ;;  %v3310_v38 = vld [vmem:[%s4877_s1 + $0x234] ss:$8 sps:$4 sm:$0xff]  }
  0x28   :  { %2137 = vmatpush2.bf16.msra.mxu1 %v3247_v39  ;;  %2057 = vmatprep.subr.bf16.mxu0 %v3248_v40  ;;  %v3313_v39 = vld [vmem:[%s4877_s1 + $0x334] ss:$8 sps:$4 sm:$0xff]   ;;  %v3308_v40 = vld [vmem:[%s4877_s1 + $0x230] ss:$8 sps:$4 sm:$0xff]  }
  0x29   :  { %2138 = vmatprep.subr.bf16.mxu1 %v3250_v41  ;;  %v3311_v41 = vld [vmem:[%s4877_s1 + $0x330] ss:$8 sps:$4 sm:$0xff]  }
  0x2b   :  { %2058 = vmatpush2.bf16.msra.mxu0 %v3252_v42  ;;  %v101_v42 = vld [vmem:[%s4878_s0 + $0x180] sm:$0xff] }
  0x2c   :  { %2139 = vmatpush2.bf16.msra.mxu1 %v3253_v43  ;;  %2059 = vmatprep.subr.bf16.mxu0 %v3254_v44  ;;  %v109_v43 = vld [vmem:[%s4878_s0 + $0x1c0] sm:$0xff]  ;;  %v2884_v44 = vcombine.low %v85_v26, %v93_v27 }
  0x2d   :  { %2140 = vmatprep.subr.bf16.mxu1 %v3256_v45  ;;  %v2886_v45 = vcombine.low %v86_v30, %v94_v31  ;;  %v2901_v50 = vcombine.high %v101_v42, %v109_v43  ;;  %v3350_v26 = vld [vmem:[%s4877_s1 + $0x2c0] ss:$8 sps:$4 sm:$0xff]   ;;  %v3356_v30 = vld [vmem:[%s4877_s1 + $0x2b0] ss:$8 sps:$4 sm:$0xff]  }
  0x2e   :  { %v3353_v27 = vld [vmem:[%s4877_s1 + $0x3c0] ss:$8 sps:$4 sm:$0xff]   ;;  %v3359_v31 = vld [vmem:[%s4877_s1 + $0x3b0] ss:$8 sps:$4 sm:$0xff]  }
  0x2f   :  { %2060 = vmatpush2.bf16.msra.mxu0 %v3258_v46  ;;  %v102_v46 = vld [vmem:[%s4878_s0 + $0x188] sm:$0xff] }
  0x30   :  { %2141 = vmatpush2.bf16.msra.mxu1 %v3259_v47  ;;  %2061 = vmatprep.subr.bf16.mxu0 %v3260_v52  ;;  %v110_v47 = vld [vmem:[%s4878_s0 + $0x1c8] sm:$0xff] }
  0x31   :  { %2142 = vmatprep.subr.bf16.mxu1 %v3262_v54  ;;  %v2903_v51 = vcombine.high %v102_v46, %v110_v47  ;;  %v3314_v52 = vld [vmem:[%s4877_s1 + $0x220] ss:$8 sps:$4 sm:$0xff]   ;;  %v3322_v54 = vld [vmem:[%s4877_s1 + $0x214] ss:$8 sps:$4 sm:$0xff]  }
  0x33   :  { %2062 = vmatpush2.bf16.msra.mxu0 %v3264_v56  ;;  %v117_v56 = vld [vmem:[%s4878_s0 + $0x200] sm:$0xff] }
  0x34   :  { %2143 = vmatpush2.bf16.msra.mxu1 %v3265_v57  ;;  %2063 = vmatprep.subr.bf16.mxu0 %v3266_v58  ;;  %v2900_v57 = vcombine.low %v101_v42, %v109_v43  ;;  %v2902_v58 = vcombine.low %v102_v46, %v110_v47  ;;  %v3378_v42 = vld [vmem:[%s4877_s1 + $0x280] ss:$8 sps:$4 sm:$0xff]   ;;  %v3384_v46 = vld [vmem:[%s4877_s1 + $0x470] ss:$8 sps:$4 sm:$0xff]  }
  0x35   :  { %2144 = vmatprep.subr.bf16.mxu1 %v3268_v59  ;;  %v118_v59 = vld [vmem:[%s4878_s0 + $0x208] sm:$0xff]  ;;  %v3387_v47 = vld [vmem:[%s4877_s1 + $0x570] ss:$8 sps:$4 sm:$0xff]  }
  0x36   :  { %v2918_v10 = vcombine.low %v118_v59, %v118_v59  ;;  %v3381_v43 = vld [vmem:[%s4877_s1 + $0x380] ss:$8 sps:$4 sm:$0xff]  }
  0x37   :  { %2064 = vmatpush2.bf16.msra.mxu0 %v3270_v60  ;;  %v3320_v60 = vld [vmem:[%s4877_s1 + $0x210] ss:$8 sps:$4 sm:$0xff]  }
  0x38   :  { %2145 = vmatpush2.bf16.msra.mxu1 %v3271_v61  ;;  %2065 = vmatprep.subr.bf16.mxu0 %v3272_v62  ;;  %v3323_v61 = vld [vmem:[%s4877_s1 + $0x310] ss:$8 sps:$4 sm:$0xff]   ;;  %v3328_v62 = vld [vmem:[%s4877_s1 + $0x204] ss:$8 sps:$4 sm:$0xff]  }
  0x39   :  { %2146 = vmatprep.subr.bf16.mxu1 %v3274_v63  ;;  %v3331_v63 = vld [vmem:[%s4877_s1 + $0x304] ss:$8 sps:$4 sm:$0xff]  }
  0x3b   :  { %2066 = vmatpush2.bf16.msra.mxu0 %v3276_v0  ;;  %v2917_v0 = vcombine.high %v117_v56, %v117_v56 }
  0x3c   :  { %2147 = vmatpush2.bf16.msra.mxu1 %v3277_v1  ;;  %2067 = vmatprep.subr.bf16.mxu0 %v3278_v2  ;;  %v2919_v1 = vcombine.high %v118_v59, %v118_v59  ;;  %v3326_v2 = vld [vmem:[%s4877_s1 + $0x200] ss:$8 sps:$4 sm:$0xff]  }
  0x3d   :  { %2148 = vmatprep.subr.bf16.mxu1 %v3280_v3  ;;  %v3329_v3 = vld [vmem:[%s4877_s1 + $0x300] ss:$8 sps:$4 sm:$0xff]  }
  0x3e   :  { %v3393_v59 = vld [vmem:[%s4877_s1 + $0x560] ss:$8 sps:$4 sm:$0xff]  }
  0x3f   :  { %2068 = vmatpush2.bf16.msra.mxu0 %v3282_v4  ;;  %v3334_v4 = vld [vmem:[%s4877_s1 + $0x2f4] ss:$8 sps:$4 sm:$0xff]  }
  0x40   :  { %2149 = vmatpush2.bf16.msra.mxu1 %v3283_v5  ;;  %2199 = vmatprep.subr.bf16.mxu0 %v3286_v6  ;;  %v3337_v5 = vld [vmem:[%s4877_s1 + $0x3f4] ss:$8 sps:$4 sm:$0xff]  }
  0x41   :  { %2280 = vmatprep.subr.bf16.mxu1 %v3289_v7  ;;  %v3959_v6 = vld [vmem:[%s4878_s0 + $0x10] sm:$0xff] }
  0x42   :  { %2070 = vmatmul.mubr.bf16.vlgmr.msra.gmra.mxu0 %v2852_v11  ;;  %v3964_v7 = vld [vmem:[%s4878_s0 + $0x50] sm:$0xff]  ;;  %v3974_v11 = vld [vmem:[%s4878_s0 + $0x58] sm:$0xff] }
  0x43   :  { %2151 = vmatmul.mubr.bf16.vlgmr.msra.gmra.mxu1 %v2854_v12  ;;  %2200 = vmatpush1.bf16.msra.mxu0 %v3284_v8  ;;  %v3969_v8 = vld [vmem:[%s4878_s0 + $0x18] sm:$0xff] }
  0x44   :  { %2281 = vmatpush1.bf16.msra.mxu1 %v3287_v9  ;;  %2201 = vmatprep.subr.bf16.mxu0 %v3292_v16  ;;  %v2916_v9 = vcombine.low %v117_v56, %v117_v56  ;;  %v3332_v12 = vld [vmem:[%s4877_s1 + $0x2f0] ss:$8 sps:$4 sm:$0xff]   ;;  %v2857_v16 = vcombine.high %v3959_v6, %v3964_v7 }
  0x45   :  { %2282 = vmatprep.subr.bf16.mxu1 %v3295_v17  ;;  %2079 = vmatprep.mubr.bf16.mxu0 %v2869_v18  ;;  %v2859_v17 = vcombine.high %v3969_v8, %v3974_v11  ;;  %v3338_v18 = vld [vmem:[%s4877_s1 + $0x2e0] ss:$8 sps:$4 sm:$0xff]  }
  0x46   :  { %2160 = vmatprep.mubr.bf16.mxu1 %v2871_v19  ;;  %v3341_v19 = vld [vmem:[%s4877_s1 + $0x3e0] ss:$8 sps:$4 sm:$0xff]  }
  0x47   :  { %2202 = vmatpush1.bf16.msra.mxu0 %v3290_v20  ;;  %v3346_v20 = vld [vmem:[%s4877_s1 + $0x2d4] ss:$8 sps:$4 sm:$0xff]  }
  0x48   :  { %2283 = vmatpush1.bf16.msra.mxu1 %v3293_v21  ;;  %2203 = vmatprep.subr.bf16.mxu0 %v3298_v22  ;;  %v3349_v21 = vld [vmem:[%s4877_s1 + $0x3d4] ss:$8 sps:$4 sm:$0xff]   ;;  %v3344_v22 = vld [vmem:[%s4877_s1 + $0x2d0] ss:$8 sps:$4 sm:$0xff]  }
  0x49   :  { %2284 = vmatprep.subr.bf16.mxu1 %v3301_v23  ;;  %v3347_v23 = vld [vmem:[%s4877_s1 + $0x3d0] ss:$8 sps:$4 sm:$0xff]  }
  0x4a   :  { %2080 = vmatmul.mubr.bf16.gmra.mxu0 %v2868_v28  ;;  %v3358_v28 = vld [vmem:[%s4877_s1 + $0x2b4] ss:$8 sps:$4 sm:$0xff]  }
  0x4b   :  { %2161 = vmatmul.mubr.bf16.gmra.mxu1 %v2870_v29  ;;  %2204 = vmatpush1.bf16.msra.mxu0 %v3296_v24  ;;  %v3352_v24 = vld [vmem:[%s4877_s1 + $0x2c4] ss:$8 sps:$4 sm:$0xff]   ;;  %v3361_v29 = vld [vmem:[%s4877_s1 + $0x3b4] ss:$8 sps:$4 sm:$0xff]  }
  0x4c   :  { %2285 = vmatpush1.bf16.msra.mxu1 %v3299_v25  ;;  %2205 = vmatprep.subr.bf16.mxu0 %v3304_v32  ;;  %v3355_v25 = vld [vmem:[%s4877_s1 + $0x3c4] ss:$8 sps:$4 sm:$0xff]  }
  0x4d   :  { %2286 = vmatprep.subr.bf16.mxu1 %v3307_v33  ;;  %2089 = vmatprep.mubr.bf16.mxu0 %v2885_v34  ;;  %v3367_v32 = vld [vmem:[%s4877_s1 + $0x2a4] ss:$8 sps:$4 sm:$0xff]   ;;  %v3365_v34 = vld [vmem:[%s4877_s1 + $0x2a0] ss:$8 sps:$4 sm:$0xff]  }
  0x4e   :  { %2170 = vmatprep.mubr.bf16.mxu1 %v2887_v35  ;;  %v3370_v33 = vld [vmem:[%s4877_s1 + $0x3a4] ss:$8 sps:$4 sm:$0xff]   ;;  %v3368_v35 = vld [vmem:[%s4877_s1 + $0x3a0] ss:$8 sps:$4 sm:$0xff]  }
  0x4f   :  { %2206 = vmatpush1.bf16.msra.mxu0 %v3302_v36  ;;  %v3374_v36 = vld [vmem:[%s4877_s1 + $0x294] ss:$8 sps:$4 sm:$0xff]  }
  0x50   :  { %2287 = vmatpush1.bf16.msra.mxu1 %v3305_v37  ;;  %2207 = vmatprep.subr.bf16.mxu0 %v3310_v38  ;;  %v3377_v37 = vld [vmem:[%s4877_s1 + $0x394] ss:$8 sps:$4 sm:$0xff]   ;;  %v3372_v38 = vld [vmem:[%s4877_s1 + $0x290] ss:$8 sps:$4 sm:$0xff]  }
  0x51   :  { %2288 = vmatprep.subr.bf16.mxu1 %v3313_v39  ;;  %v3375_v39 = vld [vmem:[%s4877_s1 + $0x390] ss:$8 sps:$4 sm:$0xff]  }
  0x52   :  { %2090 = vmatmul.mubr.bf16.gmra.mxu0 %v2884_v44  ;;  %v3386_v44 = vld [vmem:[%s4877_s1 + $0x474] ss:$8 sps:$4 sm:$0xff]  }
  0x53   :  { %2171 = vmatmul.mubr.bf16.gmra.mxu1 %v2886_v45  ;;  %2208 = vmatpush1.bf16.msra.mxu0 %v3308_v40  ;;  %v3380_v40 = vld [vmem:[%s4877_s1 + $0x284] ss:$8 sps:$4 sm:$0xff]   ;;  %v3389_v45 = vld [vmem:[%s4877_s1 + $0x574] ss:$8 sps:$4 sm:$0xff]  }
  0x54   :  { %2289 = vmatpush1.bf16.msra.mxu1 %v3311_v41  ;;  %2209 = vmatprep.subr.bf16.mxu0 %v3316_v48  ;;  %v3383_v41 = vld [vmem:[%s4877_s1 + $0x384] ss:$8 sps:$4 sm:$0xff]   ;;  %v71_v48 = vld [vmem:[%s4878_s0 + $0x90] sm:$0xff] }
  0x55   :  { %2290 = vmatprep.subr.bf16.mxu1 %v3319_v49  ;;  %2099 = vmatprep.mubr.bf16.mxu0 %v2901_v50  ;;  %v79_v49 = vld [vmem:[%s4878_s0 + $0xd0] sm:$0xff]  ;;  %v2856_v50 = vcombine.low %v3959_v6, %v3964_v7  ;;  %v3404_v6 = vld [vmem:[%s4877_s1 + $0x444] ss:$8 sps:$4 sm:$0xff]  }
  0x56   :  { %2180 = vmatprep.mubr.bf16.mxu1 %v2903_v51  ;;  %v2858_v51 = vcombine.low %v3969_v8, %v3974_v11  ;;  %v2873_v56 = vcombine.high %v71_v48, %v79_v49  ;;  %v3407_v7 = vld [vmem:[%s4877_s1 + $0x544] ss:$8 sps:$4 sm:$0xff]   ;;  %v3405_v11 = vld [vmem:[%s4877_s1 + $0x540] ss:$8 sps:$4 sm:$0xff]  }
  0x57   :  { %2210 = vmatpush1.bf16.msra.mxu0 %v3314_v52  ;;  %v72_v52 = vld [vmem:[%s4878_s0 + $0x98] sm:$0xff] }
  0x58   :  { %2291 = vmatpush1.bf16.msra.mxu1 %v3317_v53  ;;  %2211 = vmatprep.subr.bf16.mxu0 %v3322_v54  ;;  %v80_v53 = vld [vmem:[%s4878_s0 + $0xd8] sm:$0xff]  ;;  %v3392_v54 = vld [vmem:[%s4877_s1 + $0x464] ss:$8 sps:$4 sm:$0xff]  }
  0x59   :  { %2292 = vmatprep.subr.bf16.mxu1 %v3325_v55  ;;  %v3395_v55 = vld [vmem:[%s4877_s1 + $0x564] ss:$8 sps:$4 sm:$0xff]  }
  0x5a   :  { %2100 = vmatmul.mubr.bf16.gmra.mxu0 %v2900_v57  ;;  %v2875_v57 = vcombine.high %v72_v52, %v80_v53 }
  0x5b   :  { %2181 = vmatmul.mubr.bf16.gmra.mxu1 %v2902_v58  ;;  %2212 = vmatpush1.bf16.msra.mxu0 %v3320_v60  ;;  %v3390_v58 = vld [vmem:[%s4877_s1 + $0x460] ss:$8 sps:$4 sm:$0xff]   ;;  %v3398_v60 = vld [vmem:[%s4877_s1 + $0x454] ss:$8 sps:$4 sm:$0xff]  }
  0x5c   :  { %2293 = vmatpush1.bf16.msra.mxu1 %v3323_v61  ;;  %2213 = vmatprep.subr.bf16.mxu0 %v3328_v62  ;;  %v3401_v61 = vld [vmem:[%s4877_s1 + $0x554] ss:$8 sps:$4 sm:$0xff]   ;;  %v3396_v62 = vld [vmem:[%s4877_s1 + $0x450] ss:$8 sps:$4 sm:$0xff]  }
  0x5d   :  { %2294 = vmatprep.subr.bf16.mxu1 %v3331_v63  ;;  %2109 = vmatprep.mubr.bf16.mxu0 %v2917_v0  ;;  %v3399_v63 = vld [vmem:[%s4877_s1 + $0x550] ss:$8 sps:$4 sm:$0xff]  }
  0x5e   :  { %2190 = vmatprep.mubr.bf16.mxu1 %v2919_v1  ;;  %v87_v0 = vld [vmem:[%s4878_s0 + $0x110] sm:$0xff] }
  0x5f   :  { %2214 = vmatpush1.bf16.msra.mxu0 %v3326_v2  ;;  %v95_v1 = vld [vmem:[%s4878_s0 + $0x150] sm:$0xff]  ;;  %v2872_v2 = vcombine.low %v71_v48, %v79_v49  ;;  %v4231_v48 = vld [vmem:[%s4878_s0 + $0x28] sm:$0xff] }
  0x60   :  { %2295 = vmatpush1.bf16.msra.mxu1 %v3329_v3  ;;  %2215 = vmatprep.subr.bf16.mxu0 %v3334_v4  ;;  %v2874_v3 = vcombine.low %v72_v52, %v80_v53  ;;  %v88_v4 = vld [vmem:[%s4878_s0 + $0x118] sm:$0xff]  ;;  %v2889_v8 = vcombine.high %v87_v0, %v95_v1  ;;  %v4236_v49 = vld [vmem:[%s4878_s0 + $0x68] sm:$0xff] }
  0x61   :  { %2296 = vmatprep.subr.bf16.mxu1 %v3337_v5  ;;  %v96_v5 = vld [vmem:[%s4878_s0 + $0x158] sm:$0xff]  ;;  %v3444_v52 = vld [vmem:[%s4877_s1 + $0x4e4] ss:$8 sps:$4 sm:$0xff]  }
  0x62   :  { %2110 = vmatmul.mubr.bf16.gmra.mxu0 %v2916_v9  ;;  %v2891_v9 = vcombine.high %v88_v4, %v96_v5  ;;  %v3447_v53 = vld [vmem:[%s4877_s1 + $0x5e4] ss:$8 sps:$4 sm:$0xff]  }
  0x63   :  { %2191 = vmatmul.mubr.bf16.gmra.mxu1 %v2918_v10  ;;  %2216 = vmatpush2.bf16.msra.mxu0 %v3332_v12  ;;  %v3402_v10 = vld [vmem:[%s4877_s1 + $0x440] ss:$8 sps:$4 sm:$0xff]   ;;  %v3410_v12 = vld [vmem:[%s4877_s1 + $0x434] ss:$8 sps:$4 sm:$0xff]  }
  0x64   :  { %2297 = vmatpush2.bf16.msra.mxu1 %v3335_v13  ;;  %2217 = vmatprep.subr.bf16.mxu0 %v3340_v14  ;;  %v3413_v13 = vld [vmem:[%s4877_s1 + $0x534] ss:$8 sps:$4 sm:$0xff]   ;;  %v3408_v14 = vld [vmem:[%s4877_s1 + $0x430] ss:$8 sps:$4 sm:$0xff]  }
  0x65   :  { %2298 = vmatprep.subr.bf16.mxu1 %v3343_v15  ;;  %2231 = vmatprep.mubr.bf16.mxu0 %v2857_v16  ;;  %v3411_v15 = vld [vmem:[%s4877_s1 + $0x530] ss:$8 sps:$4 sm:$0xff]  }
  0x66   :  { %2312 = vmatprep.mubr.bf16.mxu1 %v2859_v17  ;;  %v103_v16 = vld [vmem:[%s4878_s0 + $0x190] sm:$0xff] }
  0x67   :  { %2218 = vmatpush2.bf16.msra.mxu0 %v3338_v18  ;;  %v111_v17 = vld [vmem:[%s4878_s0 + $0x1d0] sm:$0xff]  ;;  %v2888_v18 = vcombine.low %v87_v0, %v95_v1  ;;  %v3454_v0 = vld [vmem:[%s4877_s1 + $0x4c0] ss:$8 sps:$4 sm:$0xff]  }
  0x68   :  { %2299 = vmatpush2.bf16.msra.mxu1 %v3341_v19  ;;  %2219 = vmatprep.subr.bf16.mxu0 %v3346_v20  ;;  %v2890_v19 = vcombine.low %v88_v4, %v96_v5  ;;  %v104_v20 = vld [vmem:[%s4878_s0 + $0x198] sm:$0xff]  ;;  %v3457_v1 = vld [vmem:[%s4877_s1 + $0x5c0] ss:$8 sps:$4 sm:$0xff]  }
  0x69   :  { %2300 = vmatprep.subr.bf16.mxu1 %v3349_v21  ;;  %v112_v21 = vld [vmem:[%s4878_s0 + $0x1d8] sm:$0xff] }
  0x6a   :  { %v3460_v4 = vld [vmem:[%s4877_s1 + $0x4b0] ss:$8 sps:$4 sm:$0xff]  }
  0x6b   :  { %2220 = vmatpush2.bf16.msra.mxu0 %v3344_v22  ;;  %v3416_v22 = vld [vmem:[%s4877_s1 + $0x424] ss:$8 sps:$4 sm:$0xff]   ;;  %v3463_v5 = vld [vmem:[%s4877_s1 + $0x5b0] ss:$8 sps:$4 sm:$0xff]  }
  0x6c   :  { %2301 = vmatpush2.bf16.msra.mxu1 %v3347_v23  ;;  %2221 = vmatprep.subr.bf16.mxu0 %v3352_v24  ;;  %v3419_v23 = vld [vmem:[%s4877_s1 + $0x524] ss:$8 sps:$4 sm:$0xff]   ;;  %v2905_v24 = vcombine.high %v103_v16, %v111_v17 }
  0x6d   :  { %2302 = vmatprep.subr.bf16.mxu1 %v3355_v25  ;;  %v2907_v25 = vcombine.high %v104_v20, %v112_v21 }
  0x6f   :  { %2222 = vmatpush2.bf16.msra.mxu0 %v3350_v26  ;;  %v3414_v26 = vld [vmem:[%s4877_s1 + $0x420] ss:$8 sps:$4 sm:$0xff]  }
  0x70   :  { %2303 = vmatpush2.bf16.msra.mxu1 %v3353_v27  ;;  %2223 = vmatprep.subr.bf16.mxu0 %v3358_v28  ;;  %v3417_v27 = vld [vmem:[%s4877_s1 + $0x520] ss:$8 sps:$4 sm:$0xff]   ;;  %v3422_v28 = vld [vmem:[%s4877_s1 + $0x414] ss:$8 sps:$4 sm:$0xff]  }
  0x71   :  { %2304 = vmatprep.subr.bf16.mxu1 %v3361_v29  ;;  %v3425_v29 = vld [vmem:[%s4877_s1 + $0x514] ss:$8 sps:$4 sm:$0xff]  }
  0x73   :  { %2224 = vmatpush2.bf16.msra.mxu0 %v3356_v30  ;;  %v3420_v30 = vld [vmem:[%s4877_s1 + $0x410] ss:$8 sps:$4 sm:$0xff]  }
  0x74   :  { %2305 = vmatpush2.bf16.msra.mxu1 %v3359_v31  ;;  %2225 = vmatprep.subr.bf16.mxu0 %v3367_v32  ;;  %v2904_v31 = vcombine.low %v103_v16, %v111_v17  ;;  %v2906_v32 = vcombine.low %v104_v20, %v112_v21  ;;  %v3478_v16 = vld [vmem:[%s4877_s1 + $0x480] ss:$8 sps:$4 sm:$0xff]  }
  0x75   :  { %2306 = vmatprep.subr.bf16.mxu1 %v3370_v33  ;;  %v119_v33 = vld [vmem:[%s4878_s0 + $0x210] sm:$0xff]  ;;  %v3481_v17 = vld [vmem:[%s4877_s1 + $0x580] ss:$8 sps:$4 sm:$0xff]  }
  0x76   :  { %v73_v20 = vld [vmem:[%s4878_s0 + $0xa0] sm:$0xff] }
  0x77   :  { %2226 = vmatpush2.bf16.msra.mxu0 %v3365_v34  ;;  %v120_v34 = vld [vmem:[%s4878_s0 + $0x218] sm:$0xff] }
  0x78   :  { %2307 = vmatpush2.bf16.msra.mxu1 %v3368_v35  ;;  %2227 = vmatprep.subr.bf16.mxu0 %v3374_v36  ;;  %v3423_v35 = vld [vmem:[%s4877_s1 + $0x510] ss:$8 sps:$4 sm:$0xff]   ;;  %v3428_v36 = vld [vmem:[%s4877_s1 + $0x404] ss:$8 sps:$4 sm:$0xff]  }
  0x79   :  { %2308 = vmatprep.subr.bf16.mxu1 %v3377_v37  ;;  %v3431_v37 = vld [vmem:[%s4877_s1 + $0x504] ss:$8 sps:$4 sm:$0xff]  }
  0x7b   :  { %2228 = vmatpush2.bf16.msra.mxu0 %v3372_v38  ;;  %v2921_v38 = vcombine.high %v119_v33, %v119_v33 }
  0x7c   :  { %2309 = vmatpush2.bf16.msra.mxu1 %v3375_v39  ;;  %2229 = vmatprep.subr.bf16.mxu0 %v3380_v40  ;;  %v2923_v39 = vcombine.high %v120_v34, %v120_v34  ;;  %v3426_v40 = vld [vmem:[%s4877_s1 + $0x400] ss:$8 sps:$4 sm:$0xff]  }
  0x7d   :  { %2310 = vmatprep.subr.bf16.mxu1 %v3383_v41  ;;  %v3429_v41 = vld [vmem:[%s4877_s1 + $0x500] ss:$8 sps:$4 sm:$0xff]  }
  0x7f   :  { %2230 = vmatpush2.bf16.msra.mxu0 %v3378_v42  ;;  %v3436_v42 = vld [vmem:[%s4877_s1 + $0x4f4] ss:$8 sps:$4 sm:$0xff]  }
  0x80   :  { %2311 = vmatpush2.bf16.msra.mxu1 %v3381_v43  ;;  %2361 = vmatprep.subr.bf16.mxu0 %v3386_v44  ;;  %v3439_v43 = vld [vmem:[%s4877_s1 + $0x5f4] ss:$8 sps:$4 sm:$0xff]   ;;  %v4221_v44 = vld [vmem:[%s4878_s0 + $0x20] sm:$0xff] }
  0x81   :  { %2442 = vmatprep.subr.bf16.mxu1 %v3389_v45  ;;  %v4226_v45 = vld [vmem:[%s4878_s0 + $0x60] sm:$0xff] }
  0x82   :  { %2232 = vmatmul.mubr.bf16.vlgmr.msra.gmra.mxu0 %v2856_v50  ;;  %v3434_v50 = vld [vmem:[%s4877_s1 + $0x4f0] ss:$8 sps:$4 sm:$0xff]   ;;  %v2860_v21 = vcombine.low %v4221_v44, %v4226_v45 }
  0x83   :  { %2313 = vmatmul.mubr.bf16.vlgmr.msra.gmra.mxu1 %v2858_v51  ;;  %2362 = vmatpush1.bf16.msra.mxu0 %v3384_v46  ;;  %v2920_v46 = vcombine.low %v119_v33, %v119_v33  ;;  %v3437_v51 = vld [vmem:[%s4877_s1 + $0x5f0] ss:$8 sps:$4 sm:$0xff]   ;;  %v3493_v33 = vld [vmem:[%s4877_s1 + $0x760] ss:$8 sps:$4 sm:$0xff]  }
  0x84   :  { %2443 = vmatpush1.bf16.msra.mxu1 %v3387_v47  ;;  %2363 = vmatprep.subr.bf16.mxu0 %v3392_v54  ;;  %v2922_v47 = vcombine.low %v120_v34, %v120_v34  ;;  %v2861_v54 = vcombine.high %v4221_v44, %v4226_v45  ;;  %v3498_v34 = vld [vmem:[%s4877_s1 + $0x654] ss:$8 sps:$4 sm:$0xff]   ;;  %v3504_v44 = vld [vmem:[%s4877_s1 + $0x644] ss:$8 sps:$4 sm:$0xff]  }
  0x85   :  { %2444 = vmatprep.subr.bf16.mxu1 %v3395_v55  ;;  %2241 = vmatprep.mubr.bf16.mxu0 %v2873_v56  ;;  %v2863_v55 = vcombine.high %v4231_v48, %v4236_v49  ;;  %v3442_v56 = vld [vmem:[%s4877_s1 + $0x4e0] ss:$8 sps:$4 sm:$0xff]   ;;  %v3507_v45 = vld [vmem:[%s4877_s1 + $0x744] ss:$8 sps:$4 sm:$0xff]  }
  0x86   :  { %2322 = vmatprep.mubr.bf16.mxu1 %v2875_v57  ;;  %v3445_v57 = vld [vmem:[%s4877_s1 + $0x5e0] ss:$8 sps:$4 sm:$0xff]  }
  0x87   :  { %2364 = vmatpush1.bf16.msra.mxu0 %v3390_v58  ;;  %v3450_v58 = vld [vmem:[%s4877_s1 + $0x4d4] ss:$8 sps:$4 sm:$0xff]  }
  0x88   :  { %2445 = vmatpush1.bf16.msra.mxu1 %v3393_v59  ;;  %2365 = vmatprep.subr.bf16.mxu0 %v3398_v60  ;;  %v3453_v59 = vld [vmem:[%s4877_s1 + $0x5d4] ss:$8 sps:$4 sm:$0xff]   ;;  %v3448_v60 = vld [vmem:[%s4877_s1 + $0x4d0] ss:$8 sps:$4 sm:$0xff]  }
  0x89   :  { %2446 = vmatprep.subr.bf16.mxu1 %v3401_v61  ;;  %v3451_v61 = vld [vmem:[%s4877_s1 + $0x5d0] ss:$8 sps:$4 sm:$0xff]  }
  0x8a   :  { %2242 = vmatmul.mubr.bf16.gmra.mxu0 %v2872_v2  ;;  %v3462_v2 = vld [vmem:[%s4877_s1 + $0x4b4] ss:$8 sps:$4 sm:$0xff]  }
  0x8b   :  { %2323 = vmatmul.mubr.bf16.gmra.mxu1 %v2874_v3  ;;  %2366 = vmatpush1.bf16.msra.mxu0 %v3396_v62  ;;  %v3456_v62 = vld [vmem:[%s4877_s1 + $0x4c4] ss:$8 sps:$4 sm:$0xff]   ;;  %v3465_v3 = vld [vmem:[%s4877_s1 + $0x5b4] ss:$8 sps:$4 sm:$0xff]  }
  0x8c   :  { %2447 = vmatpush1.bf16.msra.mxu1 %v3399_v63  ;;  %2367 = vmatprep.subr.bf16.mxu0 %v3404_v6  ;;  %v3459_v63 = vld [vmem:[%s4877_s1 + $0x5c4] ss:$8 sps:$4 sm:$0xff]  }
  0x8d   :  { %2448 = vmatprep.subr.bf16.mxu1 %v3407_v7  ;;  %2251 = vmatprep.mubr.bf16.mxu0 %v2889_v8  ;;  %v3468_v6 = vld [vmem:[%s4877_s1 + $0x4a4] ss:$8 sps:$4 sm:$0xff]   ;;  %v3466_v8 = vld [vmem:[%s4877_s1 + $0x4a0] ss:$8 sps:$4 sm:$0xff]  }
  0x8e   :  { %2332 = vmatprep.mubr.bf16.mxu1 %v2891_v9  ;;  %v3471_v7 = vld [vmem:[%s4877_s1 + $0x5a4] ss:$8 sps:$4 sm:$0xff]   ;;  %v3469_v9 = vld [vmem:[%s4877_s1 + $0x5a0] ss:$8 sps:$4 sm:$0xff]  }
  0x8f   :  { %2368 = vmatpush1.bf16.msra.mxu0 %v3402_v10  ;;  %v3474_v10 = vld [vmem:[%s4877_s1 + $0x494] ss:$8 sps:$4 sm:$0xff]  }
  0x90   :  { %2449 = vmatpush1.bf16.msra.mxu1 %v3405_v11  ;;  %2369 = vmatprep.subr.bf16.mxu0 %v3410_v12  ;;  %v3477_v11 = vld [vmem:[%s4877_s1 + $0x594] ss:$8 sps:$4 sm:$0xff]   ;;  %v3472_v12 = vld [vmem:[%s4877_s1 + $0x490] ss:$8 sps:$4 sm:$0xff]  }
  0x91   :  { %2450 = vmatprep.subr.bf16.mxu1 %v3413_v13  ;;  %v3475_v13 = vld [vmem:[%s4877_s1 + $0x590] ss:$8 sps:$4 sm:$0xff]  }
  0x92   :  { %2252 = vmatmul.mubr.bf16.gmra.mxu0 %v2888_v18  ;;  %v3486_v18 = vld [vmem:[%s4877_s1 + $0x674] ss:$8 sps:$4 sm:$0xff]  }
  0x93   :  { %2333 = vmatmul.mubr.bf16.gmra.mxu1 %v2890_v19  ;;  %2370 = vmatpush1.bf16.msra.mxu0 %v3408_v14  ;;  %v3480_v14 = vld [vmem:[%s4877_s1 + $0x484] ss:$8 sps:$4 sm:$0xff]   ;;  %v3489_v19 = vld [vmem:[%s4877_s1 + $0x774] ss:$8 sps:$4 sm:$0xff]  }
  0x94   :  { %2451 = vmatpush1.bf16.msra.mxu1 %v3411_v15  ;;  %2371 = vmatprep.subr.bf16.mxu0 %v3416_v22  ;;  %v3483_v15 = vld [vmem:[%s4877_s1 + $0x584] ss:$8 sps:$4 sm:$0xff]   ;;  %v2862_v22 = vcombine.low %v4231_v48, %v4236_v49  ;;  %v3502_v48 = vld [vmem:[%s4877_s1 + $0x640] ss:$8 sps:$4 sm:$0xff]  }
  0x95   :  { %2452 = vmatprep.subr.bf16.mxu1 %v3419_v23  ;;  %2261 = vmatprep.mubr.bf16.mxu0 %v2905_v24  ;;  %v81_v23 = vld [vmem:[%s4878_s0 + $0xe0] sm:$0xff]  ;;  %v74_v24 = vld [vmem:[%s4878_s0 + $0xa8] sm:$0xff] }
  0x96   :  { %2342 = vmatprep.mubr.bf16.mxu1 %v2907_v25  ;;  %v82_v25 = vld [vmem:[%s4878_s0 + $0xe8] sm:$0xff] }
  0x97   :  { %2372 = vmatpush1.bf16.msra.mxu0 %v3414_v26  ;;  %v3484_v26 = vld [vmem:[%s4877_s1 + $0x670] ss:$8 sps:$4 sm:$0xff]   ;;  %v3505_v49 = vld [vmem:[%s4877_s1 + $0x740] ss:$8 sps:$4 sm:$0xff]  }
  0x98   :  { %2453 = vmatpush1.bf16.msra.mxu1 %v3417_v27  ;;  %2373 = vmatprep.subr.bf16.mxu0 %v3422_v28  ;;  %v3487_v27 = vld [vmem:[%s4877_s1 + $0x770] ss:$8 sps:$4 sm:$0xff]   ;;  %v3492_v28 = vld [vmem:[%s4877_s1 + $0x664] ss:$8 sps:$4 sm:$0xff]  }
  0x99   :  { %2454 = vmatprep.subr.bf16.mxu1 %v3425_v29  ;;  %v3495_v29 = vld [vmem:[%s4877_s1 + $0x764] ss:$8 sps:$4 sm:$0xff]  }
  0x9a   :  { %2262 = vmatmul.mubr.bf16.gmra.mxu0 %v2904_v31  ;;  %v2879_v31 = vcombine.high %v74_v24, %v82_v25 }
  0x9b   :  { %2343 = vmatmul.mubr.bf16.gmra.mxu1 %v2906_v32  ;;  %2374 = vmatpush1.bf16.msra.mxu0 %v3420_v30  ;;  %v2877_v30 = vcombine.high %v73_v20, %v81_v23  ;;  %v3490_v32 = vld [vmem:[%s4877_s1 + $0x660] ss:$8 sps:$4 sm:$0xff]  }
  0x9c   :  { %2455 = vmatpush1.bf16.msra.mxu1 %v3423_v35  ;;  %2375 = vmatprep.subr.bf16.mxu0 %v3428_v36  ;;  %v3501_v35 = vld [vmem:[%s4877_s1 + $0x754] ss:$8 sps:$4 sm:$0xff]   ;;  %v89_v36 = vld [vmem:[%s4878_s0 + $0x120] sm:$0xff] }
  0x9d   :  { %2456 = vmatprep.subr.bf16.mxu1 %v3431_v37  ;;  %2271 = vmatprep.mubr.bf16.mxu0 %v2921_v38  ;;  %v2876_v37 = vcombine.low %v73_v20, %v81_v23  ;;  %v2878_v38 = vcombine.low %v74_v24, %v82_v25  ;;  %v4498_v23 = vld [vmem:[%s4878_s0 + $0x78] sm:$0xff] }
  0x9e   :  { %2352 = vmatprep.mubr.bf16.mxu1 %v2923_v39  ;;  %v97_v39 = vld [vmem:[%s4878_s0 + $0x160] sm:$0xff]  ;;  %v3534_v24 = vld [vmem:[%s4877_s1 + $0x6f0] ss:$8 sps:$4 sm:$0xff]  }
  0x9f   :  { %2376 = vmatpush1.bf16.msra.mxu0 %v3426_v40  ;;  %v90_v40 = vld [vmem:[%s4878_s0 + $0x128] sm:$0xff]  ;;  %v3537_v25 = vld [vmem:[%s4877_s1 + $0x7f0] ss:$8 sps:$4 sm:$0xff]  }
  0xa0   :  { %2457 = vmatpush1.bf16.msra.mxu1 %v3429_v41  ;;  %2377 = vmatprep.subr.bf16.mxu0 %v3436_v42  ;;  %v98_v41 = vld [vmem:[%s4878_s0 + $0x168] sm:$0xff]  ;;  %v3496_v42 = vld [vmem:[%s4877_s1 + $0x650] ss:$8 sps:$4 sm:$0xff]  }
  0xa1   :  { %2458 = vmatprep.subr.bf16.mxu1 %v3439_v43  ;;  %v3499_v43 = vld [vmem:[%s4877_s1 + $0x750] ss:$8 sps:$4 sm:$0xff]  }
  0xa2   :  { %2272 = vmatmul.mubr.bf16.gmra.mxu0 %v2920_v46  ;;  %v2893_v46 = vcombine.high %v89_v36, %v97_v39 }
  0xa3   :  { %2353 = vmatmul.mubr.bf16.gmra.mxu1 %v2922_v47  ;;  %2378 = vmatpush2.bf16.msra.mxu0 %v3434_v50  ;;  %v2895_v47 = vcombine.high %v90_v40, %v98_v41  ;;  %v3510_v50 = vld [vmem:[%s4877_s1 + $0x634] ss:$8 sps:$4 sm:$0xff]  }
  0xa4   :  { %2459 = vmatpush2.bf16.msra.mxu1 %v3437_v51  ;;  %2379 = vmatprep.subr.bf16.mxu0 %v3444_v52  ;;  %v3513_v51 = vld [vmem:[%s4877_s1 + $0x734] ss:$8 sps:$4 sm:$0xff]   ;;  %v105_v52 = vld [vmem:[%s4878_s0 + $0x1a0] sm:$0xff] }
  0xa5   :  { %2460 = vmatprep.subr.bf16.mxu1 %v3447_v53  ;;  %2393 = vmatprep.mubr.bf16.mxu0 %v2861_v54  ;;  %v2892_v53 = vcombine.low %v89_v36, %v97_v39  ;;  %v2894_v54 = vcombine.low %v90_v40, %v98_v41  ;;  %v3556_v36 = vld [vmem:[%s4877_s1 + $0x6c4] ss:$8 sps:$4 sm:$0xff]   ;;  %v3557_v39 = vld [vmem:[%s4877_s1 + $0x7c0] ss:$8 sps:$4 sm:$0xff]   ;;  %v3562_v40 = vld [vmem:[%s4877_s1 + $0x6b4] ss:$8 sps:$4 sm:$0xff]  }
  0xa6   :  { %2474 = vmatprep.mubr.bf16.mxu1 %v2863_v55  ;;  %v113_v55 = vld [vmem:[%s4878_s0 + $0x1e0] sm:$0xff]  ;;  %v3565_v41 = vld [vmem:[%s4877_s1 + $0x7b4] ss:$8 sps:$4 sm:$0xff]  }
  0xa7   :  { %2380 = vmatpush2.bf16.msra.mxu0 %v3442_v56  ;;  %v106_v56 = vld [vmem:[%s4878_s0 + $0x1a8] sm:$0xff] }
  0xa8   :  { %2461 = vmatpush2.bf16.msra.mxu1 %v3445_v57  ;;  %2381 = vmatprep.subr.bf16.mxu0 %v3450_v58  ;;  %v114_v57 = vld [vmem:[%s4878_s0 + $0x1e8] sm:$0xff]  ;;  %v3508_v58 = vld [vmem:[%s4877_s1 + $0x630] ss:$8 sps:$4 sm:$0xff]  }
  0xa9   :  { %2462 = vmatprep.subr.bf16.mxu1 %v3453_v59  ;;  %v3511_v59 = vld [vmem:[%s4877_s1 + $0x730] ss:$8 sps:$4 sm:$0xff]  }
  0xab   :  { %2382 = vmatpush2.bf16.msra.mxu0 %v3448_v60  ;;  %v3516_v60 = vld [vmem:[%s4877_s1 + $0x624] ss:$8 sps:$4 sm:$0xff]  }
  0xac   :  { %2463 = vmatpush2.bf16.msra.mxu1 %v3451_v61  ;;  %2383 = vmatprep.subr.bf16.mxu0 %v3456_v62  ;;  %v3519_v61 = vld [vmem:[%s4877_s1 + $0x724] ss:$8 sps:$4 sm:$0xff]   ;;  %v2909_v62 = vcombine.high %v105_v52, %v113_v55 }
  0xad   :  { %2464 = vmatprep.subr.bf16.mxu1 %v3459_v63  ;;  %v2911_v63 = vcombine.high %v106_v56, %v114_v57 }
  0xaf   :  { %2384 = vmatpush2.bf16.msra.mxu0 %v3454_v0  ;;  %v3514_v0 = vld [vmem:[%s4877_s1 + $0x620] ss:$8 sps:$4 sm:$0xff]  }
  0xb0   :  { %2465 = vmatpush2.bf16.msra.mxu1 %v3457_v1  ;;  %2385 = vmatprep.subr.bf16.mxu0 %v3462_v2  ;;  %v3517_v1 = vld [vmem:[%s4877_s1 + $0x720] ss:$8 sps:$4 sm:$0xff]   ;;  %v3522_v2 = vld [vmem:[%s4877_s1 + $0x614] ss:$8 sps:$4 sm:$0xff]  }
  0xb1   :  { %2466 = vmatprep.subr.bf16.mxu1 %v3465_v3  ;;  %v3525_v3 = vld [vmem:[%s4877_s1 + $0x714] ss:$8 sps:$4 sm:$0xff]  }
  0xb3   :  { %2386 = vmatpush2.bf16.msra.mxu0 %v3460_v4  ;;  %v2908_v4 = vcombine.low %v105_v52, %v113_v55  ;;  %v3580_v52 = vld [vmem:[%s4877_s1 + $0x684] ss:$8 sps:$4 sm:$0xff]   ;;  %v3581_v55 = vld [vmem:[%s4877_s1 + $0x780] ss:$8 sps:$4 sm:$0xff]  }
  0xb4   :  { %2467 = vmatpush2.bf16.msra.mxu1 %v3463_v5  ;;  %2387 = vmatprep.subr.bf16.mxu0 %v3468_v6  ;;  %v2910_v5 = vcombine.low %v106_v56, %v114_v57  ;;  %v121_v6 = vld [vmem:[%s4878_s0 + $0x220] sm:$0xff]  ;;  %v75_v56 = vld [vmem:[%s4878_s0 + $0xb0] sm:$0xff] }
  0xb5   :  { %2468 = vmatprep.subr.bf16.mxu1 %v3471_v7  ;;  %v122_v7 = vld [vmem:[%s4878_s0 + $0x228] sm:$0xff]  ;;  %v83_v57 = vld [vmem:[%s4878_s0 + $0xf0] sm:$0xff] }
  0xb6   :  { %v2926_v20 = vcombine.low %v122_v7, %v122_v7 }
  0xb7   :  { %2388 = vmatpush2.bf16.msra.mxu0 %v3466_v8  ;;  %v3520_v8 = vld [vmem:[%s4877_s1 + $0x610] ss:$8 sps:$4 sm:$0xff]  }
  0xb8   :  { %2469 = vmatpush2.bf16.msra.mxu1 %v3469_v9  ;;  %2389 = vmatprep.subr.bf16.mxu0 %v3474_v10  ;;  %v3523_v9 = vld [vmem:[%s4877_s1 + $0x710] ss:$8 sps:$4 sm:$0xff]   ;;  %v3528_v10 = vld [vmem:[%s4877_s1 + $0x604] ss:$8 sps:$4 sm:$0xff]  }
  0xb9   :  { %2470 = vmatprep.subr.bf16.mxu1 %v3477_v11  ;;  %v3531_v11 = vld [vmem:[%s4877_s1 + $0x704] ss:$8 sps:$4 sm:$0xff]  }
  0xbb   :  { %2390 = vmatpush2.bf16.msra.mxu0 %v3472_v12  ;;  %v2925_v12 = vcombine.high %v121_v6, %v121_v6 }
  0xbc   :  { %2471 = vmatpush2.bf16.msra.mxu1 %v3475_v13  ;;  %2391 = vmatprep.subr.bf16.mxu0 %v3480_v14  ;;  %v2927_v13 = vcombine.high %v122_v7, %v122_v7  ;;  %v3526_v14 = vld [vmem:[%s4877_s1 + $0x600] ss:$8 sps:$4 sm:$0xff]   ;;  %v92_v7 = vld [vmem:[%s4878_s0 + $0x138] sm:$0xff] }
  0xbd   :  { %2472 = vmatprep.subr.bf16.mxu1 %v3483_v15  ;;  %v3529_v15 = vld [vmem:[%s4877_s1 + $0x700] ss:$8 sps:$4 sm:$0xff]  }
  0xbf   :  { %2392 = vmatpush2.bf16.msra.mxu0 %v3478_v16  ;;  %v3536_v16 = vld [vmem:[%s4877_s1 + $0x6f4] ss:$8 sps:$4 sm:$0xff]  }
  0xc0   :  { %2473 = vmatpush2.bf16.msra.mxu1 %v3481_v17  ;;  %2523 = vmatprep.subr.bf16.mxu0 %v3486_v18  ;;  %v3539_v17 = vld [vmem:[%s4877_s1 + $0x7f4] ss:$8 sps:$4 sm:$0xff]  }
  0xc1   :  { %2604 = vmatprep.subr.bf16.mxu1 %v3489_v19  ;;  %v4483_v18 = vld [vmem:[%s4878_s0 + $0x30] sm:$0xff]  ;;  %v2924_v19 = vcombine.low %v121_v6, %v121_v6 }
  0xc2   :  { %2394 = vmatmul.mubr.bf16.vlgmr.msra.gmra.mxu0 %v2860_v21  ;;  %v4488_v21 = vld [vmem:[%s4878_s0 + $0x70] sm:$0xff] }
  0xc3   :  { %2475 = vmatmul.mubr.bf16.vlgmr.msra.gmra.mxu1 %v2862_v22  ;;  %2524 = vmatpush1.bf16.msra.mxu0 %v3484_v26  ;;  %v4493_v22 = vld [vmem:[%s4878_s0 + $0x38] sm:$0xff]  ;;  %v3544_v26 = vld [vmem:[%s4877_s1 + $0x6e4] ss:$8 sps:$4 sm:$0xff]   ;;  %v99_v6 = vld [vmem:[%s4878_s0 + $0x170] sm:$0xff] }
  0xc4   :  { %2605 = vmatpush1.bf16.msra.mxu1 %v3487_v27  ;;  %2525 = vmatprep.subr.bf16.mxu0 %v3492_v28  ;;  %v3547_v27 = vld [vmem:[%s4877_s1 + $0x7e4] ss:$8 sps:$4 sm:$0xff]   ;;  %v2865_v28 = vcombine.high %v4483_v18, %v4488_v21 }
  0xc5   :  { %2606 = vmatprep.subr.bf16.mxu1 %v3495_v29  ;;  %2403 = vmatprep.mubr.bf16.mxu0 %v2877_v30  ;;  %v2867_v29 = vcombine.high %v4493_v22, %v4498_v23  ;;  %v3542_v30 = vld [vmem:[%s4877_s1 + $0x6e0] ss:$8 sps:$4 sm:$0xff]  }
  0xc6   :  { %2484 = vmatprep.mubr.bf16.mxu1 %v2879_v31  ;;  %v3545_v31 = vld [vmem:[%s4877_s1 + $0x7e0] ss:$8 sps:$4 sm:$0xff]  }
  0xc7   :  { %2526 = vmatpush1.bf16.msra.mxu0 %v3490_v32  ;;  %v3550_v32 = vld [vmem:[%s4877_s1 + $0x6d4] ss:$8 sps:$4 sm:$0xff]  }
  0xc8   :  { %2607 = vmatpush1.bf16.msra.mxu1 %v3493_v33  ;;  %2527 = vmatprep.subr.bf16.mxu0 %v3498_v34  ;;  %v3553_v33 = vld [vmem:[%s4877_s1 + $0x7d4] ss:$8 sps:$4 sm:$0xff]   ;;  %v3548_v34 = vld [vmem:[%s4877_s1 + $0x6d0] ss:$8 sps:$4 sm:$0xff]  }
  0xc9   :  { %2608 = vmatprep.subr.bf16.mxu1 %v3501_v35  ;;  %v3551_v35 = vld [vmem:[%s4877_s1 + $0x7d0] ss:$8 sps:$4 sm:$0xff]  }
  0xca   :  { %2404 = vmatmul.mubr.bf16.gmra.mxu0 %v2876_v37  ;;  %v3559_v37 = vld [vmem:[%s4877_s1 + $0x7c4] ss:$8 sps:$4 sm:$0xff]  }
  0xcb   :  { %2485 = vmatmul.mubr.bf16.gmra.mxu1 %v2878_v38  ;;  %2528 = vmatpush1.bf16.msra.mxu0 %v3496_v42  ;;  %v3554_v38 = vld [vmem:[%s4877_s1 + $0x6c0] ss:$8 sps:$4 sm:$0xff]   ;;  %v3560_v42 = vld [vmem:[%s4877_s1 + $0x6b0] ss:$8 sps:$4 sm:$0xff]  }
  0xcc   :  { %2609 = vmatpush1.bf16.msra.mxu1 %v3499_v43  ;;  %2529 = vmatprep.subr.bf16.mxu0 %v3504_v44  ;;  %v3563_v43 = vld [vmem:[%s4877_s1 + $0x7b0] ss:$8 sps:$4 sm:$0xff]   ;;  %v3568_v44 = vld [vmem:[%s4877_s1 + $0x6a4] ss:$8 sps:$4 sm:$0xff]  }
  0xcd   :  { %2610 = vmatprep.subr.bf16.mxu1 %v3507_v45  ;;  %2413 = vmatprep.mubr.bf16.mxu0 %v2893_v46  ;;  %v3571_v45 = vld [vmem:[%s4877_s1 + $0x7a4] ss:$8 sps:$4 sm:$0xff]   ;;  %v3566_v46 = vld [vmem:[%s4877_s1 + $0x6a0] ss:$8 sps:$4 sm:$0xff]  }
  0xce   :  { %2494 = vmatprep.mubr.bf16.mxu1 %v2895_v47  ;;  %v3569_v47 = vld [vmem:[%s4877_s1 + $0x7a0] ss:$8 sps:$4 sm:$0xff]  }
  0xcf   :  { %2530 = vmatpush1.bf16.msra.mxu0 %v3502_v48  ;;  %v3574_v48 = vld [vmem:[%s4877_s1 + $0x694] ss:$8 sps:$4 sm:$0xff]  }
  0xd0   :  { %2611 = vmatpush1.bf16.msra.mxu1 %v3505_v49  ;;  %2531 = vmatprep.subr.bf16.mxu0 %v3510_v50  ;;  %v3577_v49 = vld [vmem:[%s4877_s1 + $0x794] ss:$8 sps:$4 sm:$0xff]   ;;  %v3572_v50 = vld [vmem:[%s4877_s1 + $0x690] ss:$8 sps:$4 sm:$0xff]  }
  0xd1   :  { %2612 = vmatprep.subr.bf16.mxu1 %v3513_v51  ;;  %v3575_v51 = vld [vmem:[%s4877_s1 + $0x790] ss:$8 sps:$4 sm:$0xff]  }
  0xd2   :  { %2414 = vmatmul.mubr.bf16.gmra.mxu0 %v2892_v53  ;;  %v3583_v53 = vld [vmem:[%s4877_s1 + $0x784] ss:$8 sps:$4 sm:$0xff]  }
  0xd3   :  { %2495 = vmatmul.mubr.bf16.gmra.mxu1 %v2894_v54  ;;  %2532 = vmatpush1.bf16.msra.mxu0 %v3508_v58  ;;  %v3578_v54 = vld [vmem:[%s4877_s1 + $0x680] ss:$8 sps:$4 sm:$0xff]   ;;  %v76_v58 = vld [vmem:[%s4878_s0 + $0xb8] sm:$0xff] }
  0xd4   :  { %2613 = vmatpush1.bf16.msra.mxu1 %v3511_v59  ;;  %2533 = vmatprep.subr.bf16.mxu0 %v3516_v60  ;;  %v84_v59 = vld [vmem:[%s4878_s0 + $0xf8] sm:$0xff]  ;;  %v2864_v60 = vcombine.low %v4483_v18, %v4488_v21 }
  0xd5   :  { %2614 = vmatprep.subr.bf16.mxu1 %v3519_v61  ;;  %2423 = vmatprep.mubr.bf16.mxu0 %v2909_v62  ;;  %v2866_v61 = vcombine.low %v4493_v22, %v4498_v23  ;;  %v2881_v62 = vcombine.high %v75_v56, %v83_v57  ;;  %v107_v22 = vld [vmem:[%s4878_s0 + $0x1b0] sm:$0xff] }
  0xd6   :  { %2504 = vmatprep.mubr.bf16.mxu1 %v2911_v63  ;;  %v2883_v63 = vcombine.high %v76_v58, %v84_v59 }
  0xd7   :  { %2534 = vmatpush1.bf16.msra.mxu0 %v3514_v0 }
  0xd8   :  { %2615 = vmatpush1.bf16.msra.mxu1 %v3517_v1  ;;  %2535 = vmatprep.subr.bf16.mxu0 %v3522_v2 }
  0xd9   :  { %2616 = vmatprep.subr.bf16.mxu1 %v3525_v3  ;;  %v91_v3 = vld [vmem:[%s4878_s0 + $0x130] sm:$0xff] }
  0xda   :  { %2424 = vmatmul.mubr.bf16.gmra.mxu0 %v2908_v4 }
  0xdb   :  { %2505 = vmatmul.mubr.bf16.gmra.mxu1 %v2910_v5  ;;  %2536 = vmatpush1.bf16.msra.mxu0 %v3520_v8  ;;  %v100_v8 = vld [vmem:[%s4878_s0 + $0x178] sm:$0xff] }
  0xdc   :  { %2617 = vmatpush1.bf16.msra.mxu1 %v3523_v9  ;;  %2537 = vmatprep.subr.bf16.mxu0 %v3528_v10 }
  0xdd   :  { %2618 = vmatprep.subr.bf16.mxu1 %v3531_v11  ;;  %2433 = vmatprep.mubr.bf16.mxu0 %v2925_v12  ;;  %v2880_v12 = vcombine.low %v75_v56, %v83_v57 }
  0xde   :  { %2514 = vmatprep.mubr.bf16.mxu1 %v2927_v13  ;;  %v2882_v13 = vcombine.low %v76_v58, %v84_v59 }
  0xdf   :  { %2538 = vmatpush1.bf16.msra.mxu0 %v3526_v14 }
  0xe0   :  { %2619 = vmatpush1.bf16.msra.mxu1 %v3529_v15  ;;  %2539 = vmatprep.subr.bf16.mxu0 %v3536_v16  ;;  %v2897_v15 = vcombine.high %v91_v3, %v99_v6  ;;  %v2899_v16 = vcombine.high %v92_v7, %v100_v8 }
  0xe1   :  { %2620 = vmatprep.subr.bf16.mxu1 %v3539_v17 }
  0xe2   :  { %2434 = vmatmul.mubr.bf16.gmra.mxu0 %v2924_v19 }
  0xe3   :  { %2515 = vmatmul.mubr.bf16.gmra.mxu1 %v2926_v20  ;;  %2540 = vmatpush2.bf16.msra.mxu0 %v3534_v24  ;;  %v115_v24 = vld [vmem:[%s4878_s0 + $0x1f0] sm:$0xff] }
  0xe4   :  { %2621 = vmatpush2.bf16.msra.mxu1 %v3537_v25  ;;  %2541 = vmatprep.subr.bf16.mxu0 %v3544_v26  ;;  %v108_v25 = vld [vmem:[%s4878_s0 + $0x1b8] sm:$0xff] }
  0xe5   :  { %2622 = vmatprep.subr.bf16.mxu1 %v3547_v27  ;;  %2555 = vmatprep.mubr.bf16.mxu0 %v2865_v28  ;;  %v116_v26 = vld [vmem:[%s4878_s0 + $0x1f8] sm:$0xff] }
  0xe6   :  { %2636 = vmatprep.mubr.bf16.mxu1 %v2867_v29 }
  0xe7   :  { %2542 = vmatpush2.bf16.msra.mxu0 %v3542_v30  ;;  %v2896_v30 = vcombine.low %v91_v3, %v99_v6 }
  0xe8   :  { %2623 = vmatpush2.bf16.msra.mxu1 %v3545_v31  ;;  %2543 = vmatprep.subr.bf16.mxu0 %v3550_v32  ;;  %v2898_v31 = vcombine.low %v92_v7, %v100_v8 }
  0xe9   :  { %2624 = vmatprep.subr.bf16.mxu1 %v3553_v33 }
  0xeb   :  { %2544 = vmatpush2.bf16.msra.mxu0 %v3548_v34  ;;  %v2913_v34 = vcombine.high %v107_v22, %v115_v24 }
  0xec   :  { %2625 = vmatpush2.bf16.msra.mxu1 %v3551_v35  ;;  %2545 = vmatprep.subr.bf16.mxu0 %v3556_v36  ;;  %v2915_v35 = vcombine.high %v108_v25, %v116_v26 }
  0xed   :  { %2626 = vmatprep.subr.bf16.mxu1 %v3559_v37 }
  0xef   :  { %2546 = vmatpush2.bf16.msra.mxu0 %v3554_v38 }
  0xf0   :  { %2627 = vmatpush2.bf16.msra.mxu1 %v3557_v39  ;;  %2547 = vmatprep.subr.bf16.mxu0 %v3562_v40 }
  0xf1   :  { %2628 = vmatprep.subr.bf16.mxu1 %v3565_v41 }
  0xf3   :  { %2548 = vmatpush2.bf16.msra.mxu0 %v3560_v42 }
  0xf4   :  { %2629 = vmatpush2.bf16.msra.mxu1 %v3563_v43  ;;  %2549 = vmatprep.subr.bf16.mxu0 %v3568_v44  ;;  %v123_v43 = vld [vmem:[%s4878_s0 + $0x230] sm:$0xff]  ;;  %v124_v44 = vld [vmem:[%s4878_s0 + $0x238] sm:$0xff] }
  0xf5   :  { %2630 = vmatprep.subr.bf16.mxu1 %v3571_v45 }
  0xf7   :  { %2550 = vmatpush2.bf16.msra.mxu0 %v3566_v46 }
  0xf8   :  { %2631 = vmatpush2.bf16.msra.mxu1 %v3569_v47  ;;  %2551 = vmatprep.subr.bf16.mxu0 %v3574_v48  ;;  %v2912_v48 = vcombine.low %v107_v22, %v115_v24 }
  0xf9   :  { %2632 = vmatprep.subr.bf16.mxu1 %v3577_v49  ;;  %v2914_v49 = vcombine.low %v108_v25, %v116_v26 }
  0xfb   :  { %2552 = vmatpush2.bf16.msra.mxu0 %v3572_v50 }
  0xfc   :  { %2633 = vmatpush2.bf16.msra.mxu1 %v3575_v51  ;;  %2553 = vmatprep.subr.bf16.mxu0 %v3580_v52  ;;  %v2929_v52 = vcombine.high %v123_v43, %v123_v43 }
  0xfd   :  { %2634 = vmatprep.subr.bf16.mxu1 %v3583_v53  ;;  %v2931_v53 = vcombine.high %v124_v44, %v124_v44 }
  0xff   :  { %2554 = vmatpush2.bf16.msra.mxu0 %v3578_v54 }
 0x100   :  { %2635 = vmatpush2.bf16.msra.mxu1 %v3581_v55 }
 0x102   :  { %v2071_v0 = vpop.f32.mrf.mxu0  ;;  %2556 = vmatmul.mubr.bf16.vlgmr.msra.gmra.mxu0 %v2864_v60 }
 0x103   :  { %v2152_v1 = vpop.f32.mrf.mxu1  ;;  %2637 = vmatmul.mubr.bf16.vlgmr.msra.gmra.mxu1 %v2866_v61  ;;  %2565 = vmatprep.mubr.bf16.mxu0 %v2881_v62 }
 0x104   :  { %v4610_v2 = vadd.f32 %v2152_v1, %v2071_v0  ;;  %2646 = vmatprep.mubr.bf16.mxu1 %v2883_v63  ;;  %v2073_v4 = vpop.f32.mrf.mxu0  ;;  %v2928_v0 = vcombine.low %v123_v43, %v123_v43  ;;  %v2930_v1 = vcombine.low %v124_v44, %v124_v44 }
 0x105   :  { %v2154_v5 = vpop.f32.mrf.mxu1 }
 0x106   :  { %v4624_v9 = vadd.f32 %v2154_v5, %v2073_v4  ;;  %v2075_v10 = vpop.f32.mrf.mxu0 }
 0x107   :  { %v2156_v11 = vpop.f32.mrf.mxu1 }
 0x108   :  { %v4626_v14 = vadd.f32 %v2156_v11, %v2075_v10  ;;  %v2077_v17 = vpop.f32.mrf.mxu0 }
 0x109   :  { %v2158_v18 = vpop.f32.mrf.mxu1 }
 0x10a   :  { %v4628_v19 = vadd.f32 %v2158_v18, %v2077_v17  ;;  %2566 = vmatmul.mubr.bf16.gmra.mxu0 %v2880_v12  ;;  %v2081_v20 = vpop.f32.mrf.mxu0 }
 0x10b   :  { %2647 = vmatmul.mubr.bf16.gmra.mxu1 %v2882_v13  ;;  %v2162_v21 = vpop.f32.mrf.mxu1  ;;  %2575 = vmatprep.mubr.bf16.mxu0 %v2897_v15 }
 0x10c   :  { %2656 = vmatprep.mubr.bf16.mxu1 %v2899_v16  ;;  %v4633_v23 = vadd.f32 %v2162_v21, %v2081_v20  ;;  %v2083_v27 = vpop.f32.mrf.mxu0 }
 0x10d   :  { %v2164_v28 = vpop.f32.mrf.mxu1 }
 0x10e   :  { %v4644_v29 = vadd.f32 %v2164_v28, %v2083_v27  ;;  %v2085_v32 = vpop.f32.mrf.mxu0 }
 0x10f   :  { %v2166_v33 = vpop.f32.mrf.mxu1 }
 0x110   :  { %v4646_v36 = vadd.f32 %v2166_v33, %v2085_v32  ;;  %v2087_v37 = vpop.f32.mrf.mxu0 }
 0x111   :  { %v2168_v38 = vpop.f32.mrf.mxu1 }
 0x112   :  { %v4648_v39 = vadd.f32 %v2168_v38, %v2087_v37  ;;  %2576 = vmatmul.mubr.bf16.gmra.mxu0 %v2896_v30  ;;  %v2091_v40 = vpop.f32.mrf.mxu0 }
 0x113   :  { %2657 = vmatmul.mubr.bf16.gmra.mxu1 %v2898_v31  ;;  %v2172_v41 = vpop.f32.mrf.mxu1  ;;  %2585 = vmatprep.mubr.bf16.mxu0 %v2913_v34 }
 0x114   :  { %2666 = vmatprep.mubr.bf16.mxu1 %v2915_v35  ;;  %v4650_v42 = vadd.f32 %v2172_v41, %v2091_v40  ;;  %v2093_v45 = vpop.f32.mrf.mxu0 }
 0x115   :  { %v2174_v46 = vpop.f32.mrf.mxu1 }
 0x116   :  { %v4658_v47 = vadd.f32 %v2174_v46, %v2093_v45  ;;  %v2095_v50 = vpop.f32.mrf.mxu0 }
 0x117   :  { %v2176_v51 = vpop.f32.mrf.mxu1 }
 0x118   :  { %v4660_v54 = vadd.f32 %v2176_v51, %v2095_v50  ;;  %v2097_v55 = vpop.f32.mrf.mxu0 }
 0x119   :  { %v2178_v56 = vpop.f32.mrf.mxu1 }
 0x11a   :  { %v4662_v57 = vadd.f32 %v2178_v56, %v2097_v55  ;;  %2586 = vmatmul.mubr.bf16.gmra.mxu0 %v2912_v48  ;;  %v2101_v58 = vpop.f32.mrf.mxu0 }
 0x11b   :  { %2667 = vmatmul.mubr.bf16.gmra.mxu1 %v2914_v49  ;;  %v2182_v59 = vpop.f32.mrf.mxu1  ;;  %2595 = vmatprep.mubr.bf16.mxu0 %v2929_v52 }
 0x11c   :  { %2676 = vmatprep.mubr.bf16.mxu1 %v2931_v53  ;;  %v4664_v60 = vadd.f32 %v2182_v59, %v2101_v58  ;;  %v2103_v61 = vpop.f32.mrf.mxu0 }
 0x11d   :  { %v2184_v62 = vpop.f32.mrf.mxu1 }
 0x11e   :  { %v4666_v63 = vadd.f32 %v2184_v62, %v2103_v61  ;;  %v2105_v3 = vpop.f32.mrf.mxu0 }
 0x11f   :  { %v2186_v4 = vpop.f32.mrf.mxu1 }
 0x120   :  { %v4668_v5 = vadd.f32 %v2186_v4, %v2105_v3  ;;  %v2107_v6 = vpop.f32.mrf.mxu0 }
 0x121   :  { %v2188_v7 = vpop.f32.mrf.mxu1 }
 0x122   :  { %v4670_v8 = vadd.f32 %v2188_v7, %v2107_v6  ;;  %2596 = vmatmul.mubr.bf16.gmra.mxu0 %v2928_v0  ;;  %v2111_v10 = vpop.f32.mrf.mxu0 }
 0x123   :  { %2677 = vmatmul.mubr.bf16.gmra.mxu1 %v2930_v1  ;;  %v2192_v11 = vpop.f32.mrf.mxu1 }
 0x124   :  { %v4672_v12 = vadd.f32 %v2192_v11, %v2111_v10  ;;  %v2113_v13 = vpop.f32.mrf.mxu0 }
 0x125   :  { %v2194_v15 = vpop.f32.mrf.mxu1 }
 0x126   :  { %v4674_v16 = vadd.f32 %v2194_v15, %v2113_v13  ;;  %v2115_v17 = vpop.f32.mrf.mxu0 }
 0x127   :  { %v2196_v18 = vpop.f32.mrf.mxu1 }
 0x128   :  { %v2116_v20 = vpop.f32.mrf.mxu0 }
 0x129   :  { %v2197_v21 = vpop.f32.mrf.mxu1 }
 0x142   :  { %v2233_v22 = vpop.f32.mrf.mxu0 }
 0x143   :  { %v2314_v24 = vpop.f32.mrf.mxu1  ;;  %v2234_v25 = vadd.f32 %v2233_v22, %v4610_v2 }
 0x144   :  { %v2235_v26 = vpop.f32.mrf.mxu0 }
 0x145   :  { %v2316_v27 = vpop.f32.mrf.mxu1  ;;  %v4677_v28 = vadd.f32 %v2314_v24, %v2234_v25  ;;  %v2236_v30 = vadd.f32 %v2235_v26, %v4624_v9 }
 0x146   :  { %v2237_v31 = vpop.f32.mrf.mxu0 }
 0x147   :  { %v2318_v32 = vpop.f32.mrf.mxu1  ;;  %v4680_v33 = vadd.f32 %v2316_v27, %v2236_v30  ;;  %v2238_v34 = vadd.f32 %v2237_v31, %v4626_v14 }
 0x148   :  { %v2239_v35 = vpop.f32.mrf.mxu0 }
 0x149   :  { %v2320_v37 = vpop.f32.mrf.mxu1  ;;  %v4683_v38 = vadd.f32 %v2318_v32, %v2238_v34  ;;  %v2240_v40 = vadd.f32 %v2239_v35, %v4628_v19 }
 0x14a   :  { %v2243_v41 = vpop.f32.mrf.mxu0 }
 0x14b   :  { %v2324_v2 = vpop.f32.mrf.mxu1  ;;  %v4686_v43 = vadd.f32 %v2320_v37, %v2240_v40  ;;  %v2244_v44 = vadd.f32 %v2243_v41, %v4633_v23 }
 0x14c   :  { %v2245_v45 = vpop.f32.mrf.mxu0 }
 0x14d   :  { %v2326_v9 = vpop.f32.mrf.mxu1  ;;  %v2246_v46 = vadd.f32 %v2245_v45, %v4644_v29  ;;  %v4690_v48 = vadd.f32 %v2324_v2, %v2244_v44 }
 0x14e   :  { %v2247_v49 = vpop.f32.mrf.mxu0 }
 0x14f   :  { %v2328_v14 = vpop.f32.mrf.mxu1  ;;  %v2248_v50 = vadd.f32 %v2247_v49, %v4646_v36  ;;  %v4693_v51 = vadd.f32 %v2326_v9, %v2246_v46 }
 0x150   :  { %v2249_v52 = vpop.f32.mrf.mxu0 }
 0x151   :  { %v2330_v19 = vpop.f32.mrf.mxu1  ;;  %v2250_v53 = vadd.f32 %v2249_v52, %v4648_v39  ;;  %v4696_v55 = vadd.f32 %v2328_v14, %v2248_v50 }
 0x152   :  { %v2253_v56 = vpop.f32.mrf.mxu0 }
 0x153   :  { %v2334_v23 = vpop.f32.mrf.mxu1  ;;  %v2254_v58 = vadd.f32 %v2253_v56, %v4650_v42  ;;  %v4699_v59 = vadd.f32 %v2330_v19, %v2250_v53 }
 0x154   :  { %v2255_v29 = vpop.f32.mrf.mxu0 }
 0x155   :  { %v2336_v61 = vpop.f32.mrf.mxu1  ;;  %v2256_v62 = vadd.f32 %v2255_v29, %v4658_v47  ;;  %v4702_v0 = vadd.f32 %v2334_v23, %v2254_v58 }
 0x156   :  { %v2257_v36 = vpop.f32.mrf.mxu0 }
 0x157   :  { %v2338_v1 = vpop.f32.mrf.mxu1  ;;  %v2258_v3 = vadd.f32 %v2257_v36, %v4660_v54  ;;  %v4705_v4 = vadd.f32 %v2336_v61, %v2256_v62 }
 0x158   :  { %v2259_v39 = vpop.f32.mrf.mxu0 }
 0x159   :  { %v2340_v6 = vpop.f32.mrf.mxu1  ;;  %v2260_v7 = vadd.f32 %v2259_v39, %v4662_v57  ;;  %v4708_v10 = vadd.f32 %v2338_v1, %v2258_v3 }
 0x15a   :  { %v2263_v42 = vpop.f32.mrf.mxu0 }
 0x15b   :  { %v2344_v11 = vpop.f32.mrf.mxu1  ;;  %v2264_v13 = vadd.f32 %v2263_v42, %v4664_v60  ;;  %v4711_v15 = vadd.f32 %v2340_v6, %v2260_v7 }
 0x15c   :  { %v2265_v47 = vpop.f32.mrf.mxu0 }
 0x15d   :  { %v2346_v17 = vpop.f32.mrf.mxu1  ;;  %v2266_v18 = vadd.f32 %v2265_v47, %v4666_v63  ;;  %v4714_v20 = vadd.f32 %v2344_v11, %v2264_v13 }
 0x15e   :  { %v2267_v54 = vpop.f32.mrf.mxu0 }
 0x15f   :  { %v2348_v21 = vpop.f32.mrf.mxu1  ;;  %v2268_v22 = vadd.f32 %v2267_v54, %v4668_v5  ;;  %v4717_v24 = vadd.f32 %v2346_v17, %v2266_v18 }
 0x160   :  { %v2269_v57 = vpop.f32.mrf.mxu0 }
 0x161   :  { %v2350_v25 = vpop.f32.mrf.mxu1  ;;  %v2270_v26 = vadd.f32 %v2269_v57, %v4670_v8  ;;  %v4720_v27 = vadd.f32 %v2348_v21, %v2268_v22 }
 0x162   :  { %v2273_v60 = vpop.f32.mrf.mxu0 }
 0x163   :  { %v2354_v30 = vpop.f32.mrf.mxu1  ;;  %v2274_v31 = vadd.f32 %v2273_v60, %v4672_v12  ;;  %v4723_v32 = vadd.f32 %v2350_v25, %v2270_v26 }
 0x164   :  { %v2275_v63 = vpop.f32.mrf.mxu0 }
 0x165   :  { %v2356_v34 = vpop.f32.mrf.mxu1  ;;  %v2276_v35 = vadd.f32 %v2275_v63, %v4674_v16  ;;  %v4726_v37 = vadd.f32 %v2354_v30, %v2274_v31 }
 0x166   :  { %v2277_v5 = vpop.f32.mrf.mxu0 }
 0x167   :  { %v2358_v40 = vpop.f32.mrf.mxu1  ;;  %v4728_v41 = vadd.f32 %v2356_v34, %v2276_v35 }
 0x168   :  { %v2278_v2 = vpop.f32.mrf.mxu0 }
 0x169   :  { %4881 = vst [vmem:[#allocation3_spill] sm:$0xff] %v4728_v41  ;;  %v2359_v8 = vpop.f32.mrf.mxu1 }
 0x182   :  { %v2395_v44 = vpop.f32.mrf.mxu0 }
 0x183   :  { %v2476_v45 = vpop.f32.mrf.mxu1  ;;  %v2396_v34 = vadd.f32 %v2395_v44, %v4677_v28 }
 0x184   :  { %v2397_v9 = vpop.f32.mrf.mxu0 }
 0x185   :  { %v2478_v46 = vpop.f32.mrf.mxu1  ;;  %v2398_v35 = vadd.f32 %v2397_v9, %v4680_v33  ;;  %v2477_v5 = vadd.f32 %v2476_v45, %v2396_v34 }
 0x186   :  { %v2399_v49 = vpop.f32.mrf.mxu0 }
 0x187   :  { %v2480_v12 = vpop.f32.mrf.mxu1  ;;  %v2400_v40 = vadd.f32 %v2399_v49, %v4683_v38  ;;  %v2479_v41 = vadd.f32 %v2478_v46, %v2398_v35 }
 0x188   :  { %v2401_v14 = vpop.f32.mrf.mxu0 }
 0x189   :  { %v2482_v50 = vpop.f32.mrf.mxu1 }
 0x18a   :  { %v2405_v52 = vpop.f32.mrf.mxu0 }
 0x18b   :  { %v2486_v19 = vpop.f32.mrf.mxu1 }
 0x18c   :  { %v2407_v53 = vpop.f32.mrf.mxu0 }
 0x18d   :  { %v4730_v16 = vpop.f32.mrf.mxu1  ;;  %v2408_v45 = vadd.f32 %v2407_v53, %v4693_v51 }
 0x18e   :  { %v2409_v56 = vpop.f32.mrf.mxu0 }
 0x18f   :  { %v4732_v23 = vpop.f32.mrf.mxu1 }
 0x190   :  { %v2411_v58 = vpop.f32.mrf.mxu0 }
 0x191   :  { %v4734_v29 = vpop.f32.mrf.mxu1 }
 0x192   :  { %v4736_v61 = vpop.f32.mrf.mxu0 }
 0x193   :  { %v4738_v62 = vpop.f32.mrf.mxu1 }
 0x194   :  { %v4740_v36 = vpop.f32.mrf.mxu0 }
 0x195   :  { %v4742_v1 = vpop.f32.mrf.mxu1 }
 0x196   :  { %v4744_v3 = vpop.f32.mrf.mxu0 }
 0x197   :  { %v4746_v39 = vpop.f32.mrf.mxu1 }
 0x198   :  { %v4748_v6 = vpop.f32.mrf.mxu0 }
 0x199   :  { %v4750_v7 = vpop.f32.mrf.mxu1 }
 0x19a   :  { %v4752_v42 = vpop.f32.mrf.mxu0 }
 0x19b   :  { %v4754_v11 = vpop.f32.mrf.mxu1 }
 0x19c   :  { %v4756_v13 = vpop.f32.mrf.mxu0 }
 0x19d   :  { %v4758_v47 = vpop.f32.mrf.mxu1 }
 0x19e   :  { %v4760_v17 = vpop.f32.mrf.mxu0 }
 0x19f   :  { %v4762_v18 = vpop.f32.mrf.mxu1 }
 0x1a0   :  { %v4764_v54 = vpop.f32.mrf.mxu0 }
 0x1a1   :  { %v4766_v21 = vpop.f32.mrf.mxu1 }
 0x1a2   :  { %4882 = vst [vmem:[#allocation4_spill] sm:$0xff] %v4766_v21  ;;  %v4768_v22 = vpop.f32.mrf.mxu0 }
 0x1a3   :  { %4883 = vst [vmem:[#allocation5_spill] sm:$0xff] %v4768_v22  ;;  %v4770_v57 = vpop.f32.mrf.mxu1 }
 0x1a4   :  { %4884 = vst [vmem:[#allocation6_spill] sm:$0xff] %v4770_v57  ;;  %v4772_v25 = vpop.f32.mrf.mxu0  ;;  %v2402_v57 = vadd.f32 %v2401_v14, %v4686_v43  ;;  %v2410_v43 = vadd.f32 %v2409_v56, %v4696_v55 }
 0x1a5   :  { %4885 = vst [vmem:[#allocation7_spill] sm:$0xff] %v4772_v25  ;;  %v4774_v26 = vpop.f32.mrf.mxu1 }
 0x1a6   :  { %4886 = vst [vmem:[#allocation8_spill] sm:$0xff] %v4774_v26  ;;  %v2439_v60 = vpop.f32.mrf.mxu0  ;;  %v2481_v26 = vadd.f32 %v2480_v12, %v2400_v40  ;;  %v2483_v44 = vadd.f32 %v2482_v50, %v2402_v57  ;;  %v2412_v12 = vadd.f32 %v2411_v58, %v4699_v59 }
 0x1a7   :  { %v2520_v30 = vpop.f32.mrf.mxu1  ;;  %v2406_v60 = vadd.f32 %v2405_v52, %v4690_v48 }
 0x1a8   :  { %v2440_v31 = vpop.f32.mrf.mxu0 }
 0x1a9   :  { %v2521_v63 = vpop.f32.mrf.mxu1  ;;  %v2487_v49 = vadd.f32 %v2486_v19, %v2406_v60  ;;  %v2489_v19 = vadd.f32 %v4730_v16, %v2408_v45  ;;  %v2418_v60 = vadd.f32 %v4740_v36, %v4705_v4  ;;  %v2422_v45 = vadd.f32 %v4748_v6, %v4711_v15 }
 0x1aa   :  { %v2426_v6 = vadd.f32 %v4752_v42, %v4714_v20 }
 0x1c2   :  { %v2557_v2 = vpop.f32.mrf.mxu0 }
 0x1c3   :  { %v2638_v8 = vpop.f32.mrf.mxu1  ;;  %v2558_v21 = vadd.f32 %v2557_v2, %v2477_v5  ;;  %v2493_v5 = vadd.f32 %v4734_v29, %v2412_v12 }
 0x1c4   :  { %v2559_v25 = vpop.f32.mrf.mxu0 }
 0x1c5   :  { %v2640_v22 = vpop.f32.mrf.mxu1  ;;  %v2639_v30 = vadd.f32 %v2638_v8, %v2558_v21  ;;  %v2560_v31 = vadd.f32 %v2559_v25, %v2479_v41  ;;  %v2491_v21 = vadd.f32 %v4732_v23, %v2410_v43 }
 0x1c6   :  { %v2561_v63 = vpop.f32.mrf.mxu0 }
 0x1c7   :  { %v2642_v28 = vpop.f32.mrf.mxu1  ;;  %2742 = vst [vmem:[%s4879_s2] sm:$0xff] %v2639_v30  ;;  %v2641_v33 = vadd.f32 %v2640_v22, %v2560_v31  ;;  %v2562_v38 = vadd.f32 %v2561_v63, %v2481_v26  ;;  %v2788_v14 = vmul.f32 %v2639_v30, %v2639_v30  ;;  %v2416_v22 = vadd.f32 %v4736_v61, %v4702_v0 }
 0x1c8   :  { %v2563_v9 = vpop.f32.mrf.mxu0 }
 0x1c9   :  { %v2644_v46 = vpop.f32.mrf.mxu1  ;;  %2743 = vst [vmem:[%s4879_s2 + $0x8] sm:$0xff] %v2641_v33  ;;  %v2643_v48 = vadd.f32 %v2642_v28, %v2562_v38  ;;  %v2564_v41 = vadd.f32 %v2563_v9, %v2483_v44  ;;  %v2789_v57 = vmul.f32 %v2641_v33, %v2641_v33  ;;  %v2497_v28 = vadd.f32 %v4738_v62, %v2416_v22 }
 0x1ca   :  { %v2567_v50 = vpop.f32.mrf.mxu0  ;;  %v2430_v22 = vadd.f32 %v4760_v17, %v4720_v27 }
 0x1cb   :  { %v2648_v52 = vpop.f32.mrf.mxu1  ;;  %2744 = vst [vmem:[%s4879_s2 + $0x10] sm:$0xff] %v2643_v48  ;;  %v2760_v51 = vadd.f32 %v2643_v48, %v2639_v30  ;;  %v2790_v55 = vmul.f32 %v2643_v48, %v2643_v48  ;;  %v2645_v53 = vadd.f32 %v2644_v46, %v2564_v41  ;;  %v2568_v56 = vadd.f32 %v2567_v50, %v2487_v49 }
 0x1cc   :  { %v2569_v59 = vpop.f32.mrf.mxu0  ;;  %v2420_v30 = vadd.f32 %v4744_v3, %v4708_v10  ;;  %v2499_v49 = vadd.f32 %v4742_v1, %v2418_v60 }
 0x1cd   :  { %v2650_v58 = vpop.f32.mrf.mxu1  ;;  %v2806_v25 = vadd.f32 %v2790_v55, %v2788_v14  ;;  %2745 = vst [vmem:[%s4879_s2 + $0x18] sm:$0xff] %v2645_v53  ;;  %v2774_v26 = vadd.f32 %v2645_v53, %v2641_v33  ;;  %v2791_v34 = vmul.f32 %v2645_v53, %v2645_v53  ;;  %v2649_v35 = vadd.f32 %v2648_v52, %v2568_v56 }
 0x1ce   :  { %v2570_v40 = vadd.f32 %v2569_v59, %v2489_v19  ;;  %v2571_v16 = vpop.f32.mrf.mxu0  ;;  %v2501_v15 = vadd.f32 %v4746_v39, %v2420_v30  ;;  %v2503_v55 = vadd.f32 %v4750_v7, %v2422_v45 }
 0x1cf   :  { %v2652_v2 = vpop.f32.mrf.mxu1  ;;  %v2820_v23 = vadd.f32 %v2791_v34, %v2789_v57  ;;  %2746 = vst [vmem:[%s4879_s2 + $0x20] sm:$0xff] %v2649_v35  ;;  %v2761_v0 = vadd.f32 %v2760_v51, %v2649_v35  ;;  %v2792_v61 = vmul.f32 %v2649_v35, %v2649_v35  ;;  %v2572_v8 = vadd.f32 %v2571_v16, %v2491_v21 }
 0x1d0   :  { %v2651_v31 = vadd.f32 %v2650_v58, %v2570_v40  ;;  %v2573_v63 = vpop.f32.mrf.mxu0  ;;  %v2428_v21 = vadd.f32 %v4756_v13, %v4717_v24  ;;  %v2507_v58 = vadd.f32 %v4754_v11, %v2426_v6  ;;  %v2432_v35 = vadd.f32 %v4764_v54, %v4723_v32  ;;  %v4887_v54 = vld [vmem:[#allocation5_spill] sm:$0xff] }
 0x1d1   :  { %v2654_v29 = vpop.f32.mrf.mxu1  ;;  %v2807_v44 = vadd.f32 %v2806_v25, %v2792_v61  ;;  %v2653_v33 = vadd.f32 %v2652_v2, %v2572_v8  ;;  %v2574_v38 = vadd.f32 %v2573_v63, %v2493_v5  ;;  %v2511_v32 = vadd.f32 %v4762_v18, %v2430_v22 }
 0x1d2   :  { %2747 = vst [vmem:[%s4879_s2 + $0x28] sm:$0xff] %v2651_v31  ;;  %v2775_v43 = vadd.f32 %v2774_v26, %v2651_v31  ;;  %v2793_v4 = vmul.f32 %v2651_v31, %v2651_v31  ;;  %v2577_v36 = vpop.f32.mrf.mxu0  ;;  %v2509_v2 = vadd.f32 %v4758_v47, %v2428_v21 }
 0x1d3   :  { %v2658_v9 = vpop.f32.mrf.mxu1  ;;  %2748 = vst [vmem:[%s4879_s2 + $0x30] sm:$0xff] %v2653_v33  ;;  %v2762_v10 = vadd.f32 %v2761_v0, %v2653_v33  ;;  %v2794_v62 = vmul.f32 %v2653_v33, %v2653_v33  ;;  %v2655_v3 = vadd.f32 %v2654_v29, %v2574_v38  ;;  %v2578_v46 = vadd.f32 %v2577_v36, %v2497_v28  ;;  %v4888_v29 = vld [vmem:[#allocation4_spill] sm:$0xff] }
 0x1d4   :  { %v2821_v48 = vadd.f32 %v2820_v23, %v2793_v4  ;;  %v2579_v41 = vpop.f32.mrf.mxu0  ;;  %v2436_v23 = vadd.f32 %v4887_v54, %v4726_v37  ;;  %v2513_v28 = vadd.f32 %v4888_v29, %v2432_v35  ;;  %v4890_v4 = vld [vmem:[#allocation7_spill] sm:$0xff] }
 0x1d5   :  { %v2660_v12 = vpop.f32.mrf.mxu1  ;;  %v2808_v14 = vadd.f32 %v2807_v44, %v2794_v62  ;;  %2749 = vst [vmem:[%s4879_s2 + $0x38] sm:$0xff] %v2655_v3  ;;  %v2776_v50 = vadd.f32 %v2775_v43, %v2655_v3  ;;  %v2795_v52 = vmul.f32 %v2655_v3, %v2655_v3  ;;  %v2659_v51 = vadd.f32 %v2658_v9, %v2578_v46  ;;  %v4889_v43 = vld [vmem:[#allocation3_spill] sm:$0xff]  ;;  %v4891_v3 = vld [vmem:[#allocation6_spill] sm:$0xff] }
 0x1d6   :  { %v2580_v53 = vadd.f32 %v2579_v41, %v2499_v49  ;;  %v2581_v1 = vpop.f32.mrf.mxu0  ;;  %v2438_v36 = vadd.f32 %v4890_v4, %v4889_v43  ;;  %v2517_v46 = vadd.f32 %v4891_v3, %v2436_v23 }
 0x1d7   :  { %v2662_v56 = vpop.f32.mrf.mxu1  ;;  %v2822_v39 = vadd.f32 %v2821_v48, %v2795_v52  ;;  %2750 = vst [vmem:[%s4879_s2 + $0x40] sm:$0xff] %v2659_v51  ;;  %v2763_v20 = vadd.f32 %v2762_v10, %v2659_v51  ;;  %v2796_v42 = vmul.f32 %v2659_v51, %v2659_v51  ;;  %v2582_v19 = vadd.f32 %v2581_v1, %v2501_v15 }
 0x1d8   :  { %v2661_v57 = vadd.f32 %v2660_v12, %v2580_v53  ;;  %v2583_v59 = vpop.f32.mrf.mxu0  ;;  %v4892_v53 = vld [vmem:[#allocation8_spill] sm:$0xff] }
 0x1d9   :  { %v2664_v7 = vpop.f32.mrf.mxu1  ;;  %v2809_v25 = vadd.f32 %v2808_v14, %v2796_v42  ;;  %v2663_v26 = vadd.f32 %v2662_v56, %v2582_v19  ;;  %v2584_v34 = vadd.f32 %v2583_v59, %v2503_v55  ;;  %v2519_v1 = vadd.f32 %v4892_v53, %v2438_v36 }
 0x1da   :  { %2751 = vst [vmem:[%s4879_s2 + $0x48] sm:$0xff] %v2661_v57  ;;  %v2777_v5 = vadd.f32 %v2776_v50, %v2661_v57  ;;  %v2797_v24 = vmul.f32 %v2661_v57, %v2661_v57  ;;  %v2587_v13 = vpop.f32.mrf.mxu0 }
 0x1db   :  { %v2668_v40 = vpop.f32.mrf.mxu1  ;;  %2752 = vst [vmem:[%s4879_s2 + $0x50] sm:$0xff] %v2663_v26  ;;  %v2764_v27 = vadd.f32 %v2763_v20, %v2663_v26  ;;  %v2798_v11 = vmul.f32 %v2663_v26, %v2663_v26  ;;  %v2665_v17 = vadd.f32 %v2664_v7, %v2584_v34  ;;  %v2588_v16 = vadd.f32 %v2587_v13, %v2507_v58 }
 0x1dc   :  { %v2823_v0 = vadd.f32 %v2822_v39, %v2797_v24  ;;  %v2589_v61 = vpop.f32.mrf.mxu0 }
 0x1dd   :  { %v2670_v8 = vpop.f32.mrf.mxu1  ;;  %v2810_v60 = vadd.f32 %v2809_v25, %v2798_v11  ;;  %2753 = vst [vmem:[%s4879_s2 + $0x58] sm:$0xff] %v2665_v17  ;;  %v2778_v30 = vadd.f32 %v2777_v5, %v2665_v17  ;;  %v2799_v31 = vmul.f32 %v2665_v17, %v2665_v17  ;;  %v2669_v63 = vadd.f32 %v2668_v40, %v2588_v16 }
 0x1de   :  { %v2590_v44 = vadd.f32 %v2589_v61, %v2509_v2  ;;  %v2591_v47 = vpop.f32.mrf.mxu0  ;;  %v2834_v16 = vlaneseq }
 0x1df   :  { %v2672_v33 = vpop.f32.mrf.mxu1  ;;  %v2824_v18 = vadd.f32 %v2823_v0, %v2799_v31  ;;  %2754 = vst [vmem:[%s4879_s2 + $0x60] sm:$0xff] %v2669_v63  ;;  %v2765_v37 = vadd.f32 %v2764_v27, %v2669_v63  ;;  %v2800_v38 = vmul.f32 %v2669_v63, %v2669_v63  ;;  %v2592_v45 = vadd.f32 %v2591_v47, %v2511_v32 }
 0x1e0   :  { %v2671_v9 = vadd.f32 %v2670_v8, %v2590_v44  ;;  %v2593_v10 = vpop.f32.mrf.mxu0 }
 0x1e1   :  { %v2674_v62 = vpop.f32.mrf.mxu1  ;;  %v2811_v49 = vadd.f32 %v2810_v60, %v2800_v38  ;;  %v2673_v15 = vadd.f32 %v2672_v33, %v2592_v45  ;;  %v2594_v6 = vadd.f32 %v2593_v10, %v2513_v28 }
 0x1e2   :  { %2755 = vst [vmem:[%s4879_s2 + $0x68] sm:$0xff] %v2671_v9  ;;  %v2779_v48 = vadd.f32 %v2778_v30, %v2671_v9  ;;  %v2801_v41 = vmul.f32 %v2671_v9, %v2671_v9  ;;  %v2597_v12 = vpop.f32.mrf.mxu0  ;;  %v2835_v30 = vshrl.u32 %v2834_v16, 7 }
 0x1e3   :  { %v2678_v14 = vpop.f32.mrf.mxu1  ;;  %2756 = vst [vmem:[%s4879_s2 + $0x70] sm:$0xff] %v2673_v15  ;;  %v2766_v50 = vadd.f32 %v2765_v37, %v2673_v15  ;;  %v2802_v52 = vmul.f32 %v2673_v15, %v2673_v15  ;;  %v2675_v51 = vadd.f32 %v2674_v62, %v2594_v6  ;;  %v2598_v55 = vadd.f32 %v2597_v12, %v2517_v46 }
 0x1e4   :  { %v2825_v56 = vadd.f32 %v2824_v18, %v2801_v41  ;;  %v2599_v39 = vpop.f32.mrf.mxu0  ;;  %vm2837_vm0 = vcmp.eq.s32.totalorder %v2835_v30, 1  ;;  %vm2836_vm1 = vcmp.eq.s32.totalorder %v2835_v30, 0 }
 0x1e5   :  { %v2680_v20 = vpop.f32.mrf.mxu1  ;;  %v2812_v42 = vadd.f32 %v2811_v49, %v2802_v52  ;;  %2757 = vst [vmem:[%s4879_s2 + $0x78] sm:$0xff] %v2675_v51  ;;  %v2780_v19 = vadd.f32 %v2779_v48, %v2675_v51  ;;  %v2803_v21 = vmul.f32 %v2675_v51, %v2675_v51  ;;  %v2679_v22 = vadd.f32 %v2678_v14, %v2598_v55 }
 0x1e6   :  { %v2600_v57 = vadd.f32 %v2599_v39, %v2519_v1  ;;  %v2601_v59 = vpop.f32.mrf.mxu0 }
 0x1e7   :  { %v2682_v7 = vpop.f32.mrf.mxu1  ;;  %v2826_v58 = vadd.f32 %v2825_v56, %v2803_v21  ;;  %2758 = vst [vmem:[%s4879_s2 + $0x80] sm:$0xff] %v2679_v22  ;;  %v2767_v25 = vadd.f32 %v2766_v50, %v2679_v22  ;;  %v2804_v26 = vmul.f32 %v2679_v22, %v2679_v22 }
 0x1e8   :  { %v2681_v34 = vadd.f32 %v2680_v20, %v2600_v57  ;;  %v2602_v35 = vpop.f32.mrf.mxu0 }
 0x1e9   :  { %v2683_v5 = vpop.f32.mrf.mxu1  ;;  %v2768_v24 = vrot.slane %v2767_v25, 4  ;;  %v2813_v13 = vadd.f32 %v2812_v42, %v2804_v26 }
 0x1ea   :  { %2759 = vst [vmem:[%s4879_s2 + $0x88] sm:$0xff] %v2681_v34  ;;  %v2781_v40 = vadd.f32 %v2780_v19, %v2681_v34  ;;  %v2805_v27 = vmul.f32 %v2681_v34, %v2681_v34 }
 0x1eb   :  { %v2769_v11 = vadd.f32 %v2768_v24, %v2767_v25  ;;  %v2814_v17 = vrot.slane %v2813_v13, 4 }
 0x1ec   :  { %v2782_v2 = vrot.slane %v2781_v40, 4  ;;  %v2827_v32 = vadd.f32 %v2826_v58, %v2805_v27 }
 0x1ed   :  { %v2770_v54 = vrot.slane %v2769_v11, 2  ;;  %v2815_v23 = vadd.f32 %v2814_v17, %v2813_v13 }
 0x1ee   :  { %v2783_v0 = vadd.f32 %v2782_v2, %v2781_v40  ;;  %v2828_v61 = vrot.slane %v2827_v32, 4 }
 0x1ef   :  { %v2771_v8 = vadd.f32 %v2770_v54, %v2769_v11  ;;  %v2816_v60 = vrot.slane %v2815_v23, 2 }
 0x1f0   :  { %v2784_v31 = vrot.slane %v2783_v0, 2  ;;  %v2829_v63 = vadd.f32 %v2828_v61, %v2827_v32 }
 0x1f1   :  { %v2817_v29 = vadd.f32 %v2816_v60, %v2815_v23  ;;  %v2772_v28 = vrot.slane %v2771_v8, 1 }
 0x1f2   :  { %v2785_v44 = vadd.f32 %v2784_v31, %v2783_v0  ;;  %v2830_v47 = vrot.slane %v2829_v63, 2 }
 0x1f3   :  { %v2818_v33 = vrot.slane %v2817_v29, 1  ;;  %v2773_v45 = vadd.f32 %v2772_v28, %v2771_v8 }
 0x1f4   :  { %v2831_v18 = vadd.f32 %v2830_v47, %v2829_v63  ;;  %v2786_v38 = vrot.slane %v2785_v44, 1 }
 0x1f5   :  { %v2819_v37 = vadd.f32 %v2818_v33, %v2817_v29 }
 0x1f6   :  { %v2832_v43 = vrot.slane %v2831_v18, 1  ;;  %v2787_v10 = vadd.f32 %v2786_v38, %v2785_v44 }
 0x1f7   :  { %v2838_v4 = vsel %vm2837_vm0, %v2819_v37, 0.0 }
 0x1f8   :  { %v2840_v36 = vsel %vm2836_vm1, %v2773_v45, %v2838_v4  ;;  %v2833_v9 = vadd.f32 %v2832_v43, %v2831_v18 }
 0x1f9   :  { %2842 = vst [vmem:[%s4880_s3] sm:$0xff] %v2840_v36 }
 0x1fa   :  { %v2839_v62 = vsel %vm2837_vm0, %v2833_v9, 0.0 }
 0x1fb   :  { %v2841_v3 = vsel %vm2836_vm1, %v2787_v10, %v2839_v62 }
 0x1fc   :  { %2843 = vst [vmem:[%s4880_s3 + $0x8] sm:$0xff] %v2841_v3 }

// kernel: discriminator_forward.14
= control target key start
LH: loop header
LB: loop body
LE: loop exit
PB: predicated region body
PF: predicated region fallthrough
CT: control target
= control target key end

     0   :  { %v28_v0 = vlaneseq  ;;  %s254_s1 = inlined_call_operand.vmem [shape: f32[1,512], index: 1, kind: input, shape index: {}]   ;;  %s255_s2 = inlined_call_operand.vmem [shape: f32[1,512], index: 2, kind: input, shape index: {}]   ;;  %s256_s0 = inlined_call_operand.vmem [shape: f32[24,512], index: 0, kind: input, shape index: {}]   ;;  %s257_s3 = inlined_call_operand.vmem [shape: f32[24,512], index: 3, kind: output, shape index: {}]  }
   0x1   :  { %v26_v2 = vld [vmem:[%s254_s1] sm:$0xf]  ;;  %v15_v6 = vld [vmem:[%s256_s0 + $0x8] sm:$0xff]  ;;  %v16_v10 = vld [vmem:[%s256_s0 + $0x10] sm:$0xff] }
   0x2   :  { %v29_v1 = vshrl.u32 %v28_v0, 7  ;;  %v60_v3 = vld [vmem:[%s255_s2] sm:$0xf]  ;;  %v19_v12 = vld [vmem:[%s256_s0 + $0x28] sm:$0xff]  ;;  %v17_v17 = vld [vmem:[%s256_s0 + $0x18] sm:$0xff] }
   0x3   :  { %v14_v4 = vld [vmem:[%s256_s0] sm:$0xff]  ;;  %v20_v18 = vld [vmem:[%s256_s0 + $0x30] sm:$0xff]  ;;  %v21_v19 = vld [vmem:[%s256_s0 + $0x38] sm:$0xff] }
   0x4   :  { %v30_v5 = vsub.s32 0, %v29_v1  ;;  %v34_v7 = vsub.s32 1, %v29_v1  ;;  %v38_v8 = vsub.s32 2, %v29_v1  ;;  %v42_v9 = vsub.s32 3, %v29_v1  ;;  %v18_v11 = vld [vmem:[%s256_s0 + $0x20] sm:$0xff]  ;;  %v23_v48 = vld [vmem:[%s256_s0 + $0x48] sm:$0xff] }
   0x5   :  { %v22_v47 = vld [vmem:[%s256_s0 + $0x40] sm:$0xff]  ;;  %v24_v52 = vld [vmem:[%s256_s0 + $0x50] sm:$0xff]  ;;  %v25_v53 = vld [vmem:[%s256_s0 + $0x58] sm:$0xff] }
   0x6   :  { %v31_v13 = vrot.slane %v26_v2, %v30_v5  ;;  %v187_v14 = vrot.slane %v60_v3, %v30_v5  ;;  %v35_v15 = vrot.slane %v26_v2, %v34_v7  ;;  %v189_v16 = vrot.slane %v60_v3, %v34_v7 }
   0x7   :  { %v39_v20 = vrot.slane %v26_v2, %v38_v8  ;;  %v73_v21 = vrot.slane %v60_v3, %v38_v8  ;;  %v43_v22 = vrot.slane %v26_v2, %v42_v9  ;;  %v77_v23 = vrot.slane %v60_v3, %v42_v9 }
   0x8   :  { %v48_v24 = vmul.f32 %v31_v13, %v14_v4  ;;  %v49_v25 = vmul.f32 %v35_v15, %v15_v6  ;;  %v52_v26 = vmul.f32 %v31_v13, %v18_v11  ;;  %v53_v27 = vmul.f32 %v35_v15, %v19_v12 }
   0x9   :  { %v50_v28 = vmul.f32 %v39_v20, %v16_v10  ;;  %v51_v29 = vmul.f32 %v43_v22, %v17_v17  ;;  %v54_v30 = vmul.f32 %v39_v20, %v20_v18  ;;  %v55_v31 = vmul.f32 %v43_v22, %v21_v19 }
   0xa   :  { %v82_v32 = vadd.f32 %v187_v14, %v48_v24  ;;  %v83_v33 = vadd.f32 %v189_v16, %v49_v25  ;;  %v86_v34 = vadd.f32 %v187_v14, %v52_v26  ;;  %v87_v35 = vadd.f32 %v189_v16, %v53_v27 }
   0xb   :  { %v84_v36 = vadd.f32 %v73_v21, %v50_v28  ;;  %v85_v37 = vadd.f32 %v77_v23, %v51_v29  ;;  %v88_v38 = vadd.f32 %v73_v21, %v54_v30  ;;  %v89_v39 = vadd.f32 %v77_v23, %v55_v31 }
   0xc   :  { %vm94_vm0 = vcmp.gt.f32.partialorder %v82_v32, 0.0  ;;  %v106_v40 = vmul.f32 -0.2, %v82_v32  ;;  %vm95_vm1 = vcmp.gt.f32.partialorder %v83_v33, 0.0  ;;  %v107_v41 = vmul.f32 -0.2, %v83_v33 }
   0xd   :  { %vm96_vm2 = vcmp.gt.f32.partialorder %v84_v36, 0.0  ;;  %v108_v42 = vmul.f32 -0.2, %v84_v36  ;;  %vm97_vm3 = vcmp.gt.f32.partialorder %v85_v37, 0.0  ;;  %v109_v43 = vmul.f32 -0.2, %v85_v37 }
   0xe   :  { %v118_v44 = vsel %vm94_vm0, %v82_v32, %v106_v40  ;;  %v119_v45 = vsel %vm95_vm1, %v83_v33, %v107_v41  ;;  %vm98_vm4 = vcmp.gt.f32.partialorder %v86_v34, 0.0  ;;  %v110_v46 = vmul.f32 -0.2, %v86_v34 }
   0xf   :  { %130 = vst [vmem:[%s257_s3] sm:$0xff] %v118_v44  ;;  %131 = vst [vmem:[%s257_s3 + $0x8] sm:$0xff] %v119_v45  ;;  %v120_v49 = vsel %vm96_vm2, %v84_v36, %v108_v42  ;;  %v121_v50 = vsel %vm97_vm3, %v85_v37, %v109_v43  ;;  %vm99_vm5 = vcmp.gt.f32.partialorder %v87_v35, 0.0  ;;  %v111_v51 = vmul.f32 -0.2, %v87_v35 }
  0x10   :  { %132 = vst [vmem:[%s257_s3 + $0x10] sm:$0xff] %v120_v49  ;;  %133 = vst [vmem:[%s257_s3 + $0x18] sm:$0xff] %v121_v50  ;;  %v122_v54 = vsel %vm98_vm4, %v86_v34, %v110_v46  ;;  %vm100_vm6 = vcmp.gt.f32.partialorder %v88_v38, 0.0  ;;  %v112_v55 = vmul.f32 -0.2, %v88_v38  ;;  %vm101_vm7 = vcmp.gt.f32.partialorder %v89_v39, 0.0 }
  0x11   :  { %134 = vst [vmem:[%s257_s3 + $0x20] sm:$0xff] %v122_v54  ;;  %v123_v56 = vsel %vm99_vm5, %v87_v35, %v111_v51  ;;  %v113_v57 = vmul.f32 -0.2, %v89_v39  ;;  %v56_v58 = vmul.f32 %v31_v13, %v22_v47  ;;  %v57_v59 = vmul.f32 %v35_v15, %v23_v48 }
  0x12   :  { %135 = vst [vmem:[%s257_s3 + $0x28] sm:$0xff] %v123_v56  ;;  %v124_v60 = vsel %vm100_vm6, %v88_v38, %v112_v55  ;;  %v58_v61 = vmul.f32 %v39_v20, %v24_v52  ;;  %v59_v62 = vmul.f32 %v43_v22, %v25_v53 }
  0x13   :  { %136 = vst [vmem:[%s257_s3 + $0x30] sm:$0xff] %v124_v60  ;;  %v125_v63 = vsel %vm101_vm7, %v89_v39, %v113_v57  ;;  %v90_v0 = vadd.f32 %v187_v14, %v56_v58  ;;  %v91_v1 = vadd.f32 %v189_v16, %v57_v59 }
  0x14   :  { %137 = vst [vmem:[%s257_s3 + $0x38] sm:$0xff] %v125_v63  ;;  %v92_v2 = vadd.f32 %v73_v21, %v58_v61  ;;  %v93_v3 = vadd.f32 %v77_v23, %v59_v62 }
  0x15   :  { %vm102_vm8 = vcmp.gt.f32.partialorder %v90_v0, 0.0  ;;  %v114_v4 = vmul.f32 -0.2, %v90_v0  ;;  %vm103_vm9 = vcmp.gt.f32.partialorder %v91_v1, 0.0  ;;  %v115_v5 = vmul.f32 -0.2, %v91_v1 }
  0x16   :  { %vm104_vm10 = vcmp.gt.f32.partialorder %v92_v2, 0.0  ;;  %v116_v6 = vmul.f32 -0.2, %v92_v2  ;;  %vm105_vm11 = vcmp.gt.f32.partialorder %v93_v3, 0.0  ;;  %v117_v7 = vmul.f32 -0.2, %v93_v3 }
  0x17   :  { %v126_v8 = vsel %vm102_vm8, %v90_v0, %v114_v4  ;;  %v127_v9 = vsel %vm103_vm9, %v91_v1, %v115_v5 }
  0x18   :  { %138 = vst [vmem:[%s257_s3 + $0x40] sm:$0xff] %v126_v8  ;;  %139 = vst [vmem:[%s257_s3 + $0x48] sm:$0xff] %v127_v9  ;;  %v128_v10 = vsel %vm104_vm10, %v92_v2, %v116_v6  ;;  %v129_v11 = vsel %vm105_vm11, %v93_v3, %v117_v7 }
  0x19   :  { %140 = vst [vmem:[%s257_s3 + $0x50] sm:$0xff] %v128_v10  ;;  %141 = vst [vmem:[%s257_s3 + $0x58] sm:$0xff] %v129_v11 }

// kernel: discriminator_forward.13
= control target key start
LH: loop header
LB: loop body
LE: loop exit
PB: predicated region body
PF: predicated region fallthrough
CT: control target
= control target key end

     0   :  { %s6082_s12 = smov 0   ;;  %s6084_s13 = smov 0   ;;  %s7045_s0 = inlined_call_operand.vmem [shape: bf16[24,4096], index: 0, kind: input, shape index: {}]   ;;  %s7046_s1 = inlined_call_operand.vmem [shape: bf16[4096,512], index: 1, kind: input, shape index: {}]   ;;  %s7047_s2 = inlined_call_operand.vmem [shape: f32[24,512], index: 2, kind: output, shape index: {0}]   ;;  %s7048_s3 = inlined_call_operand.vmem [shape: f32[8,512], index: 3, kind: output, shape index: {1}]  }
   0x1   :  { %s6086_s14 = smov 0   ;;  %s6088_s15 = smov 0  }
   0x2   :  { %s6090_s16 = smov 0  }
   0x3 LB: > { %s23_s17 = sadd.s32 1, %s6055_s15  ;;  %p42_p1 = scmp.ne.s32.totalorder %s6047_s13, %s6043_s12  ;;  %s6059_s16 = sphi %s6090_s16, %s14_s16   ;;  %s6055_s15 = sphi %s6088_s15, %s7052_s15   ;;  %s6051_s14 = sphi %s6086_s14, %s7051_s14   ;;  %s6047_s13 = sphi %s6084_s13, %s7050_s13   ;;  %s6043_s12 = sphi %s6082_s12, %s7049_s12  }
   0x4   : > { %p24_p0 = scmp.ge.s32.totalorder %s23_s17, 2  ;;  %p43_p2 = scmp.eq.s32.totalorder %s6059_s16, 0 }
   0x5   : > { %s35_s19 = sadd.s32 1, %s6047_s13  ;;  %p4634_p5 = scmp.ge.s32.totalorder %s6059_s16, 2 }
   0x6   : > { %s7054_s17 = smov (%p24_p0, %s23_s17), 0  ;;  %p44_p3 = por %p43_p2, %p42_p1 }
   0x7   : > { %s31_s18 = ssub.s32 %s6055_s15, %s7054_s17  ;;  %146 = sbr.rel (%p4634_p5) target bundleno = 29 (0x1d), region = 16 }
   0x8   : > { %p33_p4 = scmp.eq.s32.totalorder %s31_s18, 0 }
   0xa   : > { %s6117_s20 = scalar_select %p33_p4, %s6047_s13, %s35_s19  }
   0xc   : > { %149 = sbr.rel (!%p44_p3) target bundleno = 29 (0x1d), region = 20  ;;  %s151_s21 = sand.u32 (%p44_p3), 1, %s6047_s13  }
   0xd   : > { %s5192_s22 = sshll.u32 (%p44_p3), %s6055_s15, 6  ;;  %s5194_s23 = smul.u32 (%p44_p3), 192, %s151_s21 }
   0xe   : > { %s6125_s26 = scalar_lea.vmem (%p44_p3), %s7045_s0, %s5192_s22 }
   0xf   : > { %v172_v0 = vld [vmem:[%s6125_s26] sm:$0xff] (%p44_p3)  ;;  %v174_v1 = vld [vmem:[%s6125_s26 + $0x8] sm:$0xff] (%p44_p3)  ;;  %v176_v2 = vld [vmem:[%s6125_s26 + $0x10] sm:$0xff] (%p44_p3)  ;;  %s6133_s27 = scalar_lea.vmem (%p44_p3), [#allocation3], %s5194_s23 }
  0x10   : > { %v178_v3 = vld [vmem:[%s6125_s26 + $0x18] sm:$0xff] (%p44_p3)  ;;  %v180_v4 = vld [vmem:[%s6125_s26 + $0x20] sm:$0xff] (%p44_p3)  ;;  %v182_v5 = vld [vmem:[%s6125_s26 + $0x28] sm:$0xff] (%p44_p3)  ;;  %173 = vst [vmem:[%s6133_s27] sm:$0xff] (%p44_p3), %v172_v0 }
  0x11   : > { %175 = vst [vmem:[%s6133_s27 + $0x8] sm:$0xff] %v174_v1  ;;  %177 = vst [vmem:[%s6133_s27 + $0x10] sm:$0xff] %v176_v2  ;;  %v184_v6 = vld [vmem:[%s6125_s26 + $0x30] sm:$0xff]  ;;  %v186_v7 = vld [vmem:[%s6125_s26 + $0x38] sm:$0xff] }
  0x12   : > { %179 = vst [vmem:[%s6133_s27 + $0x18] sm:$0xff] %v178_v3  ;;  %181 = vst [vmem:[%s6133_s27 + $0x20] sm:$0xff] %v180_v4  ;;  %v188_v8 = vld [vmem:[%s6125_s26 + $0x80] sm:$0xff]  ;;  %v190_v9 = vld [vmem:[%s6125_s26 + $0x88] sm:$0xff] }
  0x13   : > { %183 = vst [vmem:[%s6133_s27 + $0x28] sm:$0xff] %v182_v5  ;;  %185 = vst [vmem:[%s6133_s27 + $0x30] sm:$0xff] %v184_v6  ;;  %v192_v10 = vld [vmem:[%s6125_s26 + $0x90] sm:$0xff]  ;;  %v194_v11 = vld [vmem:[%s6125_s26 + $0x98] sm:$0xff] }
  0x14   : > { %187 = vst [vmem:[%s6133_s27 + $0x38] sm:$0xff] %v186_v7  ;;  %189 = vst [vmem:[%s6133_s27 + $0x40] sm:$0xff] %v188_v8  ;;  %v196_v12 = vld [vmem:[%s6125_s26 + $0xa0] sm:$0xff]  ;;  %v198_v13 = vld [vmem:[%s6125_s26 + $0xa8] sm:$0xff] }
  0x15   : > { %191 = vst [vmem:[%s6133_s27 + $0x48] sm:$0xff] %v190_v9  ;;  %193 = vst [vmem:[%s6133_s27 + $0x50] sm:$0xff] %v192_v10  ;;  %v200_v14 = vld [vmem:[%s6125_s26 + $0xb0] sm:$0xff]  ;;  %v202_v15 = vld [vmem:[%s6125_s26 + $0xb8] sm:$0xff] }
  0x16   : > { %195 = vst [vmem:[%s6133_s27 + $0x58] sm:$0xff] %v194_v11  ;;  %197 = vst [vmem:[%s6133_s27 + $0x60] sm:$0xff] %v196_v12  ;;  %v204_v16 = vld [vmem:[%s6125_s26 + $0x100] sm:$0xff]  ;;  %v206_v17 = vld [vmem:[%s6125_s26 + $0x108] sm:$0xff] }
  0x17   : > { %199 = vst [vmem:[%s6133_s27 + $0x68] sm:$0xff] %v198_v13  ;;  %201 = vst [vmem:[%s6133_s27 + $0x70] sm:$0xff] %v200_v14  ;;  %v208_v18 = vld [vmem:[%s6125_s26 + $0x110] sm:$0xff]  ;;  %v210_v19 = vld [vmem:[%s6125_s26 + $0x118] sm:$0xff] }
  0x18   : > { %203 = vst [vmem:[%s6133_s27 + $0x78] sm:$0xff] %v202_v15  ;;  %205 = vst [vmem:[%s6133_s27 + $0x80] sm:$0xff] %v204_v16  ;;  %v212_v20 = vld [vmem:[%s6125_s26 + $0x120] sm:$0xff]  ;;  %v214_v21 = vld [vmem:[%s6125_s26 + $0x128] sm:$0xff] }
  0x19   : > { %207 = vst [vmem:[%s6133_s27 + $0x88] sm:$0xff] %v206_v17  ;;  %209 = vst [vmem:[%s6133_s27 + $0x90] sm:$0xff] %v208_v18  ;;  %v216_v22 = vld [vmem:[%s6125_s26 + $0x130] sm:$0xff]  ;;  %v218_v23 = vld [vmem:[%s6125_s26 + $0x138] sm:$0xff] }
  0x1a   : > { %211 = vst [vmem:[%s6133_s27 + $0x98] sm:$0xff] %v210_v19  ;;  %213 = vst [vmem:[%s6133_s27 + $0xa0] sm:$0xff] %v212_v20 }
  0x1b   : > { %215 = vst [vmem:[%s6133_s27 + $0xa8] sm:$0xff] %v214_v21  ;;  %217 = vst [vmem:[%s6133_s27 + $0xb0] sm:$0xff] %v216_v22 }
  0x1c   : > { %219 = vst [vmem:[%s6133_s27 + $0xb8] sm:$0xff] %v218_v23 }
  0x1d PF: > { %p4637_p6 = scmp.ge.s32.totalorder %s6059_s16, 1  ;;  %p234_p7 = scmp.lt.s32.totalorder %s6059_s16, 3 }
  0x1f   : > { %p235_p8 = pnand %p4637_p6, %p234_p7 }
  0x20   : > { %s241_s28 = sand.u32 (!%p235_p8), 1, %s6043_s12   ;;  %s4638_s29 = sshll.u32 (!%p235_p8), %s6051_s14, 8 }
  0x21   : > { %238 = sbr.rel (%p235_p8) target bundleno = 802 (0x322), region = 47  ;;  %p279_p9 = scmp.lt.s32.totalorder (!%p235_p8), %s4638_s29, 511 }
  0x22   : > { %s5195_s30 = smul.u32 (!%p235_p8), 192, %s241_s28  ;;  %p4641_p10 = scmp.ne.s32.totalorder (!%p235_p8), %s6051_s14, 0 }
  0x24   : > { %s6186_s8 = scalar_lea.vmem (!%p235_p8), [#allocation3], %s5195_s30 }
  0x26   : > { %s7056_s29 = smov (!%p279_p9, %s4638_s29), 511  ;;  %300 = sbr.rel (%p4641_p10) target bundleno = 50 (0x32), region = 55 }
  0x27   : > { %s5193_s4 = sshll.u32 %s7056_s29, 4 }
  0x28   : > { %s6184_s7 = scalar_lea.vmem %s7046_s1, %s5193_s4 }
  0x2b   : > { %v6061_v24 = vmov 0.0  }
  0x2c   : > { %301 = vst [vmem:[#allocation2 + $0x30] sm:$0xff] %v6061_v24  ;;  %302 = vst [vmem:[#allocation2] sm:$0xff] %v6061_v24 }
  0x2d   : > { %303 = vst [vmem:[#allocation2 + $0x58] sm:$0xff] %v6061_v24  ;;  %304 = vst [vmem:[#allocation2 + $0x18] sm:$0xff] %v6061_v24 }
  0x2e   : > { %305 = vst [vmem:[#allocation2 + $0x50] sm:$0xff] %v6061_v24  ;;  %306 = vst [vmem:[#allocation2 + $0x20] sm:$0xff] %v6061_v24 }
  0x2f   : > { %307 = vst [vmem:[#allocation2 + $0x8] sm:$0xff] %v6061_v24  ;;  %308 = vst [vmem:[#allocation2 + $0x38] sm:$0xff] %v6061_v24 }
  0x30   : > { %309 = vst [vmem:[#allocation2 + $0x28] sm:$0xff] %v6061_v24  ;;  %310 = vst [vmem:[#allocation2 + $0x48] sm:$0xff] %v6061_v24 }
  0x31   : > { %311 = vst [vmem:[#allocation2 + $0x10] sm:$0xff] %v6061_v24  ;;  %312 = vst [vmem:[#allocation2 + $0x40] sm:$0xff] %v6061_v24 }
  0x32 PF: > { %v5237_v25 = vld [vmem:[%s6184_s7 + $0xe4] ss:$16 sps:$4 sm:$0xff]   ;;  %v5241_v27 = vld [vmem:[%s6184_s7 + $0xe0] ss:$16 sps:$4 sm:$0xff]   ;;  %v326_v11 = vld [vmem:[%s6186_s8 + $0x8] sm:$0xff]  ;;  %p5186_p11 = scmp.ne.s32.totalorder %s6051_s14, 1 }
  0x33   : > { %v5239_v26 = vld [vmem:[%s6184_s7 + $0x2e4] ss:$16 sps:$4 sm:$0xff]   ;;  %3557 = vmatprep.subr.bf16.mxu0 %v5237_v25  ;;  %v5242_v28 = vld [vmem:[%s6184_s7 + $0x2e0] ss:$16 sps:$4 sm:$0xff]   ;;  %v334_v12 = vld [vmem:[%s6186_s8 + $0x48] sm:$0xff] }
  0x34   : > { %3608 = vmatprep.subr.bf16.mxu1 %v5239_v26  ;;  %v5243_v29 = vld [vmem:[%s6184_s7 + $0xc4] ss:$16 sps:$4 sm:$0xff]   ;;  %3558 = vmatpush1.bf16.msra.mxu0 %v5241_v27  ;;  %v5247_v31 = vld [vmem:[%s6184_s7 + $0xc0] ss:$16 sps:$4 sm:$0xff]   ;;  %v6245_v16 = vcombine.high %v326_v11, %v334_v12 }
  0x35   : > { %3609 = vmatpush1.bf16.msra.mxu1 %v5242_v28  ;;  %v5245_v30 = vld [vmem:[%s6184_s7 + $0x2c4] ss:$16 sps:$4 sm:$0xff]   ;;  %3559 = vmatprep.subr.bf16.mxu0 %v5243_v29  ;;  %v5248_v32 = vld [vmem:[%s6184_s7 + $0x2c0] ss:$16 sps:$4 sm:$0xff]  }
  0x36   : > { %3610 = vmatprep.subr.bf16.mxu1 %v5245_v30  ;;  %v5249_v33 = vld [vmem:[%s6184_s7 + $0xa4] ss:$16 sps:$4 sm:$0xff]   ;;  %v5253_v35 = vld [vmem:[%s6184_s7 + $0xa0] ss:$16 sps:$4 sm:$0xff]   ;;  %3640 = vmatprep.mubr.bf16.mxu1 %v6245_v16 }
  0x37   : > { %v5251_v34 = vld [vmem:[%s6184_s7 + $0x2a4] ss:$16 sps:$4 sm:$0xff]   ;;  %v5254_v36 = vld [vmem:[%s6184_s7 + $0x2a0] ss:$16 sps:$4 sm:$0xff]  }
  0x38   : > { %3560 = vmatpush1.bf16.msra.mxu0 %v5247_v31  ;;  %v5255_v37 = vld [vmem:[%s6184_s7 + $0x84] ss:$16 sps:$4 sm:$0xff]   ;;  %v5259_v39 = vld [vmem:[%s6184_s7 + $0x80] ss:$16 sps:$4 sm:$0xff]  }
  0x39   : > { %3611 = vmatpush1.bf16.msra.mxu1 %v5248_v32  ;;  %3561 = vmatprep.subr.bf16.mxu0 %v5249_v33  ;;  %v5257_v38 = vld [vmem:[%s6184_s7 + $0x284] ss:$16 sps:$4 sm:$0xff]   ;;  %v5260_v40 = vld [vmem:[%s6184_s7 + $0x280] ss:$16 sps:$4 sm:$0xff]  }
  0x3a   : > { %3612 = vmatprep.subr.bf16.mxu1 %v5251_v34  ;;  %v5261_v41 = vld [vmem:[%s6184_s7 + $0x64] ss:$16 sps:$4 sm:$0xff]   ;;  %v5265_v43 = vld [vmem:[%s6184_s7 + $0x60] ss:$16 sps:$4 sm:$0xff]   ;;  %v6267_v34 = vcombine.low %v326_v11, %v334_v12 }
  0x3b   : > { %v5263_v42 = vld [vmem:[%s6184_s7 + $0x264] ss:$16 sps:$4 sm:$0xff]   ;;  %v5266_v44 = vld [vmem:[%s6184_s7 + $0x260] ss:$16 sps:$4 sm:$0xff]  }
  0x3c   : > { %3562 = vmatpush1.bf16.msra.mxu0 %v5253_v35  ;;  %v5267_v45 = vld [vmem:[%s6184_s7 + $0x44] ss:$16 sps:$4 sm:$0xff]   ;;  %v5271_v47 = vld [vmem:[%s6184_s7 + $0x40] ss:$16 sps:$4 sm:$0xff]  }
  0x3d   : > { %3613 = vmatpush1.bf16.msra.mxu1 %v5254_v36  ;;  %3563 = vmatprep.subr.bf16.mxu0 %v5255_v37  ;;  %v5269_v46 = vld [vmem:[%s6184_s7 + $0x244] ss:$16 sps:$4 sm:$0xff]   ;;  %v5272_v48 = vld [vmem:[%s6184_s7 + $0x240] ss:$16 sps:$4 sm:$0xff]  }
  0x3e   : > { %3614 = vmatprep.subr.bf16.mxu1 %v5257_v38  ;;  %v5273_v49 = vld [vmem:[%s6184_s7 + $0x24] ss:$16 sps:$4 sm:$0xff]   ;;  %v5277_v51 = vld [vmem:[%s6184_s7 + $0x20] ss:$16 sps:$4 sm:$0xff]  }
  0x3f   : > { %v5275_v50 = vld [vmem:[%s6184_s7 + $0x224] ss:$16 sps:$4 sm:$0xff]   ;;  %v5278_v52 = vld [vmem:[%s6184_s7 + $0x220] ss:$16 sps:$4 sm:$0xff]  }
  0x40   : > { %3564 = vmatpush1.bf16.msra.mxu0 %v5259_v39  ;;  %v5279_v53 = vld [vmem:[%s6184_s7 + $0x4] ss:$16 sps:$4 sm:$0xff]   ;;  %v5283_v55 = vld [vmem:[%s6184_s7] ss:$16 sps:$4 sm:$0xff]  }
  0x41   : > { %3615 = vmatpush1.bf16.msra.mxu1 %v5260_v40  ;;  %3565 = vmatprep.subr.bf16.mxu0 %v5261_v41  ;;  %v5281_v54 = vld [vmem:[%s6184_s7 + $0x204] ss:$16 sps:$4 sm:$0xff]   ;;  %v5284_v56 = vld [vmem:[%s6184_s7 + $0x200] ss:$16 sps:$4 sm:$0xff]  }
  0x42   : > { %3616 = vmatprep.subr.bf16.mxu1 %v5263_v42  ;;  %v5285_v57 = vld [vmem:[%s6184_s7 + $0x1e4] ss:$16 sps:$4 sm:$0xff]   ;;  %v5289_v59 = vld [vmem:[%s6184_s7 + $0x1e0] ss:$16 sps:$4 sm:$0xff]  }
  0x43   : > { %v5287_v58 = vld [vmem:[%s6184_s7 + $0x3e4] ss:$16 sps:$4 sm:$0xff]   ;;  %v5290_v60 = vld [vmem:[%s6184_s7 + $0x3e0] ss:$16 sps:$4 sm:$0xff]  }
  0x44   : > { %3566 = vmatpush1.bf16.msra.mxu0 %v5265_v43  ;;  %v5291_v61 = vld [vmem:[%s6184_s7 + $0x1c4] ss:$16 sps:$4 sm:$0xff]   ;;  %v5295_v63 = vld [vmem:[%s6184_s7 + $0x1c0] ss:$16 sps:$4 sm:$0xff]  }
  0x45   : > { %3617 = vmatpush1.bf16.msra.mxu1 %v5266_v44  ;;  %3567 = vmatprep.subr.bf16.mxu0 %v5267_v45  ;;  %v5293_v62 = vld [vmem:[%s6184_s7 + $0x3c4] ss:$16 sps:$4 sm:$0xff]   ;;  %v5296_v0 = vld [vmem:[%s6184_s7 + $0x3c0] ss:$16 sps:$4 sm:$0xff]  }
  0x46   : > { %3618 = vmatprep.subr.bf16.mxu1 %v5269_v46  ;;  %v5297_v1 = vld [vmem:[%s6184_s7 + $0x1a4] ss:$16 sps:$4 sm:$0xff]   ;;  %v5301_v3 = vld [vmem:[%s6184_s7 + $0x1a0] ss:$16 sps:$4 sm:$0xff]  }
  0x47   : > { %v5299_v2 = vld [vmem:[%s6184_s7 + $0x3a4] ss:$16 sps:$4 sm:$0xff]   ;;  %v5302_v4 = vld [vmem:[%s6184_s7 + $0x3a0] ss:$16 sps:$4 sm:$0xff]  }
  0x48   : > { %3568 = vmatpush1.bf16.msra.mxu0 %v5271_v47  ;;  %v5303_v5 = vld [vmem:[%s6184_s7 + $0x184] ss:$16 sps:$4 sm:$0xff]   ;;  %v5307_v7 = vld [vmem:[%s6184_s7 + $0x180] ss:$16 sps:$4 sm:$0xff]  }
  0x49   : > { %3619 = vmatpush1.bf16.msra.mxu1 %v5272_v48  ;;  %3569 = vmatprep.subr.bf16.mxu0 %v5273_v49  ;;  %v5305_v6 = vld [vmem:[%s6184_s7 + $0x384] ss:$16 sps:$4 sm:$0xff]   ;;  %v5308_v8 = vld [vmem:[%s6184_s7 + $0x380] ss:$16 sps:$4 sm:$0xff]  }
  0x4a   : > { %3620 = vmatprep.subr.bf16.mxu1 %v5275_v50  ;;  %v325_v9 = vld [vmem:[%s6186_s8] sm:$0xff] }
  0x4b   : > { %v333_v10 = vld [vmem:[%s6186_s8 + $0x40] sm:$0xff] }
  0x4c   : > { %3570 = vmatpush1.bf16.msra.mxu0 %v5277_v51  ;;  %v5309_v13 = vld [vmem:[%s6184_s7 + $0x164] ss:$16 sps:$4 sm:$0xff]   ;;  %v6242_v14 = vcombine.high %v325_v9, %v333_v10  ;;  %v5313_v17 = vld [vmem:[%s6184_s7 + $0x160] ss:$16 sps:$4 sm:$0xff]   ;;  %v6265_v33 = vcombine.low %v325_v9, %v333_v10 }
  0x4d   : > { %3621 = vmatpush1.bf16.msra.mxu1 %v5278_v52  ;;  %3571 = vmatprep.subr.bf16.mxu0 %v5279_v53  ;;  %v5311_v15 = vld [vmem:[%s6184_s7 + $0x364] ss:$16 sps:$4 sm:$0xff]   ;;  %v5314_v18 = vld [vmem:[%s6184_s7 + $0x360] ss:$16 sps:$4 sm:$0xff]  }
  0x4e   : > { %3622 = vmatprep.subr.bf16.mxu1 %v5281_v54  ;;  %3589 = vmatprep.mubr.bf16.mxu0 %v6242_v14  ;;  %v5315_v19 = vld [vmem:[%s6184_s7 + $0x144] ss:$16 sps:$4 sm:$0xff]   ;;  %v5319_v21 = vld [vmem:[%s6184_s7 + $0x140] ss:$16 sps:$4 sm:$0xff]   ;;  %v342_v54 = vld [vmem:[%s6186_s8 + $0x88] sm:$0xff] }
  0x4f   : > { %v5317_v20 = vld [vmem:[%s6184_s7 + $0x344] ss:$16 sps:$4 sm:$0xff]   ;;  %v5320_v22 = vld [vmem:[%s6184_s7 + $0x340] ss:$16 sps:$4 sm:$0xff]  }
  0x50   : > { %3572 = vmatpush1.bf16.msra.mxu0 %v5283_v55  ;;  %v5321_v23 = vld [vmem:[%s6184_s7 + $0x124] ss:$16 sps:$4 sm:$0xff]   ;;  %v5325_v25 = vld [vmem:[%s6184_s7 + $0x120] ss:$16 sps:$4 sm:$0xff]  }
  0x51   : > { %3623 = vmatpush1.bf16.msra.mxu1 %v5284_v56  ;;  %3573 = vmatprep.subr.bf16.mxu0 %v5285_v57  ;;  %v5323_v24 = vld [vmem:[%s6184_s7 + $0x324] ss:$16 sps:$4 sm:$0xff]   ;;  %v5326_v26 = vld [vmem:[%s6184_s7 + $0x320] ss:$16 sps:$4 sm:$0xff]   ;;  %v6295_v57 = vcombine.high %v342_v54, %v342_v54 }
  0x52   : > { %3624 = vmatprep.subr.bf16.mxu1 %v5287_v58  ;;  %v5327_v27 = vld [vmem:[%s6184_s7 + $0x104] ss:$16 sps:$4 sm:$0xff]   ;;  %v5331_v29 = vld [vmem:[%s6184_s7 + $0x100] ss:$16 sps:$4 sm:$0xff]   ;;  %v6297_v58 = vcombine.low %v342_v54, %v342_v54 }
  0x53   : > { %v5329_v28 = vld [vmem:[%s6184_s7 + $0x304] ss:$16 sps:$4 sm:$0xff]   ;;  %v5332_v30 = vld [vmem:[%s6184_s7 + $0x300] ss:$16 sps:$4 sm:$0xff]  }
  0x54   : > { %3574 = vmatpush2.bf16.msra.mxu0 %v5289_v59  ;;  %v5335_v31 = vld [vmem:[%s6184_s7 + $0x4e4] ss:$16 sps:$4 sm:$0xff]   ;;  %v5333_v35 = vld [vmem:[%s6184_s7 + $0x4e0] ss:$16 sps:$4 sm:$0xff]  }
  0x55   : > { %3625 = vmatpush2.bf16.msra.mxu1 %v5290_v60  ;;  %3575 = vmatprep.subr.bf16.mxu0 %v5291_v61  ;;  %v5338_v32 = vld [vmem:[%s6184_s7 + $0x6e4] ss:$16 sps:$4 sm:$0xff]   ;;  %v5336_v36 = vld [vmem:[%s6184_s7 + $0x6e0] ss:$16 sps:$4 sm:$0xff]  }
  0x56   : > { %3626 = vmatprep.subr.bf16.mxu1 %v5293_v62  ;;  %v5341_v37 = vld [vmem:[%s6184_s7 + $0x4c4] ss:$16 sps:$4 sm:$0xff]   ;;  %v5339_v39 = vld [vmem:[%s6184_s7 + $0x4c0] ss:$16 sps:$4 sm:$0xff]  }
  0x57   : > { %v5344_v38 = vld [vmem:[%s6184_s7 + $0x6c4] ss:$16 sps:$4 sm:$0xff]   ;;  %v5342_v40 = vld [vmem:[%s6184_s7 + $0x6c0] ss:$16 sps:$4 sm:$0xff]  }
  0x58   : > { %3576 = vmatpush2.bf16.msra.mxu0 %v5295_v63  ;;  %v5347_v41 = vld [vmem:[%s6184_s7 + $0x4a4] ss:$16 sps:$4 sm:$0xff]   ;;  %v5345_v43 = vld [vmem:[%s6184_s7 + $0x4a0] ss:$16 sps:$4 sm:$0xff]  }
  0x59   : > { %3627 = vmatpush2.bf16.msra.mxu1 %v5296_v0  ;;  %3577 = vmatprep.subr.bf16.mxu0 %v5297_v1  ;;  %v5350_v42 = vld [vmem:[%s6184_s7 + $0x6a4] ss:$16 sps:$4 sm:$0xff]   ;;  %v5348_v44 = vld [vmem:[%s6184_s7 + $0x6a0] ss:$16 sps:$4 sm:$0xff]  }
  0x5a   : > { %3628 = vmatprep.subr.bf16.mxu1 %v5299_v2  ;;  %v5353_v45 = vld [vmem:[%s6184_s7 + $0x484] ss:$16 sps:$4 sm:$0xff]   ;;  %v5351_v47 = vld [vmem:[%s6184_s7 + $0x480] ss:$16 sps:$4 sm:$0xff]  }
  0x5b   : > { %v5356_v46 = vld [vmem:[%s6184_s7 + $0x684] ss:$16 sps:$4 sm:$0xff]   ;;  %v5354_v48 = vld [vmem:[%s6184_s7 + $0x680] ss:$16 sps:$4 sm:$0xff]  }
  0x5c   : > { %3578 = vmatpush2.bf16.msra.mxu0 %v5301_v3  ;;  %v5359_v49 = vld [vmem:[%s6184_s7 + $0x464] ss:$16 sps:$4 sm:$0xff]   ;;  %v5357_v55 = vld [vmem:[%s6184_s7 + $0x460] ss:$16 sps:$4 sm:$0xff]  }
  0x5d   : > { %3629 = vmatpush2.bf16.msra.mxu1 %v5302_v4  ;;  %3579 = vmatprep.subr.bf16.mxu0 %v5303_v5  ;;  %v5362_v50 = vld [vmem:[%s6184_s7 + $0x664] ss:$16 sps:$4 sm:$0xff]   ;;  %v5360_v56 = vld [vmem:[%s6184_s7 + $0x660] ss:$16 sps:$4 sm:$0xff]  }
  0x5e   : > { %3630 = vmatprep.subr.bf16.mxu1 %v5305_v6  ;;  %v341_v51 = vld [vmem:[%s6186_s8 + $0x80] sm:$0xff]  ;;  %v6312_v3 = vld [vmem:[%s6186_s8 + $0x10] sm:$0xff]  ;;  %v6322_v6 = vld [vmem:[%s6186_s8 + $0x18] sm:$0xff] }
  0x5f   : > { %v6288_v52 = vcombine.high %v341_v51, %v341_v51  ;;  %v6290_v53 = vcombine.low %v341_v51, %v341_v51  ;;  %v5365_v59 = vld [vmem:[%s6184_s7 + $0x444] ss:$16 sps:$4 sm:$0xff]   ;;  %v5363_v61 = vld [vmem:[%s6184_s7 + $0x440] ss:$16 sps:$4 sm:$0xff]  }
  0x60   : > { %3580 = vmatpush2.bf16.msra.mxu0 %v5307_v7  ;;  %v5368_v60 = vld [vmem:[%s6184_s7 + $0x644] ss:$16 sps:$4 sm:$0xff]   ;;  %v5366_v62 = vld [vmem:[%s6184_s7 + $0x640] ss:$16 sps:$4 sm:$0xff]   ;;  %v6325_v7 = vld [vmem:[%s6186_s8 + $0x58] sm:$0xff] }
  0x61   : > { %3631 = vmatpush2.bf16.msra.mxu1 %v5308_v8  ;;  %3581 = vmatprep.subr.bf16.mxu0 %v5309_v13  ;;  %v5371_v63 = vld [vmem:[%s6184_s7 + $0x424] ss:$16 sps:$4 sm:$0xff]   ;;  %v5369_v1 = vld [vmem:[%s6184_s7 + $0x420] ss:$16 sps:$4 sm:$0xff]   ;;  %v6331_v10 = vcombine.high %v6322_v6, %v6325_v7 }
  0x62   : > { %3632 = vmatprep.subr.bf16.mxu1 %v5311_v15  ;;  %v5374_v0 = vld [vmem:[%s6184_s7 + $0x624] ss:$16 sps:$4 sm:$0xff]   ;;  %v5372_v2 = vld [vmem:[%s6184_s7 + $0x620] ss:$16 sps:$4 sm:$0xff]  }
  0x63   : > { %v6315_v4 = vld [vmem:[%s6186_s8 + $0x50] sm:$0xff] }
  0x64   : > { %3582 = vmatpush2.bf16.msra.mxu0 %v5313_v17  ;;  %v6319_v5 = vcombine.high %v6312_v3, %v6315_v4  ;;  %v5377_v8 = vld [vmem:[%s6184_s7 + $0x404] ss:$16 sps:$4 sm:$0xff]   ;;  %v5375_v11 = vld [vmem:[%s6184_s7 + $0x400] ss:$16 sps:$4 sm:$0xff]  }
  0x65   : > { %3633 = vmatpush2.bf16.msra.mxu1 %v5314_v18  ;;  %3583 = vmatprep.subr.bf16.mxu0 %v5315_v19  ;;  %v5380_v9 = vld [vmem:[%s6184_s7 + $0x604] ss:$16 sps:$4 sm:$0xff]   ;;  %v5378_v12 = vld [vmem:[%s6184_s7 + $0x600] ss:$16 sps:$4 sm:$0xff]  }
  0x66   : > { %3634 = vmatprep.subr.bf16.mxu1 %v5317_v20  ;;  %v5383_v13 = vld [vmem:[%s6184_s7 + $0x5e4] ss:$16 sps:$4 sm:$0xff]   ;;  %v5381_v17 = vld [vmem:[%s6184_s7 + $0x5e0] ss:$16 sps:$4 sm:$0xff]  }
  0x67   : > { %v5386_v15 = vld [vmem:[%s6184_s7 + $0x7e4] ss:$16 sps:$4 sm:$0xff]   ;;  %v5384_v18 = vld [vmem:[%s6184_s7 + $0x7e0] ss:$16 sps:$4 sm:$0xff]  }
  0x68   : > { %3584 = vmatpush2.bf16.msra.mxu0 %v5319_v21  ;;  %v5389_v19 = vld [vmem:[%s6184_s7 + $0x5c4] ss:$16 sps:$4 sm:$0xff]   ;;  %v5387_v21 = vld [vmem:[%s6184_s7 + $0x5c0] ss:$16 sps:$4 sm:$0xff]  }
  0x69   : > { %3635 = vmatpush2.bf16.msra.mxu1 %v5320_v22  ;;  %3585 = vmatprep.subr.bf16.mxu0 %v5321_v23  ;;  %v5392_v20 = vld [vmem:[%s6184_s7 + $0x7c4] ss:$16 sps:$4 sm:$0xff]   ;;  %v5390_v22 = vld [vmem:[%s6184_s7 + $0x7c0] ss:$16 sps:$4 sm:$0xff]  }
  0x6a   : > { %3636 = vmatprep.subr.bf16.mxu1 %v5323_v24  ;;  %v5395_v23 = vld [vmem:[%s6184_s7 + $0x5a4] ss:$16 sps:$4 sm:$0xff]   ;;  %v5433_v51 = vld [vmem:[%s6184_s7 + $0x8e0] ss:$16 sps:$4 sm:$0xff]  }
  0x6b   : > { %v5398_v24 = vld [vmem:[%s6184_s7 + $0x7a4] ss:$16 sps:$4 sm:$0xff]   ;;  %v5436_v54 = vld [vmem:[%s6184_s7 + $0xae0] ss:$16 sps:$4 sm:$0xff]  }
  0x6c   : > { %3586 = vmatpush2.bf16.msra.mxu0 %v5325_v25  ;;  %v5393_v25 = vld [vmem:[%s6184_s7 + $0x5a0] ss:$16 sps:$4 sm:$0xff]  }
  0x6d   : > { %3637 = vmatpush2.bf16.msra.mxu1 %v5326_v26  ;;  %3587 = vmatprep.subr.bf16.mxu0 %v5327_v27  ;;  %v5396_v26 = vld [vmem:[%s6184_s7 + $0x7a0] ss:$16 sps:$4 sm:$0xff]   ;;  %v5401_v27 = vld [vmem:[%s6184_s7 + $0x584] ss:$16 sps:$4 sm:$0xff]  }
  0x6e   : > { %3638 = vmatprep.subr.bf16.mxu1 %v5329_v28  ;;  %v5404_v28 = vld [vmem:[%s6184_s7 + $0x784] ss:$16 sps:$4 sm:$0xff]  }
  0x70   : > { %3588 = vmatpush2.bf16.msra.mxu0 %v5331_v29  ;;  %v5399_v29 = vld [vmem:[%s6184_s7 + $0x580] ss:$16 sps:$4 sm:$0xff]  }
  0x71   : > { %3639 = vmatpush2.bf16.msra.mxu1 %v5332_v30  ;;  %3659 = vmatprep.subr.bf16.mxu0 %v5335_v31  ;;  %v5402_v30 = vld [vmem:[%s6184_s7 + $0x780] ss:$16 sps:$4 sm:$0xff]   ;;  %v5407_v31 = vld [vmem:[%s6184_s7 + $0x564] ss:$16 sps:$4 sm:$0xff]  }
  0x72   : > { %3710 = vmatprep.subr.bf16.mxu1 %v5338_v32  ;;  %v5410_v32 = vld [vmem:[%s6184_s7 + $0x764] ss:$16 sps:$4 sm:$0xff]  }
  0x73   : > { %3590 = vmatmul.mubr.bf16.vlgmr.msra.gmra.mxu0 %v6265_v33 }
  0x74   : > { %3641 = vmatmul.mubr.bf16.vlgmr.msra.gmra.mxu1 %v6267_v34  ;;  %3660 = vmatpush1.bf16.msra.mxu0 %v5333_v35  ;;  %v5405_v35 = vld [vmem:[%s6184_s7 + $0x560] ss:$16 sps:$4 sm:$0xff]  }
  0x75   : > { %3711 = vmatpush1.bf16.msra.mxu1 %v5336_v36  ;;  %3661 = vmatprep.subr.bf16.mxu0 %v5341_v37  ;;  %v5408_v36 = vld [vmem:[%s6184_s7 + $0x760] ss:$16 sps:$4 sm:$0xff]   ;;  %v5416_v37 = vld [vmem:[%s6184_s7 + $0x544] ss:$16 sps:$4 sm:$0xff]  }
  0x76   : > { %3712 = vmatprep.subr.bf16.mxu1 %v5344_v38  ;;  %3599 = vmatprep.mubr.bf16.mxu0 %v6288_v52  ;;  %v5419_v38 = vld [vmem:[%s6184_s7 + $0x744] ss:$16 sps:$4 sm:$0xff]  }
  0x77   : > { %3650 = vmatprep.mubr.bf16.mxu1 %v6295_v57 }
  0x78   : > { %3662 = vmatpush1.bf16.msra.mxu0 %v5339_v39  ;;  %v5414_v39 = vld [vmem:[%s6184_s7 + $0x540] ss:$16 sps:$4 sm:$0xff]  }
  0x79   : > { %3713 = vmatpush1.bf16.msra.mxu1 %v5342_v40  ;;  %3663 = vmatprep.subr.bf16.mxu0 %v5347_v41  ;;  %v5417_v40 = vld [vmem:[%s6184_s7 + $0x740] ss:$16 sps:$4 sm:$0xff]   ;;  %v5423_v41 = vld [vmem:[%s6184_s7 + $0x524] ss:$16 sps:$4 sm:$0xff]  }
  0x7a   : > { %3714 = vmatprep.subr.bf16.mxu1 %v5350_v42  ;;  %v5426_v42 = vld [vmem:[%s6184_s7 + $0x724] ss:$16 sps:$4 sm:$0xff]  }
  0x7b   : > { %3600 = vmatmul.mubr.bf16.gmra.mxu0 %v6290_v53 }
  0x7c   : > { %3664 = vmatpush1.bf16.msra.mxu0 %v5345_v43  ;;  %3651 = vmatmul.mubr.bf16.gmra.mxu1 %v6297_v58  ;;  %v5421_v43 = vld [vmem:[%s6184_s7 + $0x520] ss:$16 sps:$4 sm:$0xff]  }
  0x7d   : > { %3715 = vmatpush1.bf16.msra.mxu1 %v5348_v44  ;;  %3665 = vmatprep.subr.bf16.mxu0 %v5353_v45  ;;  %v5424_v44 = vld [vmem:[%s6184_s7 + $0x720] ss:$16 sps:$4 sm:$0xff]   ;;  %v5429_v45 = vld [vmem:[%s6184_s7 + $0x504] ss:$16 sps:$4 sm:$0xff]  }
  0x7e   : > { %3716 = vmatprep.subr.bf16.mxu1 %v5356_v46  ;;  %3691 = vmatprep.mubr.bf16.mxu0 %v6319_v5  ;;  %v5432_v46 = vld [vmem:[%s6184_s7 + $0x704] ss:$16 sps:$4 sm:$0xff]  }
  0x7f   : > { %3742 = vmatprep.mubr.bf16.mxu1 %v6331_v10 }
  0x80   : > { %3666 = vmatpush1.bf16.msra.mxu0 %v5351_v47  ;;  %v5427_v47 = vld [vmem:[%s6184_s7 + $0x500] ss:$16 sps:$4 sm:$0xff]  }
  0x81   : > { %3717 = vmatpush1.bf16.msra.mxu1 %v5354_v48  ;;  %3667 = vmatprep.subr.bf16.mxu0 %v5359_v49  ;;  %v5430_v48 = vld [vmem:[%s6184_s7 + $0x700] ss:$16 sps:$4 sm:$0xff]   ;;  %v5435_v49 = vld [vmem:[%s6184_s7 + $0x8e4] ss:$16 sps:$4 sm:$0xff]  }
  0x82   : > { %3718 = vmatprep.subr.bf16.mxu1 %v5362_v50  ;;  %v5438_v50 = vld [vmem:[%s6184_s7 + $0xae4] ss:$16 sps:$4 sm:$0xff]  }
  0x84   : > { %3668 = vmatpush1.bf16.msra.mxu0 %v5357_v55  ;;  %v6375_v55 = vcombine.low %v6312_v3, %v6315_v4  ;;  %v5449_v3 = vld [vmem:[%s6184_s7 + $0x8a4] ss:$16 sps:$4 sm:$0xff]  }
  0x85   : > { %3719 = vmatpush1.bf16.msra.mxu1 %v5360_v56  ;;  %3669 = vmatprep.subr.bf16.mxu0 %v5365_v59  ;;  %v6379_v56 = vcombine.low %v6322_v6, %v6325_v7  ;;  %v343_v59 = vld [vmem:[%s6186_s8 + $0x90] sm:$0xff] }
  0x86   : > { %3720 = vmatprep.subr.bf16.mxu1 %v5368_v60  ;;  %v344_v60 = vld [vmem:[%s6186_s8 + $0x98] sm:$0xff]  ;;  %v5452_v4 = vld [vmem:[%s6184_s7 + $0xaa4] ss:$16 sps:$4 sm:$0xff]   ;;  %v5447_v6 = vld [vmem:[%s6184_s7 + $0x8a0] ss:$16 sps:$4 sm:$0xff]  }
  0x87   : > { %v5450_v7 = vld [vmem:[%s6184_s7 + $0xaa0] ss:$16 sps:$4 sm:$0xff]  }
  0x88   : > { %3670 = vmatpush1.bf16.msra.mxu0 %v5363_v61  ;;  %v5441_v61 = vld [vmem:[%s6184_s7 + $0x8c4] ss:$16 sps:$4 sm:$0xff]  }
  0x89   : > { %3721 = vmatpush1.bf16.msra.mxu1 %v5366_v62  ;;  %3671 = vmatprep.subr.bf16.mxu0 %v5371_v63  ;;  %v5444_v62 = vld [vmem:[%s6184_s7 + $0xac4] ss:$16 sps:$4 sm:$0xff]   ;;  %v6385_v63 = vcombine.high %v343_v59, %v343_v59 }
  0x8a   : > { %3722 = vmatprep.subr.bf16.mxu1 %v5374_v0  ;;  %v6387_v0 = vcombine.high %v344_v60, %v344_v60 }
  0x8c   : > { %3672 = vmatpush1.bf16.msra.mxu0 %v5369_v1  ;;  %v5439_v1 = vld [vmem:[%s6184_s7 + $0x8c0] ss:$16 sps:$4 sm:$0xff]  }
  0x8d   : > { %3723 = vmatpush1.bf16.msra.mxu1 %v5372_v2  ;;  %3673 = vmatprep.subr.bf16.mxu0 %v5377_v8  ;;  %v5442_v2 = vld [vmem:[%s6184_s7 + $0xac0] ss:$16 sps:$4 sm:$0xff]  }
  0x8e   : > { %3724 = vmatprep.subr.bf16.mxu1 %v5380_v9  ;;  %v6400_v8 = vld [vmem:[%s6186_s8 + $0x20] sm:$0xff] }
  0x8f   : > { %v6403_v9 = vld [vmem:[%s6186_s8 + $0x60] sm:$0xff] }
  0x90   : > { %3674 = vmatpush1.bf16.msra.mxu0 %v5375_v11  ;;  %v6405_v11 = vcombine.low %v343_v59, %v343_v59  ;;  %v5505_v59 = vld [vmem:[%s6184_s7 + $0x984] ss:$16 sps:$4 sm:$0xff]  }
  0x91   : > { %3725 = vmatpush1.bf16.msra.mxu1 %v5378_v12  ;;  %3675 = vmatprep.subr.bf16.mxu0 %v5383_v13  ;;  %v6407_v12 = vcombine.low %v344_v60, %v344_v60  ;;  %v6410_v13 = vld [vmem:[%s6186_s8 + $0x28] sm:$0xff]  ;;  %v5508_v60 = vld [vmem:[%s6184_s7 + $0xb84] ss:$16 sps:$4 sm:$0xff]  }
  0x92   : > { %3726 = vmatprep.subr.bf16.mxu1 %v5386_v15  ;;  %v6413_v15 = vld [vmem:[%s6186_s8 + $0x68] sm:$0xff] }
  0x94   : > { %3676 = vmatpush2.bf16.msra.mxu0 %v5381_v17  ;;  %v5457_v17 = vld [vmem:[%s6184_s7 + $0x884] ss:$16 sps:$4 sm:$0xff]  }
  0x95   : > { %3727 = vmatpush2.bf16.msra.mxu1 %v5384_v18  ;;  %3677 = vmatprep.subr.bf16.mxu0 %v5389_v19  ;;  %v5460_v18 = vld [vmem:[%s6184_s7 + $0xa84] ss:$16 sps:$4 sm:$0xff]   ;;  %v6419_v19 = vcombine.high %v6400_v8, %v6403_v9 }
  0x96   : > { %3728 = vmatprep.subr.bf16.mxu1 %v5392_v20  ;;  %v6423_v20 = vcombine.high %v6410_v13, %v6413_v15 }
  0x98   : > { %3678 = vmatpush2.bf16.msra.mxu0 %v5387_v21  ;;  %v5455_v21 = vld [vmem:[%s6184_s7 + $0x880] ss:$16 sps:$4 sm:$0xff]  }
  0x99   : > { %3729 = vmatpush2.bf16.msra.mxu1 %v5390_v22  ;;  %3679 = vmatprep.subr.bf16.mxu0 %v5395_v23  ;;  %v5458_v22 = vld [vmem:[%s6184_s7 + $0xa80] ss:$16 sps:$4 sm:$0xff]   ;;  %v5463_v23 = vld [vmem:[%s6184_s7 + $0x864] ss:$16 sps:$4 sm:$0xff]  }
  0x9a   : > { %3730 = vmatprep.subr.bf16.mxu1 %v5398_v24  ;;  %v5466_v24 = vld [vmem:[%s6184_s7 + $0xa64] ss:$16 sps:$4 sm:$0xff]  }
  0x9c   : > { %3680 = vmatpush2.bf16.msra.mxu0 %v5393_v25  ;;  %v5461_v25 = vld [vmem:[%s6184_s7 + $0x860] ss:$16 sps:$4 sm:$0xff]  }
  0x9d   : > { %3731 = vmatpush2.bf16.msra.mxu1 %v5396_v26  ;;  %3681 = vmatprep.subr.bf16.mxu0 %v5401_v27  ;;  %v5464_v26 = vld [vmem:[%s6184_s7 + $0xa60] ss:$16 sps:$4 sm:$0xff]   ;;  %v5469_v27 = vld [vmem:[%s6184_s7 + $0x844] ss:$16 sps:$4 sm:$0xff]  }
  0x9e   : > { %3732 = vmatprep.subr.bf16.mxu1 %v5404_v28  ;;  %v5472_v28 = vld [vmem:[%s6184_s7 + $0xa44] ss:$16 sps:$4 sm:$0xff]  }
  0xa0   : > { %3682 = vmatpush2.bf16.msra.mxu0 %v5399_v29  ;;  %v5467_v29 = vld [vmem:[%s6184_s7 + $0x840] ss:$16 sps:$4 sm:$0xff]  }
  0xa1   : > { %3733 = vmatpush2.bf16.msra.mxu1 %v5402_v30  ;;  %3683 = vmatprep.subr.bf16.mxu0 %v5407_v31  ;;  %v5470_v30 = vld [vmem:[%s6184_s7 + $0xa40] ss:$16 sps:$4 sm:$0xff]   ;;  %v5475_v31 = vld [vmem:[%s6184_s7 + $0x824] ss:$16 sps:$4 sm:$0xff]  }
  0xa2   : > { %3734 = vmatprep.subr.bf16.mxu1 %v5410_v32  ;;  %v5478_v32 = vld [vmem:[%s6184_s7 + $0xa24] ss:$16 sps:$4 sm:$0xff]  }
  0xa4   : > { %3684 = vmatpush2.bf16.msra.mxu0 %v5405_v35  ;;  %v5473_v35 = vld [vmem:[%s6184_s7 + $0x820] ss:$16 sps:$4 sm:$0xff]  }
  0xa5   : > { %3735 = vmatpush2.bf16.msra.mxu1 %v5408_v36  ;;  %3685 = vmatprep.subr.bf16.mxu0 %v5416_v37  ;;  %v5476_v36 = vld [vmem:[%s6184_s7 + $0xa20] ss:$16 sps:$4 sm:$0xff]   ;;  %v5481_v37 = vld [vmem:[%s6184_s7 + $0x804] ss:$16 sps:$4 sm:$0xff]  }
  0xa6   : > { %3736 = vmatprep.subr.bf16.mxu1 %v5419_v38  ;;  %v5484_v38 = vld [vmem:[%s6184_s7 + $0xa04] ss:$16 sps:$4 sm:$0xff]  }
  0xa8   : > { %3686 = vmatpush2.bf16.msra.mxu0 %v5414_v39  ;;  %v5479_v39 = vld [vmem:[%s6184_s7 + $0x800] ss:$16 sps:$4 sm:$0xff]  }
  0xa9   : > { %3737 = vmatpush2.bf16.msra.mxu1 %v5417_v40  ;;  %3687 = vmatprep.subr.bf16.mxu0 %v5423_v41  ;;  %v5482_v40 = vld [vmem:[%s6184_s7 + $0xa00] ss:$16 sps:$4 sm:$0xff]   ;;  %v5487_v41 = vld [vmem:[%s6184_s7 + $0x9e4] ss:$16 sps:$4 sm:$0xff]  }
  0xaa   : > { %3738 = vmatprep.subr.bf16.mxu1 %v5426_v42  ;;  %v5490_v42 = vld [vmem:[%s6184_s7 + $0xbe4] ss:$16 sps:$4 sm:$0xff]  }
  0xac   : > { %3688 = vmatpush2.bf16.msra.mxu0 %v5421_v43  ;;  %v5485_v43 = vld [vmem:[%s6184_s7 + $0x9e0] ss:$16 sps:$4 sm:$0xff]  }
  0xad   : > { %3739 = vmatpush2.bf16.msra.mxu1 %v5424_v44  ;;  %3689 = vmatprep.subr.bf16.mxu0 %v5429_v45  ;;  %v5488_v44 = vld [vmem:[%s6184_s7 + $0xbe0] ss:$16 sps:$4 sm:$0xff]   ;;  %v5493_v45 = vld [vmem:[%s6184_s7 + $0x9c4] ss:$16 sps:$4 sm:$0xff]  }
  0xae   : > { %3740 = vmatprep.subr.bf16.mxu1 %v5432_v46  ;;  %v5496_v46 = vld [vmem:[%s6184_s7 + $0xbc4] ss:$16 sps:$4 sm:$0xff]  }
  0xb0   : > { %3690 = vmatpush2.bf16.msra.mxu0 %v5427_v47  ;;  %v5491_v47 = vld [vmem:[%s6184_s7 + $0x9c0] ss:$16 sps:$4 sm:$0xff]  }
  0xb1   : > { %3741 = vmatpush2.bf16.msra.mxu1 %v5430_v48  ;;  %3761 = vmatprep.subr.bf16.mxu0 %v5435_v49  ;;  %v5494_v48 = vld [vmem:[%s6184_s7 + $0xbc0] ss:$16 sps:$4 sm:$0xff]   ;;  %v5499_v49 = vld [vmem:[%s6184_s7 + $0x9a4] ss:$16 sps:$4 sm:$0xff]  }
  0xb2   : > { %3812 = vmatprep.subr.bf16.mxu1 %v5438_v50  ;;  %v5502_v50 = vld [vmem:[%s6184_s7 + $0xba4] ss:$16 sps:$4 sm:$0xff]  }
  0xb3   : > { %3692 = vmatmul.mubr.bf16.vlgmr.msra.gmra.mxu0 %v6375_v55 }
  0xb4   : > { %3743 = vmatmul.mubr.bf16.vlgmr.msra.gmra.mxu1 %v6379_v56  ;;  %3762 = vmatpush1.bf16.msra.mxu0 %v5433_v51  ;;  %v5497_v51 = vld [vmem:[%s6184_s7 + $0x9a0] ss:$16 sps:$4 sm:$0xff]  }
  0xb5   : > { %3813 = vmatpush1.bf16.msra.mxu1 %v5436_v54  ;;  %3763 = vmatprep.subr.bf16.mxu0 %v5441_v61  ;;  %v5500_v54 = vld [vmem:[%s6184_s7 + $0xba0] ss:$16 sps:$4 sm:$0xff]  }
  0xb6   : > { %3814 = vmatprep.subr.bf16.mxu1 %v5444_v62  ;;  %3701 = vmatprep.mubr.bf16.mxu0 %v6385_v63  ;;  %v5503_v61 = vld [vmem:[%s6184_s7 + $0x980] ss:$16 sps:$4 sm:$0xff]  }
  0xb7   : > { %3752 = vmatprep.mubr.bf16.mxu1 %v6387_v0  ;;  %v5506_v62 = vld [vmem:[%s6184_s7 + $0xb80] ss:$16 sps:$4 sm:$0xff]  }
  0xb8   : > { %3764 = vmatpush1.bf16.msra.mxu0 %v5439_v1  ;;  %v5511_v1 = vld [vmem:[%s6184_s7 + $0x964] ss:$16 sps:$4 sm:$0xff]  }
  0xb9   : > { %3815 = vmatpush1.bf16.msra.mxu1 %v5442_v2  ;;  %3765 = vmatprep.subr.bf16.mxu0 %v5449_v3  ;;  %v5514_v2 = vld [vmem:[%s6184_s7 + $0xb64] ss:$16 sps:$4 sm:$0xff]   ;;  %v5509_v3 = vld [vmem:[%s6184_s7 + $0x960] ss:$16 sps:$4 sm:$0xff]  }
  0xba   : > { %3816 = vmatprep.subr.bf16.mxu1 %v5452_v4  ;;  %v5512_v4 = vld [vmem:[%s6184_s7 + $0xb60] ss:$16 sps:$4 sm:$0xff]  }
  0xbb   : > { %3702 = vmatmul.mubr.bf16.gmra.mxu0 %v6405_v11 }
  0xbc   : > { %3753 = vmatmul.mubr.bf16.gmra.mxu1 %v6407_v12  ;;  %3766 = vmatpush1.bf16.msra.mxu0 %v5447_v6  ;;  %v5517_v6 = vld [vmem:[%s6184_s7 + $0x944] ss:$16 sps:$4 sm:$0xff]  }
  0xbd   : > { %3817 = vmatpush1.bf16.msra.mxu1 %v5450_v7  ;;  %3767 = vmatprep.subr.bf16.mxu0 %v5457_v17  ;;  %v5520_v7 = vld [vmem:[%s6184_s7 + $0xb44] ss:$16 sps:$4 sm:$0xff]   ;;  %v5515_v17 = vld [vmem:[%s6184_s7 + $0x940] ss:$16 sps:$4 sm:$0xff]  }
  0xbe   : > { %3818 = vmatprep.subr.bf16.mxu1 %v5460_v18  ;;  %3793 = vmatprep.mubr.bf16.mxu0 %v6419_v19  ;;  %v5518_v18 = vld [vmem:[%s6184_s7 + $0xb40] ss:$16 sps:$4 sm:$0xff]  }
  0xbf   : > { %3844 = vmatprep.mubr.bf16.mxu1 %v6423_v20 }
  0xc0   : > { %3768 = vmatpush1.bf16.msra.mxu0 %v5455_v21  ;;  %v5523_v21 = vld [vmem:[%s6184_s7 + $0x924] ss:$16 sps:$4 sm:$0xff]  }
  0xc1   : > { %3819 = vmatpush1.bf16.msra.mxu1 %v5458_v22  ;;  %3769 = vmatprep.subr.bf16.mxu0 %v5463_v23  ;;  %v5526_v22 = vld [vmem:[%s6184_s7 + $0xb24] ss:$16 sps:$4 sm:$0xff]   ;;  %v5521_v23 = vld [vmem:[%s6184_s7 + $0x920] ss:$16 sps:$4 sm:$0xff]  }
  0xc2   : > { %3820 = vmatprep.subr.bf16.mxu1 %v5466_v24  ;;  %v5524_v24 = vld [vmem:[%s6184_s7 + $0xb20] ss:$16 sps:$4 sm:$0xff]  }
  0xc4   : > { %3770 = vmatpush1.bf16.msra.mxu0 %v5461_v25  ;;  %v5529_v25 = vld [vmem:[%s6184_s7 + $0x904] ss:$16 sps:$4 sm:$0xff]  }
  0xc5   : > { %3821 = vmatpush1.bf16.msra.mxu1 %v5464_v26  ;;  %3771 = vmatprep.subr.bf16.mxu0 %v5469_v27  ;;  %v5532_v26 = vld [vmem:[%s6184_s7 + $0xb04] ss:$16 sps:$4 sm:$0xff]   ;;  %v5527_v27 = vld [vmem:[%s6184_s7 + $0x900] ss:$16 sps:$4 sm:$0xff]  }
  0xc6   : > { %3822 = vmatprep.subr.bf16.mxu1 %v5472_v28  ;;  %v5530_v28 = vld [vmem:[%s6184_s7 + $0xb00] ss:$16 sps:$4 sm:$0xff]  }
  0xc8   : > { %3772 = vmatpush1.bf16.msra.mxu0 %v5467_v29  ;;  %v5535_v29 = vld [vmem:[%s6184_s7 + $0xce4] ss:$16 sps:$4 sm:$0xff]  }
  0xc9   : > { %3823 = vmatpush1.bf16.msra.mxu1 %v5470_v30  ;;  %3773 = vmatprep.subr.bf16.mxu0 %v5475_v31  ;;  %v5538_v30 = vld [vmem:[%s6184_s7 + $0xee4] ss:$16 sps:$4 sm:$0xff]   ;;  %v5533_v31 = vld [vmem:[%s6184_s7 + $0xce0] ss:$16 sps:$4 sm:$0xff]  }
  0xca   : > { %3824 = vmatprep.subr.bf16.mxu1 %v5478_v32  ;;  %v5536_v32 = vld [vmem:[%s6184_s7 + $0xee0] ss:$16 sps:$4 sm:$0xff]  }
  0xcc   : > { %3774 = vmatpush1.bf16.msra.mxu0 %v5473_v35  ;;  %v6485_v35 = vcombine.low %v6400_v8, %v6403_v9  ;;  %v5539_v9 = vld [vmem:[%s6184_s7 + $0xcc0] ss:$16 sps:$4 sm:$0xff]  }
  0xcd   : > { %3825 = vmatpush1.bf16.msra.mxu1 %v5476_v36  ;;  %3775 = vmatprep.subr.bf16.mxu0 %v5481_v37  ;;  %v6489_v36 = vcombine.low %v6410_v13, %v6413_v15  ;;  %v345_v37 = vld [vmem:[%s6186_s8 + $0xa0] sm:$0xff] }
  0xce   : > { %3826 = vmatprep.subr.bf16.mxu1 %v5484_v38  ;;  %v346_v38 = vld [vmem:[%s6186_s8 + $0xa8] sm:$0xff]  ;;  %v5542_v13 = vld [vmem:[%s6184_s7 + $0xec0] ss:$16 sps:$4 sm:$0xff]   ;;  %v5549_v15 = vld [vmem:[%s6184_s7 + $0xca4] ss:$16 sps:$4 sm:$0xff]  }
  0xcf   : > { %v6497_v8 = vcombine.high %v346_v38, %v346_v38 }
  0xd0   : > { %3776 = vmatpush1.bf16.msra.mxu0 %v5479_v39  ;;  %v5541_v39 = vld [vmem:[%s6184_s7 + $0xcc4] ss:$16 sps:$4 sm:$0xff]  }
  0xd1   : > { %3827 = vmatpush1.bf16.msra.mxu1 %v5482_v40  ;;  %3777 = vmatprep.subr.bf16.mxu0 %v5487_v41  ;;  %v5544_v40 = vld [vmem:[%s6184_s7 + $0xec4] ss:$16 sps:$4 sm:$0xff]   ;;  %v6495_v41 = vcombine.high %v345_v37, %v345_v37 }
  0xd2   : > { %3828 = vmatprep.subr.bf16.mxu1 %v5490_v42  ;;  %v5552_v42 = vld [vmem:[%s6184_s7 + $0xea4] ss:$16 sps:$4 sm:$0xff]  }
  0xd4   : > { %3778 = vmatpush2.bf16.msra.mxu0 %v5485_v43  ;;  %v5547_v43 = vld [vmem:[%s6184_s7 + $0xca0] ss:$16 sps:$4 sm:$0xff]  }
  0xd5   : > { %3829 = vmatpush2.bf16.msra.mxu1 %v5488_v44  ;;  %3779 = vmatprep.subr.bf16.mxu0 %v5493_v45  ;;  %v5550_v44 = vld [vmem:[%s6184_s7 + $0xea0] ss:$16 sps:$4 sm:$0xff]  }
  0xd6   : > { %3830 = vmatprep.subr.bf16.mxu1 %v5496_v46  ;;  %v6510_v45 = vld [vmem:[%s6186_s8 + $0x30] sm:$0xff] }
  0xd7   : > { %v6513_v46 = vld [vmem:[%s6186_s8 + $0x70] sm:$0xff] }
  0xd8   : > { %3780 = vmatpush2.bf16.msra.mxu0 %v5491_v47  ;;  %v6515_v47 = vcombine.low %v345_v37, %v345_v37  ;;  %v5593_v37 = vld [vmem:[%s6184_s7 + $0xdc4] ss:$16 sps:$4 sm:$0xff]  }
  0xd9   : > { %3831 = vmatpush2.bf16.msra.mxu1 %v5494_v48  ;;  %3781 = vmatprep.subr.bf16.mxu0 %v5499_v49  ;;  %v6517_v48 = vcombine.low %v346_v38, %v346_v38  ;;  %v6520_v49 = vld [vmem:[%s6186_s8 + $0x38] sm:$0xff]  ;;  %v5596_v38 = vld [vmem:[%s6184_s7 + $0xfc4] ss:$16 sps:$4 sm:$0xff]  }
  0xda   : > { %3832 = vmatprep.subr.bf16.mxu1 %v5502_v50  ;;  %v6523_v50 = vld [vmem:[%s6186_s8 + $0x78] sm:$0xff] }
  0xdc   : > { %3782 = vmatpush2.bf16.msra.mxu0 %v5497_v51  ;;  %v5557_v51 = vld [vmem:[%s6184_s7 + $0xc84] ss:$16 sps:$4 sm:$0xff]  }
  0xdd   : > { %3833 = vmatpush2.bf16.msra.mxu1 %v5500_v54  ;;  %3783 = vmatprep.subr.bf16.mxu0 %v5505_v59  ;;  %v5560_v54 = vld [vmem:[%s6184_s7 + $0xe84] ss:$16 sps:$4 sm:$0xff]   ;;  %v6529_v59 = vcombine.high %v6510_v45, %v6513_v46 }
  0xde   : > { %3834 = vmatprep.subr.bf16.mxu1 %v5508_v60  ;;  %v6533_v60 = vcombine.high %v6520_v49, %v6523_v50 }
  0xe0   : > { %3784 = vmatpush2.bf16.msra.mxu0 %v5503_v61  ;;  %v5555_v61 = vld [vmem:[%s6184_s7 + $0xc80] ss:$16 sps:$4 sm:$0xff]  }
  0xe1   : > { %3835 = vmatpush2.bf16.msra.mxu1 %v5506_v62  ;;  %3785 = vmatprep.subr.bf16.mxu0 %v5511_v1  ;;  %v5558_v62 = vld [vmem:[%s6184_s7 + $0xe80] ss:$16 sps:$4 sm:$0xff]   ;;  %v5563_v1 = vld [vmem:[%s6184_s7 + $0xc64] ss:$16 sps:$4 sm:$0xff]  }
  0xe2   : > { %3836 = vmatprep.subr.bf16.mxu1 %v5514_v2  ;;  %v5566_v2 = vld [vmem:[%s6184_s7 + $0xe64] ss:$16 sps:$4 sm:$0xff]  }
  0xe4   : > { %3786 = vmatpush2.bf16.msra.mxu0 %v5509_v3  ;;  %v5561_v3 = vld [vmem:[%s6184_s7 + $0xc60] ss:$16 sps:$4 sm:$0xff]  }
  0xe5   : > { %3837 = vmatpush2.bf16.msra.mxu1 %v5512_v4  ;;  %3787 = vmatprep.subr.bf16.mxu0 %v5517_v6  ;;  %v5564_v4 = vld [vmem:[%s6184_s7 + $0xe60] ss:$16 sps:$4 sm:$0xff]   ;;  %v5569_v6 = vld [vmem:[%s6184_s7 + $0xc44] ss:$16 sps:$4 sm:$0xff]  }
  0xe6   : > { %3838 = vmatprep.subr.bf16.mxu1 %v5520_v7  ;;  %v5572_v7 = vld [vmem:[%s6184_s7 + $0xe44] ss:$16 sps:$4 sm:$0xff]  }
  0xe8   : > { %3788 = vmatpush2.bf16.msra.mxu0 %v5515_v17  ;;  %v5567_v17 = vld [vmem:[%s6184_s7 + $0xc40] ss:$16 sps:$4 sm:$0xff]  }
  0xe9   : > { %3839 = vmatpush2.bf16.msra.mxu1 %v5518_v18  ;;  %3789 = vmatprep.subr.bf16.mxu0 %v5523_v21  ;;  %v5570_v18 = vld [vmem:[%s6184_s7 + $0xe40] ss:$16 sps:$4 sm:$0xff]   ;;  %v5575_v21 = vld [vmem:[%s6184_s7 + $0xc24] ss:$16 sps:$4 sm:$0xff]  }
  0xea   : > { %3840 = vmatprep.subr.bf16.mxu1 %v5526_v22  ;;  %v5578_v22 = vld [vmem:[%s6184_s7 + $0xe24] ss:$16 sps:$4 sm:$0xff]  }
  0xec   : > { %3790 = vmatpush2.bf16.msra.mxu0 %v5521_v23  ;;  %v5573_v23 = vld [vmem:[%s6184_s7 + $0xc20] ss:$16 sps:$4 sm:$0xff]  }
  0xed   : > { %3841 = vmatpush2.bf16.msra.mxu1 %v5524_v24  ;;  %3791 = vmatprep.subr.bf16.mxu0 %v5529_v25  ;;  %v5576_v24 = vld [vmem:[%s6184_s7 + $0xe20] ss:$16 sps:$4 sm:$0xff]   ;;  %v5581_v25 = vld [vmem:[%s6184_s7 + $0xc04] ss:$16 sps:$4 sm:$0xff]  }
  0xee   : > { %3842 = vmatprep.subr.bf16.mxu1 %v5532_v26  ;;  %v5584_v26 = vld [vmem:[%s6184_s7 + $0xe04] ss:$16 sps:$4 sm:$0xff]  }
  0xf0   : > { %3792 = vmatpush2.bf16.msra.mxu0 %v5527_v27  ;;  %v5579_v27 = vld [vmem:[%s6184_s7 + $0xc00] ss:$16 sps:$4 sm:$0xff]  }
  0xf1   : > { %3843 = vmatpush2.bf16.msra.mxu1 %v5530_v28  ;;  %3863 = vmatprep.subr.bf16.mxu0 %v5535_v29  ;;  %v5582_v28 = vld [vmem:[%s6184_s7 + $0xe00] ss:$16 sps:$4 sm:$0xff]   ;;  %v5587_v29 = vld [vmem:[%s6184_s7 + $0xde4] ss:$16 sps:$4 sm:$0xff]  }
  0xf2   : > { %3914 = vmatprep.subr.bf16.mxu1 %v5538_v30  ;;  %v5590_v30 = vld [vmem:[%s6184_s7 + $0xfe4] ss:$16 sps:$4 sm:$0xff]  }
  0xf3   : > { %3794 = vmatmul.mubr.bf16.vlgmr.msra.gmra.mxu0 %v6485_v35 }
  0xf4   : > { %3845 = vmatmul.mubr.bf16.vlgmr.msra.gmra.mxu1 %v6489_v36  ;;  %3864 = vmatpush1.bf16.msra.mxu0 %v5533_v31  ;;  %v5585_v31 = vld [vmem:[%s6184_s7 + $0xde0] ss:$16 sps:$4 sm:$0xff]  }
  0xf5   : > { %3915 = vmatpush1.bf16.msra.mxu1 %v5536_v32  ;;  %3865 = vmatprep.subr.bf16.mxu0 %v5541_v39  ;;  %v5588_v32 = vld [vmem:[%s6184_s7 + $0xfe0] ss:$16 sps:$4 sm:$0xff]  }
  0xf6   : > { %3916 = vmatprep.subr.bf16.mxu1 %v5544_v40  ;;  %3803 = vmatprep.mubr.bf16.mxu0 %v6495_v41  ;;  %v5591_v39 = vld [vmem:[%s6184_s7 + $0xdc0] ss:$16 sps:$4 sm:$0xff]  }
  0xf7   : > { %3854 = vmatprep.mubr.bf16.mxu1 %v6497_v8  ;;  %v5594_v40 = vld [vmem:[%s6184_s7 + $0xfc0] ss:$16 sps:$4 sm:$0xff]  }
  0xf8   : > { %3866 = vmatpush1.bf16.msra.mxu0 %v5539_v9  ;;  %v5599_v9 = vld [vmem:[%s6184_s7 + $0xda4] ss:$16 sps:$4 sm:$0xff]  }
  0xf9   : > { %3917 = vmatpush1.bf16.msra.mxu1 %v5542_v13  ;;  %3867 = vmatprep.subr.bf16.mxu0 %v5549_v15  ;;  %v5602_v13 = vld [vmem:[%s6184_s7 + $0xfa4] ss:$16 sps:$4 sm:$0xff]   ;;  %v5597_v15 = vld [vmem:[%s6184_s7 + $0xda0] ss:$16 sps:$4 sm:$0xff]  }
  0xfa   : > { %3918 = vmatprep.subr.bf16.mxu1 %v5552_v42  ;;  %v5600_v42 = vld [vmem:[%s6184_s7 + $0xfa0] ss:$16 sps:$4 sm:$0xff]  }
  0xfb   : > { %3804 = vmatmul.mubr.bf16.gmra.mxu0 %v6515_v47 }
  0xfc   : > { %3855 = vmatmul.mubr.bf16.gmra.mxu1 %v6517_v48  ;;  %3868 = vmatpush1.bf16.msra.mxu0 %v5547_v43  ;;  %v5605_v43 = vld [vmem:[%s6184_s7 + $0xd84] ss:$16 sps:$4 sm:$0xff]  }
  0xfd   : > { %3919 = vmatpush1.bf16.msra.mxu1 %v5550_v44  ;;  %3869 = vmatprep.subr.bf16.mxu0 %v5557_v51  ;;  %v5608_v44 = vld [vmem:[%s6184_s7 + $0xf84] ss:$16 sps:$4 sm:$0xff]   ;;  %v5603_v51 = vld [vmem:[%s6184_s7 + $0xd80] ss:$16 sps:$4 sm:$0xff]  }
  0xfe   : > { %3920 = vmatprep.subr.bf16.mxu1 %v5560_v54  ;;  %3895 = vmatprep.mubr.bf16.mxu0 %v6529_v59  ;;  %v5606_v54 = vld [vmem:[%s6184_s7 + $0xf80] ss:$16 sps:$4 sm:$0xff]  }
  0xff   : > { %3946 = vmatprep.mubr.bf16.mxu1 %v6533_v60 }
 0x100   : > { %3870 = vmatpush1.bf16.msra.mxu0 %v5555_v61  ;;  %v5611_v61 = vld [vmem:[%s6184_s7 + $0xd64] ss:$16 sps:$4 sm:$0xff]  }
 0x101   : > { %3921 = vmatpush1.bf16.msra.mxu1 %v5558_v62  ;;  %3871 = vmatprep.subr.bf16.mxu0 %v5563_v1  ;;  %v5614_v62 = vld [vmem:[%s6184_s7 + $0xf64] ss:$16 sps:$4 sm:$0xff]   ;;  %v5609_v1 = vld [vmem:[%s6184_s7 + $0xd60] ss:$16 sps:$4 sm:$0xff]  }
 0x102   : > { %3922 = vmatprep.subr.bf16.mxu1 %v5566_v2  ;;  %v5612_v2 = vld [vmem:[%s6184_s7 + $0xf60] ss:$16 sps:$4 sm:$0xff]  }
 0x104   : > { %3872 = vmatpush1.bf16.msra.mxu0 %v5561_v3  ;;  %v5617_v3 = vld [vmem:[%s6184_s7 + $0xd44] ss:$16 sps:$4 sm:$0xff]  }
 0x105   : > { %3923 = vmatpush1.bf16.msra.mxu1 %v5564_v4  ;;  %3873 = vmatprep.subr.bf16.mxu0 %v5569_v6  ;;  %v5620_v4 = vld [vmem:[%s6184_s7 + $0xf44] ss:$16 sps:$4 sm:$0xff]   ;;  %v5615_v6 = vld [vmem:[%s6184_s7 + $0xd40] ss:$16 sps:$4 sm:$0xff]  }
 0x106   : > { %3924 = vmatprep.subr.bf16.mxu1 %v5572_v7  ;;  %v5618_v7 = vld [vmem:[%s6184_s7 + $0xf40] ss:$16 sps:$4 sm:$0xff]  }
 0x108   : > { %3874 = vmatpush1.bf16.msra.mxu0 %v5567_v17  ;;  %v5623_v17 = vld [vmem:[%s6184_s7 + $0xd24] ss:$16 sps:$4 sm:$0xff]  }
 0x109   : > { %3925 = vmatpush1.bf16.msra.mxu1 %v5570_v18  ;;  %3875 = vmatprep.subr.bf16.mxu0 %v5575_v21  ;;  %v5626_v18 = vld [vmem:[%s6184_s7 + $0xf24] ss:$16 sps:$4 sm:$0xff]   ;;  %v5621_v21 = vld [vmem:[%s6184_s7 + $0xd20] ss:$16 sps:$4 sm:$0xff]  }
 0x10a   : > { %3926 = vmatprep.subr.bf16.mxu1 %v5578_v22  ;;  %v5624_v22 = vld [vmem:[%s6184_s7 + $0xf20] ss:$16 sps:$4 sm:$0xff]  }
 0x10c   : > { %3876 = vmatpush1.bf16.msra.mxu0 %v5573_v23  ;;  %v5629_v23 = vld [vmem:[%s6184_s7 + $0xd04] ss:$16 sps:$4 sm:$0xff]  }
 0x10d   : > { %3927 = vmatpush1.bf16.msra.mxu1 %v5576_v24  ;;  %3877 = vmatprep.subr.bf16.mxu0 %v5581_v25  ;;  %v5632_v24 = vld [vmem:[%s6184_s7 + $0xf04] ss:$16 sps:$4 sm:$0xff]   ;;  %v5627_v25 = vld [vmem:[%s6184_s7 + $0xd00] ss:$16 sps:$4 sm:$0xff]  }
 0x10e   : > { %3928 = vmatprep.subr.bf16.mxu1 %v5584_v26  ;;  %v5630_v26 = vld [vmem:[%s6184_s7 + $0xf00] ss:$16 sps:$4 sm:$0xff]  }
 0x110   : > { %3878 = vmatpush1.bf16.msra.mxu0 %v5579_v27  ;;  %v5635_v27 = vld [vmem:[%s6184_s7 + $0xec] ss:$16 sps:$4 sm:$0xff]  }
 0x111   : > { %3929 = vmatpush1.bf16.msra.mxu1 %v5582_v28  ;;  %3879 = vmatprep.subr.bf16.mxu0 %v5587_v29  ;;  %v5638_v28 = vld [vmem:[%s6184_s7 + $0x2ec] ss:$16 sps:$4 sm:$0xff]   ;;  %v5633_v29 = vld [vmem:[%s6184_s7 + $0xe8] ss:$16 sps:$4 sm:$0xff]  }
 0x112   : > { %3930 = vmatprep.subr.bf16.mxu1 %v5590_v30  ;;  %v5636_v30 = vld [vmem:[%s6184_s7 + $0x2e8] ss:$16 sps:$4 sm:$0xff]  }
 0x114   : > { %3880 = vmatpush2.bf16.msra.mxu0 %v5585_v31  ;;  %v6595_v31 = vcombine.low %v6510_v45, %v6513_v46 }
 0x115   : > { %3931 = vmatpush2.bf16.msra.mxu1 %v5588_v32  ;;  %3881 = vmatprep.subr.bf16.mxu0 %v5593_v37  ;;  %v6599_v32 = vcombine.low %v6520_v49, %v6523_v50  ;;  %v347_v37 = vld [vmem:[%s6186_s8 + $0xb0] sm:$0xff]  ;;  %v5639_v49 = vld [vmem:[%s6184_s7 + $0xc8] ss:$16 sps:$4 sm:$0xff]  }
 0x116   : > { %3932 = vmatprep.subr.bf16.mxu1 %v5596_v38  ;;  %v348_v38 = vld [vmem:[%s6186_s8 + $0xb8] sm:$0xff] }
 0x117   : > { %v6607_v45 = vcombine.high %v348_v38, %v348_v38  ;;  %v5642_v50 = vld [vmem:[%s6184_s7 + $0x2c8] ss:$16 sps:$4 sm:$0xff]  }
 0x118   : > { %3882 = vmatpush2.bf16.msra.mxu0 %v5591_v39  ;;  %v5641_v39 = vld [vmem:[%s6184_s7 + $0xcc] ss:$16 sps:$4 sm:$0xff]  }
 0x119   : > { %3933 = vmatpush2.bf16.msra.mxu1 %v5594_v40  ;;  %3883 = vmatprep.subr.bf16.mxu0 %v5599_v9  ;;  %v5644_v40 = vld [vmem:[%s6184_s7 + $0x2cc] ss:$16 sps:$4 sm:$0xff]   ;;  %v6605_v9 = vcombine.high %v347_v37, %v347_v37 }
 0x11a   : > { %3934 = vmatprep.subr.bf16.mxu1 %v5602_v13 }
 0x11c   : > { %3884 = vmatpush2.bf16.msra.mxu0 %v5597_v15 }
 0x11d   : > { %3935 = vmatpush2.bf16.msra.mxu1 %v5600_v42  ;;  %3885 = vmatprep.subr.bf16.mxu0 %v5605_v43  ;;  %v5649_v42 = vld [vmem:[%s6184_s7 + $0xac] ss:$16 sps:$4 sm:$0xff]  }
 0x11e   : > { %3936 = vmatprep.subr.bf16.mxu1 %v5608_v44 }
 0x120   : > { %3886 = vmatpush2.bf16.msra.mxu0 %v5603_v51  ;;  %v5652_v51 = vld [vmem:[%s6184_s7 + $0x2ac] ss:$16 sps:$4 sm:$0xff]  }
 0x121   : > { %3937 = vmatpush2.bf16.msra.mxu1 %v5606_v54  ;;  %3887 = vmatprep.subr.bf16.mxu0 %v5611_v61 }
 0x122   : > { %3938 = vmatprep.subr.bf16.mxu1 %v5614_v62 }
 0x124   : > { %3888 = vmatpush2.bf16.msra.mxu0 %v5609_v1  ;;  %v6621_v1 = vcombine.low %v347_v37, %v347_v37  ;;  %v5667_v37 = vld [vmem:[%s6184_s7 + $0x48] ss:$16 sps:$4 sm:$0xff]  }
 0x125   : > { %3939 = vmatpush2.bf16.msra.mxu1 %v5612_v2  ;;  %3889 = vmatprep.subr.bf16.mxu0 %v5617_v3  ;;  %v5647_v2 = vld [vmem:[%s6184_s7 + $0xa8] ss:$16 sps:$4 sm:$0xff]  }
 0x126   : > { %3940 = vmatprep.subr.bf16.mxu1 %v5620_v4  ;;  %v5650_v3 = vld [vmem:[%s6184_s7 + $0x2a8] ss:$16 sps:$4 sm:$0xff]   ;;  %v6625_v4 = vcombine.low %v348_v38, %v348_v38 }
 0x127   : > { %v5670_v38 = vld [vmem:[%s6184_s7 + $0x248] ss:$16 sps:$4 sm:$0xff]  }
 0x128   : > { %3890 = vmatpush2.bf16.msra.mxu0 %v5615_v6 }
 0x129   : > { %3941 = vmatpush2.bf16.msra.mxu1 %v5618_v7  ;;  %3891 = vmatprep.subr.bf16.mxu0 %v5623_v17  ;;  %v5657_v7 = vld [vmem:[%s6184_s7 + $0x8c] ss:$16 sps:$4 sm:$0xff]  }
 0x12a   : > { %3942 = vmatprep.subr.bf16.mxu1 %v5626_v18 }
 0x12c   : > { %3892 = vmatpush2.bf16.msra.mxu0 %v5621_v21  ;;  %v5660_v21 = vld [vmem:[%s6184_s7 + $0x28c] ss:$16 sps:$4 sm:$0xff]  }
 0x12d   : > { %3943 = vmatpush2.bf16.msra.mxu1 %v5624_v22  ;;  %3893 = vmatprep.subr.bf16.mxu0 %v5629_v23  ;;  %v5655_v23 = vld [vmem:[%s6184_s7 + $0x88] ss:$16 sps:$4 sm:$0xff]  }
 0x12e   : > { %3944 = vmatprep.subr.bf16.mxu1 %v5632_v24  ;;  %v5658_v24 = vld [vmem:[%s6184_s7 + $0x288] ss:$16 sps:$4 sm:$0xff]  }
 0x130   : > { %3894 = vmatpush2.bf16.msra.mxu0 %v5627_v25  ;;  %v5663_v25 = vld [vmem:[%s6184_s7 + $0x6c] ss:$16 sps:$4 sm:$0xff]  }
 0x131   : > { %3945 = vmatpush2.bf16.msra.mxu1 %v5630_v26  ;;  %3965 = vmatprep.subr.bf16.mxu0 %v5635_v27  ;;  %v5666_v26 = vld [vmem:[%s6184_s7 + $0x26c] ss:$16 sps:$4 sm:$0xff]   ;;  %v5661_v27 = vld [vmem:[%s6184_s7 + $0x68] ss:$16 sps:$4 sm:$0xff]  }
 0x132   : > { %4016 = vmatprep.subr.bf16.mxu1 %v5638_v28  ;;  %v5664_v28 = vld [vmem:[%s6184_s7 + $0x268] ss:$16 sps:$4 sm:$0xff]  }
 0x133   : > { %v3591_v46 = vpop.f32.mrf.mxu0  ;;  %3896 = vmatmul.mubr.bf16.vlgmr.msra.gmra.mxu0 %v6595_v31 }
 0x134   : > { %v3642_v13 = vpop.f32.mrf.mxu1  ;;  %3947 = vmatmul.mubr.bf16.vlgmr.msra.gmra.mxu1 %v6599_v32  ;;  %3966 = vmatpush1.bf16.msra.mxu0 %v5633_v29  ;;  %v5669_v29 = vld [vmem:[%s6184_s7 + $0x4c] ss:$16 sps:$4 sm:$0xff]  }
 0x135   : > { %v6613_v15 = vadd.f32 %v3642_v13, %v3591_v46  ;;  %4017 = vmatpush1.bf16.msra.mxu1 %v5636_v30  ;;  %v3593_v43 = vpop.f32.mrf.mxu0  ;;  %3967 = vmatprep.subr.bf16.mxu0 %v5641_v39  ;;  %v5672_v30 = vld [vmem:[%s6184_s7 + $0x24c] ss:$16 sps:$4 sm:$0xff]  }
 0x136   : > { %v3644_v44 = vpop.f32.mrf.mxu1  ;;  %4018 = vmatprep.subr.bf16.mxu1 %v5644_v40  ;;  %3905 = vmatprep.mubr.bf16.mxu0 %v6605_v9  ;;  %v5678_v46 = vld [vmem:[%s6184_s7 + $0x22c] ss:$16 sps:$4 sm:$0xff]  }
 0x137   : > { %v6617_v54 = vadd.f32 %v3644_v44, %v3593_v43  ;;  %3956 = vmatprep.mubr.bf16.mxu1 %v6607_v45  ;;  %v3595_v61 = vpop.f32.mrf.mxu0  ;;  %v5676_v43 = vld [vmem:[%s6184_s7 + $0x228] ss:$16 sps:$4 sm:$0xff]  }
 0x138   : > { %v3646_v62 = vpop.f32.mrf.mxu1  ;;  %3968 = vmatpush1.bf16.msra.mxu0 %v5639_v49 }
 0x139   : > { %v6627_v6 = vadd.f32 %v3646_v62, %v3595_v61  ;;  %4019 = vmatpush1.bf16.msra.mxu1 %v5642_v50  ;;  %v3597_v17 = vpop.f32.mrf.mxu0  ;;  %3969 = vmatprep.subr.bf16.mxu0 %v5649_v42  ;;  %v5673_v42 = vld [vmem:[%s6184_s7 + $0x28] ss:$16 sps:$4 sm:$0xff]   ;;  %v5681_v61 = vld [vmem:[%s6184_s7 + $0xc] ss:$16 sps:$4 sm:$0xff]  }
 0x13a   : > { %v3648_v18 = vpop.f32.mrf.mxu1  ;;  %4020 = vmatprep.subr.bf16.mxu1 %v5652_v51  ;;  %v5684_v62 = vld [vmem:[%s6184_s7 + $0x20c] ss:$16 sps:$4 sm:$0xff]  }
 0x13b   : > { %v6631_v22 = vadd.f32 %v3648_v18, %v3597_v17  ;;  %3906 = vmatmul.mubr.bf16.gmra.mxu0 %v6621_v1  ;;  %v3601_v39 = vpop.f32.mrf.mxu0  ;;  %v5682_v17 = vld [vmem:[%s6184_s7 + $0x208] ss:$16 sps:$4 sm:$0xff]   ;;  %v5687_v18 = vld [vmem:[%s6184_s7 + $0x1ec] ss:$16 sps:$4 sm:$0xff]  }
 0x13c   : > { %3957 = vmatmul.mubr.bf16.gmra.mxu1 %v6625_v4  ;;  %3970 = vmatpush1.bf16.msra.mxu0 %v5647_v2  ;;  %v3652_v40 = vpop.f32.mrf.mxu1 }
 0x13d   : > { %4021 = vmatpush1.bf16.msra.mxu1 %v5650_v3  ;;  %3971 = vmatprep.subr.bf16.mxu0 %v5657_v7  ;;  %v3603_v13 = vpop.f32.mrf.mxu0  ;;  %v5679_v7 = vld [vmem:[%s6184_s7 + $0x8] ss:$16 sps:$4 sm:$0xff]  }
 0x13e   : > { %4022 = vmatprep.subr.bf16.mxu1 %v5660_v21  ;;  %3997 = vmatprep.mubr.bf16.mxu0 %v6242_v14  ;;  %v5675_v14 = vld [vmem:[%s6184_s7 + $0x2c] ss:$16 sps:$4 sm:$0xff]   ;;  %v3654_v49 = vpop.f32.mrf.mxu1 }
 0x13f   : > { %4048 = vmatprep.mubr.bf16.mxu1 %v6245_v16  ;;  %v6648_v16 = vadd.f32 %v3652_v40, %v3601_v39  ;;  %v6651_v50 = vadd.f32 %v3654_v49, %v3603_v13  ;;  %v3605_v44 = vpop.f32.mrf.mxu0  ;;  %v5690_v21 = vld [vmem:[%s6184_s7 + $0x3ec] ss:$16 sps:$4 sm:$0xff]  }
 0x140   : > { %3972 = vmatpush1.bf16.msra.mxu0 %v5655_v23  ;;  %v3656_v51 = vpop.f32.mrf.mxu1  ;;  %v5685_v23 = vld [vmem:[%s6184_s7 + $0x1e8] ss:$16 sps:$4 sm:$0xff]   ;;  %v5705_v39 = vld [vmem:[%s6184_s7 + $0x18c] ss:$16 sps:$4 sm:$0xff]  }
 0x141   : > { %4023 = vmatpush1.bf16.msra.mxu1 %v5658_v24  ;;  %3973 = vmatprep.subr.bf16.mxu0 %v5663_v25  ;;  %v3606_v2 = vpop.f32.mrf.mxu0  ;;  %v5688_v24 = vld [vmem:[%s6184_s7 + $0x3e8] ss:$16 sps:$4 sm:$0xff]   ;;  %v5693_v25 = vld [vmem:[%s6184_s7 + $0x1cc] ss:$16 sps:$4 sm:$0xff]  }
 0x142   : > { %4024 = vmatprep.subr.bf16.mxu1 %v5666_v26  ;;  %v3657_v3 = vpop.f32.mrf.mxu1  ;;  %v5696_v26 = vld [vmem:[%s6184_s7 + $0x3cc] ss:$16 sps:$4 sm:$0xff]  }
 0x143   : > { %v5708_v40 = vld [vmem:[%s6184_s7 + $0x38c] ss:$16 sps:$4 sm:$0xff]  }
 0x144   : > { %3974 = vmatpush1.bf16.msra.mxu0 %v5661_v27  ;;  %v5691_v27 = vld [vmem:[%s6184_s7 + $0x1c8] ss:$16 sps:$4 sm:$0xff]   ;;  %v5711_v13 = vld [vmem:[%s6184_s7 + $0x16c] ss:$16 sps:$4 sm:$0xff]  }
 0x145   : > { %4025 = vmatpush1.bf16.msra.mxu1 %v5664_v28  ;;  %3975 = vmatprep.subr.bf16.mxu0 %v5669_v29  ;;  %v5694_v28 = vld [vmem:[%s6184_s7 + $0x3c8] ss:$16 sps:$4 sm:$0xff]   ;;  %v5699_v29 = vld [vmem:[%s6184_s7 + $0x1ac] ss:$16 sps:$4 sm:$0xff]  }
 0x146   : > { %4026 = vmatprep.subr.bf16.mxu1 %v5672_v30  ;;  %v5702_v30 = vld [vmem:[%s6184_s7 + $0x3ac] ss:$16 sps:$4 sm:$0xff]  }
 0x147   : > { %v5714_v49 = vld [vmem:[%s6184_s7 + $0x36c] ss:$16 sps:$4 sm:$0xff]  }
 0x148   : > { %3976 = vmatpush1.bf16.msra.mxu0 %v5667_v37  ;;  %v5697_v37 = vld [vmem:[%s6184_s7 + $0x1a8] ss:$16 sps:$4 sm:$0xff]   ;;  %v5717_v44 = vld [vmem:[%s6184_s7 + $0x14c] ss:$16 sps:$4 sm:$0xff]  }
 0x149   : > { %4027 = vmatpush1.bf16.msra.mxu1 %v5670_v38  ;;  %3977 = vmatprep.subr.bf16.mxu0 %v5675_v14  ;;  %v5700_v38 = vld [vmem:[%s6184_s7 + $0x3a8] ss:$16 sps:$4 sm:$0xff]   ;;  %v5720_v51 = vld [vmem:[%s6184_s7 + $0x34c] ss:$16 sps:$4 sm:$0xff]  }
 0x14a   : > { %4028 = vmatprep.subr.bf16.mxu1 %v5678_v46  ;;  %v5703_v14 = vld [vmem:[%s6184_s7 + $0x188] ss:$16 sps:$4 sm:$0xff]   ;;  %v5723_v2 = vld [vmem:[%s6184_s7 + $0x12c] ss:$16 sps:$4 sm:$0xff]  }
 0x14b   : > { %v5706_v46 = vld [vmem:[%s6184_s7 + $0x388] ss:$16 sps:$4 sm:$0xff]   ;;  %v5726_v3 = vld [vmem:[%s6184_s7 + $0x32c] ss:$16 sps:$4 sm:$0xff]  }
 0x14c   : > { %3978 = vmatpush1.bf16.msra.mxu0 %v5673_v42  ;;  %v5709_v42 = vld [vmem:[%s6184_s7 + $0x168] ss:$16 sps:$4 sm:$0xff]  }
 0x14d   : > { %4029 = vmatpush1.bf16.msra.mxu1 %v5676_v43  ;;  %3979 = vmatprep.subr.bf16.mxu0 %v5681_v61  ;;  %v5712_v43 = vld [vmem:[%s6184_s7 + $0x368] ss:$16 sps:$4 sm:$0xff]  }
 0x14e   : > { %4030 = vmatprep.subr.bf16.mxu1 %v5684_v62  ;;  %v5715_v61 = vld [vmem:[%s6184_s7 + $0x148] ss:$16 sps:$4 sm:$0xff]  }
 0x14f   : > { %v5718_v62 = vld [vmem:[%s6184_s7 + $0x348] ss:$16 sps:$4 sm:$0xff]  }
 0x150   : > { %3980 = vmatpush1.bf16.msra.mxu0 %v5679_v7  ;;  %v5721_v7 = vld [vmem:[%s6184_s7 + $0x128] ss:$16 sps:$4 sm:$0xff]  }
 0x151   : > { %4031 = vmatpush1.bf16.msra.mxu1 %v5682_v17  ;;  %3981 = vmatprep.subr.bf16.mxu0 %v5687_v18  ;;  %v5724_v17 = vld [vmem:[%s6184_s7 + $0x328] ss:$16 sps:$4 sm:$0xff]   ;;  %v5729_v18 = vld [vmem:[%s6184_s7 + $0x10c] ss:$16 sps:$4 sm:$0xff]  }
 0x152   : > { %4032 = vmatprep.subr.bf16.mxu1 %v5690_v21  ;;  %v5732_v21 = vld [vmem:[%s6184_s7 + $0x30c] ss:$16 sps:$4 sm:$0xff]  }
 0x154   : > { %3982 = vmatpush2.bf16.msra.mxu0 %v5685_v23  ;;  %v5727_v23 = vld [vmem:[%s6184_s7 + $0x108] ss:$16 sps:$4 sm:$0xff]  }
 0x155   : > { %4033 = vmatpush2.bf16.msra.mxu1 %v5688_v24  ;;  %3983 = vmatprep.subr.bf16.mxu0 %v5693_v25  ;;  %v5730_v24 = vld [vmem:[%s6184_s7 + $0x308] ss:$16 sps:$4 sm:$0xff]   ;;  %v5735_v25 = vld [vmem:[%s6184_s7 + $0x4ec] ss:$16 sps:$4 sm:$0xff]  }
 0x156   : > { %4034 = vmatprep.subr.bf16.mxu1 %v5696_v26  ;;  %v5738_v26 = vld [vmem:[%s6184_s7 + $0x6ec] ss:$16 sps:$4 sm:$0xff]  }
 0x158   : > { %3984 = vmatpush2.bf16.msra.mxu0 %v5691_v27  ;;  %v5733_v27 = vld [vmem:[%s6184_s7 + $0x4e8] ss:$16 sps:$4 sm:$0xff]  }
 0x159   : > { %4035 = vmatpush2.bf16.msra.mxu1 %v5694_v28  ;;  %3985 = vmatprep.subr.bf16.mxu0 %v5699_v29  ;;  %v5736_v28 = vld [vmem:[%s6184_s7 + $0x6e8] ss:$16 sps:$4 sm:$0xff]   ;;  %v5741_v29 = vld [vmem:[%s6184_s7 + $0x4cc] ss:$16 sps:$4 sm:$0xff]  }
 0x15a   : > { %4036 = vmatprep.subr.bf16.mxu1 %v5702_v30  ;;  %v5744_v30 = vld [vmem:[%s6184_s7 + $0x6cc] ss:$16 sps:$4 sm:$0xff]  }
 0x15c   : > { %3986 = vmatpush2.bf16.msra.mxu0 %v5697_v37  ;;  %v5739_v37 = vld [vmem:[%s6184_s7 + $0x4c8] ss:$16 sps:$4 sm:$0xff]  }
 0x15d   : > { %4037 = vmatpush2.bf16.msra.mxu1 %v5700_v38  ;;  %3987 = vmatprep.subr.bf16.mxu0 %v5705_v39 }
 0x15e   : > { %4038 = vmatprep.subr.bf16.mxu1 %v5708_v40 }
 0x160   : > { %3988 = vmatpush2.bf16.msra.mxu0 %v5703_v14  ;;  %v5742_v14 = vld [vmem:[%s6184_s7 + $0x6c8] ss:$16 sps:$4 sm:$0xff]  }
 0x161   : > { %4039 = vmatpush2.bf16.msra.mxu1 %v5706_v46  ;;  %3989 = vmatprep.subr.bf16.mxu0 %v5711_v13 }
 0x162   : > { %4040 = vmatprep.subr.bf16.mxu1 %v5714_v49  ;;  %v5747_v49 = vld [vmem:[%s6184_s7 + $0x4ac] ss:$16 sps:$4 sm:$0xff]  }
 0x164   : > { %3990 = vmatpush2.bf16.msra.mxu0 %v5709_v42  ;;  %v5750_v42 = vld [vmem:[%s6184_s7 + $0x6ac] ss:$16 sps:$4 sm:$0xff]  }
 0x165   : > { %4041 = vmatpush2.bf16.msra.mxu1 %v5712_v43  ;;  %3991 = vmatprep.subr.bf16.mxu0 %v5717_v44 }
 0x166   : > { %4042 = vmatprep.subr.bf16.mxu1 %v5720_v51  ;;  %v5748_v51 = vld [vmem:[%s6184_s7 + $0x6a8] ss:$16 sps:$4 sm:$0xff]  }
 0x168   : > { %3992 = vmatpush2.bf16.msra.mxu0 %v5715_v61 }
 0x169   : > { %4043 = vmatpush2.bf16.msra.mxu1 %v5718_v62  ;;  %3993 = vmatprep.subr.bf16.mxu0 %v5723_v2 }
 0x16a   : > { %4044 = vmatprep.subr.bf16.mxu1 %v5726_v3 }
 0x16c   : > { %3994 = vmatpush2.bf16.msra.mxu0 %v5721_v7  ;;  %v5756_v7 = vld [vmem:[%s6184_s7 + $0x68c] ss:$16 sps:$4 sm:$0xff]  }
 0x16d   : > { %4045 = vmatpush2.bf16.msra.mxu1 %v5724_v17  ;;  %3995 = vmatprep.subr.bf16.mxu0 %v5729_v18 }
 0x16e   : > { %4046 = vmatprep.subr.bf16.mxu1 %v5732_v21 }
 0x170   : > { %3996 = vmatpush2.bf16.msra.mxu0 %v5727_v23  ;;  %v5754_v23 = vld [vmem:[%s6184_s7 + $0x688] ss:$16 sps:$4 sm:$0xff]  }
 0x171   : > { %4047 = vmatpush2.bf16.msra.mxu1 %v5730_v24  ;;  %4067 = vmatprep.subr.bf16.mxu0 %v5735_v25 }
 0x172   : > { %4118 = vmatprep.subr.bf16.mxu1 %v5738_v26 }
 0x173   : > { %v3693_v38 = vpop.f32.mrf.mxu0  ;;  %3998 = vmatmul.mubr.bf16.vlgmr.msra.gmra.mxu0 %v6265_v33  ;;  %v5745_v33 = vld [vmem:[%s6184_s7 + $0x4a8] ss:$16 sps:$4 sm:$0xff]  }
 0x174   : > { %v3744_v39 = vpop.f32.mrf.mxu1  ;;  %4049 = vmatmul.mubr.bf16.vlgmr.msra.gmra.mxu1 %v6267_v34  ;;  %v3694_v40 = vadd.f32 %v3693_v38, %v6613_v15  ;;  %4068 = vmatpush1.bf16.msra.mxu0 %v5733_v27  ;;  %v5762_v27 = vld [vmem:[%s6184_s7 + $0x66c] ss:$16 sps:$4 sm:$0xff]  }
 0x175   : > { %4119 = vmatpush1.bf16.msra.mxu1 %v5736_v28  ;;  %v3695_v46 = vpop.f32.mrf.mxu0  ;;  %4069 = vmatprep.subr.bf16.mxu0 %v5741_v29 }
 0x176   : > { %v3746_v13 = vpop.f32.mrf.mxu1  ;;  %4120 = vmatprep.subr.bf16.mxu1 %v5744_v30  ;;  %v6704_v43 = vadd.f32 %v3744_v39, %v3694_v40  ;;  %v3696_v44 = vadd.f32 %v3695_v46, %v6617_v54  ;;  %4007 = vmatprep.mubr.bf16.mxu0 %v6288_v52  ;;  %v5753_v54 = vld [vmem:[%s6184_s7 + $0x48c] ss:$16 sps:$4 sm:$0xff]   ;;  %v5757_v30 = vld [vmem:[%s6184_s7 + $0x468] ss:$16 sps:$4 sm:$0xff]  }
 0x177   : > { %4058 = vmatprep.mubr.bf16.mxu1 %v6295_v57  ;;  %v3697_v34 = vpop.f32.mrf.mxu0  ;;  %v5751_v57 = vld [vmem:[%s6184_s7 + $0x488] ss:$16 sps:$4 sm:$0xff]   ;;  %v5774_v46 = vld [vmem:[%s6184_s7 + $0x62c] ss:$16 sps:$4 sm:$0xff]  }
 0x178   : > { %v3748_v15 = vpop.f32.mrf.mxu1  ;;  %v6711_v61 = vadd.f32 %v3746_v13, %v3696_v44  ;;  %v3698_v62 = vadd.f32 %v3697_v34, %v6627_v6  ;;  %4070 = vmatpush1.bf16.msra.mxu0 %v5739_v37  ;;  %v5760_v37 = vld [vmem:[%s6184_s7 + $0x668] ss:$16 sps:$4 sm:$0xff]   ;;  %v5780_v44 = vld [vmem:[%s6184_s7 + $0x60c] ss:$16 sps:$4 sm:$0xff]  }
 0x179   : > { %4121 = vmatpush1.bf16.msra.mxu1 %v5742_v14  ;;  %v3699_v2 = vpop.f32.mrf.mxu0  ;;  %4071 = vmatprep.subr.bf16.mxu0 %v5747_v49  ;;  %v5763_v39 = vld [vmem:[%s6184_s7 + $0x448] ss:$16 sps:$4 sm:$0xff]   ;;  %v5771_v14 = vld [vmem:[%s6184_s7 + $0x42c] ss:$16 sps:$4 sm:$0xff]  }
 0x17a   : > { %v3750_v3 = vpop.f32.mrf.mxu1  ;;  %4122 = vmatprep.subr.bf16.mxu1 %v5750_v42  ;;  %v6716_v17 = vadd.f32 %v3748_v15, %v3698_v62  ;;  %v3700_v52 = vadd.f32 %v3699_v2, %v6631_v22  ;;  %v5759_v22 = vld [vmem:[%s6184_s7 + $0x46c] ss:$16 sps:$4 sm:$0xff]   ;;  %v5766_v40 = vld [vmem:[%s6184_s7 + $0x648] ss:$16 sps:$4 sm:$0xff]  }
 0x17b   : > { %v3703_v18 = vpop.f32.mrf.mxu0  ;;  %4008 = vmatmul.mubr.bf16.gmra.mxu0 %v6290_v53  ;;  %v5769_v13 = vld [vmem:[%s6184_s7 + $0x428] ss:$16 sps:$4 sm:$0xff]   ;;  %v5777_v42 = vld [vmem:[%s6184_s7 + $0x40c] ss:$16 sps:$4 sm:$0xff]  }
 0x17c   : > { %v3754_v21 = vpop.f32.mrf.mxu1  ;;  %4059 = vmatmul.mubr.bf16.gmra.mxu1 %v6297_v58  ;;  %v6723_v6 = vadd.f32 %v3750_v3, %v3700_v52  ;;  %v3704_v24 = vadd.f32 %v3703_v18, %v6648_v16  ;;  %4072 = vmatpush1.bf16.msra.mxu0 %v5745_v33  ;;  %v5772_v49 = vld [vmem:[%s6184_s7 + $0x628] ss:$16 sps:$4 sm:$0xff]   ;;  %v5783_v34 = vld [vmem:[%s6184_s7 + $0x5ec] ss:$16 sps:$4 sm:$0xff]  }
 0x17d   : > { %4123 = vmatpush1.bf16.msra.mxu1 %v5748_v51  ;;  %v3705_v25 = vpop.f32.mrf.mxu0  ;;  %4073 = vmatprep.subr.bf16.mxu0 %v5753_v54  ;;  %v5775_v33 = vld [vmem:[%s6184_s7 + $0x408] ss:$16 sps:$4 sm:$0xff]   ;;  %v5786_v15 = vld [vmem:[%s6184_s7 + $0x7ec] ss:$16 sps:$4 sm:$0xff]  }
 0x17e   : > { %v3756_v26 = vpop.f32.mrf.mxu1  ;;  %4124 = vmatprep.subr.bf16.mxu1 %v5756_v7  ;;  %v3706_v53 = vadd.f32 %v3705_v25, %v6651_v50  ;;  %v6729_v28 = vadd.f32 %v3754_v21, %v3704_v24  ;;  %4099 = vmatprep.mubr.bf16.mxu0 %v6319_v5  ;;  %v5765_v50 = vld [vmem:[%s6184_s7 + $0x44c] ss:$16 sps:$4 sm:$0xff]   ;;  %v5778_v51 = vld [vmem:[%s6184_s7 + $0x608] ss:$16 sps:$4 sm:$0xff]  }
 0x17f   : > { %4150 = vmatprep.mubr.bf16.mxu1 %v6331_v10  ;;  %v3707_v58 = vpop.f32.mrf.mxu0  ;;  %v5768_v5 = vld [vmem:[%s6184_s7 + $0x64c] ss:$16 sps:$4 sm:$0xff]   ;;  %v5781_v62 = vld [vmem:[%s6184_s7 + $0x5e8] ss:$16 sps:$4 sm:$0xff]  }
 0x180   : > { %v3758_v16 = vpop.f32.mrf.mxu1  ;;  %v6733_v29 = vadd.f32 %v3756_v26, %v3706_v53  ;;  %4074 = vmatpush1.bf16.msra.mxu0 %v5751_v57  ;;  %v5784_v2 = vld [vmem:[%s6184_s7 + $0x7e8] ss:$16 sps:$4 sm:$0xff]   ;;  %v5789_v3 = vld [vmem:[%s6184_s7 + $0x5cc] ss:$16 sps:$4 sm:$0xff]  }
 0x181   : > { %4125 = vmatpush1.bf16.msra.mxu1 %v5754_v23  ;;  %4075 = vmatprep.subr.bf16.mxu0 %v5759_v22  ;;  %v3708_v38 = vpop.f32.mrf.mxu0  ;;  %v5792_v54 = vld [vmem:[%s6184_s7 + $0x7cc] ss:$16 sps:$4 sm:$0xff]   ;;  %v5787_v7 = vld [vmem:[%s6184_s7 + $0x5c8] ss:$16 sps:$4 sm:$0xff]  }
 0x182   : > { %4126 = vmatprep.subr.bf16.mxu1 %v5762_v27  ;;  %v3759_v10 = vpop.f32.mrf.mxu1  ;;  %v5790_v52 = vld [vmem:[%s6184_s7 + $0x7c8] ss:$16 sps:$4 sm:$0xff]   ;;  %v5795_v57 = vld [vmem:[%s6184_s7 + $0x5ac] ss:$16 sps:$4 sm:$0xff]  }
 0x183   : > { %v5798_v18 = vld [vmem:[%s6184_s7 + $0x7ac] ss:$16 sps:$4 sm:$0xff]   ;;  %v5793_v21 = vld [vmem:[%s6184_s7 + $0x5a8] ss:$16 sps:$4 sm:$0xff]  }
 0x184   : > { %4076 = vmatpush1.bf16.msra.mxu0 %v5757_v30  ;;  %v5796_v23 = vld [vmem:[%s6184_s7 + $0x7a8] ss:$16 sps:$4 sm:$0xff]   ;;  %v5801_v24 = vld [vmem:[%s6184_s7 + $0x58c] ss:$16 sps:$4 sm:$0xff]  }
 0x185   : > { %4127 = vmatpush1.bf16.msra.mxu1 %v5760_v37  ;;  %4077 = vmatprep.subr.bf16.mxu0 %v5765_v50  ;;  %v5804_v25 = vld [vmem:[%s6184_s7 + $0x78c] ss:$16 sps:$4 sm:$0xff]   ;;  %v5799_v26 = vld [vmem:[%s6184_s7 + $0x588] ss:$16 sps:$4 sm:$0xff]  }
 0x186   : > { %4128 = vmatprep.subr.bf16.mxu1 %v5768_v5  ;;  %v5802_v22 = vld [vmem:[%s6184_s7 + $0x788] ss:$16 sps:$4 sm:$0xff]   ;;  %v5807_v27 = vld [vmem:[%s6184_s7 + $0x56c] ss:$16 sps:$4 sm:$0xff]  }
 0x187   : > { %v5810_v53 = vld [vmem:[%s6184_s7 + $0x76c] ss:$16 sps:$4 sm:$0xff]   ;;  %v5805_v58 = vld [vmem:[%s6184_s7 + $0x568] ss:$16 sps:$4 sm:$0xff]  }
 0x188   : > { %4078 = vmatpush1.bf16.msra.mxu0 %v5763_v39  ;;  %v5808_v16 = vld [vmem:[%s6184_s7 + $0x768] ss:$16 sps:$4 sm:$0xff]   ;;  %v5813_v30 = vld [vmem:[%s6184_s7 + $0x54c] ss:$16 sps:$4 sm:$0xff]  }
 0x189   : > { %4129 = vmatpush1.bf16.msra.mxu1 %v5766_v40  ;;  %4079 = vmatprep.subr.bf16.mxu0 %v5771_v14  ;;  %v5816_v37 = vld [vmem:[%s6184_s7 + $0x74c] ss:$16 sps:$4 sm:$0xff]   ;;  %v5811_v50 = vld [vmem:[%s6184_s7 + $0x548] ss:$16 sps:$4 sm:$0xff]  }
 0x18a   : > { %4130 = vmatprep.subr.bf16.mxu1 %v5774_v46  ;;  %v5814_v5 = vld [vmem:[%s6184_s7 + $0x748] ss:$16 sps:$4 sm:$0xff]   ;;  %v5819_v38 = vld [vmem:[%s6184_s7 + $0x52c] ss:$16 sps:$4 sm:$0xff]  }
 0x18b   : > { %v5822_v10 = vld [vmem:[%s6184_s7 + $0x72c] ss:$16 sps:$4 sm:$0xff]   ;;  %v5817_v39 = vld [vmem:[%s6184_s7 + $0x528] ss:$16 sps:$4 sm:$0xff]  }
 0x18c   : > { %4080 = vmatpush1.bf16.msra.mxu0 %v5769_v13  ;;  %v5820_v40 = vld [vmem:[%s6184_s7 + $0x728] ss:$16 sps:$4 sm:$0xff]   ;;  %v5825_v14 = vld [vmem:[%s6184_s7 + $0x50c] ss:$16 sps:$4 sm:$0xff]  }
 0x18d   : > { %4131 = vmatpush1.bf16.msra.mxu1 %v5772_v49  ;;  %4081 = vmatprep.subr.bf16.mxu0 %v5777_v42  ;;  %v5828_v46 = vld [vmem:[%s6184_s7 + $0x70c] ss:$16 sps:$4 sm:$0xff]   ;;  %v5823_v13 = vld [vmem:[%s6184_s7 + $0x508] ss:$16 sps:$4 sm:$0xff]  }
 0x18e   : > { %4132 = vmatprep.subr.bf16.mxu1 %v5780_v44  ;;  %v5826_v49 = vld [vmem:[%s6184_s7 + $0x708] ss:$16 sps:$4 sm:$0xff]   ;;  %v5831_v42 = vld [vmem:[%s6184_s7 + $0x8ec] ss:$16 sps:$4 sm:$0xff]  }
 0x18f   : > { %v5834_v44 = vld [vmem:[%s6184_s7 + $0xaec] ss:$16 sps:$4 sm:$0xff]  }
 0x190   : > { %4082 = vmatpush1.bf16.msra.mxu0 %v5775_v33  ;;  %v5829_v33 = vld [vmem:[%s6184_s7 + $0x8e8] ss:$16 sps:$4 sm:$0xff]  }
 0x191   : > { %4133 = vmatpush1.bf16.msra.mxu1 %v5778_v51  ;;  %4083 = vmatprep.subr.bf16.mxu0 %v5783_v34  ;;  %v5832_v51 = vld [vmem:[%s6184_s7 + $0xae8] ss:$16 sps:$4 sm:$0xff]   ;;  %v5837_v34 = vld [vmem:[%s6184_s7 + $0x8cc] ss:$16 sps:$4 sm:$0xff]  }
 0x192   : > { %4134 = vmatprep.subr.bf16.mxu1 %v5786_v15  ;;  %v5840_v15 = vld [vmem:[%s6184_s7 + $0xacc] ss:$16 sps:$4 sm:$0xff]  }
 0x194   : > { %4084 = vmatpush2.bf16.msra.mxu0 %v5781_v62 }
 0x195   : > { %4135 = vmatpush2.bf16.msra.mxu1 %v5784_v2  ;;  %4085 = vmatprep.subr.bf16.mxu0 %v5789_v3  ;;  %v5835_v3 = vld [vmem:[%s6184_s7 + $0x8c8] ss:$16 sps:$4 sm:$0xff]  }
 0x196   : > { %4136 = vmatprep.subr.bf16.mxu1 %v5792_v54  ;;  %v5838_v54 = vld [vmem:[%s6184_s7 + $0xac8] ss:$16 sps:$4 sm:$0xff]  }
 0x198   : > { %4086 = vmatpush2.bf16.msra.mxu0 %v5787_v7 }
 0x199   : > { %4137 = vmatpush2.bf16.msra.mxu1 %v5790_v52  ;;  %4087 = vmatprep.subr.bf16.mxu0 %v5795_v57  ;;  %v5843_v57 = vld [vmem:[%s6184_s7 + $0x8ac] ss:$16 sps:$4 sm:$0xff]  }
 0x19a   : > { %4138 = vmatprep.subr.bf16.mxu1 %v5798_v18  ;;  %v5846_v18 = vld [vmem:[%s6184_s7 + $0xaac] ss:$16 sps:$4 sm:$0xff]  }
 0x19c   : > { %4088 = vmatpush2.bf16.msra.mxu0 %v5793_v21  ;;  %v5841_v21 = vld [vmem:[%s6184_s7 + $0x8a8] ss:$16 sps:$4 sm:$0xff]  }
 0x19d   : > { %4139 = vmatpush2.bf16.msra.mxu1 %v5796_v23  ;;  %4089 = vmatprep.subr.bf16.mxu0 %v5801_v24  ;;  %v5844_v23 = vld [vmem:[%s6184_s7 + $0xaa8] ss:$16 sps:$4 sm:$0xff]  }
 0x19e   : > { %4140 = vmatprep.subr.bf16.mxu1 %v5804_v25 }
 0x1a0   : > { %4090 = vmatpush2.bf16.msra.mxu0 %v5799_v26 }
 0x1a1   : > { %4141 = vmatpush2.bf16.msra.mxu1 %v5802_v22  ;;  %4091 = vmatprep.subr.bf16.mxu0 %v5807_v27  ;;  %v5847_v27 = vld [vmem:[%s6184_s7 + $0x888] ss:$16 sps:$4 sm:$0xff]  }
 0x1a2   : > { %4142 = vmatprep.subr.bf16.mxu1 %v5810_v53  ;;  %v5850_v53 = vld [vmem:[%s6184_s7 + $0xa88] ss:$16 sps:$4 sm:$0xff]  }
 0x1a4   : > { %4092 = vmatpush2.bf16.msra.mxu0 %v5805_v58 }
 0x1a5   : > { %4143 = vmatpush2.bf16.msra.mxu1 %v5808_v16  ;;  %4093 = vmatprep.subr.bf16.mxu0 %v5813_v30  ;;  %v5855_v30 = vld [vmem:[%s6184_s7 + $0x86c] ss:$16 sps:$4 sm:$0xff]  }
 0x1a6   : > { %4144 = vmatprep.subr.bf16.mxu1 %v5816_v37 }
 0x1a8   : > { %4094 = vmatpush2.bf16.msra.mxu0 %v5811_v50  ;;  %v5853_v50 = vld [vmem:[%s6184_s7 + $0x868] ss:$16 sps:$4 sm:$0xff]  }
 0x1a9   : > { %4145 = vmatpush2.bf16.msra.mxu1 %v5814_v5  ;;  %4095 = vmatprep.subr.bf16.mxu0 %v5819_v38  ;;  %v5856_v5 = vld [vmem:[%s6184_s7 + $0xa68] ss:$16 sps:$4 sm:$0xff]   ;;  %v5861_v38 = vld [vmem:[%s6184_s7 + $0x84c] ss:$16 sps:$4 sm:$0xff]  }
 0x1aa   : > { %4146 = vmatprep.subr.bf16.mxu1 %v5822_v10  ;;  %v5864_v10 = vld [vmem:[%s6184_s7 + $0xa4c] ss:$16 sps:$4 sm:$0xff]  }
 0x1ac   : > { %4096 = vmatpush2.bf16.msra.mxu0 %v5817_v39 }
 0x1ad   : > { %4147 = vmatpush2.bf16.msra.mxu1 %v5820_v40  ;;  %4097 = vmatprep.subr.bf16.mxu0 %v5825_v14  ;;  %v5862_v40 = vld [vmem:[%s6184_s7 + $0xa48] ss:$16 sps:$4 sm:$0xff]   ;;  %v5867_v14 = vld [vmem:[%s6184_s7 + $0x82c] ss:$16 sps:$4 sm:$0xff]  }
 0x1ae   : > { %4148 = vmatprep.subr.bf16.mxu1 %v5828_v46  ;;  %v5870_v46 = vld [vmem:[%s6184_s7 + $0xa2c] ss:$16 sps:$4 sm:$0xff]  }
 0x1b0   : > { %4098 = vmatpush2.bf16.msra.mxu0 %v5823_v13  ;;  %v5865_v13 = vld [vmem:[%s6184_s7 + $0x828] ss:$16 sps:$4 sm:$0xff]  }
 0x1b1   : > { %4149 = vmatpush2.bf16.msra.mxu1 %v5826_v49  ;;  %4169 = vmatprep.subr.bf16.mxu0 %v5831_v42  ;;  %v5868_v49 = vld [vmem:[%s6184_s7 + $0xa28] ss:$16 sps:$4 sm:$0xff]   ;;  %v5873_v42 = vld [vmem:[%s6184_s7 + $0x80c] ss:$16 sps:$4 sm:$0xff]  }
 0x1b2   : > { %4220 = vmatprep.subr.bf16.mxu1 %v5834_v44  ;;  %v5876_v44 = vld [vmem:[%s6184_s7 + $0xa0c] ss:$16 sps:$4 sm:$0xff]  }
 0x1b3   : > { %v6787_v62 = vpop.f32.mrf.mxu0  ;;  %4100 = vmatmul.mubr.bf16.vlgmr.msra.gmra.mxu0 %v6375_v55 }
 0x1b4   : > { %v6789_v2 = vpop.f32.mrf.mxu1  ;;  %4151 = vmatmul.mubr.bf16.vlgmr.msra.gmra.mxu1 %v6379_v56  ;;  %4170 = vmatpush1.bf16.msra.mxu0 %v5829_v33  ;;  %v5871_v33 = vld [vmem:[%s6184_s7 + $0x808] ss:$16 sps:$4 sm:$0xff]  }
 0x1b5   : > { %4221 = vmatpush1.bf16.msra.mxu1 %v5832_v51  ;;  %v6795_v7 = vpop.f32.mrf.mxu0  ;;  %4171 = vmatprep.subr.bf16.mxu0 %v5837_v34  ;;  %v5874_v51 = vld [vmem:[%s6184_s7 + $0xa08] ss:$16 sps:$4 sm:$0xff]   ;;  %v5879_v34 = vld [vmem:[%s6184_s7 + $0x9ec] ss:$16 sps:$4 sm:$0xff]  }
 0x1b6   : > { %v6797_v52 = vpop.f32.mrf.mxu1  ;;  %4222 = vmatprep.subr.bf16.mxu1 %v5840_v15  ;;  %4109 = vmatprep.mubr.bf16.mxu0 %v6385_v63  ;;  %v5849_v63 = vld [vmem:[%s6184_s7 + $0x88c] ss:$16 sps:$4 sm:$0xff]  }
 0x1b7   : > { %4160 = vmatprep.mubr.bf16.mxu1 %v6387_v0  ;;  %v6803_v55 = vpop.f32.mrf.mxu0  ;;  %v5852_v0 = vld [vmem:[%s6184_s7 + $0xa8c] ss:$16 sps:$4 sm:$0xff]  }
 0x1b8   : > { %v6805_v56 = vpop.f32.mrf.mxu1  ;;  %4172 = vmatpush1.bf16.msra.mxu0 %v5835_v3  ;;  %v5882_v15 = vld [vmem:[%s6184_s7 + $0xbec] ss:$16 sps:$4 sm:$0xff]   ;;  %v5877_v3 = vld [vmem:[%s6184_s7 + $0x9e8] ss:$16 sps:$4 sm:$0xff]  }
 0x1b9   : > { %4223 = vmatpush1.bf16.msra.mxu1 %v5838_v54  ;;  %v6809_v24 = vpop.f32.mrf.mxu0  ;;  %4173 = vmatprep.subr.bf16.mxu0 %v5843_v57  ;;  %v5880_v54 = vld [vmem:[%s6184_s7 + $0xbe8] ss:$16 sps:$4 sm:$0xff]   ;;  %v5885_v57 = vld [vmem:[%s6184_s7 + $0x9cc] ss:$16 sps:$4 sm:$0xff]  }
 0x1ba   : > { %v6811_v25 = vpop.f32.mrf.mxu1  ;;  %4224 = vmatprep.subr.bf16.mxu1 %v5846_v18  ;;  %v5888_v18 = vld [vmem:[%s6184_s7 + $0xbcc] ss:$16 sps:$4 sm:$0xff]  }
 0x1bb   : > { %v6815_v26 = vpop.f32.mrf.mxu0  ;;  %4110 = vmatmul.mubr.bf16.gmra.mxu0 %v6405_v11  ;;  %v5858_v11 = vld [vmem:[%s6184_s7 + $0xa6c] ss:$16 sps:$4 sm:$0xff]  }
 0x1bc   : > { %v6818_v22 = vpop.f32.mrf.mxu1  ;;  %4161 = vmatmul.mubr.bf16.gmra.mxu1 %v6407_v12  ;;  %4174 = vmatpush1.bf16.msra.mxu0 %v5841_v21  ;;  %v5883_v21 = vld [vmem:[%s6184_s7 + $0x9c8] ss:$16 sps:$4 sm:$0xff]  }
 0x1bd   : > { %4225 = vmatpush1.bf16.msra.mxu1 %v5844_v23  ;;  %v6823_v58 = vpop.f32.mrf.mxu0  ;;  %4175 = vmatprep.subr.bf16.mxu0 %v5849_v63  ;;  %v5886_v23 = vld [vmem:[%s6184_s7 + $0xbc8] ss:$16 sps:$4 sm:$0xff]   ;;  %v5891_v63 = vld [vmem:[%s6184_s7 + $0x9ac] ss:$16 sps:$4 sm:$0xff]  }
 0x1be   : > { %v6825_v16 = vpop.f32.mrf.mxu1  ;;  %4226 = vmatprep.subr.bf16.mxu1 %v5852_v0  ;;  %4201 = vmatprep.mubr.bf16.mxu0 %v6419_v19  ;;  %v5894_v0 = vld [vmem:[%s6184_s7 + $0xbac] ss:$16 sps:$4 sm:$0xff]  }
 0x1bf   : > { %4252 = vmatprep.mubr.bf16.mxu1 %v6423_v20  ;;  %v3809_v12 = vpop.f32.mrf.mxu0  ;;  %v5859_v20 = vld [vmem:[%s6184_s7 + $0x848] ss:$16 sps:$4 sm:$0xff]  }
 0x1c0   : > { %v3860_v37 = vpop.f32.mrf.mxu1  ;;  %4176 = vmatpush1.bf16.msra.mxu0 %v5847_v27  ;;  %v5889_v27 = vld [vmem:[%s6184_s7 + $0x9a8] ss:$16 sps:$4 sm:$0xff]  }
 0x1c1   : > { %4227 = vmatpush1.bf16.msra.mxu1 %v5850_v53  ;;  %4177 = vmatprep.subr.bf16.mxu0 %v5855_v30  ;;  %v3810_v39 = vpop.f32.mrf.mxu0  ;;  %v5892_v53 = vld [vmem:[%s6184_s7 + $0xba8] ss:$16 sps:$4 sm:$0xff]   ;;  %v5897_v30 = vld [vmem:[%s6184_s7 + $0x98c] ss:$16 sps:$4 sm:$0xff]  }
 0x1c2   : > { %4228 = vmatprep.subr.bf16.mxu1 %v5858_v11  ;;  %v3861_v19 = vpop.f32.mrf.mxu1  ;;  %v5900_v11 = vld [vmem:[%s6184_s7 + $0xb8c] ss:$16 sps:$4 sm:$0xff]   ;;  %v5895_v12 = vld [vmem:[%s6184_s7 + $0x988] ss:$16 sps:$4 sm:$0xff]  }
 0x1c3   : > { %v5898_v37 = vld [vmem:[%s6184_s7 + $0xb88] ss:$16 sps:$4 sm:$0xff]   ;;  %v5909_v39 = vld [vmem:[%s6184_s7 + $0x94c] ss:$16 sps:$4 sm:$0xff]  }
 0x1c4   : > { %4178 = vmatpush1.bf16.msra.mxu0 %v5853_v50  ;;  %v5903_v50 = vld [vmem:[%s6184_s7 + $0x96c] ss:$16 sps:$4 sm:$0xff]  }
 0x1c5   : > { %4229 = vmatpush1.bf16.msra.mxu1 %v5856_v5  ;;  %4179 = vmatprep.subr.bf16.mxu0 %v5861_v38  ;;  %v5906_v5 = vld [vmem:[%s6184_s7 + $0xb6c] ss:$16 sps:$4 sm:$0xff]   ;;  %v5901_v38 = vld [vmem:[%s6184_s7 + $0x968] ss:$16 sps:$4 sm:$0xff]  }
 0x1c6   : > { %4230 = vmatprep.subr.bf16.mxu1 %v5864_v10  ;;  %v5904_v10 = vld [vmem:[%s6184_s7 + $0xb68] ss:$16 sps:$4 sm:$0xff]   ;;  %v5912_v19 = vld [vmem:[%s6184_s7 + $0xb4c] ss:$16 sps:$4 sm:$0xff]  }
 0x1c8   : > { %4180 = vmatpush1.bf16.msra.mxu0 %v5859_v20  ;;  %v5907_v20 = vld [vmem:[%s6184_s7 + $0x948] ss:$16 sps:$4 sm:$0xff]  }
 0x1c9   : > { %4231 = vmatpush1.bf16.msra.mxu1 %v5862_v40  ;;  %4181 = vmatprep.subr.bf16.mxu0 %v5867_v14  ;;  %v5910_v40 = vld [vmem:[%s6184_s7 + $0xb48] ss:$16 sps:$4 sm:$0xff]   ;;  %v5915_v14 = vld [vmem:[%s6184_s7 + $0x92c] ss:$16 sps:$4 sm:$0xff]  }
 0x1ca   : > { %4232 = vmatprep.subr.bf16.mxu1 %v5870_v46  ;;  %v5918_v46 = vld [vmem:[%s6184_s7 + $0xb2c] ss:$16 sps:$4 sm:$0xff]  }
 0x1cc   : > { %4182 = vmatpush1.bf16.msra.mxu0 %v5865_v13  ;;  %v5913_v13 = vld [vmem:[%s6184_s7 + $0x928] ss:$16 sps:$4 sm:$0xff]  }
 0x1cd   : > { %4233 = vmatpush1.bf16.msra.mxu1 %v5868_v49  ;;  %4183 = vmatprep.subr.bf16.mxu0 %v5873_v42  ;;  %v5916_v49 = vld [vmem:[%s6184_s7 + $0xb28] ss:$16 sps:$4 sm:$0xff]   ;;  %v5921_v42 = vld [vmem:[%s6184_s7 + $0x90c] ss:$16 sps:$4 sm:$0xff]  }
 0x1ce   : > { %4234 = vmatprep.subr.bf16.mxu1 %v5876_v44  ;;  %v5924_v44 = vld [vmem:[%s6184_s7 + $0xb0c] ss:$16 sps:$4 sm:$0xff]  }
 0x1d0   : > { %4184 = vmatpush1.bf16.msra.mxu0 %v5871_v33  ;;  %v5919_v33 = vld [vmem:[%s6184_s7 + $0x908] ss:$16 sps:$4 sm:$0xff]  }
 0x1d1   : > { %4235 = vmatpush1.bf16.msra.mxu1 %v5874_v51  ;;  %4185 = vmatprep.subr.bf16.mxu0 %v5879_v34  ;;  %v5922_v51 = vld [vmem:[%s6184_s7 + $0xb08] ss:$16 sps:$4 sm:$0xff]   ;;  %v5927_v34 = vld [vmem:[%s6184_s7 + $0xcec] ss:$16 sps:$4 sm:$0xff]  }
 0x1d2   : > { %4236 = vmatprep.subr.bf16.mxu1 %v5882_v15  ;;  %v5930_v15 = vld [vmem:[%s6184_s7 + $0xeec] ss:$16 sps:$4 sm:$0xff]  }
 0x1d4   : > { %4186 = vmatpush2.bf16.msra.mxu0 %v5877_v3  ;;  %v3796_v3 = vadd.f32 %v6787_v62, %v6704_v43  ;;  %v3802_v43 = vadd.f32 %v6809_v24, %v6723_v6  ;;  %v5939_v24 = vld [vmem:[%s6184_s7 + $0xcac] ss:$16 sps:$4 sm:$0xff]  }
 0x1d5   : > { %4237 = vmatpush2.bf16.msra.mxu1 %v5880_v54  ;;  %4187 = vmatprep.subr.bf16.mxu0 %v5885_v57  ;;  %v3798_v54 = vadd.f32 %v6795_v7, %v6711_v61  ;;  %v5925_v57 = vld [vmem:[%s6184_s7 + $0xce8] ss:$16 sps:$4 sm:$0xff]  }
 0x1d6   : > { %4238 = vmatprep.subr.bf16.mxu1 %v5888_v18  ;;  %v5928_v18 = vld [vmem:[%s6184_s7 + $0xee8] ss:$16 sps:$4 sm:$0xff]  }
 0x1d8   : > { %4188 = vmatpush2.bf16.msra.mxu0 %v5883_v21  ;;  %v3800_v21 = vadd.f32 %v6803_v55, %v6716_v17  ;;  %v3849_v17 = vadd.f32 %v6797_v52, %v3798_v54  ;;  %v5931_v55 = vld [vmem:[%s6184_s7 + $0xcc8] ss:$16 sps:$4 sm:$0xff]   ;;  %v5951_v54 = vld [vmem:[%s6184_s7 + $0xc6c] ss:$16 sps:$4 sm:$0xff]  }
 0x1d9   : > { %4239 = vmatpush2.bf16.msra.mxu1 %v5886_v23  ;;  %4189 = vmatprep.subr.bf16.mxu0 %v5891_v63  ;;  %v5933_v23 = vld [vmem:[%s6184_s7 + $0xccc] ss:$16 sps:$4 sm:$0xff]  }
 0x1da   : > { %4240 = vmatprep.subr.bf16.mxu1 %v5894_v0  ;;  %v5936_v63 = vld [vmem:[%s6184_s7 + $0xecc] ss:$16 sps:$4 sm:$0xff]   ;;  %v3847_v0 = vadd.f32 %v6789_v2, %v3796_v3  ;;  %v3851_v2 = vadd.f32 %v6805_v56, %v3800_v21  ;;  %v3853_v56 = vadd.f32 %v6811_v25, %v3802_v43 }
 0x1db   : > { %v5945_v25 = vld [vmem:[%s6184_s7 + $0xc8c] ss:$16 sps:$4 sm:$0xff]  }
 0x1dc   : > { %4190 = vmatpush2.bf16.msra.mxu0 %v5889_v27  ;;  %v5934_v27 = vld [vmem:[%s6184_s7 + $0xec8] ss:$16 sps:$4 sm:$0xff]  }
 0x1dd   : > { %4241 = vmatpush2.bf16.msra.mxu1 %v5892_v53  ;;  %4191 = vmatprep.subr.bf16.mxu0 %v5897_v30  ;;  %v313_v53 = vld [vmem:[#allocation2 + $0x30] sm:$0xff]  ;;  %v321_v3 = vld [vmem:[#allocation2 + $0x28] sm:$0xff] }
 0x1de   : > { %4242 = vmatprep.subr.bf16.mxu1 %v5900_v11  ;;  %v5942_v11 = vld [vmem:[%s6184_s7 + $0xeac] ss:$16 sps:$4 sm:$0xff]  }
 0x1df   : > { %v322_v21 = vld [vmem:[#allocation2 + $0x48] sm:$0xff] }
 0x1e0   : > { %4192 = vmatpush2.bf16.msra.mxu0 %v5895_v12  ;;  %v3808_v12 = vadd.f32 %v6823_v58, %v6733_v29 }
 0x1e1   : > { %4243 = vmatpush2.bf16.msra.mxu1 %v5898_v37  ;;  %4193 = vmatprep.subr.bf16.mxu0 %v5903_v50  ;;  %v314_v37 = vld [vmem:[#allocation2] sm:$0xff] }
 0x1e2   : > { %4244 = vmatprep.subr.bf16.mxu1 %v5906_v5 }
 0x1e4   : > { %4194 = vmatpush2.bf16.msra.mxu0 %v5901_v38 }
 0x1e5   : > { %4245 = vmatpush2.bf16.msra.mxu1 %v5904_v10  ;;  %4195 = vmatprep.subr.bf16.mxu0 %v5909_v39  ;;  %v5940_v39 = vld [vmem:[%s6184_s7 + $0xea8] ss:$16 sps:$4 sm:$0xff]  }
 0x1e6   : > { %4246 = vmatprep.subr.bf16.mxu1 %v5912_v19 }
 0x1e8   : > { %4196 = vmatpush2.bf16.msra.mxu0 %v5907_v20  ;;  %v5948_v20 = vld [vmem:[%s6184_s7 + $0xe8c] ss:$16 sps:$4 sm:$0xff]  }
 0x1e9   : > { %4247 = vmatpush2.bf16.msra.mxu1 %v5910_v40  ;;  %4197 = vmatprep.subr.bf16.mxu0 %v5915_v14 }
 0x1ea   : > { %4248 = vmatprep.subr.bf16.mxu1 %v5918_v46  ;;  %v3859_v46 = vadd.f32 %v6825_v16, %v3808_v12  ;;  %v5978_v12 = vld [vmem:[%s6184_s7 + $0xfec] ss:$16 sps:$4 sm:$0xff]  }
 0x1ec   : > { %4198 = vmatpush2.bf16.msra.mxu0 %v5913_v13  ;;  %v318_v13 = vld [vmem:[#allocation2 + $0x20] sm:$0xff] }
 0x1ed   : > { %4249 = vmatpush2.bf16.msra.mxu1 %v5916_v49  ;;  %4199 = vmatprep.subr.bf16.mxu0 %v5921_v42 }
 0x1ee   : > { %4250 = vmatprep.subr.bf16.mxu1 %v5924_v44 }
 0x1f0   : > { %4200 = vmatpush2.bf16.msra.mxu0 %v5919_v33 }
 0x1f1   : > { %4251 = vmatpush2.bf16.msra.mxu1 %v5922_v51  ;;  %4271 = vmatprep.subr.bf16.mxu0 %v5927_v34  ;;  %v5943_v51 = vld [vmem:[%s6184_s7 + $0xc88] ss:$16 sps:$4 sm:$0xff]  }
 0x1f2   : > { %4322 = vmatprep.subr.bf16.mxu1 %v5930_v15  ;;  %v5946_v34 = vld [vmem:[%s6184_s7 + $0xe88] ss:$16 sps:$4 sm:$0xff]  }
 0x1f3   : > { %v3897_v62 = vpop.f32.mrf.mxu0  ;;  %4202 = vmatmul.mubr.bf16.vlgmr.msra.gmra.mxu0 %v6485_v35  ;;  %v3806_v35 = vadd.f32 %v6815_v26, %v6729_v28  ;;  %v5937_v26 = vld [vmem:[%s6184_s7 + $0xca8] ss:$16 sps:$4 sm:$0xff]  }
 0x1f4   : > { %v3948_v61 = vpop.f32.mrf.mxu1  ;;  %4253 = vmatmul.mubr.bf16.vlgmr.msra.gmra.mxu1 %v6489_v36  ;;  %v3898_v7 = vadd.f32 %v3897_v62, %v3847_v0  ;;  %4272 = vmatpush1.bf16.msra.mxu0 %v5925_v57  ;;  %v5949_v62 = vld [vmem:[%s6184_s7 + $0xc68] ss:$16 sps:$4 sm:$0xff]  }
 0x1f5   : > { %4323 = vmatpush1.bf16.msra.mxu1 %v5928_v18  ;;  %v3899_v30 = vpop.f32.mrf.mxu0  ;;  %4273 = vmatprep.subr.bf16.mxu0 %v5933_v23  ;;  %v3857_v29 = vadd.f32 %v6818_v22, %v3806_v35  ;;  %v5972_v35 = vld [vmem:[%s6184_s7 + $0xe0c] ss:$16 sps:$4 sm:$0xff]  }
 0x1f6   : > { %v3950_v6 = vpop.f32.mrf.mxu1  ;;  %4324 = vmatprep.subr.bf16.mxu1 %v5936_v63  ;;  %v3949_v36 = vadd.f32 %v3948_v61, %v3898_v7  ;;  %v3900_v52 = vadd.f32 %v3899_v30, %v3849_v17  ;;  %4211 = vmatprep.mubr.bf16.mxu0 %v6495_v41  ;;  %v317_v41 = vld [vmem:[#allocation2 + $0x50] sm:$0xff]  ;;  %v5952_v61 = vld [vmem:[%s6184_s7 + $0xe68] ss:$16 sps:$4 sm:$0xff]   ;;  %v5957_v17 = vld [vmem:[%s6184_s7 + $0xc4c] ss:$16 sps:$4 sm:$0xff]  }
 0x1f7   : > { %4262 = vmatprep.mubr.bf16.mxu1 %v6497_v8  ;;  %v3901_v50 = vpop.f32.mrf.mxu0  ;;  %v5966_v30 = vld [vmem:[%s6184_s7 + $0xe2c] ss:$16 sps:$4 sm:$0xff]  }
 0x1f8   : > { %v3952_v5 = vpop.f32.mrf.mxu1  ;;  %v4373_v38 = vadd.f32 %v3949_v36, %v313_v53  ;;  %v3951_v10 = vadd.f32 %v3950_v6, %v3900_v52  ;;  %v3902_v28 = vadd.f32 %v3901_v50, %v3851_v2  ;;  %4274 = vmatpush1.bf16.msra.mxu0 %v5931_v55  ;;  %v5958_v2 = vld [vmem:[%s6184_s7 + $0xe48] ss:$16 sps:$4 sm:$0xff]   ;;  %v5963_v53 = vld [vmem:[%s6184_s7 + $0xc2c] ss:$16 sps:$4 sm:$0xff]  }
 0x1f9   : > { %4325 = vmatpush1.bf16.msra.mxu1 %v5934_v27  ;;  %v3903_v19 = vpop.f32.mrf.mxu0  ;;  %4275 = vmatprep.subr.bf16.mxu0 %v5939_v24  ;;  %v5955_v27 = vld [vmem:[%s6184_s7 + $0xc48] ss:$16 sps:$4 sm:$0xff]  }
 0x1fa   : > { %v3954_v8 = vpop.f32.mrf.mxu1  ;;  %4326 = vmatprep.subr.bf16.mxu1 %v5942_v11  ;;  %4385 = vst [vmem:[#allocation2 + $0x30] sm:$0xff] %v4373_v38  ;;  %v4374_v58 = vadd.f32 %v3951_v10, %v314_v37  ;;  %v3953_v40 = vadd.f32 %v3952_v5, %v3902_v28  ;;  %v3904_v14 = vadd.f32 %v3903_v19, %v3853_v56  ;;  %v5961_v6 = vld [vmem:[%s6184_s7 + $0xc28] ss:$16 sps:$4 sm:$0xff]   ;;  %v5969_v11 = vld [vmem:[%s6184_s7 + $0xc0c] ss:$16 sps:$4 sm:$0xff]  }
 0x1fb   : > { %v3907_v49 = vpop.f32.mrf.mxu0  ;;  %4212 = vmatmul.mubr.bf16.gmra.mxu0 %v6515_v47  ;;  %v5954_v47 = vld [vmem:[%s6184_s7 + $0xe6c] ss:$16 sps:$4 sm:$0xff]   ;;  %v5964_v24 = vld [vmem:[%s6184_s7 + $0xe28] ss:$16 sps:$4 sm:$0xff]  }
 0x1fc   : > { %v3958_v42 = vpop.f32.mrf.mxu1  ;;  %4263 = vmatmul.mubr.bf16.gmra.mxu1 %v6517_v48  ;;  %4386 = vst [vmem:[#allocation2] sm:$0xff] %v4374_v58  ;;  %v4377_v44 = vadd.f32 %v3953_v40, %v317_v41  ;;  %v3955_v22 = vadd.f32 %v3954_v8, %v3904_v14  ;;  %v3908_v33 = vadd.f32 %v3907_v49, %v3857_v29  ;;  %v5967_v36 = vld [vmem:[%s6184_s7 + $0xc08] ss:$16 sps:$4 sm:$0xff]   ;;  %v5975_v56 = vld [vmem:[%s6184_s7 + $0xdec] ss:$16 sps:$4 sm:$0xff]  }
 0x1fd   : > { %4276 = vmatpush1.bf16.msra.mxu0 %v5937_v26  ;;  %4327 = vmatpush1.bf16.msra.mxu1 %v5940_v39  ;;  %v3909_v15 = vpop.f32.mrf.mxu0  ;;  %v5970_v52 = vld [vmem:[%s6184_s7 + $0xe08] ss:$16 sps:$4 sm:$0xff]   ;;  %v5981_v5 = vld [vmem:[%s6184_s7 + $0xdcc] ss:$16 sps:$4 sm:$0xff]  }
 0x1fe   : > { %v3960_v16 = vpop.f32.mrf.mxu1  ;;  %4277 = vmatprep.subr.bf16.mxu0 %v5945_v25  ;;  %4328 = vmatprep.subr.bf16.mxu1 %v5948_v20  ;;  %4389 = vst [vmem:[#allocation2 + $0x50] sm:$0xff] %v4377_v44  ;;  %v4378_v57 = vadd.f32 %v3955_v22, %v318_v13  ;;  %v3910_v48 = vadd.f32 %v3909_v15, %v3859_v46  ;;  %v5973_v37 = vld [vmem:[%s6184_s7 + $0xde8] ss:$16 sps:$4 sm:$0xff]   ;;  %v5984_v38 = vld [vmem:[%s6184_s7 + $0xfcc] ss:$16 sps:$4 sm:$0xff]  }
 0x1ff   : > { %v3959_v18 = vadd.f32 %v3958_v42, %v3908_v33  ;;  %4303 = vmatprep.mubr.bf16.mxu0 %v6529_v59  ;;  %4354 = vmatprep.mubr.bf16.mxu1 %v6533_v60  ;;  %v3911_v23 = vpop.f32.mrf.mxu0  ;;  %v5960_v59 = vld [vmem:[%s6184_s7 + $0xe4c] ss:$16 sps:$4 sm:$0xff]   ;;  %v5976_v50 = vld [vmem:[%s6184_s7 + $0xfe8] ss:$16 sps:$4 sm:$0xff]  }
 0x200   : > { %v3962_v63 = vpop.f32.mrf.mxu1  ;;  %4390 = vst [vmem:[#allocation2 + $0x20] sm:$0xff] %v4378_v57  ;;  %v3961_v43 = vadd.f32 %v3960_v16, %v3910_v48  ;;  %v5979_v10 = vld [vmem:[%s6184_s7 + $0xdc8] ss:$16 sps:$4 sm:$0xff]   ;;  %v5987_v26 = vld [vmem:[%s6184_s7 + $0xdac] ss:$16 sps:$4 sm:$0xff]  }
 0x201   : > { %v4381_v0 = vadd.f32 %v3959_v18, %v321_v3  ;;  %4278 = vmatpush1.bf16.msra.mxu0 %v5943_v51  ;;  %4329 = vmatpush1.bf16.msra.mxu1 %v5946_v34  ;;  %v3912_v60 = vpop.f32.mrf.mxu0  ;;  %v5982_v28 = vld [vmem:[%s6184_s7 + $0xfc8] ss:$16 sps:$4 sm:$0xff]   ;;  %v5990_v39 = vld [vmem:[%s6184_s7 + $0xfac] ss:$16 sps:$4 sm:$0xff]  }
 0x202   : > { %4279 = vmatprep.subr.bf16.mxu0 %v5951_v54  ;;  %4330 = vmatprep.subr.bf16.mxu1 %v5954_v47  ;;  %v3963_v7 = vpop.f32.mrf.mxu1  ;;  %v4382_v55 = vadd.f32 %v3961_v43, %v322_v21  ;;  %v5985_v41 = vld [vmem:[%s6184_s7 + $0xda8] ss:$16 sps:$4 sm:$0xff]   ;;  %v5993_v8 = vld [vmem:[%s6184_s7 + $0xd8c] ss:$16 sps:$4 sm:$0xff]  }
 0x203   : > { %4393 = vst [vmem:[#allocation2 + $0x28] sm:$0xff] %v4381_v0  ;;  %v5988_v19 = vld [vmem:[%s6184_s7 + $0xfa8] ss:$16 sps:$4 sm:$0xff]   ;;  %v5996_v25 = vld [vmem:[%s6184_s7 + $0xf8c] ss:$16 sps:$4 sm:$0xff]  }
 0x204   : > { %4394 = vst [vmem:[#allocation2 + $0x48] sm:$0xff] %v4382_v55  ;;  %v5991_v20 = vld [vmem:[%s6184_s7 + $0xd88] ss:$16 sps:$4 sm:$0xff]   ;;  %v5999_v58 = vld [vmem:[%s6184_s7 + $0xd6c] ss:$16 sps:$4 sm:$0xff]  }
 0x205   : > { %4280 = vmatpush1.bf16.msra.mxu0 %v5949_v62  ;;  %4331 = vmatpush1.bf16.msra.mxu1 %v5952_v61  ;;  %v5994_v29 = vld [vmem:[%s6184_s7 + $0xf88] ss:$16 sps:$4 sm:$0xff]   ;;  %v6002_v40 = vld [vmem:[%s6184_s7 + $0xf6c] ss:$16 sps:$4 sm:$0xff]  }
 0x206   : > { %4281 = vmatprep.subr.bf16.mxu0 %v5957_v17  ;;  %4332 = vmatprep.subr.bf16.mxu1 %v5960_v59  ;;  %v5997_v14 = vld [vmem:[%s6184_s7 + $0xd68] ss:$16 sps:$4 sm:$0xff]   ;;  %v6005_v13 = vld [vmem:[%s6184_s7 + $0xd4c] ss:$16 sps:$4 sm:$0xff]  }
 0x207   : > { %v6000_v46 = vld [vmem:[%s6184_s7 + $0xf68] ss:$16 sps:$4 sm:$0xff]   ;;  %v6008_v49 = vld [vmem:[%s6184_s7 + $0xf4c] ss:$16 sps:$4 sm:$0xff]  }
 0x208   : > { %v6003_v42 = vld [vmem:[%s6184_s7 + $0xd48] ss:$16 sps:$4 sm:$0xff]   ;;  %v6011_v22 = vld [vmem:[%s6184_s7 + $0xd2c] ss:$16 sps:$4 sm:$0xff]  }
 0x209   : > { %4282 = vmatpush1.bf16.msra.mxu0 %v5955_v27  ;;  %4333 = vmatpush1.bf16.msra.mxu1 %v5958_v2  ;;  %v6006_v44 = vld [vmem:[%s6184_s7 + $0xf48] ss:$16 sps:$4 sm:$0xff]   ;;  %v6014_v33 = vld [vmem:[%s6184_s7 + $0xf2c] ss:$16 sps:$4 sm:$0xff]  }
 0x20a   : > { %4283 = vmatprep.subr.bf16.mxu0 %v5963_v53  ;;  %4334 = vmatprep.subr.bf16.mxu1 %v5966_v30  ;;  %v6009_v51 = vld [vmem:[%s6184_s7 + $0xd28] ss:$16 sps:$4 sm:$0xff]   ;;  %v6017_v15 = vld [vmem:[%s6184_s7 + $0xd0c] ss:$16 sps:$4 sm:$0xff]  }
 0x20b   : > { %v6012_v34 = vld [vmem:[%s6184_s7 + $0xf28] ss:$16 sps:$4 sm:$0xff]   ;;  %v6020_v3 = vld [vmem:[%s6184_s7 + $0xf0c] ss:$16 sps:$4 sm:$0xff]  }
 0x20c   : > { %v6015_v16 = vld [vmem:[%s6184_s7 + $0xd08] ss:$16 sps:$4 sm:$0xff]  }
 0x20d   : > { %4284 = vmatpush1.bf16.msra.mxu0 %v5961_v6  ;;  %4335 = vmatpush1.bf16.msra.mxu1 %v5964_v24  ;;  %v6018_v54 = vld [vmem:[%s6184_s7 + $0xf08] ss:$16 sps:$4 sm:$0xff]  }
 0x20e   : > { %4285 = vmatprep.subr.bf16.mxu0 %v5969_v11  ;;  %4336 = vmatprep.subr.bf16.mxu1 %v5972_v35 }
 0x211   : > { %4286 = vmatpush1.bf16.msra.mxu0 %v5967_v36  ;;  %4337 = vmatpush1.bf16.msra.mxu1 %v5970_v52 }
 0x212   : > { %4287 = vmatprep.subr.bf16.mxu0 %v5975_v56  ;;  %4338 = vmatprep.subr.bf16.mxu1 %v5978_v12 }
 0x215   : > { %4288 = vmatpush2.bf16.msra.mxu0 %v5973_v37  ;;  %4339 = vmatpush2.bf16.msra.mxu1 %v5976_v50 }
 0x216   : > { %4289 = vmatprep.subr.bf16.mxu0 %v5981_v5  ;;  %4340 = vmatprep.subr.bf16.mxu1 %v5984_v38 }
 0x219   : > { %4290 = vmatpush2.bf16.msra.mxu0 %v5979_v10  ;;  %4341 = vmatpush2.bf16.msra.mxu1 %v5982_v28 }
 0x21a   : > { %4291 = vmatprep.subr.bf16.mxu0 %v5987_v26  ;;  %4342 = vmatprep.subr.bf16.mxu1 %v5990_v39 }
 0x21d   : > { %4292 = vmatpush2.bf16.msra.mxu0 %v5985_v41  ;;  %4343 = vmatpush2.bf16.msra.mxu1 %v5988_v19 }
 0x21e   : > { %4293 = vmatprep.subr.bf16.mxu0 %v5993_v8  ;;  %4344 = vmatprep.subr.bf16.mxu1 %v5996_v25 }
 0x221   : > { %4294 = vmatpush2.bf16.msra.mxu0 %v5991_v20  ;;  %4345 = vmatpush2.bf16.msra.mxu1 %v5994_v29 }
 0x222   : > { %4295 = vmatprep.subr.bf16.mxu0 %v5999_v58  ;;  %4346 = vmatprep.subr.bf16.mxu1 %v6002_v40 }
 0x225   : > { %4296 = vmatpush2.bf16.msra.mxu0 %v5997_v14  ;;  %4347 = vmatpush2.bf16.msra.mxu1 %v6000_v46 }
 0x226   : > { %4297 = vmatprep.subr.bf16.mxu0 %v6005_v13  ;;  %4348 = vmatprep.subr.bf16.mxu1 %v6008_v49 }
 0x229   : > { %4298 = vmatpush2.bf16.msra.mxu0 %v6003_v42  ;;  %4349 = vmatpush2.bf16.msra.mxu1 %v6006_v44 }
 0x22a   : > { %4299 = vmatprep.subr.bf16.mxu0 %v6011_v22  ;;  %4350 = vmatprep.subr.bf16.mxu1 %v6014_v33 }
 0x22d   : > { %4300 = vmatpush2.bf16.msra.mxu0 %v6009_v51  ;;  %4351 = vmatpush2.bf16.msra.mxu1 %v6012_v34 }
 0x22e   : > { %4301 = vmatprep.subr.bf16.mxu0 %v6017_v15  ;;  %4352 = vmatprep.subr.bf16.mxu1 %v6020_v3 }
 0x231   : > { %4302 = vmatpush2.bf16.msra.mxu0 %v6015_v16  ;;  %4353 = vmatpush2.bf16.msra.mxu1 %v6018_v54 }
 0x233   : > { %v3999_v47 = vpop.f32.mrf.mxu0 }
 0x234   : > { %v4050_v57 = vpop.f32.mrf.mxu1  ;;  %4304 = vmatmul.mubr.bf16.vlgmr.msra.gmra.mxu0 %v6595_v31  ;;  %4355 = vmatmul.mubr.bf16.vlgmr.msra.gmra.mxu1 %v6599_v32 }
 0x235   : > { %v4051_v48 = vadd.f32 %v4050_v57, %v3999_v47  ;;  %4313 = vmatprep.mubr.bf16.mxu0 %v6605_v9  ;;  %4364 = vmatprep.mubr.bf16.mxu1 %v6607_v45  ;;  %v4001_v18 = vpop.f32.mrf.mxu0 }
 0x236   : > { %v4052_v21 = vpop.f32.mrf.mxu1 }
 0x237   : > { %v4053_v23 = vadd.f32 %v4052_v21, %v4001_v18  ;;  %v4003_v63 = vpop.f32.mrf.mxu0 }
 0x238   : > { %v4054_v0 = vpop.f32.mrf.mxu1 }
 0x239   : > { %v4055_v43 = vadd.f32 %v4054_v0, %v4003_v63  ;;  %v4005_v62 = vpop.f32.mrf.mxu0 }
 0x23a   : > { %v4056_v61 = vpop.f32.mrf.mxu1 }
 0x23b   : > { %v4057_v17 = vadd.f32 %v4056_v61, %v4005_v62  ;;  %v4009_v31 = vpop.f32.mrf.mxu0 }
 0x23c   : > { %4314 = vmatmul.mubr.bf16.gmra.mxu0 %v6621_v1  ;;  %4365 = vmatmul.mubr.bf16.gmra.mxu1 %v6625_v4  ;;  %v4060_v32 = vpop.f32.mrf.mxu1 }
 0x23d   : > { %v4061_v59 = vadd.f32 %v4060_v32, %v4009_v31  ;;  %v4011_v60 = vpop.f32.mrf.mxu0 }
 0x23e   : > { %v4062_v9 = vpop.f32.mrf.mxu1 }
 0x23f   : > { %v4063_v7 = vadd.f32 %v4062_v9, %v4011_v60  ;;  %v4013_v45 = vpop.f32.mrf.mxu0 }
 0x240   : > { %v4064_v55 = vpop.f32.mrf.mxu1 }
 0x241   : > { %v4014_v27 = vpop.f32.mrf.mxu0  ;;  %v316_v55 = vld [vmem:[#allocation2 + $0x18] sm:$0xff] }
 0x242   : > { %v4065_v2 = vpop.f32.mrf.mxu1 }
 0x273   : > { %v4101_v53 = vpop.f32.mrf.mxu0 }
 0x274   : > { %v4152_v30 = vpop.f32.mrf.mxu1  ;;  %v4102_v6 = vadd.f32 %v4101_v53, %v4051_v48 }
 0x275   : > { %v4103_v24 = vpop.f32.mrf.mxu0 }
 0x276   : > { %v4154_v11 = vpop.f32.mrf.mxu1  ;;  %v4153_v35 = vadd.f32 %v4152_v30, %v4102_v6  ;;  %v4104_v36 = vadd.f32 %v4103_v24, %v4053_v23 }
 0x277   : > { %v4105_v1 = vpop.f32.mrf.mxu0 }
 0x278   : > { %v4156_v52 = vpop.f32.mrf.mxu1  ;;  %v4155_v4 = vadd.f32 %v4154_v11, %v4104_v36  ;;  %v4106_v56 = vadd.f32 %v4105_v1, %v4055_v43  ;;  %v319_v11 = vld [vmem:[#allocation2 + $0x8] sm:$0xff] }
 0x279   : > { %v4107_v12 = vpop.f32.mrf.mxu0 }
 0x27a   : > { %v4158_v37 = vpop.f32.mrf.mxu1  ;;  %v4157_v50 = vadd.f32 %v4156_v52, %v4106_v56  ;;  %v4108_v5 = vadd.f32 %v4107_v12, %v4057_v17  ;;  %v315_v17 = vld [vmem:[#allocation2 + $0x58] sm:$0xff] }
 0x27b   : > { %v4111_v38 = vpop.f32.mrf.mxu0  ;;  %v320_v12 = vld [vmem:[#allocation2 + $0x38] sm:$0xff] }
 0x27c   : > { %v4162_v10 = vpop.f32.mrf.mxu1  ;;  %v4159_v28 = vadd.f32 %v4158_v37, %v4108_v5  ;;  %v4112_v26 = vadd.f32 %v4111_v38, %v4061_v59 }
 0x27d   : > { %v4113_v39 = vpop.f32.mrf.mxu0 }
 0x27e   : > { %v4164_v41 = vpop.f32.mrf.mxu1  ;;  %v4114_v19 = vadd.f32 %v4113_v39, %v4063_v7  ;;  %v4163_v8 = vadd.f32 %v4162_v10, %v4112_v26  ;;  %v323_v26 = vld [vmem:[#allocation2 + $0x10] sm:$0xff] }
 0x27f   : > { %v4115_v25 = vpop.f32.mrf.mxu0 }
 0x280   : > { %v4166_v20 = vpop.f32.mrf.mxu1  ;;  %v4165_v29 = vadd.f32 %v4164_v41, %v4114_v19 }
 0x281   : > { %v4116_v58 = vpop.f32.mrf.mxu0  ;;  %v324_v20 = vld [vmem:[#allocation2 + $0x40] sm:$0xff] }
 0x282   : > { %v4167_v40 = vpop.f32.mrf.mxu1 }
 0x2b3   : > { %v4203_v14 = vpop.f32.mrf.mxu0 }
 0x2b4   : > { %v4254_v46 = vpop.f32.mrf.mxu1  ;;  %v4204_v48 = vadd.f32 %v4203_v14, %v4153_v35 }
 0x2b5   : > { %v4205_v13 = vpop.f32.mrf.mxu0 }
 0x2b6   : > { %v4256_v49 = vpop.f32.mrf.mxu1  ;;  %v4206_v18 = vadd.f32 %v4205_v13, %v4155_v4  ;;  %v4255_v21 = vadd.f32 %v4254_v46, %v4204_v48 }
 0x2b7   : > { %v4207_v42 = vpop.f32.mrf.mxu0 }
 0x2b8   : > { %v4258_v44 = vpop.f32.mrf.mxu1  ;;  %v4208_v23 = vadd.f32 %v4207_v42, %v4157_v50  ;;  %v4257_v62 = vadd.f32 %v4256_v49, %v4206_v18 }
 0x2b9   : > { %v4209_v22 = vpop.f32.mrf.mxu0 }
 0x2ba   : > { %v4260_v33 = vpop.f32.mrf.mxu1  ;;  %v4210_v63 = vadd.f32 %v4209_v22, %v4159_v28  ;;  %v4259_v59 = vadd.f32 %v4258_v44, %v4208_v23 }
 0x2bb   : > { %v4213_v51 = vpop.f32.mrf.mxu0 }
 0x2bc   : > { %v4264_v34 = vpop.f32.mrf.mxu1  ;;  %v4214_v60 = vadd.f32 %v4213_v51, %v4163_v8  ;;  %v4261_v45 = vadd.f32 %v4260_v33, %v4210_v63 }
 0x2bd   : > { %v4215_v15 = vpop.f32.mrf.mxu0 }
 0x2be   : > { %v4266_v3 = vpop.f32.mrf.mxu1  ;;  %v4216_v53 = vadd.f32 %v4215_v15, %v4165_v29  ;;  %v4265_v1 = vadd.f32 %v4264_v34, %v4214_v60 }
 0x2bf   : > { %v4217_v16 = vpop.f32.mrf.mxu0 }
 0x2c0   : > { %v4268_v54 = vpop.f32.mrf.mxu1  ;;  %v4267_v5 = vadd.f32 %v4266_v3, %v4216_v53 }
 0x2c1   : > { %v4218_v47 = vpop.f32.mrf.mxu0 }
 0x2c2   : > { %v4269_v57 = vpop.f32.mrf.mxu1 }
 0x2f4   : > { %v4305_v0 = vpop.f32.mrf.mxu0  ;;  %v4356_v43 = vpop.f32.mrf.mxu1 }
 0x2f5   : > { %v4306_v61 = vadd.f32 %v4305_v0, %v4255_v21 }
 0x2f6   : > { %v4307_v31 = vpop.f32.mrf.mxu0  ;;  %v4358_v32 = vpop.f32.mrf.mxu1 }
 0x2f7   : > { %v4357_v9 = vadd.f32 %v4356_v43, %v4306_v61  ;;  %v4308_v7 = vadd.f32 %v4307_v31, %v4257_v62 }
 0x2f8   : > { %v4309_v27 = vpop.f32.mrf.mxu0  ;;  %v4360_v2 = vpop.f32.mrf.mxu1 }
 0x2f9   : > { %v4375_v30 = vadd.f32 %v4357_v9, %v315_v17  ;;  %v4359_v6 = vadd.f32 %v4358_v32, %v4308_v7  ;;  %v4310_v24 = vadd.f32 %v4309_v27, %v4259_v59 }
 0x2fa   : > { %v4311_v35 = vpop.f32.mrf.mxu0  ;;  %v4362_v36 = vpop.f32.mrf.mxu1 }
 0x2fb   : > { %4387 = vst [vmem:[#allocation2 + $0x58] sm:$0xff] %v4375_v30  ;;  %v4376_v52 = vadd.f32 %v4359_v6, %v316_v55  ;;  %v4361_v4 = vadd.f32 %v4360_v2, %v4310_v24  ;;  %v4312_v56 = vadd.f32 %v4311_v35, %v4261_v45 }
 0x2fc   : > { %v4315_v37 = vpop.f32.mrf.mxu0  ;;  %v4366_v50 = vpop.f32.mrf.mxu1 }
 0x2fd   : > { %4388 = vst [vmem:[#allocation2 + $0x18] sm:$0xff] %v4376_v52  ;;  %v4379_v38 = vadd.f32 %v4361_v4, %v319_v11  ;;  %v4363_v10 = vadd.f32 %v4362_v36, %v4312_v56  ;;  %v4316_v28 = vadd.f32 %v4315_v37, %v4265_v1 }
 0x2fe   : > { %v4317_v39 = vpop.f32.mrf.mxu0  ;;  %v4368_v41 = vpop.f32.mrf.mxu1 }
 0x2ff   : > { %4391 = vst [vmem:[#allocation2 + $0x8] sm:$0xff] %v4379_v38  ;;  %v4380_v19 = vadd.f32 %v4363_v10, %v320_v12  ;;  %v4367_v8 = vadd.f32 %v4366_v50, %v4316_v28  ;;  %v4318_v25 = vadd.f32 %v4317_v39, %v4267_v5 }
 0x300   : > { %v4319_v29 = vpop.f32.mrf.mxu0  ;;  %v4370_v58 = vpop.f32.mrf.mxu1 }
 0x301   : > { %4392 = vst [vmem:[#allocation2 + $0x38] sm:$0xff] %v4380_v19  ;;  %v4383_v40 = vadd.f32 %v4367_v8, %v323_v26  ;;  %v4369_v14 = vadd.f32 %v4368_v41, %v4318_v25  ;;  %4400 = sbr.rel (%p5186_p11) target bundleno = 802 (0x322), region = 59 }
 0x302   : > { %v4320_v46 = vpop.f32.mrf.mxu0  ;;  %v4371_v13 = vpop.f32.mrf.mxu1 }
 0x303   : > { %4395 = vst [vmem:[#allocation2 + $0x10] sm:$0xff] %v4383_v40  ;;  %v4384_v49 = vadd.f32 %v4369_v14, %v324_v20 }
 0x305   : > { %4396 = vst [vmem:[#allocation2 + $0x40] sm:$0xff] %v4384_v49 }
 0x306   : > { %v4401_v42 = vld [vmem:[#allocation2 + $0x30] sm:$0xff]  ;;  %v4402_v44 = vld [vmem:[#allocation2] sm:$0xff]  ;;  %v4403_v22 = vld [vmem:[#allocation2 + $0x58] sm:$0xff]  ;;  %v4501_v54 = vlaneseq }
 0x307   : > { %4413 = vst [vmem:[%s7047_s2] sm:$0xff] %v4401_v42  ;;  %v4457_v33 = vmul.f32 %v4401_v42, %v4401_v42  ;;  %4414 = vst [vmem:[%s7047_s2 + $0x8] sm:$0xff] %v4402_v44  ;;  %v4458_v51 = vmul.f32 %v4402_v44, %v4402_v44  ;;  %v4459_v34 = vmul.f32 %v4403_v22, %v4403_v22  ;;  %v4404_v15 = vld [vmem:[#allocation2 + $0x18] sm:$0xff]  ;;  %v4405_v3 = vld [vmem:[#allocation2 + $0x50] sm:$0xff] }
 0x308   : > { %4415 = vst [vmem:[%s7047_s2 + $0x10] sm:$0xff] %v4403_v22  ;;  %v4406_v16 = vld [vmem:[#allocation2 + $0x20] sm:$0xff]  ;;  %4416 = vst [vmem:[%s7047_s2 + $0x18] sm:$0xff] %v4404_v15  ;;  %v4460_v47 = vmul.f32 %v4404_v15, %v4404_v15  ;;  %v4425_v57 = vadd.f32 %v4405_v3, %v4401_v42  ;;  %v4461_v48 = vmul.f32 %v4405_v3, %v4405_v3  ;;  %v4407_v21 = vld [vmem:[#allocation2 + $0x8] sm:$0xff]  ;;  %v4502_v25 = vshrl.u32 %v4501_v54, 7 }
 0x309   : > { %4417 = vst [vmem:[%s7047_s2 + $0x20] sm:$0xff] %v4405_v3  ;;  %4418 = vst [vmem:[%s7047_s2 + $0x28] sm:$0xff] %v4406_v16  ;;  %v4433_v18 = vadd.f32 %v4406_v16, %v4402_v44  ;;  %v4408_v23 = vld [vmem:[#allocation2 + $0x38] sm:$0xff]  ;;  %v4409_v63 = vld [vmem:[#allocation2 + $0x28] sm:$0xff]  ;;  %v4462_v0 = vmul.f32 %v4406_v16, %v4406_v16  ;;  %v4441_v43 = vadd.f32 %v4407_v21, %v4403_v22 }
 0x30a   : > { %4419 = vst [vmem:[%s7047_s2 + $0x30] sm:$0xff] %v4407_v21  ;;  %v4463_v62 = vmul.f32 %v4407_v21, %v4407_v21  ;;  %4420 = vst [vmem:[%s7047_s2 + $0x38] sm:$0xff] %v4408_v23  ;;  %v4449_v61 = vadd.f32 %v4408_v23, %v4404_v15  ;;  %v4410_v17 = vld [vmem:[#allocation2 + $0x48] sm:$0xff]  ;;  %v4411_v31 = vld [vmem:[#allocation2 + $0x10] sm:$0xff]  ;;  %v4469_v59 = vadd.f32 %v4461_v48, %v4457_v33  ;;  %vm4503_vm0 = vcmp.eq.s32.totalorder %v4502_v25, 0 }
 0x30b   : > { %4421 = vst [vmem:[%s7047_s2 + $0x40] sm:$0xff] %v4409_v63  ;;  %v4464_v60 = vmul.f32 %v4408_v23, %v4408_v23  ;;  %v4426_v9 = vadd.f32 %v4425_v57, %v4409_v63  ;;  %v4465_v7 = vmul.f32 %v4409_v63, %v4409_v63  ;;  %4422 = vst [vmem:[%s7047_s2 + $0x48] sm:$0xff] %v4410_v17  ;;  %vm4504_vm1 = vcmp.eq.s32.totalorder %v4502_v25, 1 }
 0x30c   : > { %v4412_v32 = vld [vmem:[#allocation2 + $0x40] sm:$0xff]  ;;  %4423 = vst [vmem:[%s7047_s2 + $0x50] sm:$0xff] %v4411_v31  ;;  %v4477_v45 = vadd.f32 %v4462_v0, %v4458_v51  ;;  %v4485_v55 = vadd.f32 %v4463_v62, %v4459_v34  ;;  %v4434_v27 = vadd.f32 %v4433_v18, %v4410_v17  ;;  %v4466_v2 = vmul.f32 %v4410_v17, %v4410_v17 }
 0x30d   : > { %4424 = vst [vmem:[%s7047_s2 + $0x58] sm:$0xff] %v4412_v32  ;;  %v4493_v53 = vadd.f32 %v4464_v60, %v4460_v47  ;;  %v4427_v30 = vrot.slane %v4426_v9, 4  ;;  %v4470_v6 = vadd.f32 %v4469_v59, %v4465_v7  ;;  %v4442_v24 = vadd.f32 %v4441_v43, %v4411_v31 }
 0x30e   : > { %v4435_v11 = vrot.slane %v4434_v27, 4  ;;  %v4478_v35 = vadd.f32 %v4477_v45, %v4466_v2  ;;  %v4467_v36 = vmul.f32 %v4411_v31, %v4411_v31  ;;  %v4450_v1 = vadd.f32 %v4449_v61, %v4412_v32 }
 0x30f   : > { %v4428_v52 = vadd.f32 %v4427_v30, %v4426_v9  ;;  %v4471_v4 = vrot.slane %v4470_v6, 4  ;;  %v4443_v56 = vrot.slane %v4442_v24, 4  ;;  %v4468_v12 = vmul.f32 %v4412_v32, %v4412_v32 }
 0x310   : > { %v4436_v37 = vadd.f32 %v4435_v11, %v4434_v27  ;;  %v4479_v50 = vrot.slane %v4478_v35, 4  ;;  %v4486_v5 = vadd.f32 %v4485_v55, %v4467_v36  ;;  %v4451_v38 = vrot.slane %v4450_v1, 4 }
 0x311   : > { %v4429_v10 = vrot.slane %v4428_v52, 2  ;;  %v4444_v28 = vadd.f32 %v4443_v56, %v4442_v24  ;;  %v4494_v26 = vadd.f32 %v4493_v53, %v4468_v12  ;;  %v4472_v39 = vadd.f32 %v4471_v4, %v4470_v6 }
 0x312   : > { %v4437_v41 = vrot.slane %v4436_v37, 2  ;;  %v4487_v19 = vrot.slane %v4486_v5, 4  ;;  %v4452_v8 = vadd.f32 %v4451_v38, %v4450_v1  ;;  %v4480_v42 = vadd.f32 %v4479_v50, %v4478_v35 }
 0x313   : > { %v4445_v20 = vrot.slane %v4444_v28, 2  ;;  %v4495_v29 = vrot.slane %v4494_v26, 4  ;;  %v4430_v58 = vadd.f32 %v4429_v10, %v4428_v52  ;;  %v4473_v40 = vrot.slane %v4472_v39, 2 }
 0x314   : > { %v4453_v14 = vrot.slane %v4452_v8, 2  ;;  %v4438_v46 = vadd.f32 %v4437_v41, %v4436_v37  ;;  %v4488_v22 = vadd.f32 %v4487_v19, %v4486_v5  ;;  %v4481_v15 = vrot.slane %v4480_v42, 2 }
 0x315   : > { %v4431_v13 = vrot.slane %v4430_v58, 1  ;;  %v4474_v49 = vadd.f32 %v4473_v40, %v4472_v39  ;;  %v4446_v44 = vadd.f32 %v4445_v20, %v4444_v28  ;;  %v4496_v51 = vadd.f32 %v4495_v29, %v4494_v26 }
 0x316   : > { %v4454_v33 = vadd.f32 %v4453_v14, %v4452_v8  ;;  %v4439_v16 = vrot.slane %v4438_v46, 1  ;;  %v4489_v54 = vrot.slane %v4488_v22, 2  ;;  %v4482_v48 = vadd.f32 %v4481_v15, %v4480_v42 }
 0x317   : > { %v4475_v34 = vrot.slane %v4474_v49, 1  ;;  %v4432_v3 = vadd.f32 %v4431_v13, %v4430_v58  ;;  %v4497_v47 = vrot.slane %v4496_v51, 2  ;;  %v4447_v18 = vrot.slane %v4446_v44, 1 }
 0x318   : > { %v4455_v21 = vrot.slane %v4454_v33, 1  ;;  %v4490_v23 = vadd.f32 %v4489_v54, %v4488_v22  ;;  %v4483_v43 = vrot.slane %v4482_v48, 1  ;;  %v4440_v61 = vadd.f32 %v4439_v16, %v4438_v46 }
 0x319   : > { %v4476_v57 = vadd.f32 %v4475_v34, %v4474_v49  ;;  %v4498_v63 = vadd.f32 %v4497_v47, %v4496_v51  ;;  %v4448_v59 = vadd.f32 %v4447_v18, %v4446_v44 }
 0x31a   : > { %v4491_v17 = vrot.slane %v4490_v23, 1  ;;  %v4484_v32 = vadd.f32 %v4483_v43, %v4482_v48  ;;  %v4456_v60 = vadd.f32 %v4455_v21, %v4454_v33 }
 0x31b   : > { %v4505_v0 = vsel %vm4504_vm1, %v4476_v57, 0.0  ;;  %v4499_v31 = vrot.slane %v4498_v63, 1 }
 0x31c   : > { %v4509_v62 = vsel %vm4503_vm0, %v4432_v3, %v4505_v0  ;;  %v4492_v9 = vadd.f32 %v4491_v17, %v4490_v23  ;;  %v4506_v45 = vsel %vm4504_vm1, %v4484_v32, 0.0 }
 0x31d   : > { %4513 = vst [vmem:[%s7048_s3] sm:$0xff] %v4509_v62  ;;  %v4500_v7 = vadd.f32 %v4499_v31, %v4498_v63  ;;  %v4510_v55 = vsel %vm4503_vm0, %v4440_v61, %v4506_v45 }
 0x31e   : > { %v4507_v27 = vsel %vm4504_vm1, %v4492_v9, 0.0  ;;  %4514 = vst [vmem:[%s7048_s3 + $0x8] sm:$0xff] %v4510_v55 }
 0x31f   : > { %v4508_v2 = vsel %vm4504_vm1, %v4500_v7, 0.0  ;;  %v4511_v53 = vsel %vm4503_vm0, %v4448_v59, %v4507_v27 }
 0x320   : > { %v4512_v30 = vsel %vm4503_vm0, %v4456_v60, %v4508_v2  ;;  %4515 = vst [vmem:[%s7048_s3 + $0x10] sm:$0xff] %v4511_v53 }
 0x321   : > { %4516 = vst [vmem:[%s7048_s3 + $0x18] sm:$0xff] %v4512_v30 }
 0x322 PF: > { %s14_s16 = sadd.s32 1, %s6059_s16   ;;  %s7049_s12 = smov %s6047_s13 }
 0x323   : > { %p11_p12 = scmp.ge.s32.totalorder %s14_s16, 4   ;;  %s7050_s13 = smov %s6117_s20 }
 0x324   : > { %s7051_s14 = smov %s6055_s15  ;;  %s7052_s15 = smov %s7054_s17 }
 0x325   :  { %13 = sbr.rel (!%p11_p12) target bundleno = 3 (0x3), region = 109 }

// kernel: discriminator_forward.15
= control target key start
LH: loop header
LB: loop body
LE: loop exit
PB: predicated region body
PF: predicated region fallthrough
CT: control target
= control target key end

     0   :  { %s2275_s12 = smov 0   ;;  %s2277_s13 = smov 0   ;;  %s2460_s0 = inlined_call_operand.vmem [shape: bf16[8,8192], index: 0, kind: input, shape index: {}]   ;;  %s2461_s1 = inlined_call_operand.vmem [shape: bf16[8192,128], index: 1, kind: input, shape index: {}]   ;;  %s2462_s2 = inlined_call_operand.vmem [shape: f32[1,128], index: 2, kind: input, shape index: {}]   ;;  %s2463_s3 = inlined_call_operand.vmem [shape: f32[8,128], index: 3, kind: output, shape index: {}]  }
   0x1   :  { %s2279_s14 = smov 0  }
   0x2 LB: > { %s22_s15 = sadd.s32 1, %s2248_s13  ;;  %p1730_p0 = scmp.ge.s32.totalorder %s2252_s14, 1  ;;  %s2252_s14 = sphi %s2279_s14, %s13_s14   ;;  %s2248_s13 = sphi %s2277_s13, %s2465_s13   ;;  %s2244_s12 = sphi %s2275_s12, %s2464_s12  }
   0x3   : > { %p23_p1 = scmp.ge.s32.totalorder %s22_s15, 4  ;;  %p167_p2 = scmp.lt.s32.totalorder %s2252_s14, 5 }
   0x5   : > { %s2467_s15 = smov (%p23_p1, %s22_s15), 0  ;;  %p168_p3 = pnand %p1730_p0, %p167_p2 }
   0x6   : > { %s1731_s16 = sshll.u32 (!%p168_p3), %s2244_s12, 4  ;;  %s1733_s17 = sshll.u32 (!%p168_p3), %s2244_s12, 8 }
   0x7   : > { %171 = sbr.rel (%p168_p3) target bundleno = 366 (0x16e), region = 32  ;;  %p202_p4 = scmp.lt.s32.totalorder (!%p168_p3), %s1731_s16, 63 }
   0x8   : > { %p210_p5 = scmp.lt.s32.totalorder (!%p168_p3), %s1733_s17, 1023  ;;  %p1735_p6 = scmp.ne.s32.totalorder (!%p168_p3), %s2244_s12, 0 }
   0xc   : > { %s2469_s16 = smov (!%p202_p4, %s1731_s16), 63  ;;  %s2471_s17 = smov (!%p210_p5, %s1733_s17), 1023 }
   0xd   : > { %s1732_s18 = sshll.u32 %s2469_s16, 2  ;;  %s1734_s22 = sshll.u32 %s2471_s17, 2 }
   0xe   : > { %s2300_s21 = scalar_lea.vmem %s2460_s0, %s1732_s18  ;;  %s2305_s25 = scalar_lea.vmem %s2461_s1, %s1734_s22 }
   0xf   : > { %223 = sbr.rel (%p1735_p6) target bundleno = 22 (0x16), region = 36 }
  0x14   : > { %v2254_v0 = vmov 0.0  }
  0x15   : > { %224 = vst [vmem:[#allocation2] sm:$0xff] %v2254_v0 }
  0x16 PF: > { %v2086_v1 = vld [vmem:[%s2305_s25 + $0x78] sm:$0xff]   ;;  %v2090_v5 = vld [vmem:[%s2305_s25 + $0x70] sm:$0xff]   ;;  %v2094_v9 = vld [vmem:[%s2305_s25 + $0x68] sm:$0xff]   ;;  %p1880_p7 = scmp.ne.s32.totalorder %s2244_s12, 3 }
  0x17   : > { %v2087_v2 = vld [vmem:[%s2305_s25 + $0xf8] sm:$0xff]   ;;  %1885 = vmatprep.subr.bf16.mxu0 %v2086_v1  ;;  %v2091_v6 = vld [vmem:[%s2305_s25 + $0xf0] sm:$0xff]   ;;  %v2095_v10 = vld [vmem:[%s2305_s25 + $0xe8] sm:$0xff]  }
  0x18   : > { %v2088_v3 = vld [vmem:[%s2305_s25 + $0x38] sm:$0xff]   ;;  %1907 = vmatprep.subr.bf16.mxu1 %v2087_v2  ;;  %v2092_v7 = vld [vmem:[%s2305_s25 + $0x30] sm:$0xff]   ;;  %v2096_v11 = vld [vmem:[%s2305_s25 + $0x28] sm:$0xff]  }
  0x19   : > { %v2089_v4 = vld [vmem:[%s2305_s25 + $0xb8] sm:$0xff]   ;;  %1886 = vmatpush3.bf16.msra.mxu0 %v2088_v3  ;;  %v2093_v8 = vld [vmem:[%s2305_s25 + $0xb0] sm:$0xff]   ;;  %v2097_v12 = vld [vmem:[%s2305_s25 + $0xa8] sm:$0xff]  }
  0x1a   : > { %1908 = vmatpush3.bf16.msra.mxu1 %v2089_v4  ;;  %1887 = vmatprep.subr.bf16.mxu0 %v2090_v5  ;;  %v2098_v13 = vld [vmem:[%s2305_s25 + $0x60] sm:$0xff]   ;;  %v2102_v17 = vld [vmem:[%s2305_s25 + $0x58] sm:$0xff]   ;;  %v2106_v21 = vld [vmem:[%s2305_s25 + $0x50] sm:$0xff]  }
  0x1b   : > { %1909 = vmatprep.subr.bf16.mxu1 %v2091_v6  ;;  %v2099_v14 = vld [vmem:[%s2305_s25 + $0xe0] sm:$0xff]   ;;  %v2103_v18 = vld [vmem:[%s2305_s25 + $0xd8] sm:$0xff]   ;;  %v2107_v22 = vld [vmem:[%s2305_s25 + $0xd0] sm:$0xff]  }
  0x1c   : > { %v2100_v15 = vld [vmem:[%s2305_s25 + $0x20] sm:$0xff]   ;;  %v2104_v19 = vld [vmem:[%s2305_s25 + $0x18] sm:$0xff]   ;;  %v2108_v23 = vld [vmem:[%s2305_s25 + $0x10] sm:$0xff]  }
  0x1d   : > { %1888 = vmatpush3.bf16.msra.mxu0 %v2092_v7  ;;  %v2101_v16 = vld [vmem:[%s2305_s25 + $0xa0] sm:$0xff]   ;;  %v2105_v20 = vld [vmem:[%s2305_s25 + $0x98] sm:$0xff]   ;;  %v2109_v24 = vld [vmem:[%s2305_s25 + $0x90] sm:$0xff]  }
  0x1e   : > { %1910 = vmatpush3.bf16.msra.mxu1 %v2093_v8  ;;  %1889 = vmatprep.subr.bf16.mxu0 %v2094_v9  ;;  %v2110_v25 = vld [vmem:[%s2305_s25 + $0x48] sm:$0xff]   ;;  %v2114_v29 = vld [vmem:[%s2305_s25 + $0x40] sm:$0xff]   ;;  %v2122_v39 = vld [vmem:[%s2305_s25 + $0x178] sm:$0xff]  }
  0x1f   : > { %1911 = vmatprep.subr.bf16.mxu1 %v2095_v10  ;;  %v2111_v26 = vld [vmem:[%s2305_s25 + $0xc8] sm:$0xff]   ;;  %v2115_v30 = vld [vmem:[%s2305_s25 + $0xc0] sm:$0xff]   ;;  %v2123_v40 = vld [vmem:[%s2305_s25 + $0x1f8] sm:$0xff]  }
  0x20   : > { %v2112_v27 = vld [vmem:[%s2305_s25 + $0x8] sm:$0xff]   ;;  %v2116_v31 = vld [vmem:[%s2305_s25] sm:$0xff]   ;;  %v2124_v41 = vld [vmem:[%s2305_s25 + $0x138] sm:$0xff]  }
  0x21   : > { %1890 = vmatpush3.bf16.msra.mxu0 %v2096_v11  ;;  %v2113_v28 = vld [vmem:[%s2305_s25 + $0x88] sm:$0xff]   ;;  %v2117_v32 = vld [vmem:[%s2305_s25 + $0x80] sm:$0xff]   ;;  %v2125_v42 = vld [vmem:[%s2305_s25 + $0x1b8] sm:$0xff]  }
  0x22   : > { %1912 = vmatpush3.bf16.msra.mxu1 %v2097_v12  ;;  %1891 = vmatprep.subr.bf16.mxu0 %v2098_v13  ;;  %v226_v33 = vld [vmem:[%s2300_s21] sm:$0xff]  ;;  %v227_v34 = vld [vmem:[%s2300_s21 + $0x8] sm:$0xff]  ;;  %v2126_v43 = vld [vmem:[%s2305_s25 + $0x170] sm:$0xff]  }
  0x23   : > { %1913 = vmatprep.subr.bf16.mxu1 %v2099_v14  ;;  %v1736_v35 = vcombine.low %v226_v33, %v226_v33  ;;  %v1737_v36 = vcombine.high %v226_v33, %v226_v33  ;;  %v1738_v37 = vcombine.low %v227_v34, %v227_v34  ;;  %v1739_v38 = vcombine.high %v227_v34, %v227_v34  ;;  %v2127_v44 = vld [vmem:[%s2305_s25 + $0x1f0] sm:$0xff]   ;;  %v2130_v47 = vld [vmem:[%s2305_s25 + $0x168] sm:$0xff]   ;;  %v2134_v51 = vld [vmem:[%s2305_s25 + $0x160] sm:$0xff]  }
  0x24   : > { %v2128_v45 = vld [vmem:[%s2305_s25 + $0x130] sm:$0xff]   ;;  %v2131_v48 = vld [vmem:[%s2305_s25 + $0x1e8] sm:$0xff]   ;;  %v2135_v52 = vld [vmem:[%s2305_s25 + $0x1e0] sm:$0xff]  }
  0x25   : > { %1892 = vmatpush3.bf16.msra.mxu0 %v2100_v15  ;;  %1346 = vmatprep.mubr.bf16.mxu0 %v1737_v36  ;;  %v2129_v46 = vld [vmem:[%s2305_s25 + $0x1b0] sm:$0xff]   ;;  %v2132_v49 = vld [vmem:[%s2305_s25 + $0x128] sm:$0xff]   ;;  %v2136_v53 = vld [vmem:[%s2305_s25 + $0x120] sm:$0xff]  }
  0x26   : > { %1914 = vmatpush3.bf16.msra.mxu1 %v2101_v16  ;;  %1893 = vmatprep.subr.bf16.mxu0 %v2102_v17  ;;  %v2133_v50 = vld [vmem:[%s2305_s25 + $0x1a8] sm:$0xff]   ;;  %v2137_v54 = vld [vmem:[%s2305_s25 + $0x1a0] sm:$0xff]   ;;  %v2138_v55 = vld [vmem:[%s2305_s25 + $0x158] sm:$0xff]  }
  0x27   : > { %1915 = vmatprep.subr.bf16.mxu1 %v2103_v18  ;;  %1386 = vmatprep.mubr.bf16.mxu1 %v1739_v38  ;;  %v2139_v56 = vld [vmem:[%s2305_s25 + $0x1d8] sm:$0xff]   ;;  %v2142_v59 = vld [vmem:[%s2305_s25 + $0x150] sm:$0xff]   ;;  %v2146_v63 = vld [vmem:[%s2305_s25 + $0x148] sm:$0xff]  }
  0x28   : > { %v2140_v57 = vld [vmem:[%s2305_s25 + $0x118] sm:$0xff]   ;;  %v2143_v60 = vld [vmem:[%s2305_s25 + $0x1d0] sm:$0xff]   ;;  %v2147_v0 = vld [vmem:[%s2305_s25 + $0x1c8] sm:$0xff]  }
  0x29   : > { %1894 = vmatpush3.bf16.msra.mxu0 %v2104_v19  ;;  %v2141_v58 = vld [vmem:[%s2305_s25 + $0x198] sm:$0xff]   ;;  %v2144_v61 = vld [vmem:[%s2305_s25 + $0x110] sm:$0xff]   ;;  %v2148_v1 = vld [vmem:[%s2305_s25 + $0x108] sm:$0xff]  }
  0x2a   : > { %1916 = vmatpush3.bf16.msra.mxu1 %v2105_v20  ;;  %1895 = vmatprep.subr.bf16.mxu0 %v2106_v21  ;;  %v2145_v62 = vld [vmem:[%s2305_s25 + $0x190] sm:$0xff]   ;;  %v2149_v2 = vld [vmem:[%s2305_s25 + $0x188] sm:$0xff]   ;;  %v2150_v3 = vld [vmem:[%s2305_s25 + $0x140] sm:$0xff]  }
  0x2b   : > { %1917 = vmatprep.subr.bf16.mxu1 %v2107_v22  ;;  %v2151_v4 = vld [vmem:[%s2305_s25 + $0x1c0] sm:$0xff]   ;;  %v228_v7 = vld [vmem:[%s2300_s21 + $0x10] sm:$0xff]  ;;  %v229_v10 = vld [vmem:[%s2300_s21 + $0x18] sm:$0xff] }
  0x2c   : > { %v2152_v5 = vld [vmem:[%s2305_s25 + $0x100] sm:$0xff]   ;;  %v1740_v8 = vcombine.low %v228_v7, %v228_v7  ;;  %v1741_v9 = vcombine.high %v228_v7, %v228_v7  ;;  %v1742_v11 = vcombine.low %v229_v10, %v229_v10  ;;  %v1743_v12 = vcombine.high %v229_v10, %v229_v10  ;;  %v2158_v13 = vld [vmem:[%s2305_s25 + $0x278] sm:$0xff]   ;;  %v2162_v17 = vld [vmem:[%s2305_s25 + $0x270] sm:$0xff]  }
  0x2d   : > { %1896 = vmatpush3.bf16.msra.mxu0 %v2108_v23  ;;  %v2153_v6 = vld [vmem:[%s2305_s25 + $0x180] sm:$0xff]   ;;  %v2159_v14 = vld [vmem:[%s2305_s25 + $0x2f8] sm:$0xff]   ;;  %v2163_v18 = vld [vmem:[%s2305_s25 + $0x2f0] sm:$0xff]  }
  0x2e   : > { %1918 = vmatpush3.bf16.msra.mxu1 %v2109_v24  ;;  %1897 = vmatprep.subr.bf16.mxu0 %v2110_v25  ;;  %v2160_v15 = vld [vmem:[%s2305_s25 + $0x238] sm:$0xff]   ;;  %v2164_v19 = vld [vmem:[%s2305_s25 + $0x230] sm:$0xff]   ;;  %v2166_v21 = vld [vmem:[%s2305_s25 + $0x268] sm:$0xff]  }
  0x2f   : > { %1919 = vmatprep.subr.bf16.mxu1 %v2111_v26  ;;  %v2161_v16 = vld [vmem:[%s2305_s25 + $0x2b8] sm:$0xff]   ;;  %v2165_v20 = vld [vmem:[%s2305_s25 + $0x2b0] sm:$0xff]   ;;  %v2167_v22 = vld [vmem:[%s2305_s25 + $0x2e8] sm:$0xff]  }
  0x30   : > { %v2168_v23 = vld [vmem:[%s2305_s25 + $0x228] sm:$0xff]   ;;  %v2170_v25 = vld [vmem:[%s2305_s25 + $0x260] sm:$0xff]   ;;  %v2178_v33 = vld [vmem:[%s2305_s25 + $0x250] sm:$0xff]  }
  0x31   : > { %1898 = vmatpush3.bf16.msra.mxu0 %v2112_v27  ;;  %v2169_v24 = vld [vmem:[%s2305_s25 + $0x2a8] sm:$0xff]   ;;  %v2171_v26 = vld [vmem:[%s2305_s25 + $0x2e0] sm:$0xff]   ;;  %v2179_v34 = vld [vmem:[%s2305_s25 + $0x2d0] sm:$0xff]  }
  0x32   : > { %1920 = vmatpush3.bf16.msra.mxu1 %v2113_v28  ;;  %1899 = vmatprep.subr.bf16.mxu0 %v2114_v29  ;;  %v2172_v27 = vld [vmem:[%s2305_s25 + $0x220] sm:$0xff]   ;;  %v2174_v29 = vld [vmem:[%s2305_s25 + $0x258] sm:$0xff]   ;;  %v2181_v36 = vld [vmem:[%s2305_s25 + $0x290] sm:$0xff]  }
  0x33   : > { %1921 = vmatprep.subr.bf16.mxu1 %v2115_v30  ;;  %v2173_v28 = vld [vmem:[%s2305_s25 + $0x2a0] sm:$0xff]   ;;  %v2175_v30 = vld [vmem:[%s2305_s25 + $0x2d8] sm:$0xff]   ;;  %v2183_v38 = vld [vmem:[%s2305_s25 + $0x2c8] sm:$0xff]  }
  0x34   : > { %v2214_v7 = vld [vmem:[%s2305_s25 + $0x350] sm:$0xff]  }
  0x35   : > { %1900 = vmatpush3.bf16.msra.mxu0 %v2116_v31  ;;  %v2176_v31 = vld [vmem:[%s2305_s25 + $0x218] sm:$0xff]   ;;  %v2217_v10 = vld [vmem:[%s2305_s25 + $0x390] sm:$0xff]  }
  0x36   : > { %1922 = vmatpush3.bf16.msra.mxu1 %v2117_v32  ;;  %1929 = vmatprep.subr.bf16.mxu0 %v2122_v39  ;;  %v2177_v32 = vld [vmem:[%s2305_s25 + $0x298] sm:$0xff]   ;;  %v2184_v39 = vld [vmem:[%s2305_s25 + $0x208] sm:$0xff]  }
  0x37   : > { %1951 = vmatprep.subr.bf16.mxu1 %v2123_v40  ;;  %v2185_v40 = vld [vmem:[%s2305_s25 + $0x288] sm:$0xff]  }
  0x38   : > { %1347 = vmatmul.mubr.bf16.vlgmr.msra.gmra.mxu0 %v1736_v35  ;;  %v2180_v35 = vld [vmem:[%s2305_s25 + $0x210] sm:$0xff]  }
  0x39   : > { %1387 = vmatmul.mubr.bf16.vlgmr.msra.gmra.mxu1 %v1738_v37  ;;  %1930 = vmatpush3.bf16.msra.mxu0 %v2124_v41  ;;  %v2182_v37 = vld [vmem:[%s2305_s25 + $0x248] sm:$0xff]   ;;  %v2186_v41 = vld [vmem:[%s2305_s25 + $0x240] sm:$0xff]  }
  0x3a   : > { %1952 = vmatpush3.bf16.msra.mxu1 %v2125_v42  ;;  %1931 = vmatprep.subr.bf16.mxu0 %v2126_v43  ;;  %v2187_v42 = vld [vmem:[%s2305_s25 + $0x2c0] sm:$0xff]  }
  0x3b   : > { %1953 = vmatprep.subr.bf16.mxu1 %v2127_v44  ;;  %1426 = vmatprep.mubr.bf16.mxu0 %v1741_v9  ;;  %v2188_v43 = vld [vmem:[%s2305_s25 + $0x200] sm:$0xff]   ;;  %v2216_v9 = vld [vmem:[%s2305_s25 + $0x310] sm:$0xff]  }
  0x3c   : > { %1466 = vmatprep.mubr.bf16.mxu1 %v1743_v12  ;;  %v2189_v44 = vld [vmem:[%s2305_s25 + $0x280] sm:$0xff]   ;;  %v2219_v12 = vld [vmem:[%s2305_s25 + $0x3c8] sm:$0xff]  }
  0x3d   : > { %1932 = vmatpush3.bf16.msra.mxu0 %v2128_v45  ;;  %v230_v45 = vld [vmem:[%s2300_s21 + $0x20] sm:$0xff] }
  0x3e   : > { %1954 = vmatpush3.bf16.msra.mxu1 %v2129_v46  ;;  %1933 = vmatprep.subr.bf16.mxu0 %v2130_v47  ;;  %v231_v46 = vld [vmem:[%s2300_s21 + $0x28] sm:$0xff]  ;;  %v1744_v47 = vcombine.low %v230_v45, %v230_v45 }
  0x3f   : > { %1955 = vmatprep.subr.bf16.mxu1 %v2131_v48  ;;  %v1745_v48 = vcombine.high %v230_v45, %v230_v45 }
  0x41   : > { %1934 = vmatpush3.bf16.msra.mxu0 %v2132_v49  ;;  %v1746_v49 = vcombine.low %v231_v46, %v231_v46 }
  0x42   : > { %1956 = vmatpush3.bf16.msra.mxu1 %v2133_v50  ;;  %1935 = vmatprep.subr.bf16.mxu0 %v2134_v51  ;;  %v1747_v50 = vcombine.high %v231_v46, %v231_v46  ;;  %v2194_v51 = vld [vmem:[%s2305_s25 + $0x378] sm:$0xff]  }
  0x43   : > { %1957 = vmatprep.subr.bf16.mxu1 %v2135_v52  ;;  %v2195_v52 = vld [vmem:[%s2305_s25 + $0x3f8] sm:$0xff]  }
  0x45   : > { %1936 = vmatpush3.bf16.msra.mxu0 %v2136_v53  ;;  %v2196_v53 = vld [vmem:[%s2305_s25 + $0x338] sm:$0xff]  }
  0x46   : > { %1958 = vmatpush3.bf16.msra.mxu1 %v2137_v54  ;;  %1937 = vmatprep.subr.bf16.mxu0 %v2138_v55  ;;  %v2197_v54 = vld [vmem:[%s2305_s25 + $0x3b8] sm:$0xff]   ;;  %v2198_v55 = vld [vmem:[%s2305_s25 + $0x370] sm:$0xff]  }
  0x47   : > { %1959 = vmatprep.subr.bf16.mxu1 %v2139_v56  ;;  %v2199_v56 = vld [vmem:[%s2305_s25 + $0x3f0] sm:$0xff]  }
  0x49   : > { %1938 = vmatpush3.bf16.msra.mxu0 %v2140_v57  ;;  %v2200_v57 = vld [vmem:[%s2305_s25 + $0x330] sm:$0xff]  }
  0x4a   : > { %1960 = vmatpush3.bf16.msra.mxu1 %v2141_v58  ;;  %1939 = vmatprep.subr.bf16.mxu0 %v2142_v59  ;;  %v2201_v58 = vld [vmem:[%s2305_s25 + $0x3b0] sm:$0xff]   ;;  %v2202_v59 = vld [vmem:[%s2305_s25 + $0x368] sm:$0xff]  }
  0x4b   : > { %1961 = vmatprep.subr.bf16.mxu1 %v2143_v60  ;;  %v2203_v60 = vld [vmem:[%s2305_s25 + $0x3e8] sm:$0xff]  }
  0x4d   : > { %1940 = vmatpush3.bf16.msra.mxu0 %v2144_v61  ;;  %v2204_v61 = vld [vmem:[%s2305_s25 + $0x328] sm:$0xff]  }
  0x4e   : > { %1962 = vmatpush3.bf16.msra.mxu1 %v2145_v62  ;;  %1941 = vmatprep.subr.bf16.mxu0 %v2146_v63  ;;  %v2205_v62 = vld [vmem:[%s2305_s25 + $0x3a8] sm:$0xff]   ;;  %v2206_v63 = vld [vmem:[%s2305_s25 + $0x360] sm:$0xff]  }
  0x4f   : > { %1963 = vmatprep.subr.bf16.mxu1 %v2147_v0  ;;  %v2207_v0 = vld [vmem:[%s2305_s25 + $0x3e0] sm:$0xff]  }
  0x51   : > { %1942 = vmatpush3.bf16.msra.mxu0 %v2148_v1  ;;  %v2208_v1 = vld [vmem:[%s2305_s25 + $0x320] sm:$0xff]  }
  0x52   : > { %1964 = vmatpush3.bf16.msra.mxu1 %v2149_v2  ;;  %1943 = vmatprep.subr.bf16.mxu0 %v2150_v3  ;;  %v2209_v2 = vld [vmem:[%s2305_s25 + $0x3a0] sm:$0xff]   ;;  %v2210_v3 = vld [vmem:[%s2305_s25 + $0x358] sm:$0xff]  }
  0x53   : > { %1965 = vmatprep.subr.bf16.mxu1 %v2151_v4  ;;  %v2211_v4 = vld [vmem:[%s2305_s25 + $0x3d8] sm:$0xff]  }
  0x55   : > { %1944 = vmatpush3.bf16.msra.mxu0 %v2152_v5  ;;  %v2212_v5 = vld [vmem:[%s2305_s25 + $0x318] sm:$0xff]  }
  0x56   : > { %1966 = vmatpush3.bf16.msra.mxu1 %v2153_v6  ;;  %1973 = vmatprep.subr.bf16.mxu0 %v2158_v13  ;;  %v2213_v6 = vld [vmem:[%s2305_s25 + $0x398] sm:$0xff]   ;;  %v2220_v13 = vld [vmem:[%s2305_s25 + $0x308] sm:$0xff]  }
  0x57   : > { %1995 = vmatprep.subr.bf16.mxu1 %v2159_v14  ;;  %v2221_v14 = vld [vmem:[%s2305_s25 + $0x388] sm:$0xff]  }
  0x58   : > { %1427 = vmatmul.mubr.bf16.vlgmr.msra.gmra.mxu0 %v1740_v8  ;;  %v2215_v8 = vld [vmem:[%s2305_s25 + $0x3d0] sm:$0xff]  }
  0x59   : > { %1467 = vmatmul.mubr.bf16.vlgmr.msra.gmra.mxu1 %v1742_v11  ;;  %1974 = vmatpush3.bf16.msra.mxu0 %v2160_v15  ;;  %v2218_v11 = vld [vmem:[%s2305_s25 + $0x348] sm:$0xff]   ;;  %v2222_v15 = vld [vmem:[%s2305_s25 + $0x340] sm:$0xff]  }
  0x5a   : > { %1996 = vmatpush3.bf16.msra.mxu1 %v2161_v16  ;;  %1975 = vmatprep.subr.bf16.mxu0 %v2162_v17  ;;  %v2223_v16 = vld [vmem:[%s2305_s25 + $0x3c0] sm:$0xff]  }
  0x5b   : > { %1997 = vmatprep.subr.bf16.mxu1 %v2163_v18  ;;  %1506 = vmatprep.mubr.bf16.mxu0 %v1745_v48  ;;  %v2224_v17 = vld [vmem:[%s2305_s25 + $0x300] sm:$0xff]  }
  0x5c   : > { %1546 = vmatprep.mubr.bf16.mxu1 %v1747_v50  ;;  %v2225_v18 = vld [vmem:[%s2305_s25 + $0x380] sm:$0xff]  }
  0x5d   : > { %1976 = vmatpush3.bf16.msra.mxu0 %v2164_v19  ;;  %v232_v19 = vld [vmem:[%s2300_s21 + $0x30] sm:$0xff] }
  0x5e   : > { %1998 = vmatpush3.bf16.msra.mxu1 %v2165_v20  ;;  %1977 = vmatprep.subr.bf16.mxu0 %v2166_v21  ;;  %v233_v20 = vld [vmem:[%s2300_s21 + $0x38] sm:$0xff]  ;;  %v1748_v21 = vcombine.low %v232_v19, %v232_v19 }
  0x5f   : > { %1999 = vmatprep.subr.bf16.mxu1 %v2167_v22  ;;  %v1749_v22 = vcombine.high %v232_v19, %v232_v19 }
  0x61   : > { %1978 = vmatpush3.bf16.msra.mxu0 %v2168_v23  ;;  %v1750_v23 = vcombine.low %v233_v20, %v233_v20 }
  0x62   : > { %2000 = vmatpush3.bf16.msra.mxu1 %v2169_v24  ;;  %1979 = vmatprep.subr.bf16.mxu0 %v2170_v25  ;;  %v1751_v24 = vcombine.high %v233_v20, %v233_v20 }
  0x63   : > { %2001 = vmatprep.subr.bf16.mxu1 %v2171_v26 }
  0x65   : > { %1980 = vmatpush3.bf16.msra.mxu0 %v2172_v27 }
  0x66   : > { %2002 = vmatpush3.bf16.msra.mxu1 %v2173_v28  ;;  %1981 = vmatprep.subr.bf16.mxu0 %v2174_v29 }
  0x67   : > { %2003 = vmatprep.subr.bf16.mxu1 %v2175_v30 }
  0x69   : > { %1982 = vmatpush3.bf16.msra.mxu0 %v2176_v31 }
  0x6a   : > { %2004 = vmatpush3.bf16.msra.mxu1 %v2177_v32  ;;  %1983 = vmatprep.subr.bf16.mxu0 %v2178_v33 }
  0x6b   : > { %2005 = vmatprep.subr.bf16.mxu1 %v2179_v34 }
  0x6d   : > { %1984 = vmatpush3.bf16.msra.mxu0 %v2180_v35 }
  0x6e   : > { %2006 = vmatpush3.bf16.msra.mxu1 %v2181_v36  ;;  %1985 = vmatprep.subr.bf16.mxu0 %v2182_v37 }
  0x6f   : > { %2007 = vmatprep.subr.bf16.mxu1 %v2183_v38 }
  0x71   : > { %1986 = vmatpush3.bf16.msra.mxu0 %v2184_v39 }
  0x72   : > { %2008 = vmatpush3.bf16.msra.mxu1 %v2185_v40  ;;  %1987 = vmatprep.subr.bf16.mxu0 %v2186_v41 }
  0x73   : > { %2009 = vmatprep.subr.bf16.mxu1 %v2187_v42 }
  0x75   : > { %1988 = vmatpush3.bf16.msra.mxu0 %v2188_v43 }
  0x76   : > { %2010 = vmatpush3.bf16.msra.mxu1 %v2189_v44  ;;  %2017 = vmatprep.subr.bf16.mxu0 %v2194_v51 }
  0x77   : > { %2039 = vmatprep.subr.bf16.mxu1 %v2195_v52 }
  0x78   : > { %1507 = vmatmul.mubr.bf16.vlgmr.msra.gmra.mxu0 %v1744_v47 }
  0x79   : > { %1547 = vmatmul.mubr.bf16.vlgmr.msra.gmra.mxu1 %v1746_v49  ;;  %2018 = vmatpush3.bf16.msra.mxu0 %v2196_v53 }
  0x7a   : > { %2040 = vmatpush3.bf16.msra.mxu1 %v2197_v54  ;;  %2019 = vmatprep.subr.bf16.mxu0 %v2198_v55 }
  0x7b   : > { %2041 = vmatprep.subr.bf16.mxu1 %v2199_v56  ;;  %1586 = vmatprep.mubr.bf16.mxu0 %v1749_v22 }
  0x7c   : > { %1626 = vmatprep.mubr.bf16.mxu1 %v1751_v24 }
  0x7d   : > { %2020 = vmatpush3.bf16.msra.mxu0 %v2200_v57 }
  0x7e   : > { %2042 = vmatpush3.bf16.msra.mxu1 %v2201_v58  ;;  %2021 = vmatprep.subr.bf16.mxu0 %v2202_v59 }
  0x7f   : > { %2043 = vmatprep.subr.bf16.mxu1 %v2203_v60 }
  0x81   : > { %2022 = vmatpush3.bf16.msra.mxu0 %v2204_v61 }
  0x82   : > { %2044 = vmatpush3.bf16.msra.mxu1 %v2205_v62  ;;  %2023 = vmatprep.subr.bf16.mxu0 %v2206_v63 }
  0x83   : > { %2045 = vmatprep.subr.bf16.mxu1 %v2207_v0 }
  0x85   : > { %2024 = vmatpush3.bf16.msra.mxu0 %v2208_v1 }
  0x86   : > { %2046 = vmatpush3.bf16.msra.mxu1 %v2209_v2  ;;  %2025 = vmatprep.subr.bf16.mxu0 %v2210_v3 }
  0x87   : > { %2047 = vmatprep.subr.bf16.mxu1 %v2211_v4 }
  0x89   : > { %2026 = vmatpush3.bf16.msra.mxu0 %v2212_v5  ;;  %v225_v5 = vld [vmem:[#allocation2] sm:$0xff] }
  0x8a   : > { %2048 = vmatpush3.bf16.msra.mxu1 %v2213_v6  ;;  %2027 = vmatprep.subr.bf16.mxu0 %v2214_v7 }
  0x8b   : > { %2049 = vmatprep.subr.bf16.mxu1 %v2215_v8 }
  0x8d   : > { %2028 = vmatpush3.bf16.msra.mxu0 %v2216_v9 }
  0x8e   : > { %2050 = vmatpush3.bf16.msra.mxu1 %v2217_v10  ;;  %2029 = vmatprep.subr.bf16.mxu0 %v2218_v11 }
  0x8f   : > { %2051 = vmatprep.subr.bf16.mxu1 %v2219_v12 }
  0x91   : > { %2030 = vmatpush3.bf16.msra.mxu0 %v2220_v13 }
  0x92   : > { %2052 = vmatpush3.bf16.msra.mxu1 %v2221_v14  ;;  %2031 = vmatprep.subr.bf16.mxu0 %v2222_v15 }
  0x93   : > { %2053 = vmatprep.subr.bf16.mxu1 %v2223_v16 }
  0x95   : > { %2032 = vmatpush3.bf16.msra.mxu0 %v2224_v17 }
  0x96   : > { %2054 = vmatpush3.bf16.msra.mxu1 %v2225_v18 }
  0x98   : > { %1587 = vmatmul.mubr.bf16.vlgmr.msra.gmra.mxu0 %v1748_v21 }
  0x99   : > { %1627 = vmatmul.mubr.bf16.vlgmr.msra.gmra.mxu1 %v1750_v23 }
  0xf8   : > { %v1901_v25 = vpop.f32.mrf.mxu0 }
  0xf9   : > { %v1923_v26 = vpop.f32.mrf.mxu1 }
  0xfa   : > { %v1902_v27 = vpop.f32.mrf.mxu0 }
  0xfb   : > { %v1924_v28 = vpop.f32.mrf.mxu1  ;;  %v1903_v29 = vadd.f32 %v1902_v27, %v1901_v25 }
  0xfc   : > { %v1925_v30 = vadd.f32 %v1924_v28, %v1923_v26  ;;  %v1904_v31 = vpop.f32.mrf.mxu0 }
  0xfd   : > { %v1926_v32 = vpop.f32.mrf.mxu1 }
  0xfe   : > { %v1389_v33 = vadd.f32 %v1925_v30, %v1903_v29  ;;  %v1905_v34 = vpop.f32.mrf.mxu0 }
  0xff   : > { %v1927_v35 = vpop.f32.mrf.mxu1 }
 0x118   : > { %v1945_v36 = vpop.f32.mrf.mxu0 }
 0x119   : > { %v1967_v37 = vpop.f32.mrf.mxu1 }
 0x11a   : > { %v1946_v38 = vpop.f32.mrf.mxu0 }
 0x11b   : > { %v1968_v39 = vpop.f32.mrf.mxu1  ;;  %v1947_v52 = vadd.f32 %v1946_v38, %v1945_v36 }
 0x11c   : > { %v1948_v40 = vpop.f32.mrf.mxu0  ;;  %v1969_v54 = vadd.f32 %v1968_v39, %v1967_v37 }
 0x11d   : > { %v1970_v41 = vpop.f32.mrf.mxu1  ;;  %v1429_v53 = vadd.f32 %v1947_v52, %v1389_v33 }
 0x11e   : > { %v1949_v42 = vpop.f32.mrf.mxu0 }
 0x11f   : > { %v1971_v43 = vpop.f32.mrf.mxu1  ;;  %v1469_v56 = vadd.f32 %v1969_v54, %v1429_v53 }
 0x138   : > { %v1989_v44 = vpop.f32.mrf.mxu0 }
 0x139   : > { %v2011_v45 = vpop.f32.mrf.mxu1 }
 0x13a   : > { %v1990_v46 = vpop.f32.mrf.mxu0 }
 0x13b   : > { %v2012_v47 = vpop.f32.mrf.mxu1  ;;  %v1991_v55 = vadd.f32 %v1990_v46, %v1989_v44 }
 0x13c   : > { %v1992_v48 = vpop.f32.mrf.mxu0  ;;  %v2013_v58 = vadd.f32 %v2012_v47, %v2011_v45 }
 0x13d   : > { %v2014_v49 = vpop.f32.mrf.mxu1  ;;  %v1509_v57 = vadd.f32 %v1991_v55, %v1469_v56 }
 0x13e   : > { %v1993_v50 = vpop.f32.mrf.mxu0 }
 0x13f   : > { %v2015_v51 = vpop.f32.mrf.mxu1  ;;  %v1549_v62 = vadd.f32 %v2013_v58, %v1509_v57 }
 0x158   : > { %v2033_v59 = vpop.f32.mrf.mxu0 }
 0x159   : > { %v2055_v60 = vpop.f32.mrf.mxu1 }
 0x15a   : > { %v2034_v61 = vpop.f32.mrf.mxu0 }
 0x15b   : > { %v2035_v63 = vadd.f32 %v2034_v61, %v2033_v59  ;;  %v2056_v0 = vpop.f32.mrf.mxu1 }
 0x15c   : > { %v2036_v1 = vpop.f32.mrf.mxu0  ;;  %v2057_v3 = vadd.f32 %v2056_v0, %v2055_v60 }
 0x15d   : > { %v1589_v2 = vadd.f32 %v2035_v63, %v1549_v62  ;;  %v2058_v4 = vpop.f32.mrf.mxu1 }
 0x15e   : > { %v2037_v6 = vpop.f32.mrf.mxu0 }
 0x15f   : > { %v1629_v7 = vadd.f32 %v2057_v3, %v1589_v2  ;;  %v2059_v8 = vpop.f32.mrf.mxu1  ;;  %1639 = sbr.rel (%p1880_p7) target bundleno = 366 (0x16e), region = 40 }
 0x161   : > { %v1634_v9 = vadd.f32 %v1629_v7, %v225_v5 }
 0x163   : > { %1635 = vst [vmem:[#allocation2] sm:$0xff] %v1634_v9 }
 0x164   : > { %v1881_v11 = vld [vmem:[%s2462_s2] ss:$0 sm:$0xff] }
 0x16a   : > { %v1640_v10 = vld [vmem:[#allocation2] sm:$0xff] }
 0x16b   : > { %v1648_v12 = vadd.f32 %v1881_v11, %v1640_v10 }
 0x16d   : > { %1649 = vst [vmem:[%s2463_s3] sm:$0xff] %v1648_v12 }
 0x16e PF: > { %s13_s14 = sadd.s32 1, %s2252_s14   ;;  %s2464_s12 = smov %s2248_s13 }
 0x16f   : > { %p10_p8 = scmp.ge.s32.totalorder %s13_s14, 6   ;;  %s2465_s13 = smov %s2467_s15 }
 0x171   :  { %12 = sbr.rel (!%p10_p8) target bundleno = 2 (0x2), region = 73 }

</bundles_post_ra>
